<compile_context>
chip_gen: v6e
topology: v6e:2x2x1
jax: 0.10.0
libtpu: 0.0.40
codegen_flags: <defaults>
</compile_context>

<pallas_src>
import functools

import jax
import jax.numpy as jnp
from jax import lax
from jax.experimental import pallas as pl
from jax.experimental.pallas import tpu as pltpu


def _round_up(x, m=8):
    return ((x + m - 1) // m) * m


# ---------------------------------------------------------------------------
# Fused Pallas kernel: conv3x3(z) + conv3x3(x) + depthwise corr + head
# ---------------------------------------------------------------------------

def fused_rpn_kernel(z_ref, x_ref,
                     wk_ref, sk_ref, bk_ref,
                     ws_ref, ss_ref, bs_ref,
                     w1c_ref, w1l_ref, s1_ref, b1_ref,
                     w2c_ref, w2l_ref, b2_ref,
                     o_ref,
                     zk_vmem, xs_vmem,
                     *, Wz, Wx, kh, kw, hid):
    """One batch element end-to-end.

    z_ref: (Zrows, Cin) f32 flat template image (row width Wz, zero padded).
    x_ref: (Xrows, Cin) f32 flat search image (row width Wx, zero padded).
    wk_ref / ws_ref: (9, Cin, 2*hid) f32 tap-major 3x3 conv weights
                     (cls | loc concatenated along N).
    sk/bk, ss/bs: (1, 2*hid) f32 folded BN of the two convs.
    w1c/w1l: (hid, hid) f32 first 1x1 head conv (cls / loc halves).
    s1/b1: (1, 2*hid) f32 folded BN of the first head conv.
    w2c/w2l: (hid, Npad) f32 second 1x1 head conv, output padded to 128 lanes.
    b2: (1, Npad) f32.
    o_ref: (Mo, Npad) f32 flat head output (corr row i*Wx + j); columns
           j >= woc wrap around and are garbage, sliced off outside.
    zk_vmem / xs_vmem: VMEM scratch holding the conv activations.
    """
    mz = zk_vmem.shape[0]
    ms = xs_vmem.shape[0]
    mo = o_ref.shape[0]

    # ---- template branch: implicit-GEMM 3x3 VALID conv + BN + ReLU --------
    acc = jnp.dot(z_ref[pl.ds(0, mz), :], wk_ref[0],
                  preferred_element_type=jnp.float32)
    for t in range(1, 9):
        dy, dx = divmod(t, 3)
        acc = acc + jnp.dot(z_ref[pl.ds(dy * Wz + dx, mz), :], wk_ref[t],
                            preferred_element_type=jnp.float32)
    zk_vmem[...] = jnp.maximum(acc * sk_ref[...] + bk_ref[...], 0.0)

    # ---- search branch -----------------------------------------------------
    acc = jnp.dot(x_ref[pl.ds(0, ms), :], ws_ref[0],
                  preferred_element_type=jnp.float32)
    for t in range(1, 9):
        dy, dx = divmod(t, 3)
        acc = acc + jnp.dot(x_ref[pl.ds(dy * Wx + dx, ms), :], ws_ref[t],
                            preferred_element_type=jnp.float32)
    xs_vmem[...] = jnp.maximum(acc * ss_ref[...] + bs_ref[...], 0.0)

    # ---- depthwise cross-correlation: static unrolled taps, local acc -----
    corr = xs_vmem[pl.ds(0, mo), :] * zk_vmem[pl.ds(0, 1), :]
    for u in range(kh):
        for v in range(kw):
            if u == 0 and v == 0:
                continue
            corr = corr + (xs_vmem[pl.ds(u * Wx + v, mo), :]
                           * zk_vmem[pl.ds(u * Wz + v, 1), :])

    # ---- head: split block-diagonal 1x1 convs (no structural-zero MACs) ---
    s1 = s1_ref[...]
    b1 = b1_ref[...]
    h_cls = jnp.dot(corr[:, :hid], w1c_ref[...],
                    preferred_element_type=jnp.float32)
    h_loc = jnp.dot(corr[:, hid:], w1l_ref[...],
                    preferred_element_type=jnp.float32)
    h_cls = jnp.maximum(h_cls * s1[:, :hid] + b1[:, :hid], 0.0)
    h_loc = jnp.maximum(h_loc * s1[:, hid:] + b1[:, hid:], 0.0)

    out = (jnp.dot(h_cls, w2c_ref[...], preferred_element_type=jnp.float32)
           + jnp.dot(h_loc, w2l_ref[...], preferred_element_type=jnp.float32)
           + b2_ref[...])
    o_ref[...] = out.astype(o_ref.dtype)


# ---------------------------------------------------------------------------
# One-time weight fusion (cls + loc share the conv stage; head padded to 128)
# ---------------------------------------------------------------------------

def prepare_fused_params(params):
    p_cls, p_loc = params["cls"], params["loc"]
    hid = p_cls["w1"].shape[0]
    n_cls = p_cls["w2"].shape[1]
    n_loc = p_loc["w2"].shape[1]
    cin = p_cls["wk"].shape[2]

    wk = jnp.concatenate([p_cls["wk"], p_loc["wk"]], axis=-1)   # (3,3,Cin,2h)
    ws = jnp.concatenate([p_cls["ws"], p_loc["ws"]], axis=-1)

    fp = {
        "wk_taps": wk.reshape(9, cin, 2 * hid).astype(jnp.float32),
        "ws_taps": ws.reshape(9, cin, 2 * hid).astype(jnp.float32),
        "scale_k": jnp.concatenate([p_cls["scale_k"], p_loc["scale_k"]], -1),
        "shift_k": jnp.concatenate([p_cls["shift_k"], p_loc["shift_k"]], -1),
        "scale_s": jnp.concatenate([p_cls["scale_s"], p_loc["scale_s"]], -1),
        "shift_s": jnp.concatenate([p_cls["shift_s"], p_loc["shift_s"]], -1),
        "w1_cls": p_cls["w1"].astype(jnp.float32),
        "w1_loc": p_loc["w1"].astype(jnp.float32),
        "scale1": jnp.concatenate([p_cls["scale1"], p_loc["scale1"]], -1),
        "shift1": jnp.concatenate([p_cls["shift1"], p_loc["shift1"]], -1),
    }

    n_out = n_cls + n_loc
    n_pad = max(128, _round_up(n_out, 128))
    w2c = jnp.zeros((hid, n_pad), jnp.float32).at[:, :n_cls].set(p_cls["w2"])
    w2l = jnp.zeros((hid, n_pad), jnp.float32).at[:, n_cls:n_out].set(p_loc["w2"])
    b2 = jnp.zeros((1, n_pad), jnp.float32)
    b2 = b2.at[:, :n_cls].set(p_cls["b2"][0]).at[:, n_cls:n_out].set(p_loc["b2"][0])
    fp["w2_cls"], fp["w2_loc"], fp["b2"] = w2c, w2l, b2
    return fp, n_cls, n_loc


# ---------------------------------------------------------------------------
# Forward pass (per-frame, jitted; weight prep is NOT redone here)
# ---------------------------------------------------------------------------

def _rpn_forward_impl(z_f, x_f, fp, *, n_cls, n_loc):
    B, Cin, Hz, Wz = z_f.shape
    _, _, Hx, Wx = x_f.shape
    hid2 = fp["wk_taps"].shape[-1]
    hid = hid2 // 2
    n_pad = fp["w2_cls"].shape[-1]

    kh, kw = Hz - 2, Wz - 2                      # template after 3x3 conv
    hs, ws_valid = Hx - 2, Wx - 2                # search after 3x3 conv
    hoc, woc = hs - kh + 1, ws_valid - kw + 1    # correlation output
    mo = hoc * Wx
    mo_pad = _round_up(mo)

    # Scratch / padded-input row counts (all static Python ints).
    mz = _round_up(kh * Wz)                                  # template conv rows
    ms = _round_up((kh - 1) * Wx + kw + mo_pad - 1)          # search conv rows
    z_rows = _round_up(max(Hz * Wz, mz + 2 * Wz + 2))
    x_rows = _round_up(max(Hx * Wx, ms + 2 * Wx + 2))

    z = jnp.transpose(z_f, (0, 2, 3, 1)).reshape(B, Hz * Wz, Cin)
    x = jnp.transpose(x_f, (0, 2, 3, 1)).reshape(B, Hx * Wx, Cin)
    z = z.astype(jnp.float32)
    x = x.astype(jnp.float32)
    if z_rows > Hz * Wz:
        z = jnp.pad(z, ((0, 0), (0, z_rows - Hz * Wz), (0, 0)))
    if x_rows > Hx * Wx:
        x = jnp.pad(x, ((0, 0), (0, x_rows - Hx * Wx), (0, 0)))

    kernel = functools.partial(fused_rpn_kernel,
                               Wz=Wz, Wx=Wx, kh=kh, kw=kw, hid=hid)

    out_flat = pl.pallas_call(
        kernel,
        out_shape=jax.ShapeDtypeStruct((B, mo_pad, n_pad), jnp.float32),
        grid=(B,),
        in_specs=[
            pl.BlockSpec((None, z_rows, Cin), lambda b: (b, 0, 0)),
            pl.BlockSpec((None, x_rows, Cin), lambda b: (b, 0, 0)),
            pl.BlockSpec((9, Cin, hid2), lambda b: (0, 0, 0)),   # weights resident
            pl.BlockSpec((1, hid2), lambda b: (0, 0)),
            pl.BlockSpec((1, hid2), lambda b: (0, 0)),
            pl.BlockSpec((9, Cin, hid2), lambda b: (0, 0, 0)),
            pl.BlockSpec((1, hid2), lambda b: (0, 0)),
            pl.BlockSpec((1, hid2), lambda b: (0, 0)),
            pl.BlockSpec((hid, hid), lambda b: (0, 0)),
            pl.BlockSpec((hid, hid), lambda b: (0, 0)),
            pl.BlockSpec((1, hid2), lambda b: (0, 0)),
            pl.BlockSpec((1, hid2), lambda b: (0, 0)),
            pl.BlockSpec((hid, n_pad), lambda b: (0, 0)),
            pl.BlockSpec((hid, n_pad), lambda b: (0, 0)),
            pl.BlockSpec((1, n_pad), lambda b: (0, 0)),
        ],
        out_specs=pl.BlockSpec((None, mo_pad, n_pad), lambda b: (b, 0, 0)),
        scratch_shapes=[pltpu.VMEM((mz, hid2), jnp.float32),
                        pltpu.VMEM((ms, hid2), jnp.float32)],
        compiler_params=pltpu.CompilerParams(dimension_semantics=("parallel",)),
    )(z, x,
      fp["wk_taps"], fp["scale_k"], fp["shift_k"],
      fp["ws_taps"], fp["scale_s"], fp["shift_s"],
      fp["w1_cls"], fp["w1_loc"], fp["scale1"], fp["shift1"],
      fp["w2_cls"], fp["w2_loc"], fp["b2"])

    # Drop wrap-around garbage rows/columns and padded lanes; back to NCHW.
    out = out_flat[:, :mo, :].reshape(B, hoc, Wx, n_pad)[:, :, :woc, :]
    cls = jnp.transpose(out[..., :n_cls], (0, 3, 1, 2))
    loc = jnp.transpose(out[..., n_cls:n_cls + n_loc], (0, 3, 1, 2))
    return cls, loc


rpn_forward = jax.jit(_rpn_forward_impl, static_argnames=("n_cls", "n_loc"))


# ---------------------------------------------------------------------------
# Deterministic parameter init (synthetic; shapes from DepthCorr.__init__)
# ---------------------------------------------------------------------------

def _fold_bn(key, c):
    kg, kb, km, kv = jax.random.split(key, 4)
    gamma = 1.0 + 0.1 * jax.random.normal(kg, (c,), jnp.float32)
    beta = 0.1 * jax.random.normal(kb, (c,), jnp.float32)
    mean = 0.1 * jax.random.normal(km, (c,), jnp.float32)
    var = jnp.abs(1.0 + 0.1 * jax.random.normal(kv, (c,), jnp.float32))
    scale = gamma * jax.lax.rsqrt(var + 1e-5)
    shift = beta - mean * scale
    return scale.reshape(1, c), shift.reshape(1, c)


def init_depthcorr(key, cin, hidden, cout):
    ks = jax.random.split(key, 8)
    p = {}
    p["wk"] = 0.1 * jax.random.normal(ks[0], (3, 3, cin, hidden), jnp.float32)
    p["scale_k"], p["shift_k"] = _fold_bn(ks[1], hidden)
    p["ws"] = 0.1 * jax.random.normal(ks[2], (3, 3, cin, hidden), jnp.float32)
    p["scale_s"], p["shift_s"] = _fold_bn(ks[3], hidden)
    p["w1"] = 0.1 * jax.random.normal(ks[4], (hidden, hidden), jnp.float32)
    p["scale1"], p["shift1"] = _fold_bn(ks[5], hidden)
    p["w2"] = 0.1 * jax.random.normal(ks[6], (hidden, cout), jnp.float32)
    p["b2"] = 0.1 * jax.random.normal(ks[7], (1, cout), jnp.float32)
    return p


# ---------------------------------------------------------------------------
# Pure-JAX reference (mirrors the PyTorch forward; all f32)
# ---------------------------------------------------------------------------

def _ref_conv_bn_relu(x_nchw, w_hwio, scale, shift):
    w_oihw = jnp.transpose(w_hwio, (3, 2, 0, 1))
    y = lax.conv_general_dilated(
        x_nchw, w_oihw, (1, 1), "VALID",
        dimension_numbers=("NCHW", "OIHW", "NCHW"),
        precision=lax.Precision.HIGHEST)
    y = y * scale.reshape(1, -1, 1, 1) + shift.reshape(1, -1, 1, 1)
    return jnp.maximum(y, 0.0)


def _ref_depthcorr(z, x, p):
    zk = _ref_conv_bn_relu(z, p["wk"], p["scale_k"], p["shift_k"])
    xs = _ref_conv_bn_relu(x, p["ws"], p["scale_s"], p["shift_s"])
    B, C, H, W = xs.shape
    xg = xs.reshape(1, B * C, H, W)
    kg = zk.reshape(B * C, 1, zk.shape[2], zk.shape[3])
    feat = lax.conv_general_dilated(
        xg, kg, (1, 1), "VALID",
        dimension_numbers=("NCHW", "OIHW", "NCHW"),
        feature_group_count=B * C,
        precision=lax.Precision.HIGHEST)
    feat = feat.reshape(B, C, feat.shape[2], feat.shape[3])
    h = jnp.einsum("bchw,cd->bdhw", feat, p["w1"],
                   precision=lax.Precision.HIGHEST)
    h = jnp.maximum(h * p["scale1"].reshape(1, -1, 1, 1)
                    + p["shift1"].reshape(1, -1, 1, 1), 0.0)
    o = jnp.einsum("bchw,cd->bdhw", h, p["w2"],
                   precision=lax.Precision.HIGHEST)
    return o + p["b2"].reshape(1, -1, 1, 1)


def ref_rpn_forward(z_f, x_f, params):
    return (_ref_depthcorr(z_f, x_f, params["cls"]),
            _ref_depthcorr(z_f, x_f, params["loc"]))


# ---------------------------------------------------------------------------
# Main
# ---------------------------------------------------------------------------

if __name__ == "__main__":
    key = jax.random.PRNGKey(0)
    k_z, k_x, k_cls, k_loc = jax.random.split(key, 4)

    # Small shapes consistent with the module (template/search feature maps).
    B, C_IN, HIDDEN, ANCHOR = 2, 16, 16, 2
    z_f = jax.random.normal(k_z, (B, C_IN, 8, 8), jnp.float32)     # template
    x_f = jax.random.normal(k_x, (B, C_IN, 16, 16), jnp.float32)   # search

    params = {
        "cls": init_depthcorr(k_cls, C_IN, HIDDEN, 2 * ANCHOR),
        "loc": init_depthcorr(k_loc, C_IN, HIDDEN, 4 * ANCHOR),
    }

    # One-time weight fusion (hoisted out of the per-frame forward).
    fp, n_cls, n_loc = prepare_fused_params(params)
    jax.block_until_ready(fp)

    cls, loc = rpn_forward(z_f, x_f, fp, n_cls=n_cls, n_loc=n_loc)
    jax.block_until_ready((cls, loc))

    assert cls.shape == (B, 2 * ANCHOR, 9, 9), cls.shape
    assert loc.shape == (B, 4 * ANCHOR, 9, 9), loc.shape

    cls_ref, loc_ref = ref_rpn_forward(z_f, x_f, params)
    assert jnp.allclose(cls, cls_ref, rtol=2e-2, atol=2e-2), "cls mismatch"
    assert jnp.allclose(loc, loc_ref, rtol=2e-2, atol=2e-2), "loc mismatch"

    # TODO(synk): RPN.param_groups / template / track are optimizer & tracker
    # bookkeeping with no kernel equivalent.
    print("KERNEL_OK")
</pallas_src>

<mosaic_0001>
module attributes {stable_mosaic.version = 11 : i64} {
  func.func @fused_rpn_kernel(%arg0: i32, %arg1: memref<1x72x16xf32, #tpu.memory_space<vmem>>, %arg2: memref<1x272x16xf32, #tpu.memory_space<vmem>>, %arg3: memref<9x16x32xf32, #tpu.memory_space<vmem>>, %arg4: memref<1x32xf32, #tpu.memory_space<vmem>>, %arg5: memref<1x32xf32, #tpu.memory_space<vmem>>, %arg6: memref<9x16x32xf32, #tpu.memory_space<vmem>>, %arg7: memref<1x32xf32, #tpu.memory_space<vmem>>, %arg8: memref<1x32xf32, #tpu.memory_space<vmem>>, %arg9: memref<16x16xf32, #tpu.memory_space<vmem>>, %arg10: memref<16x16xf32, #tpu.memory_space<vmem>>, %arg11: memref<1x32xf32, #tpu.memory_space<vmem>>, %arg12: memref<1x32xf32, #tpu.memory_space<vmem>>, %arg13: memref<16x128xf32, #tpu.memory_space<vmem>>, %arg14: memref<16x128xf32, #tpu.memory_space<vmem>>, %arg15: memref<1x128xf32, #tpu.memory_space<vmem>>, %arg16: memref<1x144x128xf32, #tpu.memory_space<vmem>>, %arg17: memref<48x32xf32, #tpu.memory_space<vmem>>, %arg18: memref<232x32xf32, #tpu.memory_space<vmem>>) attributes {dimension_semantics = [#tpu.dimension_semantics<parallel>], iteration_bounds = array<i64: 2>, scalar_prefetch = 0 : i64, scratch_operands = 2 : i64, tpu.core_type = #tpu.core_type<tc>, window_params = [{transform_indices = @transform_0, window_bounds = array<i64: 1, 72, 16>}, {transform_indices = @transform_1, window_bounds = array<i64: 1, 272, 16>}, {pipeline_mode = #tpu.pipeline_mode<synchronous>, transform_indices = @transform_2, window_bounds = array<i64: 9, 16, 32>}, {pipeline_mode = #tpu.pipeline_mode<synchronous>, transform_indices = @transform_3, window_bounds = array<i64: 1, 32>}, {pipeline_mode = #tpu.pipeline_mode<synchronous>, transform_indices = @transform_4, window_bounds = array<i64: 1, 32>}, {pipeline_mode = #tpu.pipeline_mode<synchronous>, transform_indices = @transform_5, window_bounds = array<i64: 9, 16, 32>}, {pipeline_mode = #tpu.pipeline_mode<synchronous>, transform_indices = @transform_6, window_bounds = array<i64: 1, 32>}, {pipeline_mode = #tpu.pipeline_mode<synchronous>, transform_indices = @transform_7, window_bounds = array<i64: 1, 32>}, {pipeline_mode = #tpu.pipeline_mode<synchronous>, transform_indices = @transform_8, window_bounds = array<i64: 16, 16>}, {pipeline_mode = #tpu.pipeline_mode<synchronous>, transform_indices = @transform_9, window_bounds = array<i64: 16, 16>}, {pipeline_mode = #tpu.pipeline_mode<synchronous>, transform_indices = @transform_10, window_bounds = array<i64: 1, 32>}, {pipeline_mode = #tpu.pipeline_mode<synchronous>, transform_indices = @transform_11, window_bounds = array<i64: 1, 32>}, {pipeline_mode = #tpu.pipeline_mode<synchronous>, transform_indices = @transform_12, window_bounds = array<i64: 16, 128>}, {pipeline_mode = #tpu.pipeline_mode<synchronous>, transform_indices = @transform_13, window_bounds = array<i64: 16, 128>}, {pipeline_mode = #tpu.pipeline_mode<synchronous>, transform_indices = @transform_14, window_bounds = array<i64: 1, 128>}, {transform_indices = @transform_15, window_bounds = array<i64: 1, 144, 128>}]} {
    %c0 = arith.constant 0 : index
    %c0_0 = arith.constant 0 : index
    %c0_1 = arith.constant 0 : index
    %0 = vector.load %arg1[%c0, %c0_0, %c0_1] : memref<1x72x16xf32, #tpu.memory_space<vmem>>, vector<1x48x16xf32>
    %1 = vector.shape_cast %0 : vector<1x48x16xf32> to vector<48x16xf32>
    %c0_2 = arith.constant 0 : index
    %c0_3 = arith.constant 0 : index
    %c0_4 = arith.constant 0 : index
    %2 = vector.load %arg3[%c0_2, %c0_3, %c0_4] : memref<9x16x32xf32, #tpu.memory_space<vmem>>, vector<1x16x32xf32>
    %3 = vector.shape_cast %2 : vector<1x16x32xf32> to vector<16x32xf32>
    %cst = arith.constant dense<0.000000e+00> : vector<48x32xf32>
    %4 = tpu.matmul %1, %3, %cst {dimension_numbers = #tpu.dot_dimension_numbers<[1], [0], [0], [1], [0, 0, 1, 1], [], []>} : vector<48x16xf32>, vector<16x32xf32>, vector<48x32xf32> -> vector<48x32xf32>
    %c0_5 = arith.constant 0 : index
    %c1 = arith.constant 1 : index
    %c0_6 = arith.constant 0 : index
    %5 = vector.load %arg1[%c0_5, %c1, %c0_6] : memref<1x72x16xf32, #tpu.memory_space<vmem>>, vector<1x48x16xf32>
    %6 = vector.shape_cast %5 : vector<1x48x16xf32> to vector<48x16xf32>
    %c1_7 = arith.constant 1 : index
    %c0_8 = arith.constant 0 : index
    %c0_9 = arith.constant 0 : index
    %7 = vector.load %arg3[%c1_7, %c0_8, %c0_9] : memref<9x16x32xf32, #tpu.memory_space<vmem>>, vector<1x16x32xf32>
    %8 = vector.shape_cast %7 : vector<1x16x32xf32> to vector<16x32xf32>
    %cst_10 = arith.constant dense<0.000000e+00> : vector<48x32xf32>
    %9 = tpu.matmul %6, %8, %cst_10 {dimension_numbers = #tpu.dot_dimension_numbers<[1], [0], [0], [1], [0, 0, 1, 1], [], []>} : vector<48x16xf32>, vector<16x32xf32>, vector<48x32xf32> -> vector<48x32xf32>
    %10 = arith.addf %4, %9 : vector<48x32xf32>
    %c0_11 = arith.constant 0 : index
    %c2 = arith.constant 2 : index
    %c0_12 = arith.constant 0 : index
    %11 = vector.load %arg1[%c0_11, %c2, %c0_12] : memref<1x72x16xf32, #tpu.memory_space<vmem>>, vector<1x48x16xf32>
    %12 = vector.shape_cast %11 : vector<1x48x16xf32> to vector<48x16xf32>
    %c2_13 = arith.constant 2 : index
    %c0_14 = arith.constant 0 : index
    %c0_15 = arith.constant 0 : index
    %13 = vector.load %arg3[%c2_13, %c0_14, %c0_15] : memref<9x16x32xf32, #tpu.memory_space<vmem>>, vector<1x16x32xf32>
    %14 = vector.shape_cast %13 : vector<1x16x32xf32> to vector<16x32xf32>
    %cst_16 = arith.constant dense<0.000000e+00> : vector<48x32xf32>
    %15 = tpu.matmul %12, %14, %cst_16 {dimension_numbers = #tpu.dot_dimension_numbers<[1], [0], [0], [1], [0, 0, 1, 1], [], []>} : vector<48x16xf32>, vector<16x32xf32>, vector<48x32xf32> -> vector<48x32xf32>
    %16 = arith.addf %10, %15 : vector<48x32xf32>
    %c0_17 = arith.constant 0 : index
    %c8 = arith.constant 8 : index
    %c0_18 = arith.constant 0 : index
    %17 = vector.load %arg1[%c0_17, %c8, %c0_18] : memref<1x72x16xf32, #tpu.memory_space<vmem>>, vector<1x48x16xf32>
    %18 = vector.shape_cast %17 : vector<1x48x16xf32> to vector<48x16xf32>
    %c3 = arith.constant 3 : index
    %c0_19 = arith.constant 0 : index
    %c0_20 = arith.constant 0 : index
    %19 = vector.load %arg3[%c3, %c0_19, %c0_20] : memref<9x16x32xf32, #tpu.memory_space<vmem>>, vector<1x16x32xf32>
    %20 = vector.shape_cast %19 : vector<1x16x32xf32> to vector<16x32xf32>
    %cst_21 = arith.constant dense<0.000000e+00> : vector<48x32xf32>
    %21 = tpu.matmul %18, %20, %cst_21 {dimension_numbers = #tpu.dot_dimension_numbers<[1], [0], [0], [1], [0, 0, 1, 1], [], []>} : vector<48x16xf32>, vector<16x32xf32>, vector<48x32xf32> -> vector<48x32xf32>
    %22 = arith.addf %16, %21 : vector<48x32xf32>
    %c0_22 = arith.constant 0 : index
    %c9 = arith.constant 9 : index
    %c0_23 = arith.constant 0 : index
    %23 = vector.load %arg1[%c0_22, %c9, %c0_23] : memref<1x72x16xf32, #tpu.memory_space<vmem>>, vector<1x48x16xf32>
    %24 = vector.shape_cast %23 : vector<1x48x16xf32> to vector<48x16xf32>
    %c4 = arith.constant 4 : index
    %c0_24 = arith.constant 0 : index
    %c0_25 = arith.constant 0 : index
    %25 = vector.load %arg3[%c4, %c0_24, %c0_25] : memref<9x16x32xf32, #tpu.memory_space<vmem>>, vector<1x16x32xf32>
    %26 = vector.shape_cast %25 : vector<1x16x32xf32> to vector<16x32xf32>
    %cst_26 = arith.constant dense<0.000000e+00> : vector<48x32xf32>
    %27 = tpu.matmul %24, %26, %cst_26 {dimension_numbers = #tpu.dot_dimension_numbers<[1], [0], [0], [1], [0, 0, 1, 1], [], []>} : vector<48x16xf32>, vector<16x32xf32>, vector<48x32xf32> -> vector<48x32xf32>
    %28 = arith.addf %22, %27 : vector<48x32xf32>
    %c0_27 = arith.constant 0 : index
    %c10 = arith.constant 10 : index
    %c0_28 = arith.constant 0 : index
    %29 = vector.load %arg1[%c0_27, %c10, %c0_28] : memref<1x72x16xf32, #tpu.memory_space<vmem>>, vector<1x48x16xf32>
    %30 = vector.shape_cast %29 : vector<1x48x16xf32> to vector<48x16xf32>
    %c5 = arith.constant 5 : index
    %c0_29 = arith.constant 0 : index
    %c0_30 = arith.constant 0 : index
    %31 = vector.load %arg3[%c5, %c0_29, %c0_30] : memref<9x16x32xf32, #tpu.memory_space<vmem>>, vector<1x16x32xf32>
    %32 = vector.shape_cast %31 : vector<1x16x32xf32> to vector<16x32xf32>
    %cst_31 = arith.constant dense<0.000000e+00> : vector<48x32xf32>
    %33 = tpu.matmul %30, %32, %cst_31 {dimension_numbers = #tpu.dot_dimension_numbers<[1], [0], [0], [1], [0, 0, 1, 1], [], []>} : vector<48x16xf32>, vector<16x32xf32>, vector<48x32xf32> -> vector<48x32xf32>
    %34 = arith.addf %28, %33 : vector<48x32xf32>
    %c0_32 = arith.constant 0 : index
    %c16 = arith.constant 16 : index
    %c0_33 = arith.constant 0 : index
    %35 = vector.load %arg1[%c0_32, %c16, %c0_33] : memref<1x72x16xf32, #tpu.memory_space<vmem>>, vector<1x48x16xf32>
    %36 = vector.shape_cast %35 : vector<1x48x16xf32> to vector<48x16xf32>
    %c6 = arith.constant 6 : index
    %c0_34 = arith.constant 0 : index
    %c0_35 = arith.constant 0 : index
    %37 = vector.load %arg3[%c6, %c0_34, %c0_35] : memref<9x16x32xf32, #tpu.memory_space<vmem>>, vector<1x16x32xf32>
    %38 = vector.shape_cast %37 : vector<1x16x32xf32> to vector<16x32xf32>
    %cst_36 = arith.constant dense<0.000000e+00> : vector<48x32xf32>
    %39 = tpu.matmul %36, %38, %cst_36 {dimension_numbers = #tpu.dot_dimension_numbers<[1], [0], [0], [1], [0, 0, 1, 1], [], []>} : vector<48x16xf32>, vector<16x32xf32>, vector<48x32xf32> -> vector<48x32xf32>
    %40 = arith.addf %34, %39 : vector<48x32xf32>
    %c0_37 = arith.constant 0 : index
    %c17 = arith.constant 17 : index
    %c0_38 = arith.constant 0 : index
    %41 = vector.load %arg1[%c0_37, %c17, %c0_38] : memref<1x72x16xf32, #tpu.memory_space<vmem>>, vector<1x48x16xf32>
    %42 = vector.shape_cast %41 : vector<1x48x16xf32> to vector<48x16xf32>
    %c7 = arith.constant 7 : index
    %c0_39 = arith.constant 0 : index
    %c0_40 = arith.constant 0 : index
    %43 = vector.load %arg3[%c7, %c0_39, %c0_40] : memref<9x16x32xf32, #tpu.memory_space<vmem>>, vector<1x16x32xf32>
    %44 = vector.shape_cast %43 : vector<1x16x32xf32> to vector<16x32xf32>
    %cst_41 = arith.constant dense<0.000000e+00> : vector<48x32xf32>
    %45 = tpu.matmul %42, %44, %cst_41 {dimension_numbers = #tpu.dot_dimension_numbers<[1], [0], [0], [1], [0, 0, 1, 1], [], []>} : vector<48x16xf32>, vector<16x32xf32>, vector<48x32xf32> -> vector<48x32xf32>
    %46 = arith.addf %40, %45 : vector<48x32xf32>
    %c0_42 = arith.constant 0 : index
    %c18 = arith.constant 18 : index
    %c0_43 = arith.constant 0 : index
    %47 = vector.load %arg1[%c0_42, %c18, %c0_43] : memref<1x72x16xf32, #tpu.memory_space<vmem>>, vector<1x48x16xf32>
    %48 = vector.shape_cast %47 : vector<1x48x16xf32> to vector<48x16xf32>
    %c8_44 = arith.constant 8 : index
    %c0_45 = arith.constant 0 : index
    %c0_46 = arith.constant 0 : index
    %49 = vector.load %arg3[%c8_44, %c0_45, %c0_46] : memref<9x16x32xf32, #tpu.memory_space<vmem>>, vector<1x16x32xf32>
    %50 = vector.shape_cast %49 : vector<1x16x32xf32> to vector<16x32xf32>
    %cst_47 = arith.constant dense<0.000000e+00> : vector<48x32xf32>
    %51 = tpu.matmul %48, %50, %cst_47 {dimension_numbers = #tpu.dot_dimension_numbers<[1], [0], [0], [1], [0, 0, 1, 1], [], []>} : vector<48x16xf32>, vector<16x32xf32>, vector<48x32xf32> -> vector<48x32xf32>
    %52 = arith.addf %46, %51 : vector<48x32xf32>
    %c0_48 = arith.constant 0 : index
    %c0_49 = arith.constant 0 : index
    %53 = vector.load %arg4[%c0_48, %c0_49] : memref<1x32xf32, #tpu.memory_space<vmem>>, vector<1x32xf32>
    %54 = vector.broadcast %53 : vector<1x32xf32> to vector<48x32xf32>
    %55 = arith.mulf %52, %54 : vector<48x32xf32>
    %c0_50 = arith.constant 0 : index
    %c0_51 = arith.constant 0 : index
    %56 = vector.load %arg5[%c0_50, %c0_51] : memref<1x32xf32, #tpu.memory_space<vmem>>, vector<1x32xf32>
    %57 = vector.broadcast %56 : vector<1x32xf32> to vector<48x32xf32>
    %58 = arith.addf %55, %57 : vector<48x32xf32>
    %cst_52 = arith.constant 0.000000e+00 : f32
    %59 = vector.broadcast %cst_52 : f32 to vector<48x32xf32>
    %60 = arith.maximumf %58, %59 : vector<48x32xf32>
    %c0_53 = arith.constant 0 : index
    %c0_54 = arith.constant 0 : index
    %61 = vector.load %arg17[%c0_53, %c0_54] : memref<48x32xf32, #tpu.memory_space<vmem>>, vector<48x32xf32>
    tpu.vector_store %arg17[%c0_53, %c0_54], %60 {strides = array<i32>} : memref<48x32xf32, #tpu.memory_space<vmem>>, vector<48x32xf32>,
    %c0_55 = arith.constant 0 : index
    %c0_56 = arith.constant 0 : index
    %c0_57 = arith.constant 0 : index
    %62 = vector.load %arg2[%c0_55, %c0_56, %c0_57] : memref<1x272x16xf32, #tpu.memory_space<vmem>>, vector<1x232x16xf32>
    %63 = vector.shape_cast %62 : vector<1x232x16xf32> to vector<232x16xf32>
    %c0_58 = arith.constant 0 : index
    %c0_59 = arith.constant 0 : index
    %c0_60 = arith.constant 0 : index
    %64 = vector.load %arg6[%c0_58, %c0_59, %c0_60] : memref<9x16x32xf32, #tpu.memory_space<vmem>>, vector<1x16x32xf32>
    %65 = vector.shape_cast %64 : vector<1x16x32xf32> to vector<16x32xf32>
    %cst_61 = arith.constant dense<0.000000e+00> : vector<232x32xf32>
    %66 = tpu.matmul %63, %65, %cst_61 {dimension_numbers = #tpu.dot_dimension_numbers<[1], [0], [0], [1], [0, 0, 1, 1], [], []>} : vector<232x16xf32>, vector<16x32xf32>, vector<232x32xf32> -> vector<232x32xf32>
    %c0_62 = arith.constant 0 : index
    %c1_63 = arith.constant 1 : index
    %c0_64 = arith.constant 0 : index
    %67 = vector.load %arg2[%c0_62, %c1_63, %c0_64] : memref<1x272x16xf32, #tpu.memory_space<vmem>>, vector<1x232x16xf32>
    %68 = vector.shape_cast %67 : vector<1x232x16xf32> to vector<232x16xf32>
    %c1_65 = arith.constant 1 : index
    %c0_66 = arith.constant 0 : index
    %c0_67 = arith.constant 0 : index
    %69 = vector.load %arg6[%c1_65, %c0_66, %c0_67] : memref<9x16x32xf32, #tpu.memory_space<vmem>>, vector<1x16x32xf32>
    %70 = vector.shape_cast %69 : vector<1x16x32xf32> to vector<16x32xf32>
    %cst_68 = arith.constant dense<0.000000e+00> : vector<232x32xf32>
    %71 = tpu.matmul %68, %70, %cst_68 {dimension_numbers = #tpu.dot_dimension_numbers<[1], [0], [0], [1], [0, 0, 1, 1], [], []>} : vector<232x16xf32>, vector<16x32xf32>, vector<232x32xf32> -> vector<232x32xf32>
    %72 = arith.addf %66, %71 : vector<232x32xf32>
    %c0_69 = arith.constant 0 : index
    %c2_70 = arith.constant 2 : index
    %c0_71 = arith.constant 0 : index
    %73 = vector.load %arg2[%c0_69, %c2_70, %c0_71] : memref<1x272x16xf32, #tpu.memory_space<vmem>>, vector<1x232x16xf32>
    %74 = vector.shape_cast %73 : vector<1x232x16xf32> to vector<232x16xf32>
    %c2_72 = arith.constant 2 : index
    %c0_73 = arith.constant 0 : index
    %c0_74 = arith.constant 0 : index
    %75 = vector.load %arg6[%c2_72, %c0_73, %c0_74] : memref<9x16x32xf32, #tpu.memory_space<vmem>>, vector<1x16x32xf32>
    %76 = vector.shape_cast %75 : vector<1x16x32xf32> to vector<16x32xf32>
    %cst_75 = arith.constant dense<0.000000e+00> : vector<232x32xf32>
    %77 = tpu.matmul %74, %76, %cst_75 {dimension_numbers = #tpu.dot_dimension_numbers<[1], [0], [0], [1], [0, 0, 1, 1], [], []>} : vector<232x16xf32>, vector<16x32xf32>, vector<232x32xf32> -> vector<232x32xf32>
    %78 = arith.addf %72, %77 : vector<232x32xf32>
    %c0_76 = arith.constant 0 : index
    %c16_77 = arith.constant 16 : index
    %c0_78 = arith.constant 0 : index
    %79 = vector.load %arg2[%c0_76, %c16_77, %c0_78] : memref<1x272x16xf32, #tpu.memory_space<vmem>>, vector<1x232x16xf32>
    %80 = vector.shape_cast %79 : vector<1x232x16xf32> to vector<232x16xf32>
    %c3_79 = arith.constant 3 : index
    %c0_80 = arith.constant 0 : index
    %c0_81 = arith.constant 0 : index
    %81 = vector.load %arg6[%c3_79, %c0_80, %c0_81] : memref<9x16x32xf32, #tpu.memory_space<vmem>>, vector<1x16x32xf32>
    %82 = vector.shape_cast %81 : vector<1x16x32xf32> to vector<16x32xf32>
    %cst_82 = arith.constant dense<0.000000e+00> : vector<232x32xf32>
    %83 = tpu.matmul %80, %82, %cst_82 {dimension_numbers = #tpu.dot_dimension_numbers<[1], [0], [0], [1], [0, 0, 1, 1], [], []>} : vector<232x16xf32>, vector<16x32xf32>, vector<232x32xf32> -> vector<232x32xf32>
    %84 = arith.addf %78, %83 : vector<232x32xf32>
    %c0_83 = arith.constant 0 : index
    %c17_84 = arith.constant 17 : index
    %c0_85 = arith.constant 0 : index
    %85 = vector.load %arg2[%c0_83, %c17_84, %c0_85] : memref<1x272x16xf32, #tpu.memory_space<vmem>>, vector<1x232x16xf32>
    %86 = vector.shape_cast %85 : vector<1x232x16xf32> to vector<232x16xf32>
    %c4_86 = arith.constant 4 : index
    %c0_87 = arith.constant 0 : index
    %c0_88 = arith.constant 0 : index
    %87 = vector.load %arg6[%c4_86, %c0_87, %c0_88] : memref<9x16x32xf32, #tpu.memory_space<vmem>>, vector<1x16x32xf32>
    %88 = vector.shape_cast %87 : vector<1x16x32xf32> to vector<16x32xf32>
    %cst_89 = arith.constant dense<0.000000e+00> : vector<232x32xf32>
    %89 = tpu.matmul %86, %88, %cst_89 {dimension_numbers = #tpu.dot_dimension_numbers<[1], [0], [0], [1], [0, 0, 1, 1], [], []>} : vector<232x16xf32>, vector<16x32xf32>, vector<232x32xf32> -> vector<232x32xf32>
    %90 = arith.addf %84, %89 : vector<232x32xf32>
    %c0_90 = arith.constant 0 : index
    %c18_91 = arith.constant 18 : index
    %c0_92 = arith.constant 0 : index
    %91 = vector.load %arg2[%c0_90, %c18_91, %c0_92] : memref<1x272x16xf32, #tpu.memory_space<vmem>>, vector<1x232x16xf32>
    %92 = vector.shape_cast %91 : vector<1x232x16xf32> to vector<232x16xf32>
    %c5_93 = arith.constant 5 : index
    %c0_94 = arith.constant 0 : index
    %c0_95 = arith.constant 0 : index
    %93 = vector.load %arg6[%c5_93, %c0_94, %c0_95] : memref<9x16x32xf32, #tpu.memory_space<vmem>>, vector<1x16x32xf32>
    %94 = vector.shape_cast %93 : vector<1x16x32xf32> to vector<16x32xf32>
    %cst_96 = arith.constant dense<0.000000e+00> : vector<232x32xf32>
    %95 = tpu.matmul %92, %94, %cst_96 {dimension_numbers = #tpu.dot_dimension_numbers<[1], [0], [0], [1], [0, 0, 1, 1], [], []>} : vector<232x16xf32>, vector<16x32xf32>, vector<232x32xf32> -> vector<232x32xf32>
    %96 = arith.addf %90, %95 : vector<232x32xf32>
    %c0_97 = arith.constant 0 : index
    %c32 = arith.constant 32 : index
    %c0_98 = arith.constant 0 : index
    %97 = vector.load %arg2[%c0_97, %c32, %c0_98] : memref<1x272x16xf32, #tpu.memory_space<vmem>>, vector<1x232x16xf32>
    %98 = vector.shape_cast %97 : vector<1x232x16xf32> to vector<232x16xf32>
    %c6_99 = arith.constant 6 : index
    %c0_100 = arith.constant 0 : index
    %c0_101 = arith.constant 0 : index
    %99 = vector.load %arg6[%c6_99, %c0_100, %c0_101] : memref<9x16x32xf32, #tpu.memory_space<vmem>>, vector<1x16x32xf32>
    %100 = vector.shape_cast %99 : vector<1x16x32xf32> to vector<16x32xf32>
    %cst_102 = arith.constant dense<0.000000e+00> : vector<232x32xf32>
    %101 = tpu.matmul %98, %100, %cst_102 {dimension_numbers = #tpu.dot_dimension_numbers<[1], [0], [0], [1], [0, 0, 1, 1], [], []>} : vector<232x16xf32>, vector<16x32xf32>, vector<232x32xf32> -> vector<232x32xf32>
    %102 = arith.addf %96, %101 : vector<232x32xf32>
    %c0_103 = arith.constant 0 : index
    %c33 = arith.constant 33 : index
    %c0_104 = arith.constant 0 : index
    %103 = vector.load %arg2[%c0_103, %c33, %c0_104] : memref<1x272x16xf32, #tpu.memory_space<vmem>>, vector<1x232x16xf32>
    %104 = vector.shape_cast %103 : vector<1x232x16xf32> to vector<232x16xf32>
    %c7_105 = arith.constant 7 : index
    %c0_106 = arith.constant 0 : index
    %c0_107 = arith.constant 0 : index
    %105 = vector.load %arg6[%c7_105, %c0_106, %c0_107] : memref<9x16x32xf32, #tpu.memory_space<vmem>>, vector<1x16x32xf32>
    %106 = vector.shape_cast %105 : vector<1x16x32xf32> to vector<16x32xf32>
    %cst_108 = arith.constant dense<0.000000e+00> : vector<232x32xf32>
    %107 = tpu.matmul %104, %106, %cst_108 {dimension_numbers = #tpu.dot_dimension_numbers<[1], [0], [0], [1], [0, 0, 1, 1], [], []>} : vector<232x16xf32>, vector<16x32xf32>, vector<232x32xf32> -> vector<232x32xf32>
    %108 = arith.addf %102, %107 : vector<232x32xf32>
    %c0_109 = arith.constant 0 : index
    %c34 = arith.constant 34 : index
    %c0_110 = arith.constant 0 : index
    %109 = vector.load %arg2[%c0_109, %c34, %c0_110] : memref<1x272x16xf32, #tpu.memory_space<vmem>>, vector<1x232x16xf32>
    %110 = vector.shape_cast %109 : vector<1x232x16xf32> to vector<232x16xf32>
    %c8_111 = arith.constant 8 : index
    %c0_112 = arith.constant 0 : index
    %c0_113 = arith.constant 0 : index
    %111 = vector.load %arg6[%c8_111, %c0_112, %c0_113] : memref<9x16x32xf32, #tpu.memory_space<vmem>>, vector<1x16x32xf32>
    %112 = vector.shape_cast %111 : vector<1x16x32xf32> to vector<16x32xf32>
    %cst_114 = arith.constant dense<0.000000e+00> : vector<232x32xf32>
    %113 = tpu.matmul %110, %112, %cst_114 {dimension_numbers = #tpu.dot_dimension_numbers<[1], [0], [0], [1], [0, 0, 1, 1], [], []>} : vector<232x16xf32>, vector<16x32xf32>, vector<232x32xf32> -> vector<232x32xf32>
    %114 = arith.addf %108, %113 : vector<232x32xf32>
    %c0_115 = arith.constant 0 : index
    %c0_116 = arith.constant 0 : index
    %115 = vector.load %arg7[%c0_115, %c0_116] : memref<1x32xf32, #tpu.memory_space<vmem>>, vector<1x32xf32>
    %116 = vector.broadcast %115 : vector<1x32xf32> to vector<232x32xf32>
    %117 = arith.mulf %114, %116 : vector<232x32xf32>
    %c0_117 = arith.constant 0 : index
    %c0_118 = arith.constant 0 : index
    %118 = vector.load %arg8[%c0_117, %c0_118] : memref<1x32xf32, #tpu.memory_space<vmem>>, vector<1x32xf32>
    %119 = vector.broadcast %118 : vector<1x32xf32> to vector<232x32xf32>
    %120 = arith.addf %117, %119 : vector<232x32xf32>
    %cst_119 = arith.constant 0.000000e+00 : f32
    %121 = vector.broadcast %cst_119 : f32 to vector<232x32xf32>
    %122 = arith.maximumf %120, %121 : vector<232x32xf32>
    %c0_120 = arith.constant 0 : index
    %c0_121 = arith.constant 0 : index
    %123 = vector.load %arg18[%c0_120, %c0_121] : memref<232x32xf32, #tpu.memory_space<vmem>>, vector<232x32xf32>
    tpu.vector_store %arg18[%c0_120, %c0_121], %122 {strides = array<i32>} : memref<232x32xf32, #tpu.memory_space<vmem>>, vector<232x32xf32>,
    %c0_122 = arith.constant 0 : index
    %c0_123 = arith.constant 0 : index
    %124 = vector.load %arg18[%c0_122, %c0_123] : memref<232x32xf32, #tpu.memory_space<vmem>>, vector<144x32xf32>
    %c0_124 = arith.constant 0 : index
    %c0_125 = arith.constant 0 : index
    %125 = vector.load %arg17[%c0_124, %c0_125] : memref<48x32xf32, #tpu.memory_space<vmem>>, vector<1x32xf32>
    %126 = vector.broadcast %125 : vector<1x32xf32> to vector<144x32xf32>
    %127 = arith.mulf %124, %126 : vector<144x32xf32>
    %c1_126 = arith.constant 1 : index
    %c0_127 = arith.constant 0 : index
    %128 = vector.load %arg18[%c1_126, %c0_127] : memref<232x32xf32, #tpu.memory_space<vmem>>, vector<144x32xf32>
    %c1_128 = arith.constant 1 : index
    %c0_129 = arith.constant 0 : index
    %129 = vector.load %arg17[%c1_128, %c0_129] : memref<48x32xf32, #tpu.memory_space<vmem>>, vector<1x32xf32>
    %130 = vector.broadcast %129 : vector<1x32xf32> to vector<144x32xf32>
    %131 = arith.mulf %128, %130 : vector<144x32xf32>
    %132 = arith.addf %127, %131 : vector<144x32xf32>
    %c2_130 = arith.constant 2 : index
    %c0_131 = arith.constant 0 : index
    %133 = vector.load %arg18[%c2_130, %c0_131] : memref<232x32xf32, #tpu.memory_space<vmem>>, vector<144x32xf32>
    %c2_132 = arith.constant 2 : index
    %c0_133 = arith.constant 0 : index
    %134 = vector.load %arg17[%c2_132, %c0_133] : memref<48x32xf32, #tpu.memory_space<vmem>>, vector<1x32xf32>
    %135 = vector.broadcast %134 : vector<1x32xf32> to vector<144x32xf32>
    %136 = arith.mulf %133, %135 : vector<144x32xf32>
    %137 = arith.addf %132, %136 : vector<144x32xf32>
    %c3_134 = arith.constant 3 : index
    %c0_135 = arith.constant 0 : index
    %138 = vector.load %arg18[%c3_134, %c0_135] : memref<232x32xf32, #tpu.memory_space<vmem>>, vector<144x32xf32>
    %c3_136 = arith.constant 3 : index
    %c0_137 = arith.constant 0 : index
    %139 = vector.load %arg17[%c3_136, %c0_137] : memref<48x32xf32, #tpu.memory_space<vmem>>, vector<1x32xf32>
    %140 = vector.broadcast %139 : vector<1x32xf32> to vector<144x32xf32>
    %141 = arith.mulf %138, %140 : vector<144x32xf32>
    %142 = arith.addf %137, %141 : vector<144x32xf32>
    %c4_138 = arith.constant 4 : index
    %c0_139 = arith.constant 0 : index
    %143 = vector.load %arg18[%c4_138, %c0_139] : memref<232x32xf32, #tpu.memory_space<vmem>>, vector<144x32xf32>
    %c4_140 = arith.constant 4 : index
    %c0_141 = arith.constant 0 : index
    %144 = vector.load %arg17[%c4_140, %c0_141] : memref<48x32xf32, #tpu.memory_space<vmem>>, vector<1x32xf32>
    %145 = vector.broadcast %144 : vector<1x32xf32> to vector<144x32xf32>
    %146 = arith.mulf %143, %145 : vector<144x32xf32>
    %147 = arith.addf %142, %146 : vector<144x32xf32>
    %c5_142 = arith.constant 5 : index
    %c0_143 = arith.constant 0 : index
    %148 = vector.load %arg18[%c5_142, %c0_143] : memref<232x32xf32, #tpu.memory_space<vmem>>, vector<144x32xf32>
    %c5_144 = arith.constant 5 : index
    %c0_145 = arith.constant 0 : index
    %149 = vector.load %arg17[%c5_144, %c0_145] : memref<48x32xf32, #tpu.memory_space<vmem>>, vector<1x32xf32>
    %150 = vector.broadcast %149 : vector<1x32xf32> to vector<144x32xf32>
    %151 = arith.mulf %148, %150 : vector<144x32xf32>
    %152 = arith.addf %147, %151 : vector<144x32xf32>
    %c16_146 = arith.constant 16 : index
    %c0_147 = arith.constant 0 : index
    %153 = vector.load %arg18[%c16_146, %c0_147] : memref<232x32xf32, #tpu.memory_space<vmem>>, vector<144x32xf32>
    %c8_148 = arith.constant 8 : index
    %c0_149 = arith.constant 0 : index
    %154 = vector.load %arg17[%c8_148, %c0_149] : memref<48x32xf32, #tpu.memory_space<vmem>>, vector<1x32xf32>
    %155 = vector.broadcast %154 : vector<1x32xf32> to vector<144x32xf32>
    %156 = arith.mulf %153, %155 : vector<144x32xf32>
    %157 = arith.addf %152, %156 : vector<144x32xf32>
    %c17_150 = arith.constant 17 : index
    %c0_151 = arith.constant 0 : index
    %158 = vector.load %arg18[%c17_150, %c0_151] : memref<232x32xf32, #tpu.memory_space<vmem>>, vector<144x32xf32>
    %c9_152 = arith.constant 9 : index
    %c0_153 = arith.constant 0 : index
    %159 = vector.load %arg17[%c9_152, %c0_153] : memref<48x32xf32, #tpu.memory_space<vmem>>, vector<1x32xf32>
    %160 = vector.broadcast %159 : vector<1x32xf32> to vector<144x32xf32>
    %161 = arith.mulf %158, %160 : vector<144x32xf32>
    %162 = arith.addf %157, %161 : vector<144x32xf32>
    %c18_154 = arith.constant 18 : index
    %c0_155 = arith.constant 0 : index
    %163 = vector.load %arg18[%c18_154, %c0_155] : memref<232x32xf32, #tpu.memory_space<vmem>>, vector<144x32xf32>
    %c10_156 = arith.constant 10 : index
    %c0_157 = arith.constant 0 : index
    %164 = vector.load %arg17[%c10_156, %c0_157] : memref<48x32xf32, #tpu.memory_space<vmem>>, vector<1x32xf32>
    %165 = vector.broadcast %164 : vector<1x32xf32> to vector<144x32xf32>
    %166 = arith.mulf %163, %165 : vector<144x32xf32>
    %167 = arith.addf %162, %166 : vector<144x32xf32>
    %c19 = arith.constant 19 : index
    %c0_158 = arith.constant 0 : index
    %168 = vector.load %arg18[%c19, %c0_158] : memref<232x32xf32, #tpu.memory_space<vmem>>, vector<144x32xf32>
    %c11 = arith.constant 11 : index
    %c0_159 = arith.constant 0 : index
    %169 = vector.load %arg17[%c11, %c0_159] : memref<48x32xf32, #tpu.memory_space<vmem>>, vector<1x32xf32>
    %170 = vector.broadcast %169 : vector<1x32xf32> to vector<144x32xf32>
    %171 = arith.mulf %168, %170 : vector<144x32xf32>
    %172 = arith.addf %167, %171 : vector<144x32xf32>
    %c20 = arith.constant 20 : index
    %c0_160 = arith.constant 0 : index
    %173 = vector.load %arg18[%c20, %c0_160] : memref<232x32xf32, #tpu.memory_space<vmem>>, vector<144x32xf32>
    %c12 = arith.constant 12 : index
    %c0_161 = arith.constant 0 : index
    %174 = vector.load %arg17[%c12, %c0_161] : memref<48x32xf32, #tpu.memory_space<vmem>>, vector<1x32xf32>
    %175 = vector.broadcast %174 : vector<1x32xf32> to vector<144x32xf32>
    %176 = arith.mulf %173, %175 : vector<144x32xf32>
    %177 = arith.addf %172, %176 : vector<144x32xf32>
    %c21 = arith.constant 21 : index
    %c0_162 = arith.constant 0 : index
    %178 = vector.load %arg18[%c21, %c0_162] : memref<232x32xf32, #tpu.memory_space<vmem>>, vector<144x32xf32>
    %c13 = arith.constant 13 : index
    %c0_163 = arith.constant 0 : index
    %179 = vector.load %arg17[%c13, %c0_163] : memref<48x32xf32, #tpu.memory_space<vmem>>, vector<1x32xf32>
    %180 = vector.broadcast %179 : vector<1x32xf32> to vector<144x32xf32>
    %181 = arith.mulf %178, %180 : vector<144x32xf32>
    %182 = arith.addf %177, %181 : vector<144x32xf32>
    %c32_164 = arith.constant 32 : index
    %c0_165 = arith.constant 0 : index
    %183 = vector.load %arg18[%c32_164, %c0_165] : memref<232x32xf32, #tpu.memory_space<vmem>>, vector<144x32xf32>
    %c16_166 = arith.constant 16 : index
    %c0_167 = arith.constant 0 : index
    %184 = vector.load %arg17[%c16_166, %c0_167] : memref<48x32xf32, #tpu.memory_space<vmem>>, vector<1x32xf32>
    %185 = vector.broadcast %184 : vector<1x32xf32> to vector<144x32xf32>
    %186 = arith.mulf %183, %185 : vector<144x32xf32>
    %187 = arith.addf %182, %186 : vector<144x32xf32>
    %c33_168 = arith.constant 33 : index
    %c0_169 = arith.constant 0 : index
    %188 = vector.load %arg18[%c33_168, %c0_169] : memref<232x32xf32, #tpu.memory_space<vmem>>, vector<144x32xf32>
    %c17_170 = arith.constant 17 : index
    %c0_171 = arith.constant 0 : index
    %189 = vector.load %arg17[%c17_170, %c0_171] : memref<48x32xf32, #tpu.memory_space<vmem>>, vector<1x32xf32>
    %190 = vector.broadcast %189 : vector<1x32xf32> to vector<144x32xf32>
    %191 = arith.mulf %188, %190 : vector<144x32xf32>
    %192 = arith.addf %187, %191 : vector<144x32xf32>
    %c34_172 = arith.constant 34 : index
    %c0_173 = arith.constant 0 : index
    %193 = vector.load %arg18[%c34_172, %c0_173] : memref<232x32xf32, #tpu.memory_space<vmem>>, vector<144x32xf32>
    %c18_174 = arith.constant 18 : index
    %c0_175 = arith.constant 0 : index
    %194 = vector.load %arg17[%c18_174, %c0_175] : memref<48x32xf32, #tpu.memory_space<vmem>>, vector<1x32xf32>
    %195 = vector.broadcast %194 : vector<1x32xf32> to vector<144x32xf32>
    %196 = arith.mulf %193, %195 : vector<144x32xf32>
    %197 = arith.addf %192, %196 : vector<144x32xf32>
    %c35 = arith.constant 35 : index
    %c0_176 = arith.constant 0 : index
    %198 = vector.load %arg18[%c35, %c0_176] : memref<232x32xf32, #tpu.memory_space<vmem>>, vector<144x32xf32>
    %c19_177 = arith.constant 19 : index
    %c0_178 = arith.constant 0 : index
    %199 = vector.load %arg17[%c19_177, %c0_178] : memref<48x32xf32, #tpu.memory_space<vmem>>, vector<1x32xf32>
    %200 = vector.broadcast %199 : vector<1x32xf32> to vector<144x32xf32>
    %201 = arith.mulf %198, %200 : vector<144x32xf32>
    %202 = arith.addf %197, %201 : vector<144x32xf32>
    %c36 = arith.constant 36 : index
    %c0_179 = arith.constant 0 : index
    %203 = vector.load %arg18[%c36, %c0_179] : memref<232x32xf32, #tpu.memory_space<vmem>>, vector<144x32xf32>
    %c20_180 = arith.constant 20 : index
    %c0_181 = arith.constant 0 : index
    %204 = vector.load %arg17[%c20_180, %c0_181] : memref<48x32xf32, #tpu.memory_space<vmem>>, vector<1x32xf32>
    %205 = vector.broadcast %204 : vector<1x32xf32> to vector<144x32xf32>
    %206 = arith.mulf %203, %205 : vector<144x32xf32>
    %207 = arith.addf %202, %206 : vector<144x32xf32>
    %c37 = arith.constant 37 : index
    %c0_182 = arith.constant 0 : index
    %208 = vector.load %arg18[%c37, %c0_182] : memref<232x32xf32, #tpu.memory_space<vmem>>, vector<144x32xf32>
    %c21_183 = arith.constant 21 : index
    %c0_184 = arith.constant 0 : index
    %209 = vector.load %arg17[%c21_183, %c0_184] : memref<48x32xf32, #tpu.memory_space<vmem>>, vector<1x32xf32>
    %210 = vector.broadcast %209 : vector<1x32xf32> to vector<144x32xf32>
    %211 = arith.mulf %208, %210 : vector<144x32xf32>
    %212 = arith.addf %207, %211 : vector<144x32xf32>
    %c48 = arith.constant 48 : index
    %c0_185 = arith.constant 0 : index
    %213 = vector.load %arg18[%c48, %c0_185] : memref<232x32xf32, #tpu.memory_space<vmem>>, vector<144x32xf32>
    %c24 = arith.constant 24 : index
    %c0_186 = arith.constant 0 : index
    %214 = vector.load %arg17[%c24, %c0_186] : memref<48x32xf32, #tpu.memory_space<vmem>>, vector<1x32xf32>
    %215 = vector.broadcast %214 : vector<1x32xf32> to vector<144x32xf32>
    %216 = arith.mulf %213, %215 : vector<144x32xf32>
    %217 = arith.addf %212, %216 : vector<144x32xf32>
    %c49 = arith.constant 49 : index
    %c0_187 = arith.constant 0 : index
    %218 = vector.load %arg18[%c49, %c0_187] : memref<232x32xf32, #tpu.memory_space<vmem>>, vector<144x32xf32>
    %c25 = arith.constant 25 : index
    %c0_188 = arith.constant 0 : index
    %219 = vector.load %arg17[%c25, %c0_188] : memref<48x32xf32, #tpu.memory_space<vmem>>, vector<1x32xf32>
    %220 = vector.broadcast %219 : vector<1x32xf32> to vector<144x32xf32>
    %221 = arith.mulf %218, %220 : vector<144x32xf32>
    %222 = arith.addf %217, %221 : vector<144x32xf32>
    %c50 = arith.constant 50 : index
    %c0_189 = arith.constant 0 : index
    %223 = vector.load %arg18[%c50, %c0_189] : memref<232x32xf32, #tpu.memory_space<vmem>>, vector<144x32xf32>
    %c26 = arith.constant 26 : index
    %c0_190 = arith.constant 0 : index
    %224 = vector.load %arg17[%c26, %c0_190] : memref<48x32xf32, #tpu.memory_space<vmem>>, vector<1x32xf32>
    %225 = vector.broadcast %224 : vector<1x32xf32> to vector<144x32xf32>
    %226 = arith.mulf %223, %225 : vector<144x32xf32>
    %227 = arith.addf %222, %226 : vector<144x32xf32>
    %c51 = arith.constant 51 : index
    %c0_191 = arith.constant 0 : index
    %228 = vector.load %arg18[%c51, %c0_191] : memref<232x32xf32, #tpu.memory_space<vmem>>, vector<144x32xf32>
    %c27 = arith.constant 27 : index
    %c0_192 = arith.constant 0 : index
    %229 = vector.load %arg17[%c27, %c0_192] : memref<48x32xf32, #tpu.memory_space<vmem>>, vector<1x32xf32>
    %230 = vector.broadcast %229 : vector<1x32xf32> to vector<144x32xf32>
    %231 = arith.mulf %228, %230 : vector<144x32xf32>
    %232 = arith.addf %227, %231 : vector<144x32xf32>
    %c52 = arith.constant 52 : index
    %c0_193 = arith.constant 0 : index
    %233 = vector.load %arg18[%c52, %c0_193] : memref<232x32xf32, #tpu.memory_space<vmem>>, vector<144x32xf32>
    %c28 = arith.constant 28 : index
    %c0_194 = arith.constant 0 : index
    %234 = vector.load %arg17[%c28, %c0_194] : memref<48x32xf32, #tpu.memory_space<vmem>>, vector<1x32xf32>
    %235 = vector.broadcast %234 : vector<1x32xf32> to vector<144x32xf32>
    %236 = arith.mulf %233, %235 : vector<144x32xf32>
    %237 = arith.addf %232, %236 : vector<144x32xf32>
    %c53 = arith.constant 53 : index
    %c0_195 = arith.constant 0 : index
    %238 = vector.load %arg18[%c53, %c0_195] : memref<232x32xf32, #tpu.memory_space<vmem>>, vector<144x32xf32>
    %c29 = arith.constant 29 : index
    %c0_196 = arith.constant 0 : index
    %239 = vector.load %arg17[%c29, %c0_196] : memref<48x32xf32, #tpu.memory_space<vmem>>, vector<1x32xf32>
    %240 = vector.broadcast %239 : vector<1x32xf32> to vector<144x32xf32>
    %241 = arith.mulf %238, %240 : vector<144x32xf32>
    %242 = arith.addf %237, %241 : vector<144x32xf32>
    %c64 = arith.constant 64 : index
    %c0_197 = arith.constant 0 : index
    %243 = vector.load %arg18[%c64, %c0_197] : memref<232x32xf32, #tpu.memory_space<vmem>>, vector<144x32xf32>
    %c32_198 = arith.constant 32 : index
    %c0_199 = arith.constant 0 : index
    %244 = vector.load %arg17[%c32_198, %c0_199] : memref<48x32xf32, #tpu.memory_space<vmem>>, vector<1x32xf32>
    %245 = vector.broadcast %244 : vector<1x32xf32> to vector<144x32xf32>
    %246 = arith.mulf %243, %245 : vector<144x32xf32>
    %247 = arith.addf %242, %246 : vector<144x32xf32>
    %c65 = arith.constant 65 : index
    %c0_200 = arith.constant 0 : index
    %248 = vector.load %arg18[%c65, %c0_200] : memref<232x32xf32, #tpu.memory_space<vmem>>, vector<144x32xf32>
    %c33_201 = arith.constant 33 : index
    %c0_202 = arith.constant 0 : index
    %249 = vector.load %arg17[%c33_201, %c0_202] : memref<48x32xf32, #tpu.memory_space<vmem>>, vector<1x32xf32>
    %250 = vector.broadcast %249 : vector<1x32xf32> to vector<144x32xf32>
    %251 = arith.mulf %248, %250 : vector<144x32xf32>
    %252 = arith.addf %247, %251 : vector<144x32xf32>
    %c66 = arith.constant 66 : index
    %c0_203 = arith.constant 0 : index
    %253 = vector.load %arg18[%c66, %c0_203] : memref<232x32xf32, #tpu.memory_space<vmem>>, vector<144x32xf32>
    %c34_204 = arith.constant 34 : index
    %c0_205 = arith.constant 0 : index
    %254 = vector.load %arg17[%c34_204, %c0_205] : memref<48x32xf32, #tpu.memory_space<vmem>>, vector<1x32xf32>
    %255 = vector.broadcast %254 : vector<1x32xf32> to vector<144x32xf32>
    %256 = arith.mulf %253, %255 : vector<144x32xf32>
    %257 = arith.addf %252, %256 : vector<144x32xf32>
    %c67 = arith.constant 67 : index
    %c0_206 = arith.constant 0 : index
    %258 = vector.load %arg18[%c67, %c0_206] : memref<232x32xf32, #tpu.memory_space<vmem>>, vector<144x32xf32>
    %c35_207 = arith.constant 35 : index
    %c0_208 = arith.constant 0 : index
    %259 = vector.load %arg17[%c35_207, %c0_208] : memref<48x32xf32, #tpu.memory_space<vmem>>, vector<1x32xf32>
    %260 = vector.broadcast %259 : vector<1x32xf32> to vector<144x32xf32>
    %261 = arith.mulf %258, %260 : vector<144x32xf32>
    %262 = arith.addf %257, %261 : vector<144x32xf32>
    %c68 = arith.constant 68 : index
    %c0_209 = arith.constant 0 : index
    %263 = vector.load %arg18[%c68, %c0_209] : memref<232x32xf32, #tpu.memory_space<vmem>>, vector<144x32xf32>
    %c36_210 = arith.constant 36 : index
    %c0_211 = arith.constant 0 : index
    %264 = vector.load %arg17[%c36_210, %c0_211] : memref<48x32xf32, #tpu.memory_space<vmem>>, vector<1x32xf32>
    %265 = vector.broadcast %264 : vector<1x32xf32> to vector<144x32xf32>
    %266 = arith.mulf %263, %265 : vector<144x32xf32>
    %267 = arith.addf %262, %266 : vector<144x32xf32>
    %c69 = arith.constant 69 : index
    %c0_212 = arith.constant 0 : index
    %268 = vector.load %arg18[%c69, %c0_212] : memref<232x32xf32, #tpu.memory_space<vmem>>, vector<144x32xf32>
    %c37_213 = arith.constant 37 : index
    %c0_214 = arith.constant 0 : index
    %269 = vector.load %arg17[%c37_213, %c0_214] : memref<48x32xf32, #tpu.memory_space<vmem>>, vector<1x32xf32>
    %270 = vector.broadcast %269 : vector<1x32xf32> to vector<144x32xf32>
    %271 = arith.mulf %268, %270 : vector<144x32xf32>
    %272 = arith.addf %267, %271 : vector<144x32xf32>
    %c80 = arith.constant 80 : index
    %c0_215 = arith.constant 0 : index
    %273 = vector.load %arg18[%c80, %c0_215] : memref<232x32xf32, #tpu.memory_space<vmem>>, vector<144x32xf32>
    %c40 = arith.constant 40 : index
    %c0_216 = arith.constant 0 : index
    %274 = vector.load %arg17[%c40, %c0_216] : memref<48x32xf32, #tpu.memory_space<vmem>>, vector<1x32xf32>
    %275 = vector.broadcast %274 : vector<1x32xf32> to vector<144x32xf32>
    %276 = arith.mulf %273, %275 : vector<144x32xf32>
    %277 = arith.addf %272, %276 : vector<144x32xf32>
    %c81 = arith.constant 81 : index
    %c0_217 = arith.constant 0 : index
    %278 = vector.load %arg18[%c81, %c0_217] : memref<232x32xf32, #tpu.memory_space<vmem>>, vector<144x32xf32>
    %c41 = arith.constant 41 : index
    %c0_218 = arith.constant 0 : index
    %279 = vector.load %arg17[%c41, %c0_218] : memref<48x32xf32, #tpu.memory_space<vmem>>, vector<1x32xf32>
    %280 = vector.broadcast %279 : vector<1x32xf32> to vector<144x32xf32>
    %281 = arith.mulf %278, %280 : vector<144x32xf32>
    %282 = arith.addf %277, %281 : vector<144x32xf32>
    %c82 = arith.constant 82 : index
    %c0_219 = arith.constant 0 : index
    %283 = vector.load %arg18[%c82, %c0_219] : memref<232x32xf32, #tpu.memory_space<vmem>>, vector<144x32xf32>
    %c42 = arith.constant 42 : index
    %c0_220 = arith.constant 0 : index
    %284 = vector.load %arg17[%c42, %c0_220] : memref<48x32xf32, #tpu.memory_space<vmem>>, vector<1x32xf32>
    %285 = vector.broadcast %284 : vector<1x32xf32> to vector<144x32xf32>
    %286 = arith.mulf %283, %285 : vector<144x32xf32>
    %287 = arith.addf %282, %286 : vector<144x32xf32>
    %c83 = arith.constant 83 : index
    %c0_221 = arith.constant 0 : index
    %288 = vector.load %arg18[%c83, %c0_221] : memref<232x32xf32, #tpu.memory_space<vmem>>, vector<144x32xf32>
    %c43 = arith.constant 43 : index
    %c0_222 = arith.constant 0 : index
    %289 = vector.load %arg17[%c43, %c0_222] : memref<48x32xf32, #tpu.memory_space<vmem>>, vector<1x32xf32>
    %290 = vector.broadcast %289 : vector<1x32xf32> to vector<144x32xf32>
    %291 = arith.mulf %288, %290 : vector<144x32xf32>
    %292 = arith.addf %287, %291 : vector<144x32xf32>
    %c84 = arith.constant 84 : index
    %c0_223 = arith.constant 0 : index
    %293 = vector.load %arg18[%c84, %c0_223] : memref<232x32xf32, #tpu.memory_space<vmem>>, vector<144x32xf32>
    %c44 = arith.constant 44 : index
    %c0_224 = arith.constant 0 : index
    %294 = vector.load %arg17[%c44, %c0_224] : memref<48x32xf32, #tpu.memory_space<vmem>>, vector<1x32xf32>
    %295 = vector.broadcast %294 : vector<1x32xf32> to vector<144x32xf32>
    %296 = arith.mulf %293, %295 : vector<144x32xf32>
    %297 = arith.addf %292, %296 : vector<144x32xf32>
    %c85 = arith.constant 85 : index
    %c0_225 = arith.constant 0 : index
    %298 = vector.load %arg18[%c85, %c0_225] : memref<232x32xf32, #tpu.memory_space<vmem>>, vector<144x32xf32>
    %c45 = arith.constant 45 : index
    %c0_226 = arith.constant 0 : index
    %299 = vector.load %arg17[%c45, %c0_226] : memref<48x32xf32, #tpu.memory_space<vmem>>, vector<1x32xf32>
    %300 = vector.broadcast %299 : vector<1x32xf32> to vector<144x32xf32>
    %301 = arith.mulf %298, %300 : vector<144x32xf32>
    %302 = arith.addf %297, %301 : vector<144x32xf32>
    %c0_227 = arith.constant 0 : index
    %c0_228 = arith.constant 0 : index
    %303 = vector.load %arg11[%c0_227, %c0_228] : memref<1x32xf32, #tpu.memory_space<vmem>>, vector<1x32xf32>
    %c0_229 = arith.constant 0 : index
    %c0_230 = arith.constant 0 : index
    %304 = vector.load %arg12[%c0_229, %c0_230] : memref<1x32xf32, #tpu.memory_space<vmem>>, vector<1x32xf32>
    %305 = vector.extract_strided_slice %302 {offsets = [0, 0], sizes = [144, 16], strides = [1, 1]} : vector<144x32xf32> to vector<144x16xf32>
    %c0_231 = arith.constant 0 : index
    %c0_232 = arith.constant 0 : index
    %306 = vector.load %arg9[%c0_231, %c0_232] : memref<16x16xf32, #tpu.memory_space<vmem>>, vector<16x16xf32>
    %cst_233 = arith.constant dense<0.000000e+00> : vector<144x16xf32>
    %307 = tpu.matmul %305, %306, %cst_233 {dimension_numbers = #tpu.dot_dimension_numbers<[1], [0], [0], [1], [0, 0, 1, 1], [], []>} : vector<144x16xf32>, vector<16x16xf32>, vector<144x16xf32> -> vector<144x16xf32>
    %308 = vector.extract_strided_slice %302 {offsets = [0, 16], sizes = [144, 16], strides = [1, 1]} : vector<144x32xf32> to vector<144x16xf32>
    %c0_234 = arith.constant 0 : index
    %c0_235 = arith.constant 0 : index
    %309 = vector.load %arg10[%c0_234, %c0_235] : memref<16x16xf32, #tpu.memory_space<vmem>>, vector<16x16xf32>
    %cst_236 = arith.constant dense<0.000000e+00> : vector<144x16xf32>
    %310 = tpu.matmul %308, %309, %cst_236 {dimension_numbers = #tpu.dot_dimension_numbers<[1], [0], [0], [1], [0, 0, 1, 1], [], []>} : vector<144x16xf32>, vector<16x16xf32>, vector<144x16xf32> -> vector<144x16xf32>
    %311 = vector.extract_strided_slice %303 {offsets = [0, 0], sizes = [1, 16], strides = [1, 1]} : vector<1x32xf32> to vector<1x16xf32>
    %312 = vector.broadcast %311 : vector<1x16xf32> to vector<144x16xf32>
    %313 = arith.mulf %307, %312 : vector<144x16xf32>
    %314 = vector.extract_strided_slice %304 {offsets = [0, 0], sizes = [1, 16], strides = [1, 1]} : vector<1x32xf32> to vector<1x16xf32>
    %315 = vector.broadcast %314 : vector<1x16xf32> to vector<144x16xf32>
    %316 = arith.addf %313, %315 : vector<144x16xf32>
    %cst_237 = arith.constant 0.000000e+00 : f32
    %317 = vector.broadcast %cst_237 : f32 to vector<144x16xf32>
    %318 = arith.maximumf %316, %317 : vector<144x16xf32>
    %319 = vector.extract_strided_slice %303 {offsets = [0, 16], sizes = [1, 16], strides = [1, 1]} : vector<1x32xf32> to vector<1x16xf32>
    %320 = vector.broadcast %319 : vector<1x16xf32> to vector<144x16xf32>
    %321 = arith.mulf %310, %320 : vector<144x16xf32>
    %322 = vector.extract_strided_slice %304 {offsets = [0, 16], sizes = [1, 16], strides = [1, 1]} : vector<1x32xf32> to vector<1x16xf32>
    %323 = vector.broadcast %322 : vector<1x16xf32> to vector<144x16xf32>
    %324 = arith.addf %321, %323 : vector<144x16xf32>
    %cst_238 = arith.constant 0.000000e+00 : f32
    %325 = vector.broadcast %cst_238 : f32 to vector<144x16xf32>
    %326 = arith.maximumf %324, %325 : vector<144x16xf32>
    %c0_239 = arith.constant 0 : index
    %c0_240 = arith.constant 0 : index
    %327 = vector.load %arg13[%c0_239, %c0_240] : memref<16x128xf32, #tpu.memory_space<vmem>>, vector<16x128xf32>
    %cst_241 = arith.constant dense<0.000000e+00> : vector<144x128xf32>
    %328 = tpu.matmul %318, %327, %cst_241 {dimension_numbers = #tpu.dot_dimension_numbers<[1], [0], [0], [1], [0, 0, 1, 1], [], []>} : vector<144x16xf32>, vector<16x128xf32>, vector<144x128xf32> -> vector<144x128xf32>
    %c0_242 = arith.constant 0 : index
    %c0_243 = arith.constant 0 : index
    %329 = vector.load %arg14[%c0_242, %c0_243] : memref<16x128xf32, #tpu.memory_space<vmem>>, vector<16x128xf32>
    %cst_244 = arith.constant dense<0.000000e+00> : vector<144x128xf32>
    %330 = tpu.matmul %326, %329, %cst_244 {dimension_numbers = #tpu.dot_dimension_numbers<[1], [0], [0], [1], [0, 0, 1, 1], [], []>} : vector<144x16xf32>, vector<16x128xf32>, vector<144x128xf32> -> vector<144x128xf32>
    %331 = arith.addf %328, %330 : vector<144x128xf32>
    %c0_245 = arith.constant 0 : index
    %c0_246 = arith.constant 0 : index
    %332 = vector.load %arg15[%c0_245, %c0_246] : memref<1x128xf32, #tpu.memory_space<vmem>>, vector<1x128xf32>
    %333 = vector.broadcast %332 : vector<1x128xf32> to vector<144x128xf32>
    %334 = arith.addf %331, %333 : vector<144x128xf32>
    %c0_247 = arith.constant 0 : index
    %c0_248 = arith.constant 0 : index
    %c0_249 = arith.constant 0 : index
    %335 = vector.load %arg16[%c0_247, %c0_248, %c0_249] : memref<1x144x128xf32, #tpu.memory_space<vmem>>, vector<1x144x128xf32>
    %336 = vector.shape_cast %335 : vector<1x144x128xf32> to vector<144x128xf32>
    %337 = vector.shape_cast %334 : vector<144x128xf32> to vector<1x144x128xf32>
    tpu.vector_store %arg16[%c0_247, %c0_248, %c0_249], %337 {strides = array<i32>} : memref<1x144x128xf32, #tpu.memory_space<vmem>>, vector<1x144x128xf32>,
    return
  }
  func.func @transform_0(%arg0: i32) -> (i32, i32, i32) {
    %c0_i32 = arith.constant 0 : i32
    %c0_i32_0 = arith.constant 0 : i32
    %c0_i32_1 = arith.constant 0 : i32
    return %arg0, %c0_i32, %c0_i32_0 : i32, i32, i32
  }
  func.func @transform_1(%arg0: i32) -> (i32, i32, i32) {
    %c0_i32 = arith.constant 0 : i32
    %c0_i32_0 = arith.constant 0 : i32
    %c0_i32_1 = arith.constant 0 : i32
    return %arg0, %c0_i32, %c0_i32_0 : i32, i32, i32
  }
  func.func @transform_2(%arg0: i32) -> (i32, i32, i32) {
    %c0_i32 = arith.constant 0 : i32
    %c0_i32_0 = arith.constant 0 : i32
    %c0_i32_1 = arith.constant 0 : i32
    %c0_i32_2 = arith.constant 0 : i32
    return %c0_i32, %c0_i32_0, %c0_i32_1 : i32, i32, i32
  }
  func.func @transform_3(%arg0: i32) -> (i32, i32) {
    %c0_i32 = arith.constant 0 : i32
    %c0_i32_0 = arith.constant 0 : i32
    %c0_i32_1 = arith.constant 0 : i32
    return %c0_i32, %c0_i32_0 : i32, i32
  }
  func.func @transform_4(%arg0: i32) -> (i32, i32) {
    %c0_i32 = arith.constant 0 : i32
    %c0_i32_0 = arith.constant 0 : i32
    %c0_i32_1 = arith.constant 0 : i32
    return %c0_i32, %c0_i32_0 : i32, i32
  }
  func.func @transform_5(%arg0: i32) -> (i32, i32, i32) {
    %c0_i32 = arith.constant 0 : i32
    %c0_i32_0 = arith.constant 0 : i32
    %c0_i32_1 = arith.constant 0 : i32
    %c0_i32_2 = arith.constant 0 : i32
    return %c0_i32, %c0_i32_0, %c0_i32_1 : i32, i32, i32
  }
  func.func @transform_6(%arg0: i32) -> (i32, i32) {
    %c0_i32 = arith.constant 0 : i32
    %c0_i32_0 = arith.constant 0 : i32
    %c0_i32_1 = arith.constant 0 : i32
    return %c0_i32, %c0_i32_0 : i32, i32
  }
  func.func @transform_7(%arg0: i32) -> (i32, i32) {
    %c0_i32 = arith.constant 0 : i32
    %c0_i32_0 = arith.constant 0 : i32
    %c0_i32_1 = arith.constant 0 : i32
    return %c0_i32, %c0_i32_0 : i32, i32
  }
  func.func @transform_8(%arg0: i32) -> (i32, i32) {
    %c0_i32 = arith.constant 0 : i32
    %c0_i32_0 = arith.constant 0 : i32
    %c0_i32_1 = arith.constant 0 : i32
    return %c0_i32, %c0_i32_0 : i32, i32
  }
  func.func @transform_9(%arg0: i32) -> (i32, i32) {
    %c0_i32 = arith.constant 0 : i32
    %c0_i32_0 = arith.constant 0 : i32
    %c0_i32_1 = arith.constant 0 : i32
    return %c0_i32, %c0_i32_0 : i32, i32
  }
  func.func @transform_10(%arg0: i32) -> (i32, i32) {
    %c0_i32 = arith.constant 0 : i32
    %c0_i32_0 = arith.constant 0 : i32
    %c0_i32_1 = arith.constant 0 : i32
    return %c0_i32, %c0_i32_0 : i32, i32
  }
  func.func @transform_11(%arg0: i32) -> (i32, i32) {
    %c0_i32 = arith.constant 0 : i32
    %c0_i32_0 = arith.constant 0 : i32
    %c0_i32_1 = arith.constant 0 : i32
    return %c0_i32, %c0_i32_0 : i32, i32
  }
  func.func @transform_12(%arg0: i32) -> (i32, i32) {
    %c0_i32 = arith.constant 0 : i32
    %c0_i32_0 = arith.constant 0 : i32
    %c0_i32_1 = arith.constant 0 : i32
    return %c0_i32, %c0_i32_0 : i32, i32
  }
  func.func @transform_13(%arg0: i32) -> (i32, i32) {
    %c0_i32 = arith.constant 0 : i32
    %c0_i32_0 = arith.constant 0 : i32
    %c0_i32_1 = arith.constant 0 : i32
    return %c0_i32, %c0_i32_0 : i32, i32
  }
  func.func @transform_14(%arg0: i32) -> (i32, i32) {
    %c0_i32 = arith.constant 0 : i32
    %c0_i32_0 = arith.constant 0 : i32
    %c0_i32_1 = arith.constant 0 : i32
    return %c0_i32, %c0_i32_0 : i32, i32
  }
  func.func @transform_15(%arg0: i32) -> (i32, i32, i32) {
    %c0_i32 = arith.constant 0 : i32
    %c0_i32_0 = arith.constant 0 : i32
    %c0_i32_1 = arith.constant 0 : i32
    return %arg0, %c0_i32, %c0_i32_0 : i32, i32, i32
  }
}

</mosaic_0001>

<bundles_post_ra>
// kernel: _rpn_forward_impl.1
= control target key start
LH: loop header
LB: loop body
LE: loop exit
PB: predicated region body
PF: predicated region fallthrough
CT: control target
= control target key end

     0   :  { %s9854_s18 = smov 0   ;;  %s14504_s0 = inlined_call_operand.vmem [shape: f32[2,72,16], index: 0, kind: input, shape index: {}]   ;;  %s14505_s1 = inlined_call_operand.vmem [shape: f32[2,272,16], index: 1, kind: input, shape index: {}]   ;;  %s14506_s2 = inlined_call_operand.vmem [shape: f32[9,16,32], index: 2, kind: input, shape index: {}]   ;;  %s14507_s3 = inlined_call_operand.vmem [shape: f32[1,32], index: 3, kind: input, shape index: {}]   ;;  %s14508_s4 = inlined_call_operand.vmem [shape: f32[1,32], index: 4, kind: input, shape index: {}]   ;;  %s14509_s5 = inlined_call_operand.vmem [shape: f32[9,16,32], index: 5, kind: input, shape index: {}]   ;;  %s14510_s6 = inlined_call_operand.vmem [shape: f32[1,32], index: 6, kind: input, shape index: {}]   ;;  %s14511_s7 = inlined_call_operand.vmem [shape: f32[1,32], index: 7, kind: input, shape index: {}]   ;;  %s14512_s8 = inlined_call_operand.vmem [shape: f32[16,16], index: 8, kind: input, shape index: {}]   ;;  %s14513_s9 = inlined_call_operand.vmem [shape: f32[16,16], index: 9, kind: input, shape index: {}]   ;;  %s14514_s10 = inlined_call_operand.vmem [shape: f32[1,32], index: 10, kind: input, shape index: {}]   ;;  %s14515_s11 = inlined_call_operand.vmem [shape: f32[1,32], index: 11, kind: input, shape index: {}]   ;;  %s14516_s12 = inlined_call_operand.vmem [shape: f32[16,128], index: 12, kind: input, shape index: {}]   ;;  %s14517_s13 = inlined_call_operand.vmem [shape: f32[16,128], index: 13, kind: input, shape index: {}]   ;;  %s14518_s14 = inlined_call_operand.vmem [shape: f32[1,128], index: 14, kind: input, shape index: {}]   ;;  %s14519_s15 = inlined_call_operand.vmem [shape: f32[2,144,128], index: 15, kind: output, shape index: {}]  }
   0x1 LB: > { %s7713_s19 = sadd.s32 4294967295, %s9769_s18   ;;  %p7717_p0 = scmp.ge.s32.totalorder %s9769_s18, 1  ;;  %s9769_s18 = sphi %s9854_s18, %s25_s18  }
   0x2   : > { %p447_p1 = scmp.lt.s32.totalorder %s9769_s18, 3 }
   0x4   : > { %p448_p2 = pnand %p7717_p0, %p447_p1 }
   0x6   : > { %451 = sbr.rel (%p448_p2) target bundleno = 1615 (0x64f), region = 80 }
   0xb   : > { %v522_v0 = vld [vmem:[%s14506_s2 + $0x8] sm:$0xff]  ;;  %v7722_v1 = vld [vmem:[%s14506_s2 + $0x18] sm:$0xff]  ;;  %v521_v2 = vld [vmem:[%s14506_s2] sm:$0xff]  ;;  %p500_p3 = scmp.lt.s32.totalorder %s7713_s19, 1  ;;  %vm532_vm0 = vcmask 130048   ;;  %v14522_v37 = vmov 0.0  }
   0xc   : > { %8629 = vmatprep.subr.mxu1 %v522_v0  ;;  %8616 = vmatprep.subr.mxu0 %v7722_v1  ;;  %v7721_v3 = vld [vmem:[%s14506_s2 + $0x10] sm:$0xff]  ;;  %v7744_v4 = vld [vmem:[%s14506_s2 + $0x38] sm:$0xff]  ;;  %v7736_v5 = vld [vmem:[%s14506_s2 + $0x28] sm:$0xff]  ;;  %vm9772_vm1 = vmmov 0   ;;  %vm1687_vm2 = vcmask 261120   ;;  %s9773_s29 = smov 112  }
   0xd   : > { %8630 = vmatpush3.msra.mxu1 %v522_v0  ;;  %8617 = vmatpush3.msra.mxu0 %v7722_v1  ;;  %s15038_s19 = smov (!%p500_p3, %s7713_s19), 1  ;;  %v7743_v6 = vld [vmem:[%s14506_s2 + $0x30] sm:$0xff]  ;;  %v7735_v17 = vld [vmem:[%s14506_s2 + $0x20] sm:$0xff]  ;;  %v7760_v18 = vld [vmem:[%s14506_s2 + $0x58] sm:$0xff] }
   0xe   : > { %8631 = vmatprep.subr.mxu1 %v521_v2  ;;  %8618 = vmatprep.subr.mxu0 %v7721_v3  ;;  %s9680_s17 = smul.u32 72, %s15038_s19  ;;  %v7752_v22 = vld [vmem:[%s14506_s2 + $0x48] sm:$0xff]  ;;  %v7759_v25 = vld [vmem:[%s14506_s2 + $0x50] sm:$0xff]  ;;  %v7751_v28 = vld [vmem:[%s14506_s2 + $0x40] sm:$0xff] }
   0xf   : > { %8632 = vmatpush3.msra.mxu1 %v521_v2  ;;  %8619 = vmatpush3.msra.mxu0 %v7721_v3  ;;  %v7776_v29 = vld [vmem:[%s14506_s2 + $0x78] sm:$0xff]  ;;  %v7768_v32 = vld [vmem:[%s14506_s2 + $0x68] sm:$0xff]  ;;  %v7775_v33 = vld [vmem:[%s14506_s2 + $0x70] sm:$0xff]  ;;  %s9681_s25 = smul.u32 272, %s15038_s19 }
  0x10   : > { %8655 = vmatprep.subr.mxu1 %v7744_v4  ;;  %8642 = vmatprep.subr.mxu0 %v7736_v5  ;;  %s9886_s22 = scalar_lea.vmem %s14504_s0, %s9680_s17  ;;  %v7767_v34 = vld [vmem:[%s14506_s2 + $0x60] sm:$0xff]  ;;  %v7784_v38 = vld [vmem:[%s14506_s2 + $0x88] sm:$0xff]  ;;  %v7794_v39 = vld [vmem:[%s14509_s5 + $0x18] sm:$0xff]  ;;  %s9682_s20 = smul.u32 144, %s15038_s19 }
  0x11   : > { %v523_v7 = vld [vmem:[%s9886_s22 + $0x1] sm:$0xff]  ;;  %v9894_v9 = vld [vmem:[%s9886_s22 + $0x9] sm:$0xff]  ;;  %v9900_v11 = vld [vmem:[%s9886_s22 + $0x11] sm:$0xff]  ;;  %s10065_s30 = scalar_lea.vmem %s14505_s1, %s9681_s25 }
  0x12   : > { %v515_v8 = vld [vmem:[%s9886_s22] sm:$0xff]  ;;  %8620 = vmatprep.mubr.msk.f32.mxu0 %vm532_vm0, %v523_v7  ;;  %v516_v10 = vld [vmem:[%s9886_s22 + $0x8] sm:$0xff]  ;;  %v9903_v12 = vld [vmem:[%s9886_s22 + $0x10] sm:$0xff]  ;;  %s14463_s25 = scalar_lea.vmem %s14519_s15, %s9682_s20 }
  0x13   : > { %8633 = vmatprep.mubr.msk.f32.mxu1 %vm532_vm0, %v515_v8  ;;  %8621 = vmatmul.mubr.msk.f32.vlgmr.msra.gmra.mxu0 %vm532_vm0, %v9894_v9  ;;  %v9911_v13 = vld [vmem:[%s9886_s22 + $0x19] sm:$0xff]  ;;  %v9919_v15 = vld [vmem:[%s9886_s22 + $0x21] sm:$0xff]  ;;  %v9939_v19 = vld [vmem:[%s9886_s22 + $0x29] sm:$0xff] }
  0x14   : > { %8634 = vmatmul.mubr.msk.f32.vlgmr.msra.gmra.mxu1 %vm532_vm0, %v516_v10  ;;  %8623 = vmatprep.mubr.msk.f32.mxu0 %vm532_vm0, %v9900_v11  ;;  %v9914_v14 = vld [vmem:[%s9886_s22 + $0x18] sm:$0xff]  ;;  %v9922_v16 = vld [vmem:[%s9886_s22 + $0x20] sm:$0xff]  ;;  %v9942_v20 = vld [vmem:[%s9886_s22 + $0x28] sm:$0xff] }
  0x15   : > { %8656 = vmatpush3.msra.mxu1 %v7744_v4  ;;  %8636 = vmatprep.mubr.msk.f32.mxu1 %vm532_vm0, %v9903_v12  ;;  %v759_v21 = vld [vmem:[%s9886_s22 + $0x2] sm:$0xff]  ;;  %v760_v23 = vld [vmem:[%s9886_s22 + $0xa] sm:$0xff]  ;;  %v9956_v24 = vld [vmem:[%s9886_s22 + $0x12] sm:$0xff] }
  0x16   : > { %8657 = vmatprep.subr.mxu1 %v7743_v6  ;;  %8643 = vmatpush3.msra.mxu0 %v7736_v5  ;;  %v9967_v26 = vld [vmem:[%s9886_s22 + $0x1a] sm:$0xff]  ;;  %v9972_v27 = vld [vmem:[%s9886_s22 + $0x22] sm:$0xff]  ;;  %v9989_v30 = vld [vmem:[%s9886_s22 + $0x2a] sm:$0xff] }
  0x17   : > { %8658 = vmatpush3.msra.mxu1 %v7743_v6  ;;  %8624 = vmatmul.mubr.msk.f32.gmra.mxu0 %vm532_vm0, %v9911_v13  ;;  %v892_v31 = vld [vmem:[%s9886_s22 + $0x30] sm:$0xff]  ;;  %v7783_v41 = vld [vmem:[%s14506_s2 + $0x80] sm:$0xff]  ;;  %v1276_v42 = vld [vmem:[%s9886_s22 + $0x38] sm:$0xff] }
  0x18   : > { %8637 = vmatmul.mubr.msk.f32.gmra.mxu1 %vm532_vm0, %v9914_v14  ;;  %8626 = vmatprep.mubr.msk.f32.mxu0 %vm532_vm0, %v9919_v15  ;;  %v1020_v35 = vld [vmem:[%s9886_s22 + $0x31] sm:$0xff]  ;;  %v1404_v43 = vld [vmem:[%s9886_s22 + $0x39] sm:$0xff]  ;;  %v1729_v44 = vld [vmem:[%s10065_s30 + $0x21] sm:$0xff] }
  0x19   : > { %8639 = vmatprep.mubr.msk.f32.mxu1 %vm532_vm0, %v9922_v16  ;;  %8644 = vmatprep.subr.mxu0 %v7735_v17  ;;  %v1148_v36 = vld [vmem:[%s9886_s22 + $0x32] sm:$0xff]  ;;  %v7854_v45 = vld [vmem:[%s14509_s5 + $0x28] sm:$0xff]  ;;  %v7853_v47 = vld [vmem:[%s14509_s5 + $0x20] sm:$0xff] }
  0x1a   : > { %8681 = vmatprep.subr.mxu1 %v7760_v18  ;;  %8645 = vmatpush3.msra.mxu0 %v7735_v17  ;;  %v7793_v40 = vld [vmem:[%s14509_s5 + $0x10] sm:$0xff]  ;;  %v1532_v48 = vld [vmem:[%s9886_s22 + $0x3a] sm:$0xff]  ;;  %v1724_v52 = vld [vmem:[%s14509_s5 + $0x8] sm:$0xff] }
  0x1b   : > { %8627 = vmatmul.mubr.msk.f32.gmra.mxu0 %vm532_vm0, %v9939_v19  ;;  %8668 = vmatprep.subr.mxu0 %v7752_v22  ;;  %v1730_v46 = vld [vmem:[%s10065_s30 + $0x29] sm:$0xff]  ;;  %v1731_v49 = vld [vmem:[%s10065_s30 + $0x31] sm:$0xff]  ;;  %v1725_v50 = vld [vmem:[%s10065_s30 + $0x1] sm:$0xff] }
  0x1c   : > { %8640 = vmatmul.mubr.msk.f32.gmra.mxu1 %vm532_vm0, %v9942_v20  ;;  %8646 = vmatprep.mubr.msk.f32.mxu0 %vm532_vm0, %v759_v21  ;;  %v1732_v51 = vld [vmem:[%s10065_s30 + $0x39] sm:$0xff]  ;;  %v1726_v53 = vld [vmem:[%s10065_s30 + $0x9] sm:$0xff]  ;;  %v1733_v54 = vld [vmem:[%s10065_s30 + $0x41] sm:$0xff] }
  0x1d   : > { %8659 = vmatprep.mubr.msk.f32.mxu1 %vm532_vm0, %v516_v10  ;;  %v1723_v55 = vld [vmem:[%s14509_s5] sm:$0xff]  ;;  %v10132_v56 = vld [vmem:[%s10065_s30 + $0x11] sm:$0xff]  ;;  %v1734_v57 = vld [vmem:[%s10065_s30 + $0x49] sm:$0xff] }
  0x1e   : > { %v1728_v58 = vld [vmem:[%s10065_s30 + $0x19] sm:$0xff]  ;;  %v1735_v59 = vld [vmem:[%s10065_s30 + $0x51] sm:$0xff]  ;;  %v1737_v63 = vld [vmem:[%s10065_s30 + $0x61] sm:$0xff] }
  0x1f   : > { %8647 = vmatmul.mubr.msk.f32.vlgmr.msra.gmra.mxu0 %vm532_vm0, %v760_v23  ;;  %v1736_v60 = vld [vmem:[%s10065_s30 + $0x59] sm:$0xff]  ;;  %v1695_v0 = vld [vmem:[%s10065_s30 + $0x8] sm:$0xff]  ;;  %v7884_v1 = vld [vmem:[%s14509_s5 + $0x30] sm:$0xff] }
  0x20   : > { %8660 = vmatmul.mubr.msk.f32.vlgmr.msra.gmra.mxu1 %vm532_vm0, %v9903_v12  ;;  %8649 = vmatprep.mubr.msk.f32.mxu0 %vm532_vm0, %v9956_v24  ;;  %v1694_v61 = vld [vmem:[%s10065_s30] sm:$0xff]  ;;  %v7885_v62 = vld [vmem:[%s14509_s5 + $0x38] sm:$0xff]  ;;  %v1738_v2 = vld [vmem:[%s10065_s30 + $0x69] sm:$0xff] }
  0x21   : > { %8682 = vmatpush3.msra.mxu1 %v7760_v18  ;;  %8662 = vmatprep.mubr.msk.f32.mxu1 %vm532_vm0, %v9914_v14  ;;  %v10176_v3 = vld [vmem:[%s10065_s30 + $0x10] sm:$0xff]  ;;  %v10188_v5 = vld [vmem:[%s10065_s30 + $0x18] sm:$0xff]  ;;  %v10199_v7 = vld [vmem:[%s10065_s30 + $0x20] sm:$0xff] }
  0x22   : > { %8683 = vmatprep.subr.mxu1 %v7759_v25  ;;  %8669 = vmatpush3.msra.mxu0 %v7752_v22  ;;  %v1739_v4 = vld [vmem:[%s10065_s30 + $0x71] sm:$0xff]  ;;  %v1740_v6 = vld [vmem:[%s10065_s30 + $0x79] sm:$0xff]  ;;  %v1741_v8 = vld [vmem:[%s10065_s30 + $0x81] sm:$0xff] }
  0x23   : > { %8684 = vmatpush3.msra.mxu1 %v7759_v25  ;;  %8650 = vmatmul.mubr.msk.f32.gmra.mxu0 %vm532_vm0, %v9967_v26  ;;  %v1742_v10 = vld [vmem:[%s10065_s30 + $0x89] sm:$0xff]  ;;  %v10276_v21 = vld [vmem:[%s10065_s30 + $0x58] sm:$0xff] }
  0x24   : > { %8663 = vmatmul.mubr.msk.f32.gmra.mxu1 %vm532_vm0, %v9922_v16  ;;  %8652 = vmatprep.mubr.msk.f32.mxu0 %vm532_vm0, %v9972_v27  ;;  %v10254_v17 = vld [vmem:[%s10065_s30 + $0x48] sm:$0xff]  ;;  %v1748_v22 = vld [vmem:[%s10065_s30 + $0xb9] sm:$0xff] }
  0x25   : > { %8665 = vmatprep.mubr.msk.f32.mxu1 %vm532_vm0, %v9942_v20  ;;  %8670 = vmatprep.subr.mxu0 %v7751_v28  ;;  %v1746_v18 = vld [vmem:[%s10065_s30 + $0xa9] sm:$0xff] }
  0x26   : > { %8707 = vmatprep.subr.mxu1 %v7776_v29  ;;  %8671 = vmatpush3.msra.mxu0 %v7751_v28  ;;  %v10298_v25 = vld [vmem:[%s10065_s30 + $0x68] sm:$0xff]  ;;  %v1751_v28 = vld [vmem:[%s10065_s30 + $0xd1] sm:$0xff] }
  0x27   : > { %8653 = vmatmul.mubr.msk.f32.gmra.mxu0 %vm532_vm0, %v9989_v30  ;;  %8694 = vmatprep.subr.mxu0 %v7768_v32 }
  0x28   : > { %8666 = vmatmul.mubr.msk.f32.gmra.mxu1 %vm532_vm0, %v892_v31  ;;  %8672 = vmatprep.mubr.msk.f32.mxu0 %vm532_vm0, %v9894_v9  ;;  %v10210_v9 = vld [vmem:[%s10065_s30 + $0x28] sm:$0xff] }
  0x29   : > { %8685 = vmatprep.mubr.msk.f32.mxu1 %vm532_vm0, %v760_v23  ;;  %v10287_v23 = vld [vmem:[%s10065_s30 + $0x60] sm:$0xff] }
  0x2b   : > { %8673 = vmatmul.mubr.msk.f32.vlgmr.msra.gmra.mxu0 %vm532_vm0, %v9900_v11 }
  0x2c   : > { %8686 = vmatmul.mubr.msk.f32.vlgmr.msra.gmra.mxu1 %vm532_vm0, %v9956_v24  ;;  %8675 = vmatprep.mubr.msk.f32.mxu0 %vm532_vm0, %v9911_v13 }
  0x2d   : > { %8708 = vmatpush3.msra.mxu1 %v7776_v29  ;;  %8688 = vmatprep.mubr.msk.f32.mxu1 %vm532_vm0, %v9967_v26  ;;  %v10320_v29 = vld [vmem:[%s10065_s30 + $0x78] sm:$0xff] }
  0x2e   : > { %8709 = vmatprep.subr.mxu1 %v7775_v33  ;;  %8695 = vmatpush3.msra.mxu0 %v7768_v32  ;;  %v1753_v32 = vld [vmem:[%s10065_s30 + $0xe1] sm:$0xff] }
  0x2f   : > { %8710 = vmatpush3.msra.mxu1 %v7775_v33  ;;  %8676 = vmatmul.mubr.msk.f32.gmra.mxu0 %vm532_vm0, %v9919_v15  ;;  %v10342_v33 = vld [vmem:[%s10065_s30 + $0x88] sm:$0xff] }
  0x30   : > { %8689 = vmatmul.mubr.msk.f32.gmra.mxu1 %vm532_vm0, %v9972_v27  ;;  %8678 = vmatprep.mubr.msk.f32.mxu0 %vm532_vm0, %v9939_v19 }
  0x31   : > { %8691 = vmatprep.mubr.msk.f32.mxu1 %vm532_vm0, %v9989_v30  ;;  %8696 = vmatprep.subr.mxu0 %v7767_v34 }
  0x32   : > { %9676 = vmatprep.subr.mxu1 %v14522_v37  ;;  %8697 = vmatpush3.msra.mxu0 %v7767_v34  ;;  %v10352_v34 = vld [vmem:[%s10065_s30 + $0x90] sm:$0xff] }
  0x33   : > { %8679 = vmatmul.mubr.msk.f32.gmra.mxu0 %vm532_vm0, %v1020_v35  ;;  %8720 = vmatprep.subr.mxu0 %v7784_v38 }
  0x34   : > { %8692 = vmatmul.mubr.msk.f32.gmra.mxu1 %vm532_vm0, %v1148_v36  ;;  %8698 = vmatprep.mubr.msk.f32.mxu0 %vm532_vm0, %v9903_v12  ;;  %v1743_v12 = vld [vmem:[%s10065_s30 + $0x91] sm:$0xff] }
  0x35   : > { %8711 = vmatprep.mubr.msk.f32.mxu1 %vm532_vm0, %v9900_v11  ;;  %v10221_v11 = vld [vmem:[%s10065_s30 + $0x30] sm:$0xff] }
  0x37   : > { %8699 = vmatmul.mubr.msk.f32.vlgmr.msra.gmra.mxu0 %vm532_vm0, %v9914_v14  ;;  %v1744_v14 = vld [vmem:[%s10065_s30 + $0x99] sm:$0xff] }
  0x38   : > { %8712 = vmatmul.mubr.msk.f32.vlgmr.msra.gmra.mxu1 %vm532_vm0, %v9911_v13  ;;  %8701 = vmatprep.mubr.msk.f32.mxu0 %vm532_vm0, %v9922_v16  ;;  %v10232_v13 = vld [vmem:[%s10065_s30 + $0x38] sm:$0xff]  ;;  %v1745_v16 = vld [vmem:[%s10065_s30 + $0xa1] sm:$0xff] }
  0x39   : > { %9678 = vmatpush3.msra.mxu1 %v7794_v39  ;;  %8714 = vmatprep.mubr.msk.f32.mxu1 %vm532_vm0, %v9919_v15  ;;  %v10243_v15 = vld [vmem:[%s10065_s30 + $0x40] sm:$0xff] }
  0x3a   : > { %9677 = vmatprep.subr.mxu1 %v14522_v37  ;;  %8721 = vmatpush3.msra.mxu0 %v7784_v38  ;;  %v7915_v38 = vld [vmem:[%s14509_s5 + $0x40] sm:$0xff] }
  0x3b   : > { %9679 = vmatpush3.msra.mxu1 %v7793_v40  ;;  %8702 = vmatmul.mubr.msk.f32.gmra.mxu0 %vm532_vm0, %v9942_v20  ;;  %v1747_v20 = vld [vmem:[%s10065_s30 + $0xb1] sm:$0xff] }
  0x3c   : > { %8715 = vmatmul.mubr.msk.f32.gmra.mxu1 %vm532_vm0, %v9939_v19  ;;  %8704 = vmatprep.mubr.msk.f32.mxu0 %vm532_vm0, %v892_v31  ;;  %v10265_v19 = vld [vmem:[%s10065_s30 + $0x50] sm:$0xff]  ;;  %v10331_v31 = vld [vmem:[%s10065_s30 + $0x80] sm:$0xff] }
  0x3d   : > { %8717 = vmatprep.mubr.msk.f32.mxu1 %vm532_vm0, %v1020_v35  ;;  %8722 = vmatprep.subr.mxu0 %v7783_v41  ;;  %v2351_v35 = vld [vmem:[%s10065_s30 + $0x2] sm:$0xff] }
  0x3e   : > { %8915 = vmatprep.subr.mxu1 %v14522_v37  ;;  %8723 = vmatpush3.msra.mxu0 %v7783_v41  ;;  %v10381_v41 = vld [vmem:[%s10065_s30 + $0xa0] sm:$0xff] }
  0x3f   : > { %8705 = vmatmul.mubr.msk.f32.gmra.mxu0 %vm532_vm0, %v1276_v42  ;;  %8733 = vmatprep.subr.mxu0 %v14522_v37  ;;  %v10384_v42 = vld [vmem:[%s10065_s30 + $0x12] sm:$0xff] }
  0x40   : > { %8718 = vmatmul.mubr.msk.f32.gmra.mxu1 %vm532_vm0, %v1404_v43  ;;  %8724 = vmatprep.mubr.msk.f32.mxu0 %vm532_vm0, %v9956_v24  ;;  %v1749_v24 = vld [vmem:[%s10065_s30 + $0xc1] sm:$0xff] }
  0x41   : > { %8749 = vmatprep.mubr.msk.f32.mxu1 %vm9772_vm1, %v14522_v37  ;;  %v10396_v43 = vld [vmem:[%s10065_s30 + $0xa8] sm:$0xff] }
  0x43   : > { %8725 = vmatmul.mubr.msk.f32.vlgmr.msra.gmra.mxu0 %vm532_vm0, %v9967_v26  ;;  %v1750_v26 = vld [vmem:[%s10065_s30 + $0xc9] sm:$0xff] }
  0x44   : > { %8750 = vmatmul.mubr.msk.f32.vlgmr.msra.gmra.mxu1 %vm532_vm0, %v1729_v44  ;;  %8727 = vmatprep.mubr.msk.f32.mxu0 %vm532_vm0, %v9972_v27  ;;  %v10309_v27 = vld [vmem:[%s10065_s30 + $0x70] sm:$0xff]  ;;  %v10399_v44 = vld [vmem:[%s10065_s30 + $0x1a] sm:$0xff] }
  0x45   : > { %8916 = vmatpush3.msra.mxu1 %v7854_v45  ;;  %8752 = vmatprep.mubr.msk.f32.mxu1 %vm9772_vm1, %v14522_v37  ;;  %v10410_v45 = vld [vmem:[%s10065_s30 + $0xb0] sm:$0xff] }
  0x46   : > { %8734 = vmatpush3.msra.mxu0 %v7794_v39  ;;  %8917 = vmatprep.subr.mxu1 %v14522_v37  ;;  %v10367_v39 = vld [vmem:[%s10065_s30 + $0x98] sm:$0xff] }
  0x47   : > { %8735 = vmatprep.subr.mxu0 %v14522_v37  ;;  %8728 = vmatmul.mubr.msk.f32.gmra.mxu0 %vm532_vm0, %v9989_v30  ;;  %v1752_v30 = vld [vmem:[%s10065_s30 + $0xd9] sm:$0xff] }
  0x48   : > { %8753 = vmatmul.mubr.msk.f32.gmra.mxu1 %vm532_vm0, %v1730_v46  ;;  %8730 = vmatprep.mubr.msk.f32.mxu0 %vm532_vm0, %v1148_v36  ;;  %v7916_v36 = vld [vmem:[%s14509_s5 + $0x48] sm:$0xff] }
  0x49   : > { %8755 = vmatprep.mubr.msk.f32.mxu1 %vm9772_vm1, %v14522_v37  ;;  %8736 = vmatpush3.msra.mxu0 %v7793_v40  ;;  %v2352_v40 = vld [vmem:[%s10065_s30 + $0xa] sm:$0xff]  ;;  %v10413_v46 = vld [vmem:[%s10065_s30 + $0x22] sm:$0xff] }
  0x4a   : > { %8918 = vmatpush3.msra.mxu1 %v7853_v47  ;;  %8824 = vmatprep.subr.mxu0 %v14522_v37  ;;  %v10424_v47 = vld [vmem:[%s10065_s30 + $0xb8] sm:$0xff] }
  0x4b   : > { %9097 = vmatprep.subr.mxu1 %v14522_v37  ;;  %8731 = vmatmul.mubr.msk.f32.gmra.mxu0 %vm532_vm0, %v1532_v48  ;;  %v10427_v48 = vld [vmem:[%s10065_s30 + $0x2a] sm:$0xff] }
  0x4c   : > { %8756 = vmatmul.mubr.msk.f32.gmra.mxu1 %vm532_vm0, %v1731_v49  ;;  %8737 = vmatprep.mubr.msk.f32.mxu0 %vm9772_vm1, %v14522_v37  ;;  %v10438_v49 = vld [vmem:[%s10065_s30 + $0xc0] sm:$0xff] }
  0x4d   : > { %8758 = vmatprep.mubr.msk.f32.mxu1 %vm9772_vm1, %v14522_v37 }
  0x4f   : > { %8738 = vmatmul.mubr.msk.f32.vlgmr.msra.gmra.mxu0 %vm532_vm0, %v1725_v50  ;;  %v10441_v50 = vld [vmem:[%s10065_s30 + $0x32] sm:$0xff] }
  0x50   : > { %8759 = vmatmul.mubr.msk.f32.gmra.mxu1 %vm532_vm0, %v1732_v51  ;;  %8740 = vmatprep.mubr.msk.f32.mxu0 %vm9772_vm1, %v14522_v37  ;;  %14675 = vst [vmem:[#allocation4_spill] sm:$0xff] %v10441_v50  ;;  %v10452_v51 = vld [vmem:[%s10065_s30 + $0xc8] sm:$0xff] }
  0x51   : > { %8761 = vmatprep.mubr.msk.f32.mxu1 %vm9772_vm1, %v14522_v37  ;;  %8825 = vmatpush3.msra.mxu0 %v1724_v52  ;;  %v10455_v52 = vld [vmem:[%s10065_s30 + $0x3a] sm:$0xff] }
  0x52   : > { %8826 = vmatprep.subr.mxu0 %v14522_v37  ;;  %14676 = vst [vmem:[#allocation5_spill] sm:$0xff] %v10455_v52 }
  0x53   : > { %8741 = vmatmul.mubr.msk.f32.gmra.mxu0 %vm532_vm0, %v1726_v53  ;;  %v10466_v53 = vld [vmem:[%s10065_s30 + $0xd0] sm:$0xff] }
  0x54   : > { %8762 = vmatmul.mubr.msk.f32.gmra.mxu1 %vm532_vm0, %v1733_v54  ;;  %8743 = vmatprep.mubr.msk.f32.mxu0 %vm9772_vm1, %v14522_v37  ;;  %v2359_v54 = vld [vmem:[%s10065_s30 + $0x42] sm:$0xff] }
  0x55   : > { %8764 = vmatprep.mubr.msk.f32.mxu1 %vm9772_vm1, %v14522_v37  ;;  %8827 = vmatpush3.msra.mxu0 %v1723_v55  ;;  %v10477_v55 = vld [vmem:[%s10065_s30 + $0xd8] sm:$0xff] }
  0x56   : > { %9006 = vmatprep.subr.mxu0 %v14522_v37 }
  0x57   : > { %8744 = vmatmul.mubr.msk.f32.gmra.mxu0 %vm532_vm0, %v10132_v56 }
  0x58   : > { %8765 = vmatmul.mubr.msk.f32.gmra.mxu1 %vm532_vm0, %v1734_v57  ;;  %8746 = vmatprep.mubr.msk.f32.mxu0 %vm9772_vm1, %v14522_v37  ;;  %v2360_v57 = vld [vmem:[%s10065_s30 + $0x4a] sm:$0xff] }
  0x59   : > { %8767 = vmatprep.mubr.msk.f32.mxu1 %vm9772_vm1, %v14522_v37 }
  0x5b   : > { %8747 = vmatmul.mubr.msk.f32.gmra.mxu0 %vm532_vm0, %v1728_v58  ;;  %v10488_v58 = vld [vmem:[%s10065_s30 + $0xe0] sm:$0xff] }
  0x5c   : > { %8768 = vmatmul.mubr.msk.f32.gmra.mxu1 %vm532_vm0, %v1735_v59  ;;  %8828 = vmatprep.mubr.msk.f32.mxu0 %vm9772_vm1, %v14522_v37  ;;  %v2361_v59 = vld [vmem:[%s10065_s30 + $0x52] sm:$0xff] }
  0x5d   : > { %8770 = vmatprep.mubr.msk.f32.mxu1 %vm9772_vm1, %v14522_v37 }
  0x5f   : > { %8829 = vmatmul.mubr.msk.f32.vlgmr.msra.gmra.mxu0 %vm532_vm0, %v1694_v61  ;;  %v7947_v61 = vld [vmem:[%s14509_s5 + $0x58] sm:$0xff] }
  0x60   : > { %8771 = vmatmul.mubr.msk.f32.gmra.mxu1 %vm532_vm0, %v1736_v60  ;;  %8831 = vmatprep.mubr.msk.f32.mxu0 %vm9772_vm1, %v14522_v37  ;;  %v2362_v60 = vld [vmem:[%s10065_s30 + $0x5a] sm:$0xff] }
  0x61   : > { %8773 = vmatprep.mubr.msk.f32.mxu1 %vm9772_vm1, %v14522_v37  ;;  %9007 = vmatpush3.msra.mxu0 %v7885_v62 }
  0x62   : > { %9008 = vmatprep.subr.mxu0 %v14522_v37 }
  0x63   : > { %8832 = vmatmul.mubr.msk.f32.gmra.mxu0 %vm532_vm0, %v1695_v0  ;;  %v2363_v0 = vld [vmem:[%s10065_s30 + $0x62] sm:$0xff] }
  0x64   : > { %8774 = vmatmul.mubr.msk.f32.gmra.mxu1 %vm532_vm0, %v1737_v63  ;;  %8834 = vmatprep.mubr.msk.f32.mxu0 %vm9772_vm1, %v14522_v37 }
  0x65   : > { %8776 = vmatprep.mubr.msk.f32.mxu1 %vm9772_vm1, %v14522_v37  ;;  %9009 = vmatpush3.msra.mxu0 %v7884_v1 }
  0x66   : > { %9188 = vmatprep.subr.mxu0 %v14522_v37 }
  0x67   : > { %8835 = vmatmul.mubr.msk.f32.gmra.mxu0 %vm532_vm0, %v10176_v3 }
  0x68   : > { %8777 = vmatmul.mubr.msk.f32.gmra.mxu1 %vm532_vm0, %v1738_v2  ;;  %8837 = vmatprep.mubr.msk.f32.mxu0 %vm9772_vm1, %v14522_v37 }
  0x69   : > { %8779 = vmatprep.mubr.msk.f32.mxu1 %vm9772_vm1, %v14522_v37 }
  0x6b   : > { %8838 = vmatmul.mubr.msk.f32.gmra.mxu0 %vm532_vm0, %v10188_v5 }
  0x6c   : > { %8780 = vmatmul.mubr.msk.f32.gmra.mxu1 %vm532_vm0, %v1739_v4  ;;  %8840 = vmatprep.mubr.msk.f32.mxu0 %vm9772_vm1, %v14522_v37  ;;  %v7946_v4 = vld [vmem:[%s14509_s5 + $0x50] sm:$0xff] }
  0x6d   : > { %8782 = vmatprep.mubr.msk.f32.mxu1 %vm9772_vm1, %v14522_v37 }
  0x6f   : > { %8841 = vmatmul.mubr.msk.f32.gmra.mxu0 %vm532_vm0, %v10199_v7 }
  0x70   : > { %8783 = vmatmul.mubr.msk.f32.gmra.mxu1 %vm532_vm0, %v1740_v6  ;;  %8843 = vmatprep.mubr.msk.f32.mxu0 %vm9772_vm1, %v14522_v37 }
  0x71   : > { %8785 = vmatprep.mubr.msk.f32.mxu1 %vm9772_vm1, %v14522_v37 }
  0x73   : > { %8844 = vmatmul.mubr.msk.f32.gmra.mxu0 %vm532_vm0, %v10210_v9 }
  0x74   : > { %8786 = vmatmul.mubr.msk.f32.gmra.mxu1 %vm532_vm0, %v1741_v8  ;;  %8846 = vmatprep.mubr.msk.f32.mxu0 %vm9772_vm1, %v14522_v37  ;;  %v2364_v8 = vld [vmem:[%s10065_s30 + $0x6a] sm:$0xff] }
  0x75   : > { %8788 = vmatprep.mubr.msk.f32.mxu1 %vm9772_vm1, %v14522_v37 }
  0x77   : > { %8847 = vmatmul.mubr.msk.f32.gmra.mxu0 %vm532_vm0, %v10221_v11 }
  0x78   : > { %8789 = vmatmul.mubr.msk.f32.gmra.mxu1 %vm532_vm0, %v1742_v10  ;;  %8849 = vmatprep.mubr.msk.f32.mxu0 %vm9772_vm1, %v14522_v37 }
  0x79   : > { %8791 = vmatprep.mubr.msk.f32.mxu1 %vm9772_vm1, %v14522_v37 }
  0x7b   : > { %8850 = vmatmul.mubr.msk.f32.gmra.mxu0 %vm532_vm0, %v10232_v13 }
  0x7c   : > { %8792 = vmatmul.mubr.msk.f32.gmra.mxu1 %vm532_vm0, %v1743_v12  ;;  %8852 = vmatprep.mubr.msk.f32.mxu0 %vm9772_vm1, %v14522_v37 }
  0x7d   : > { %8794 = vmatprep.mubr.msk.f32.mxu1 %vm9772_vm1, %v14522_v37 }
  0x7f   : > { %8853 = vmatmul.mubr.msk.f32.gmra.mxu0 %vm532_vm0, %v10243_v15 }
  0x80   : > { %8795 = vmatmul.mubr.msk.f32.gmra.mxu1 %vm532_vm0, %v1744_v14  ;;  %8855 = vmatprep.mubr.msk.f32.mxu0 %vm9772_vm1, %v14522_v37 }
  0x81   : > { %8797 = vmatprep.mubr.msk.f32.mxu1 %vm9772_vm1, %v14522_v37 }
  0x83   : > { %8856 = vmatmul.mubr.msk.f32.gmra.mxu0 %vm532_vm0, %v10254_v17 }
  0x84   : > { %8798 = vmatmul.mubr.msk.f32.gmra.mxu1 %vm532_vm0, %v1745_v16  ;;  %8858 = vmatprep.mubr.msk.f32.mxu0 %vm9772_vm1, %v14522_v37 }
  0x85   : > { %8800 = vmatprep.mubr.msk.f32.mxu1 %vm9772_vm1, %v14522_v37 }
  0x87   : > { %8859 = vmatmul.mubr.msk.f32.gmra.mxu0 %vm532_vm0, %v10265_v19 }
  0x88   : > { %8801 = vmatmul.mubr.msk.f32.gmra.mxu1 %vm532_vm0, %v1746_v18  ;;  %8861 = vmatprep.mubr.msk.f32.mxu0 %vm9772_vm1, %v14522_v37 }
  0x89   : > { %8803 = vmatprep.mubr.msk.f32.mxu1 %vm9772_vm1, %v14522_v37 }
  0x8b   : > { %8862 = vmatmul.mubr.msk.f32.gmra.mxu0 %vm532_vm0, %v10276_v21 }
  0x8c   : > { %8804 = vmatmul.mubr.msk.f32.gmra.mxu1 %vm532_vm0, %v1747_v20  ;;  %8864 = vmatprep.mubr.msk.f32.mxu0 %vm9772_vm1, %v14522_v37 }
  0x8d   : > { %8806 = vmatprep.mubr.msk.f32.mxu1 %vm9772_vm1, %v14522_v37 }
  0x8f   : > { %8865 = vmatmul.mubr.msk.f32.gmra.mxu0 %vm532_vm0, %v10287_v23 }
  0x90   : > { %8807 = vmatmul.mubr.msk.f32.gmra.mxu1 %vm532_vm0, %v1748_v22  ;;  %8867 = vmatprep.mubr.msk.f32.mxu0 %vm9772_vm1, %v14522_v37 }
  0x91   : > { %8809 = vmatprep.mubr.msk.f32.mxu1 %vm9772_vm1, %v14522_v37 }
  0x93   : > { %8868 = vmatmul.mubr.msk.f32.gmra.mxu0 %vm532_vm0, %v10298_v25 }
  0x94   : > { %8810 = vmatmul.mubr.msk.f32.gmra.mxu1 %vm532_vm0, %v1749_v24  ;;  %8870 = vmatprep.mubr.msk.f32.mxu0 %vm9772_vm1, %v14522_v37 }
  0x95   : > { %8812 = vmatprep.mubr.msk.f32.mxu1 %vm9772_vm1, %v14522_v37 }
  0x97   : > { %8871 = vmatmul.mubr.msk.f32.gmra.mxu0 %vm532_vm0, %v10309_v27 }
  0x98   : > { %8813 = vmatmul.mubr.msk.f32.gmra.mxu1 %vm532_vm0, %v1750_v26  ;;  %8873 = vmatprep.mubr.msk.f32.mxu0 %vm9772_vm1, %v14522_v37 }
  0x99   : > { %8815 = vmatprep.mubr.msk.f32.mxu1 %vm9772_vm1, %v14522_v37 }
  0x9b   : > { %8874 = vmatmul.mubr.msk.f32.gmra.mxu0 %vm532_vm0, %v10320_v29 }
  0x9c   : > { %8816 = vmatmul.mubr.msk.f32.gmra.mxu1 %vm532_vm0, %v1751_v28  ;;  %8876 = vmatprep.mubr.msk.f32.mxu0 %vm9772_vm1, %v14522_v37 }
  0x9d   : > { %8818 = vmatprep.mubr.msk.f32.mxu1 %vm9772_vm1, %v14522_v37 }
  0x9f   : > { %8877 = vmatmul.mubr.msk.f32.gmra.mxu0 %vm532_vm0, %v10331_v31 }
  0xa0   : > { %8819 = vmatmul.mubr.msk.f32.gmra.mxu1 %vm532_vm0, %v1752_v30  ;;  %8879 = vmatprep.mubr.msk.f32.mxu0 %vm9772_vm1, %v14522_v37 }
  0xa1   : > { %8821 = vmatprep.mubr.msk.f32.mxu1 %vm9772_vm1, %v14522_v37 }
  0xa3   : > { %8880 = vmatmul.mubr.msk.f32.gmra.mxu0 %vm532_vm0, %v10342_v33 }
  0xa4   : > { %8822 = vmatmul.mubr.msk.f32.gmra.mxu1 %vm532_vm0, %v1753_v32  ;;  %8882 = vmatprep.mubr.msk.f32.mxu0 %vm9772_vm1, %v14522_v37 }
  0xa5   : > { %8919 = vmatprep.mubr.msk.f32.mxu1 %vm9772_vm1, %v14522_v37 }
  0xa7   : > { %8883 = vmatmul.mubr.msk.f32.gmra.mxu0 %vm532_vm0, %v10352_v34 }
  0xa8   : > { %8920 = vmatmul.mubr.msk.f32.vlgmr.msra.gmra.mxu1 %vm532_vm0, %v2351_v35  ;;  %8885 = vmatprep.mubr.msk.f32.mxu0 %vm9772_vm1, %v14522_v37 }
  0xa9   : > { %9098 = vmatpush3.msra.mxu1 %v7916_v36  ;;  %8922 = vmatprep.mubr.msk.f32.mxu1 %vm9772_vm1, %v14522_v37 }
  0xaa   : > { %9099 = vmatprep.subr.mxu1 %v14522_v37 }
  0xab   : > { %9100 = vmatpush3.msra.mxu1 %v7915_v38  ;;  %8886 = vmatmul.mubr.msk.f32.gmra.mxu0 %vm532_vm0, %v10367_v39 }
  0xac   : > { %8923 = vmatmul.mubr.msk.f32.gmra.mxu1 %vm532_vm0, %v2352_v40  ;;  %8888 = vmatprep.mubr.msk.f32.mxu0 %vm9772_vm1, %v14522_v37 }
  0xad   : > { %8925 = vmatprep.mubr.msk.f32.mxu1 %vm9772_vm1, %v14522_v37  ;;  %9279 = vmatprep.subr.mxu1 %v14522_v37 }
  0xaf   : > { %8889 = vmatmul.mubr.msk.f32.gmra.mxu0 %vm532_vm0, %v10381_v41 }
  0xb0   : > { %8926 = vmatmul.mubr.msk.f32.gmra.mxu1 %vm532_vm0, %v10384_v42  ;;  %8891 = vmatprep.mubr.msk.f32.mxu0 %vm9772_vm1, %v14522_v37 }
  0xb1   : > { %8928 = vmatprep.mubr.msk.f32.mxu1 %vm9772_vm1, %v14522_v37 }
  0xb3   : > { %8892 = vmatmul.mubr.msk.f32.gmra.mxu0 %vm532_vm0, %v10396_v43 }
  0xb4   : > { %8929 = vmatmul.mubr.msk.f32.gmra.mxu1 %vm532_vm0, %v10399_v44  ;;  %8894 = vmatprep.mubr.msk.f32.mxu0 %vm9772_vm1, %v14522_v37 }
  0xb5   : > { %8931 = vmatprep.mubr.msk.f32.mxu1 %vm9772_vm1, %v14522_v37 }
  0xb7   : > { %8895 = vmatmul.mubr.msk.f32.gmra.mxu0 %vm532_vm0, %v10410_v45 }
  0xb8   : > { %8932 = vmatmul.mubr.msk.f32.gmra.mxu1 %vm532_vm0, %v10413_v46  ;;  %8897 = vmatprep.mubr.msk.f32.mxu0 %vm9772_vm1, %v14522_v37 }
  0xb9   : > { %8934 = vmatprep.mubr.msk.f32.mxu1 %vm9772_vm1, %v14522_v37 }
  0xbb   : > { %8898 = vmatmul.mubr.msk.f32.gmra.mxu0 %vm532_vm0, %v10424_v47 }
  0xbc   : > { %8935 = vmatmul.mubr.msk.f32.gmra.mxu1 %vm532_vm0, %v10427_v48  ;;  %8900 = vmatprep.mubr.msk.f32.mxu0 %vm9772_vm1, %v14522_v37 }
  0xbd   : > { %8937 = vmatprep.mubr.msk.f32.mxu1 %vm9772_vm1, %v14522_v37 }
  0xbf   : > { %8901 = vmatmul.mubr.msk.f32.gmra.mxu0 %vm532_vm0, %v10438_v49 }
  0xc0   : > { %8938 = vmatmul.mubr.msk.f32.gmra.mxu1 %vm532_vm0, %v10441_v50  ;;  %8903 = vmatprep.mubr.msk.f32.mxu0 %vm9772_vm1, %v14522_v37 }
  0xc1   : > { %8940 = vmatprep.mubr.msk.f32.mxu1 %vm9772_vm1, %v14522_v37 }
  0xc3   : > { %8904 = vmatmul.mubr.msk.f32.gmra.mxu0 %vm532_vm0, %v10452_v51 }
  0xc4   : > { %8941 = vmatmul.mubr.msk.f32.gmra.mxu1 %vm532_vm0, %v10455_v52  ;;  %8906 = vmatprep.mubr.msk.f32.mxu0 %vm9772_vm1, %v14522_v37 }
  0xc5   : > { %8943 = vmatprep.mubr.msk.f32.mxu1 %vm9772_vm1, %v14522_v37 }
  0xc7   : > { %8907 = vmatmul.mubr.msk.f32.gmra.mxu0 %vm532_vm0, %v10466_v53 }
  0xc8   : > { %8944 = vmatmul.mubr.msk.f32.gmra.mxu1 %vm532_vm0, %v2359_v54  ;;  %8909 = vmatprep.mubr.msk.f32.mxu0 %vm9772_vm1, %v14522_v37 }
  0xc9   : > { %8946 = vmatprep.mubr.msk.f32.mxu1 %vm9772_vm1, %v14522_v37 }
  0xcb   : > { %8910 = vmatmul.mubr.msk.f32.gmra.mxu0 %vm532_vm0, %v10477_v55 }
  0xcc   : > { %8947 = vmatmul.mubr.msk.f32.gmra.mxu1 %vm532_vm0, %v2360_v57  ;;  %8912 = vmatprep.mubr.msk.f32.mxu0 %vm9772_vm1, %v14522_v37 }
  0xcd   : > { %8949 = vmatprep.mubr.msk.f32.mxu1 %vm9772_vm1, %v14522_v37 }
  0xcf   : > { %8913 = vmatmul.mubr.msk.f32.gmra.mxu0 %vm532_vm0, %v10488_v58 }
  0xd0   : > { %8950 = vmatmul.mubr.msk.f32.gmra.mxu1 %vm532_vm0, %v2361_v59  ;;  %9010 = vmatprep.mubr.msk.f32.mxu0 %vm9772_vm1, %v14522_v37 }
  0xd1   : > { %8952 = vmatprep.mubr.msk.f32.mxu1 %vm9772_vm1, %v14522_v37 }
  0xd3   : > { %v10502_v62 = vpop.f32.mrf.mxu0  ;;  %9011 = vmatmul.mubr.msk.f32.vlgmr.msra.gmra.mxu0 %vm532_vm0, %v10176_v3 }
  0xd4   : > { %v10504_v63 = vpop.f32.mrf.mxu1  ;;  %8953 = vmatmul.mubr.msk.f32.gmra.mxu1 %vm532_vm0, %v2362_v60  ;;  %9013 = vmatprep.mubr.msk.f32.mxu0 %vm9772_vm1, %v14522_v37 }
  0xd5   : > { %8955 = vmatprep.mubr.msk.f32.mxu1 %vm9772_vm1, %v14522_v37  ;;  %v10514_v1 = vpop.f32.mrf.mxu0  ;;  %9189 = vmatpush3.msra.mxu0 %v7947_v61 }
  0xd6   : > { %v10516_v2 = vpop.f32.mrf.mxu1  ;;  %9190 = vmatprep.subr.mxu0 %v14522_v37 }
  0xd7   : > { %v10522_v6 = vpop.f32.mrf.mxu0  ;;  %9014 = vmatmul.mubr.msk.f32.gmra.mxu0 %vm532_vm0, %v10188_v5  ;;  %v2365_v5 = vld [vmem:[%s10065_s30 + $0x72] sm:$0xff] }
  0xd8   : > { %v10524_v3 = vpop.f32.mrf.mxu1  ;;  %8956 = vmatmul.mubr.msk.f32.gmra.mxu1 %vm532_vm0, %v2363_v0  ;;  %9016 = vmatprep.mubr.msk.f32.mxu0 %vm9772_vm1, %v14522_v37 }
  0xd9   : > { %8958 = vmatprep.mubr.msk.f32.mxu1 %vm9772_vm1, %v14522_v37  ;;  %v10534_v10 = vpop.f32.mrf.mxu0  ;;  %9191 = vmatpush3.msra.mxu0 %v7946_v4 }
  0xda   : > { %v10536_v12 = vpop.f32.mrf.mxu1  ;;  %9370 = vmatprep.subr.mxu0 %v14522_v37 }
  0xdb   : > { %v10539_v14 = vpop.f32.mrf.mxu0  ;;  %9017 = vmatmul.mubr.msk.f32.gmra.mxu0 %vm532_vm0, %v10199_v7  ;;  %v2366_v7 = vld [vmem:[%s10065_s30 + $0x7a] sm:$0xff] }
  0xdc   : > { %v10541_v16 = vpop.f32.mrf.mxu1  ;;  %8959 = vmatmul.mubr.msk.f32.gmra.mxu1 %vm532_vm0, %v2364_v8  ;;  %9019 = vmatprep.mubr.msk.f32.mxu0 %vm9772_vm1, %v14522_v37 }
  0xdd   : > { %8961 = vmatprep.mubr.msk.f32.mxu1 %vm9772_vm1, %v14522_v37  ;;  %v10551_v18 = vpop.f32.mrf.mxu0 }
  0xde   : > { %v10553_v20 = vpop.f32.mrf.mxu1 }
  0xdf   : > { %v8648_v22 = vpop.f32.mrf.mxu0  ;;  %9020 = vmatmul.mubr.msk.f32.gmra.mxu0 %vm532_vm0, %v10210_v9  ;;  %v2367_v9 = vld [vmem:[%s10065_s30 + $0x82] sm:$0xff] }
  0xe0   : > { %v8661_v24 = vpop.f32.mrf.mxu1  ;;  %8962 = vmatmul.mubr.msk.f32.gmra.mxu1 %vm532_vm0, %v2365_v5  ;;  %9022 = vmatprep.mubr.msk.f32.mxu0 %vm9772_vm1, %v14522_v37  ;;  %v2370_v5 = vld [vmem:[%s10065_s30 + $0x9a] sm:$0xff] }
  0xe1   : > { %8964 = vmatprep.mubr.msk.f32.mxu1 %vm9772_vm1, %v14522_v37  ;;  %v852_v26 = vpop.f32.mrf.mxu0 }
  0xe2   : > { %v980_v28 = vpop.f32.mrf.mxu1 }
  0xe3   : > { %v8651_v30 = vpop.f32.mrf.mxu0  ;;  %9023 = vmatmul.mubr.msk.f32.gmra.mxu0 %vm532_vm0, %v10221_v11  ;;  %v2368_v11 = vld [vmem:[%s10065_s30 + $0x8a] sm:$0xff] }
  0xe4   : > { %v10563_v32 = vpop.f32.mrf.mxu1  ;;  %8965 = vmatmul.mubr.msk.f32.gmra.mxu1 %vm532_vm0, %v2366_v7  ;;  %9025 = vmatprep.mubr.msk.f32.mxu0 %vm9772_vm1, %v14522_v37 }
  0xe5   : > { %8967 = vmatprep.mubr.msk.f32.mxu1 %vm9772_vm1, %v14522_v37  ;;  %v862_v35 = vpop.f32.mrf.mxu0 }
  0xe6   : > { %v990_v36 = vpop.f32.mrf.mxu1 }
  0xe7   : > { %v8654_v38 = vpop.f32.mrf.mxu0  ;;  %9026 = vmatmul.mubr.msk.f32.gmra.mxu0 %vm532_vm0, %v10232_v13  ;;  %v2369_v13 = vld [vmem:[%s10065_s30 + $0x92] sm:$0xff] }
  0xe8   : > { %v10573_v40 = vpop.f32.mrf.mxu1  ;;  %8968 = vmatmul.mubr.msk.f32.gmra.mxu1 %vm532_vm0, %v2367_v9  ;;  %9028 = vmatprep.mubr.msk.f32.mxu0 %vm9772_vm1, %v14522_v37 }
  0xe9   : > { %8970 = vmatprep.mubr.msk.f32.mxu1 %vm9772_vm1, %v14522_v37  ;;  %v10583_v54 = vpop.f32.mrf.mxu0 }
  0xea   : > { %v10585_v57 = vpop.f32.mrf.mxu1 }
  0xeb   : > { %v8674_v59 = vpop.f32.mrf.mxu0  ;;  %9029 = vmatmul.mubr.msk.f32.gmra.mxu0 %vm532_vm0, %v10243_v15  ;;  %v736_v15 = vadd.f32 %v10504_v63, %v10502_v62  ;;  %v2371_v63 = vld [vmem:[%s10065_s30 + $0xa2] sm:$0xff] }
  0xec   : > { %v8687_v60 = vpop.f32.mrf.mxu1  ;;  %8971 = vmatmul.mubr.msk.f32.gmra.mxu1 %vm532_vm0, %v2368_v11  ;;  %9031 = vmatprep.mubr.msk.f32.mxu0 %vm9772_vm1, %v14522_v37  ;;  %v731_v11 = vadd.f32 %v10516_v2, %v10514_v1  ;;  %v741_v1 = vadd.f32 %v10536_v12, %v10534_v10  ;;  %v14677_v10 = vmov 0.0   ;;  %v2372_v12 = vld [vmem:[%s10065_s30 + $0xaa] sm:$0xff] }
  0xed   : > { %8973 = vmatprep.mubr.msk.f32.mxu1 %vm9772_vm1, %v14522_v37  ;;  %v1108_v61 = vpop.f32.mrf.mxu0 }
  0xee   : > { %v1236_v0 = vpop.f32.mrf.mxu1  ;;  %v881_v62 = vadd.f32 %v852_v26, %v731_v11 }
  0xef   : > { %v8677_v4 = vpop.f32.mrf.mxu0  ;;  %9032 = vmatmul.mubr.msk.f32.gmra.mxu0 %vm532_vm0, %v10254_v17  ;;  %v746_v17 = vadd.f32 %v10524_v3, %v10522_v6  ;;  %v756_v6 = vadd.f32 %v10541_v16, %v10539_v14  ;;  %v883_v3 = vadd.f32 %v862_v35, %v741_v1 }
  0xf0   : > { %v10595_v8 = vpop.f32.mrf.mxu1  ;;  %8974 = vmatmul.mubr.msk.f32.gmra.mxu1 %vm532_vm0, %v2369_v13  ;;  %9034 = vmatprep.mubr.msk.f32.mxu0 %vm9772_vm1, %v14522_v37  ;;  %v882_v13 = vadd.f32 %v8648_v22, %v736_v15  ;;  %v1009_v11 = vadd.f32 %v980_v28, %v881_v62 }
  0xf1   : > { %8976 = vmatprep.mubr.msk.f32.mxu1 %vm9772_vm1, %v14522_v37  ;;  %v1118_v7 = vpop.f32.mrf.mxu0  ;;  %v884_v15 = vadd.f32 %v8651_v30, %v746_v17 }
  0xf2   : > { %v1246_v9 = vpop.f32.mrf.mxu1  ;;  %v1137_v35 = vadd.f32 %v1108_v61, %v1009_v11 }
  0xf3   : > { %v8680_v52 = vpop.f32.mrf.mxu0  ;;  %9035 = vmatmul.mubr.msk.f32.gmra.mxu0 %vm532_vm0, %v10265_v19  ;;  %v1010_v19 = vadd.f32 %v8661_v24, %v882_v13  ;;  %v886_v24 = vadd.f32 %v8654_v38, %v756_v6  ;;  %v1012_v30 = vadd.f32 %v10563_v32, %v884_v15  ;;  %v1011_v13 = vadd.f32 %v990_v36, %v883_v3  ;;  %v2373_v38 = vld [vmem:[%s10065_s30 + $0xb2] sm:$0xff] }
  0xf4   : > { %v10609_v50 = vpop.f32.mrf.mxu1  ;;  %8977 = vmatmul.mubr.msk.f32.gmra.mxu1 %vm532_vm0, %v2370_v5  ;;  %9037 = vmatprep.mubr.msk.f32.mxu0 %vm9772_vm1, %v14522_v37  ;;  %v751_v32 = vadd.f32 %v10553_v20, %v10551_v18  ;;  %v1265_v1 = vadd.f32 %v1236_v0, %v1137_v35 }
  0xf5   : > { %8979 = vmatprep.mubr.msk.f32.mxu1 %vm9772_vm1, %v14522_v37  ;;  %v10623_v2 = vpop.f32.mrf.mxu0  ;;  %v1138_v37 = vadd.f32 %v8674_v59, %v1010_v19  ;;  %v1140_v28 = vadd.f32 %v8677_v4, %v1012_v30  ;;  %v1014_v36 = vadd.f32 %v10573_v40, %v886_v24  ;;  %v1139_v59 = vadd.f32 %v1118_v7, %v1011_v13  ;;  %v10659_v40 = vld [vmem:[%s10065_s30 + $0xba] sm:$0xff] }
  0xf6   : > { %v10625_v22 = vpop.f32.mrf.mxu1  ;;  %v10687_v24 = vld [vmem:[%s14508_s4] ss:$0 sm:$0xff] }
  0xf7   : > { %v8700_v26 = vpop.f32.mrf.mxu0  ;;  %9038 = vmatmul.mubr.msk.f32.gmra.mxu0 %vm532_vm0, %v10276_v21  ;;  %v1266_v21 = vadd.f32 %v8687_v60, %v1138_v37  ;;  %v885_v37 = vadd.f32 %v10583_v54, %v751_v32  ;;  %v1142_v60 = vadd.f32 %v8680_v52, %v1014_v36  ;;  %v1268_v18 = vadd.f32 %v10595_v8, %v1140_v28 }
  0xf8   : > { %v8713_v5 = vpop.f32.mrf.mxu1  ;;  %8980 = vmatmul.mubr.msk.f32.gmra.mxu1 %vm532_vm0, %v2371_v63  ;;  %9040 = vmatprep.mubr.msk.f32.mxu0 %vm9772_vm1, %v14677_v10  ;;  %v1267_v54 = vadd.f32 %v1246_v9, %v1139_v59 }
  0xf9   : > { %8982 = vmatprep.mubr.msk.f32.mxu1 %vm9772_vm1, %v14677_v10  ;;  %v1364_v14 = vpop.f32.mrf.mxu0  ;;  %v1270_v8 = vadd.f32 %v10609_v50, %v1142_v60  ;;  %v10681_v50 = vld [vmem:[%s10065_s30 + $0xc2] sm:$0xff] }
  0xfa   : > { %v1492_v16 = vpop.f32.mrf.mxu1  ;;  %v1393_v20 = vadd.f32 %v1364_v14, %v1265_v1 }
  0xfb   : > { %v8703_v17 = vpop.f32.mrf.mxu0  ;;  %9041 = vmatmul.mubr.msk.f32.gmra.mxu0 %vm532_vm0, %v10287_v23  ;;  %v1394_v23 = vadd.f32 %v8700_v26, %v1266_v21  ;;  %v10668_v26 = vld [vmem:[%s14507_s3] ss:$0 sm:$0xff] }
  0xfc   : > { %v8716_v63 = vpop.f32.mrf.mxu1  ;;  %8983 = vmatmul.mubr.msk.f32.gmra.mxu1 %vm532_vm0, %v2372_v12  ;;  %9043 = vmatprep.mubr.msk.f32.mxu0 %vm9772_vm1, %v14677_v10  ;;  %v1396_v15 = vadd.f32 %v8703_v17, %v1268_v18  ;;  %v1521_v9 = vadd.f32 %v1492_v16, %v1393_v20 }
  0xfd   : > { %8985 = vmatprep.mubr.msk.f32.mxu1 %vm9772_vm1, %v14677_v10  ;;  %v1374_v61 = vpop.f32.mrf.mxu0  ;;  %v1522_v7 = vadd.f32 %v8713_v5, %v1394_v23 }
  0xfe   : > { %v1502_v62 = vpop.f32.mrf.mxu1  ;;  %v1395_v6 = vadd.f32 %v1374_v61, %v1267_v54  ;;  %v1524_v16 = vadd.f32 %v8716_v63, %v1396_v15  ;;  %v10703_v63 = vld [vmem:[%s10065_s30 + $0xca] sm:$0xff]  ;;  %v10722_v54 = vld [vmem:[%s10065_s30 + $0xd2] sm:$0xff] }
  0xff   : > { %v8706_v4 = vpop.f32.mrf.mxu0  ;;  %9044 = vmatmul.mubr.msk.f32.gmra.mxu0 %vm532_vm0, %v10298_v25  ;;  %v1013_v25 = vadd.f32 %v10585_v57, %v885_v37 }
 0x100   : > { %v8719_v19 = vpop.f32.mrf.mxu1  ;;  %8986 = vmatmul.mubr.msk.f32.gmra.mxu1 %vm532_vm0, %v2373_v38  ;;  %9046 = vmatprep.mubr.msk.f32.mxu0 %vm9772_vm1, %v14677_v10  ;;  %v1398_v12 = vadd.f32 %v8706_v4, %v1270_v8  ;;  %v1523_v13 = vadd.f32 %v1502_v62, %v1395_v6 }
 0x101   : > { %8988 = vmatprep.mubr.msk.f32.mxu1 %vm9772_vm1, %v14677_v10  ;;  %v1384_v52 = vpop.f32.mrf.mxu0  ;;  %v1141_v57 = vadd.f32 %v10623_v2, %v1013_v25 }
 0x102   : > { %v10661_v0 = vpop.f32.mrf.mxu1  ;;  %v1526_v36 = vadd.f32 %v8719_v19, %v1398_v12 }
 0x103   : > { %v8726_v3 = vpop.f32.mrf.mxu0  ;;  %9047 = vmatmul.mubr.msk.f32.gmra.mxu0 %vm532_vm0, %v10309_v27  ;;  %v1269_v32 = vadd.f32 %v10625_v22, %v1141_v57 }
 0x104   : > { %v10670_v11 = vpop.f32.mrf.mxu1  ;;  %8989 = vmatmul.mubr.msk.f32.gmra.mxu1 %vm532_vm0, %v10659_v40  ;;  %v1650_v5 = vadd.f32 %v8726_v3, %v1522_v7  ;;  %9049 = vmatprep.mubr.msk.f32.mxu0 %vm9772_vm1, %v14677_v10 }
 0x105   : > { %8991 = vmatprep.mubr.msk.f32.mxu1 %vm9772_vm1, %v14677_v10  ;;  %v1620_v27 = vpop.f32.mrf.mxu0  ;;  %v1397_v37 = vadd.f32 %v1384_v52, %v1269_v32  ;;  %v7978_v32 = vld [vmem:[%s14509_s5 + $0x68] sm:$0xff] }
 0x106   : > { %v8751_v14 = vpop.f32.mrf.mxu1  ;;  %v1663_v30 = vmul.f32 %v10668_v26, %v1650_v5  ;;  %v1649_v35 = vadd.f32 %v1620_v27, %v1521_v9 }
 0x107   : > { %v8729_v17 = vpop.f32.mrf.mxu0  ;;  %9050 = vmatmul.mubr.msk.f32.gmra.mxu0 %vm532_vm0, %v10320_v29  ;;  %v1525_v8 = vadd.f32 %v10661_v0, %v1397_v37  ;;  %v10741_v0 = vld [vmem:[%s10065_s30 + $0xda] sm:$0xff] }
 0x108   : > { %v10690_v21 = vpop.f32.mrf.mxu1  ;;  %8992 = vmatmul.mubr.msk.f32.gmra.mxu1 %vm532_vm0, %v10681_v50  ;;  %v1676_v2 = vadd.f32 %v10687_v24, %v1663_v30  ;;  %v1662_v28 = vmul.f32 %v10668_v26, %v1649_v35  ;;  %v1652_v38 = vadd.f32 %v8729_v17, %v1524_v16  ;;  %9052 = vmatprep.mubr.msk.f32.mxu0 %vm9772_vm1, %v14677_v10  ;;  %v10756_v30 = vld [vmem:[%s10065_s30 + $0xe2] sm:$0xff] }
 0x109   : > { %8994 = vmatprep.mubr.msk.f32.mxu1 %vm9772_vm1, %v14677_v10  ;;  %v1630_v59 = vpop.f32.mrf.mxu0 }
 0x10a   : > { %v8754_v61 = vpop.f32.mrf.mxu1  ;;  %v1682_v29 = vmax.f32 %v1676_v2, 0.0  ;;  %v1675_v62 = vadd.f32 %v10687_v24, %v1662_v28  ;;  %v1665_v1 = vmul.f32 %v10668_v26, %v1652_v38  ;;  %v1651_v23 = vadd.f32 %v1630_v59, %v1523_v13 }
 0x10b   : > { %v8732_v60 = vpop.f32.mrf.mxu0  ;;  %9053 = vmatmul.mubr.msk.f32.gmra.mxu0 %vm532_vm0, %v10331_v31 }
 0x10c   : > { %v10708_v4 = vpop.f32.mrf.mxu1  ;;  %8995 = vmatmul.mubr.msk.f32.gmra.mxu1 %vm532_vm0, %v10703_v63  ;;  %1689 = vst.msk [vmem:[#allocation2 + $0x8] sm:$0xff] %vm1687_vm2, %v1682_v29  ;;  %v1681_v22 = vmax.f32 %v1675_v62, 0.0  ;;  %v1678_v19 = vadd.f32 %v10687_v24, %v1665_v1  ;;  %v1664_v18 = vmul.f32 %v10668_v26, %v1651_v23  ;;  %v1654_v20 = vadd.f32 %v8732_v60, %v1526_v36  ;;  %v10801_v23 = vld [vmem:[%s10065_s30 + $0x21] sm:$0xff] }
 0x10d   : > { %8997 = vmatprep.mubr.msk.f32.mxu1 %vm9772_vm1, %v14677_v10  ;;  %9055 = vmatprep.mubr.msk.f32.mxu0 %vm9772_vm1, %v14677_v10  ;;  %v1640_v52 = vpop.f32.mrf.mxu0 }
 0x10e   : > { %v8757_v7 = vpop.f32.mrf.mxu1  ;;  %1688 = vst.msk [vmem:[#allocation2] sm:$0xff] %vm1687_vm2, %v1681_v22  ;;  %v1684_v31 = vmax.f32 %v1678_v19, 0.0  ;;  %v1677_v15 = vadd.f32 %v10687_v24, %v1664_v18  ;;  %v1667_v25 = vmul.f32 %v10668_v26, %v1654_v20  ;;  %v1653_v57 = vadd.f32 %v1640_v52, %v1525_v8  ;;  %v10817_v18 = vld [vmem:[%s10065_s30 + $0x29] sm:$0xff] }
 0x10f   : > { %v1910_v6 = vpop.f32.mrf.mxu0  ;;  %9056 = vmatmul.mubr.msk.f32.gmra.mxu0 %vm532_vm0, %v10342_v33 }
 0x110   : > { %v10728_v3 = vpop.f32.mrf.mxu1  ;;  %8998 = vmatmul.mubr.msk.f32.gmra.mxu1 %vm532_vm0, %v10722_v54  ;;  %1691 = vst.msk [vmem:[#allocation2 + $0x18] sm:$0xff] %vm1687_vm2, %v1684_v31  ;;  %v1683_v9 = vmax.f32 %v1677_v15, 0.0  ;;  %v1680_v5 = vadd.f32 %v10687_v24, %v1667_v25  ;;  %9058 = vmatprep.mubr.msk.f32.mxu0 %vm9772_vm1, %v14677_v10  ;;  %v1666_v35 = vmul.f32 %v10668_v26, %v1653_v57  ;;  %v10832_v15 = vld [vmem:[%s10065_s30 + $0x31] sm:$0xff] }
 0x111   : > { %9000 = vmatprep.mubr.msk.f32.mxu1 %vm9772_vm1, %v14677_v10  ;;  %v8739_v12 = vpop.f32.mrf.mxu0 }
 0x112   : > { %v8760_v27 = vpop.f32.mrf.mxu1  ;;  %1690 = vst.msk [vmem:[#allocation2 + $0x10] sm:$0xff] %vm1687_vm2, %v1683_v9  ;;  %v1686_v33 = vmax.f32 %v1680_v5, 0.0  ;;  %v10847_v5 = vld [vmem:[%s10065_s30 + $0x39] sm:$0xff] }
 0x113   : > { %v1915_v14 = vpop.f32.mrf.mxu0  ;;  %9059 = vmatmul.mubr.msk.f32.gmra.mxu0 %vm532_vm0, %v10352_v34  ;;  %v1679_v34 = vadd.f32 %v10687_v24, %v1666_v35  ;;  %v3068_v24 = vld [vmem:[%s10065_s30 + $0x19] sm:$0xff] }
 0x114   : > { %v10744_v16 = vpop.f32.mrf.mxu1  ;;  %9001 = vmatmul.mubr.msk.f32.gmra.mxu1 %vm532_vm0, %v10741_v0  ;;  %1693 = vst.msk [vmem:[#allocation2 + $0x28] sm:$0xff] %vm1687_vm2, %v1686_v33  ;;  %9061 = vmatprep.mubr.msk.f32.mxu0 %vm9772_vm1, %v14677_v10 }
 0x115   : > { %9003 = vmatprep.mubr.msk.f32.mxu1 %vm9772_vm1, %v14677_v10  ;;  %v8742_v13 = vpop.f32.mrf.mxu0  ;;  %v1685_v61 = vmax.f32 %v1679_v34, 0.0 }
 0x116   : > { %v8763_v17 = vpop.f32.mrf.mxu1 }
 0x117   : > { %v1920_v2 = vpop.f32.mrf.mxu0  ;;  %9062 = vmatmul.mubr.msk.f32.gmra.mxu0 %vm532_vm0, %v10367_v39  ;;  %v7977_v39 = vld [vmem:[%s14509_s5 + $0x60] sm:$0xff]  ;;  %1692 = vst.msk [vmem:[#allocation2 + $0x20] sm:$0xff] %vm1687_vm2, %v1685_v61  ;;  %v2736_v61 = vld [vmem:[%s10065_s30 + $0xe8] sm:$0xff] }
 0x118   : > { %v10759_v28 = vpop.f32.mrf.mxu1  ;;  %9004 = vmatmul.mubr.msk.f32.gmra.mxu1 %vm532_vm0, %v10756_v30  ;;  %9064 = vmatprep.mubr.msk.f32.mxu0 %vm9772_vm1, %v14677_v10 }
 0x119   : > { %9101 = vmatprep.mubr.msk.f32.mxu1 %vm9772_vm1, %v14677_v10  ;;  %v8745_v26 = vpop.f32.mrf.mxu0 }
 0x11a   : > { %v8766_v38 = vpop.f32.mrf.mxu1 }
 0x11b   : > { %v1925_v36 = vpop.f32.mrf.mxu0  ;;  %9065 = vmatmul.mubr.msk.f32.gmra.mxu0 %vm532_vm0, %v10381_v41 }
 0x11c   : > { %v10773_v59 = vpop.f32.mrf.mxu1  ;;  %9102 = vmatmul.mubr.msk.f32.vlgmr.msra.gmra.mxu1 %vm532_vm0, %v10132_v56  ;;  %9067 = vmatprep.mubr.msk.f32.mxu0 %vm9772_vm1, %v14677_v10 }
 0x11d   : > { %9280 = vmatpush3.msra.mxu1 %v7978_v32  ;;  %v8748_v29 = vpop.f32.mrf.mxu0  ;;  %9104 = vmatprep.mubr.msk.f32.mxu1 %vm9772_vm1, %v14677_v10 }
 0x11e   : > { %v8769_v62 = vpop.f32.mrf.mxu1  ;;  %9281 = vmatprep.subr.mxu1 %v14677_v10  ;;  %v10912_v29 = vld [vmem:[%s10065_s30 + $0x59] sm:$0xff] }
 0x11f   : > { %9282 = vmatpush3.msra.mxu1 %v7977_v39  ;;  %v2207_v41 = vpop.f32.mrf.mxu0  ;;  %9068 = vmatmul.mubr.msk.f32.gmra.mxu0 %vm532_vm0, %v10396_v43 }
 0x120   : > { %v10789_v56 = vpop.f32.mrf.mxu1  ;;  %9105 = vmatmul.mubr.msk.f32.gmra.mxu1 %vm532_vm0, %v3068_v24  ;;  %v10794_v1 = vadd.f32 %v2207_v41, %v1910_v6  ;;  %9070 = vmatprep.mubr.msk.f32.mxu0 %vm9772_vm1, %v14677_v10 }
 0x121   : > { %9107 = vmatprep.mubr.msk.f32.mxu1 %vm9772_vm1, %v14677_v10  ;;  %v8830_v60 = vpop.f32.mrf.mxu0  ;;  %9461 = vmatprep.subr.mxu1 %v14677_v10 }
 0x122   : > { %v8772_v37 = vpop.f32.mrf.mxu1  ;;  %v2737_v60 = vld [vmem:[%s10065_s30 + $0xf0] sm:$0xff] }
 0x123   : > { %v2212_v43 = vpop.f32.mrf.mxu0  ;;  %9071 = vmatmul.mubr.msk.f32.gmra.mxu0 %vm532_vm0, %v10410_v45 }
 0x124   : > { %v10804_v22 = vpop.f32.mrf.mxu1  ;;  %9108 = vmatmul.mubr.msk.f32.gmra.mxu1 %vm532_vm0, %v10801_v23  ;;  %v10810_v19 = vadd.f32 %v2212_v43, %v1915_v14  ;;  %9073 = vmatprep.mubr.msk.f32.mxu0 %vm9772_vm1, %v14677_v10  ;;  %v10863_v14 = vld [vmem:[%s10065_s30 + $0x41] sm:$0xff] }
 0x125   : > { %9110 = vmatprep.mubr.msk.f32.mxu1 %vm9772_vm1, %v14677_v10  ;;  %v8833_v52 = vpop.f32.mrf.mxu0  ;;  %v10928_v43 = vld [vmem:[%s10065_s30 + $0x61] sm:$0xff] }
 0x126   : > { %v8775_v20 = vpop.f32.mrf.mxu1 }
 0x127   : > { %v2217_v31 = vpop.f32.mrf.mxu0  ;;  %9074 = vmatmul.mubr.msk.f32.gmra.mxu0 %vm532_vm0, %v10424_v47 }
 0x128   : > { %v10819_v7 = vpop.f32.mrf.mxu1  ;;  %9111 = vmatmul.mubr.msk.f32.gmra.mxu1 %vm532_vm0, %v10817_v18  ;;  %v10825_v45 = vadd.f32 %v2217_v31, %v1920_v2  ;;  %9076 = vmatprep.mubr.msk.f32.mxu0 %vm9772_vm1, %v14677_v10 }
 0x129   : > { %9113 = vmatprep.mubr.msk.f32.mxu1 %vm9772_vm1, %v14677_v10  ;;  %v8836_v8 = vpop.f32.mrf.mxu0 }
 0x12a   : > { %v8778_v25 = vpop.f32.mrf.mxu1  ;;  %v10943_v8 = vld [vmem:[%s10065_s30 + $0x69] sm:$0xff] }
 0x12b   : > { %v2222_v9 = vpop.f32.mrf.mxu0  ;;  %9077 = vmatmul.mubr.msk.f32.gmra.mxu0 %vm532_vm0, %v10438_v49 }
 0x12c   : > { %v10834_v6 = vpop.f32.mrf.mxu1  ;;  %9114 = vmatmul.mubr.msk.f32.gmra.mxu1 %vm532_vm0, %v10832_v15  ;;  %v10840_v47 = vadd.f32 %v2222_v9, %v1925_v36  ;;  %9079 = vmatprep.mubr.msk.f32.mxu0 %vm9772_vm1, %v14677_v10 }
 0x12d   : > { %9116 = vmatprep.mubr.msk.f32.mxu1 %vm9772_vm1, %v14677_v10  ;;  %v8839_v12 = vpop.f32.mrf.mxu0 }
 0x12e   : > { %v8781_v57 = vpop.f32.mrf.mxu1  ;;  %v8009_v12 = vld [vmem:[%s14509_s5 + $0x78] sm:$0xff] }
 0x12f   : > { %v2227_v33 = vpop.f32.mrf.mxu0  ;;  %9080 = vmatmul.mubr.msk.f32.gmra.mxu0 %vm532_vm0, %v10452_v51 }
 0x130   : > { %v10849_v27 = vpop.f32.mrf.mxu1  ;;  %9117 = vmatmul.mubr.msk.f32.gmra.mxu1 %vm532_vm0, %v10847_v5  ;;  %v10856_v49 = vadd.f32 %v2227_v33, %v10670_v11  ;;  %9082 = vmatprep.mubr.msk.f32.mxu0 %vm9772_vm1, %v14677_v10  ;;  %v10879_v11 = vld [vmem:[%s10065_s30 + $0x49] sm:$0xff] }
 0x131   : > { %9119 = vmatprep.mubr.msk.f32.mxu1 %vm9772_vm1, %v14677_v10  ;;  %v8842_v13 = vpop.f32.mrf.mxu0 }
 0x132   : > { %v8784_v35 = vpop.f32.mrf.mxu1  ;;  %v10962_v13 = vld [vmem:[%s10065_s30 + $0x71] sm:$0xff] }
 0x133   : > { %v2232_v2 = vpop.f32.mrf.mxu0  ;;  %9083 = vmatmul.mubr.msk.f32.gmra.mxu0 %vm532_vm0, %v10466_v53 }
 0x134   : > { %v10865_v17 = vpop.f32.mrf.mxu1  ;;  %9120 = vmatmul.mubr.msk.f32.gmra.mxu1 %vm532_vm0, %v10863_v14  ;;  %v10872_v51 = vadd.f32 %v2232_v2, %v10690_v21  ;;  %9085 = vmatprep.mubr.msk.f32.mxu0 %vm9772_vm1, %v14677_v10  ;;  %v10895_v21 = vld [vmem:[%s10065_s30 + $0x51] sm:$0xff] }
 0x135   : > { %9122 = vmatprep.mubr.msk.f32.mxu1 %vm9772_vm1, %v14677_v10  ;;  %v8845_v26 = vpop.f32.mrf.mxu0 }
 0x136   : > { %v8787_v34 = vpop.f32.mrf.mxu1 }
 0x137   : > { %v2237_v32 = vpop.f32.mrf.mxu0  ;;  %9086 = vmatmul.mubr.msk.f32.gmra.mxu0 %vm532_vm0, %v10477_v55 }
 0x138   : > { %v10881_v38 = vpop.f32.mrf.mxu1  ;;  %9123 = vmatmul.mubr.msk.f32.gmra.mxu1 %vm532_vm0, %v10879_v11  ;;  %v10888_v53 = vadd.f32 %v2237_v32, %v10708_v4  ;;  %9088 = vmatprep.mubr.msk.f32.mxu0 %vm9772_vm1, %v14677_v10 }
 0x139   : > { %9125 = vmatprep.mubr.msk.f32.mxu1 %vm9772_vm1, %v14677_v10  ;;  %v8848_v39 = vpop.f32.mrf.mxu0 }
 0x13a   : > { %v8790_v36 = vpop.f32.mrf.mxu1 }
 0x13b   : > { %v2242_v55 = vpop.f32.mrf.mxu0  ;;  %9089 = vmatmul.mubr.msk.f32.gmra.mxu0 %vm532_vm0, %v10488_v58  ;;  %v10982_v36 = vld [vmem:[%s10065_s30 + $0x79] sm:$0xff] }
 0x13c   : > { %v10897_v24 = vpop.f32.mrf.mxu1  ;;  %9126 = vmatmul.mubr.msk.f32.gmra.mxu1 %vm532_vm0, %v10895_v21  ;;  %v10904_v4 = vadd.f32 %v2242_v55, %v10728_v3  ;;  %9091 = vmatprep.mubr.msk.f32.mxu0 %vm9772_vm1, %v14677_v10 }
 0x13d   : > { %9128 = vmatprep.mubr.msk.f32.mxu1 %vm9772_vm1, %v14677_v10  ;;  %v8851_v41 = vpop.f32.mrf.mxu0 }
 0x13e   : > { %v8793_v62 = vpop.f32.mrf.mxu1 }
 0x13f   : > { %v2247_v37 = vpop.f32.mrf.mxu0  ;;  %9092 = vmatmul.mubr.msk.f32.gmra.mxu0 %vm532_vm0, %v2736_v61 }
 0x140   : > { %v10914_v58 = vpop.f32.mrf.mxu1  ;;  %9129 = vmatmul.mubr.msk.f32.gmra.mxu1 %vm532_vm0, %v10912_v29  ;;  %v10920_v3 = vadd.f32 %v2247_v37, %v10744_v16  ;;  %9094 = vmatprep.mubr.msk.f32.mxu0 %vm9772_vm1, %v14677_v10 }
 0x141   : > { %9131 = vmatprep.mubr.msk.f32.mxu1 %vm9772_vm1, %v14677_v10  ;;  %v8854_v52 = vpop.f32.mrf.mxu0 }
 0x142   : > { %v8796_v20 = vpop.f32.mrf.mxu1 }
 0x143   : > { %v2252_v25 = vpop.f32.mrf.mxu0  ;;  %9095 = vmatmul.mubr.msk.f32.gmra.mxu0 %vm532_vm0, %v2737_v60 }
 0x144   : > { %v10930_v31 = vpop.f32.mrf.mxu1  ;;  %9132 = vmatmul.mubr.msk.f32.gmra.mxu1 %vm532_vm0, %v10928_v43  ;;  %v10936_v16 = vadd.f32 %v2252_v25, %v10759_v28  ;;  %9192 = vmatprep.mubr.msk.f32.mxu0 %vm9772_vm1, %v14677_v10 }
 0x145   : > { %9134 = vmatprep.mubr.msk.f32.mxu1 %vm9772_vm1, %v14677_v10  ;;  %v8857_v57 = vpop.f32.mrf.mxu0 }
 0x146   : > { %v8799_v9 = vpop.f32.mrf.mxu1 }
 0x147   : > { %v2257_v35 = vpop.f32.mrf.mxu0  ;;  %9193 = vmatmul.mubr.msk.f32.vlgmr.msra.gmra.mxu0 %vm532_vm0, %v10384_v42  ;;  %v8008_v42 = vld [vmem:[%s14509_s5 + $0x70] sm:$0xff] }
 0x148   : > { %v10948_v33 = vpop.f32.mrf.mxu1  ;;  %9135 = vmatmul.mubr.msk.f32.gmra.mxu1 %vm532_vm0, %v10943_v8  ;;  %v10955_v28 = vadd.f32 %v2257_v35, %v10773_v59  ;;  %9195 = vmatprep.mubr.msk.f32.mxu0 %vm9772_vm1, %v14677_v10 }
 0x149   : > { %9137 = vmatprep.mubr.msk.f32.mxu1 %vm9772_vm1, %v14677_v10  ;;  %v8860_v34 = vpop.f32.mrf.mxu0  ;;  %9371 = vmatpush3.msra.mxu0 %v8009_v12  ;;  %v11030_v12 = vld [vmem:[%s10065_s30 + $0x91] sm:$0xff] }
 0x14a   : > { %v8802_v2 = vpop.f32.mrf.mxu1  ;;  %9372 = vmatprep.subr.mxu0 %v14677_v10 }
 0x14b   : > { %v2262_v26 = vpop.f32.mrf.mxu0  ;;  %9196 = vmatmul.mubr.msk.f32.gmra.mxu0 %vm532_vm0, %v10399_v44 }
 0x14c   : > { %v10968_v59 = vpop.f32.mrf.mxu1  ;;  %9138 = vmatmul.mubr.msk.f32.gmra.mxu1 %vm532_vm0, %v10962_v13  ;;  %v10975_v32 = vadd.f32 %v2262_v26, %v10789_v56  ;;  %9198 = vmatprep.mubr.msk.f32.mxu0 %vm9772_vm1, %v14677_v10  ;;  %v10998_v56 = vld [vmem:[%s10065_s30 + $0x81] sm:$0xff] }
 0x14d   : > { %9140 = vmatprep.mubr.msk.f32.mxu1 %vm9772_vm1, %v14677_v10  ;;  %v8863_v55 = vpop.f32.mrf.mxu0  ;;  %9373 = vmatpush3.msra.mxu0 %v8008_v42  ;;  %v14679_v26 = vld [vmem:[#allocation5_spill] sm:$0xff] }
 0x14e   : > { %v8805_v39 = vpop.f32.mrf.mxu1  ;;  %v3431_v55 = vld [vmem:[%s10065_s30 + $0x42] sm:$0xff] }
 0x14f   : > { %v2267_v62 = vpop.f32.mrf.mxu0  ;;  %9199 = vmatmul.mubr.msk.f32.gmra.mxu0 %vm532_vm0, %v10413_v46  ;;  %v11046_v39 = vld [vmem:[%s10065_s30 + $0x99] sm:$0xff] }
 0x150   : > { %v10984_v61 = vpop.f32.mrf.mxu1  ;;  %9141 = vmatmul.mubr.msk.f32.gmra.mxu1 %vm532_vm0, %v10982_v36  ;;  %v10991_v44 = vadd.f32 %v2267_v62, %v10804_v22  ;;  %9201 = vmatprep.mubr.msk.f32.mxu0 %vm9772_vm1, %v14677_v10  ;;  %v11014_v22 = vld [vmem:[%s10065_s30 + $0x89] sm:$0xff] }
 0x151   : > { %9143 = vmatprep.mubr.msk.f32.mxu1 %vm9772_vm1, %v14677_v10  ;;  %v8866_v37 = vpop.f32.mrf.mxu0 }
 0x152   : > { %v8808_v41 = vpop.f32.mrf.mxu1 }
 0x153   : > { %v2272_v20 = vpop.f32.mrf.mxu0  ;;  %9202 = vmatmul.mubr.msk.f32.gmra.mxu0 %vm532_vm0, %v10427_v48  ;;  %v14678_v48 = vld [vmem:[#allocation4_spill] sm:$0xff] }
 0x154   : > { %v11000_v60 = vpop.f32.mrf.mxu1  ;;  %9144 = vmatmul.mubr.msk.f32.gmra.mxu1 %vm532_vm0, %v10998_v56  ;;  %v11007_v46 = vadd.f32 %v2272_v20, %v10819_v7  ;;  %9204 = vmatprep.mubr.msk.f32.mxu0 %vm9772_vm1, %v14677_v10 }
 0x155   : > { %9146 = vmatprep.mubr.msk.f32.mxu1 %vm9772_vm1, %v14677_v10  ;;  %v8869_v25 = vpop.f32.mrf.mxu0 }
 0x156   : > { %v8811_v52 = vpop.f32.mrf.mxu1  ;;  %v3432_v25 = vld [vmem:[%s10065_s30 + $0x4a] sm:$0xff] }
 0x157   : > { %v2277_v57 = vpop.f32.mrf.mxu0  ;;  %9205 = vmatmul.mubr.msk.f32.gmra.mxu0 %vm532_vm0, %v14678_v48  ;;  %v11062_v52 = vld [vmem:[%s10065_s30 + $0xa1] sm:$0xff] }
 0x158   : > { %v11016_v9 = vpop.f32.mrf.mxu1  ;;  %9147 = vmatmul.mubr.msk.f32.gmra.mxu1 %vm532_vm0, %v11014_v22  ;;  %v11023_v7 = vadd.f32 %v2277_v57, %v10834_v6  ;;  %9207 = vmatprep.mubr.msk.f32.mxu0 %vm9772_vm1, %v14677_v10 }
 0x159   : > { %9149 = vmatprep.mubr.msk.f32.mxu1 %vm9772_vm1, %v14677_v10  ;;  %v8872_v2 = vpop.f32.mrf.mxu0 }
 0x15a   : > { %v8814_v35 = vpop.f32.mrf.mxu1 }
 0x15b   : > { %v2282_v42 = vpop.f32.mrf.mxu0  ;;  %9208 = vmatmul.mubr.msk.f32.gmra.mxu0 %vm532_vm0, %v14679_v26  ;;  %v3433_v26 = vld [vmem:[%s10065_s30 + $0x52] sm:$0xff] }
 0x15c   : > { %v11032_v34 = vpop.f32.mrf.mxu1  ;;  %9150 = vmatmul.mubr.msk.f32.gmra.mxu1 %vm532_vm0, %v11030_v12  ;;  %v11039_v6 = vadd.f32 %v2282_v42, %v10849_v27  ;;  %9210 = vmatprep.mubr.msk.f32.mxu0 %vm9772_vm1, %v14677_v10  ;;  %v11078_v42 = vld [vmem:[%s10065_s30 + $0xa9] sm:$0xff] }
 0x15d   : > { %9152 = vmatprep.mubr.msk.f32.mxu1 %vm9772_vm1, %v14677_v10  ;;  %v8875_v41 = vpop.f32.mrf.mxu0  ;;  %14680 = vst [vmem:[#allocation4_spill] sm:$0xff] %v11078_v42 }
 0x15e   : > { %v8817_v62 = vpop.f32.mrf.mxu1 }
 0x15f   : > { %v2287_v20 = vpop.f32.mrf.mxu0  ;;  %9211 = vmatmul.mubr.msk.f32.gmra.mxu0 %vm532_vm0, %v3431_v55 }
 0x160   : > { %v11049_v37 = vpop.f32.mrf.mxu1  ;;  %9153 = vmatmul.mubr.msk.f32.gmra.mxu1 %vm532_vm0, %v11046_v39  ;;  %v11055_v27 = vadd.f32 %v2287_v20, %v10865_v17  ;;  %9213 = vmatprep.mubr.msk.f32.mxu0 %vm9772_vm1, %v14677_v10 }
 0x161   : > { %9155 = vmatprep.mubr.msk.f32.mxu1 %vm9772_vm1, %v14677_v10  ;;  %v8878_v48 = vpop.f32.mrf.mxu0 }
 0x162   : > { %v8820_v57 = vpop.f32.mrf.mxu1  ;;  %v3434_v48 = vld [vmem:[%s10065_s30 + $0x5a] sm:$0xff] }
 0x163   : > { %v2292_v2 = vpop.f32.mrf.mxu0  ;;  %9214 = vmatmul.mubr.msk.f32.gmra.mxu0 %vm532_vm0, %v3432_v25  ;;  %v11095_v57 = vld [vmem:[%s10065_s30 + $0xb1] sm:$0xff] }
 0x164   : > { %v11065_v35 = vpop.f32.mrf.mxu1  ;;  %9156 = vmatmul.mubr.msk.f32.gmra.mxu1 %vm532_vm0, %v11062_v52  ;;  %v11071_v17 = vadd.f32 %v2292_v2, %v10881_v38  ;;  %9216 = vmatprep.mubr.msk.f32.mxu0 %vm9772_vm1, %v14677_v10  ;;  %14681 = vst [vmem:[#allocation5_spill] sm:$0xff] %v11095_v57 }
 0x165   : > { %9158 = vmatprep.mubr.msk.f32.mxu1 %vm9772_vm1, %v14677_v10  ;;  %v8881_v62 = vpop.f32.mrf.mxu0 }
 0x166   : > { %v8823_v55 = vpop.f32.mrf.mxu1 }
 0x167   : > { %v2297_v41 = vpop.f32.mrf.mxu0  ;;  %9217 = vmatmul.mubr.msk.f32.gmra.mxu0 %vm532_vm0, %v3433_v26 }
 0x168   : > { %v2536_v20 = vpop.f32.mrf.mxu1  ;;  %9159 = vmatmul.mubr.msk.f32.gmra.mxu1 %vm532_vm0, %v11078_v42  ;;  %v11085_v38 = vadd.f32 %v2297_v41, %v10897_v24  ;;  %9219 = vmatprep.mubr.msk.f32.mxu0 %vm9772_vm1, %v14677_v10  ;;  %v11112_v41 = vld [vmem:[%s10065_s30 + $0xb9] sm:$0xff] }
 0x169   : > { %v11088_v25 = vadd.f32 %v2536_v20, %v10794_v1  ;;  %9161 = vmatprep.mubr.msk.f32.mxu1 %vm9772_vm1, %v14677_v10  ;;  %v8884_v2 = vpop.f32.mrf.mxu0  ;;  %14682 = vst [vmem:[#allocation6_spill] sm:$0xff] %v11112_v41  ;;  %v3435_v20 = vld [vmem:[%s10065_s30 + $0x62] sm:$0xff] }
 0x16a   : > { %v8921_v55 = vpop.f32.mrf.mxu1 }
 0x16b   : > { %v2302_v26 = vpop.f32.mrf.mxu0  ;;  %9220 = vmatmul.mubr.msk.f32.gmra.mxu0 %vm532_vm0, %v3434_v48 }
 0x16c   : > { %v2541_v62 = vpop.f32.mrf.mxu1  ;;  %9162 = vmatmul.mubr.msk.f32.gmra.mxu1 %vm532_vm0, %v11095_v57  ;;  %v11102_v1 = vadd.f32 %v2302_v26, %v10914_v58  ;;  %9222 = vmatprep.mubr.msk.f32.mxu0 %vm9772_vm1, %v14677_v10  ;;  %v11129_v26 = vld [vmem:[%s10065_s30 + $0xc1] sm:$0xff] }
 0x16d   : > { %v11105_v24 = vadd.f32 %v2541_v62, %v10810_v19  ;;  %9164 = vmatprep.mubr.msk.f32.mxu1 %vm9772_vm1, %v14677_v10  ;;  %v8887_v2 = vpop.f32.mrf.mxu0  ;;  %14683 = vst [vmem:[#allocation7_spill] sm:$0xff] %v11129_v26  ;;  %v3436_v62 = vld [vmem:[%s10065_s30 + $0x6a] sm:$0xff] }
 0x16e   : > { %v8924_v55 = vpop.f32.mrf.mxu1 }
 0x16f   : > { %v2307_v48 = vpop.f32.mrf.mxu0  ;;  %9223 = vmatmul.mubr.msk.f32.gmra.mxu0 %vm532_vm0, %v3435_v20 }
 0x170   : > { %v2546_v57 = vpop.f32.mrf.mxu1  ;;  %9165 = vmatmul.mubr.msk.f32.gmra.mxu1 %vm532_vm0, %v11112_v41  ;;  %v11119_v19 = vadd.f32 %v2307_v48, %v10930_v31  ;;  %9225 = vmatprep.mubr.msk.f32.mxu0 %vm9772_vm1, %v14677_v10  ;;  %v3437_v48 = vld [vmem:[%s10065_s30 + $0x72] sm:$0xff] }
 0x171   : > { %v11122_v58 = vadd.f32 %v2546_v57, %v10825_v45  ;;  %9167 = vmatprep.mubr.msk.f32.mxu1 %vm9772_vm1, %v14677_v10  ;;  %v8890_v2 = vpop.f32.mrf.mxu0  ;;  %v11146_v57 = vld [vmem:[%s10065_s30 + $0xc9] sm:$0xff] }
 0x172   : > { %v8927_v55 = vpop.f32.mrf.mxu1  ;;  %14684 = vst [vmem:[#allocation8_spill] sm:$0xff] %v11146_v57 }
 0x173   : > { %v2312_v20 = vpop.f32.mrf.mxu0  ;;  %9226 = vmatmul.mubr.msk.f32.gmra.mxu0 %vm532_vm0, %v3436_v62 }
 0x174   : > { %v2551_v41 = vpop.f32.mrf.mxu1  ;;  %9168 = vmatmul.mubr.msk.f32.gmra.mxu1 %vm532_vm0, %v11129_v26  ;;  %v11136_v45 = vadd.f32 %v2312_v20, %v10948_v33  ;;  %9228 = vmatprep.mubr.msk.f32.mxu0 %vm9772_vm1, %v14677_v10  ;;  %v3438_v20 = vld [vmem:[%s10065_s30 + $0x7a] sm:$0xff] }
 0x175   : > { %v11139_v31 = vadd.f32 %v2551_v41, %v10840_v47  ;;  %9170 = vmatprep.mubr.msk.f32.mxu1 %vm9772_vm1, %v14677_v10  ;;  %v8893_v2 = vpop.f32.mrf.mxu0  ;;  %v11163_v41 = vld [vmem:[%s10065_s30 + $0xd1] sm:$0xff] }
 0x176   : > { %v8930_v55 = vpop.f32.mrf.mxu1  ;;  %14685 = vst [vmem:[#allocation9_spill] sm:$0xff] %v11163_v41 }
 0x177   : > { %v2317_v62 = vpop.f32.mrf.mxu0  ;;  %9229 = vmatmul.mubr.msk.f32.gmra.mxu0 %vm532_vm0, %v3437_v48 }
 0x178   : > { %v2556_v26 = vpop.f32.mrf.mxu1  ;;  %9171 = vmatmul.mubr.msk.f32.gmra.mxu1 %vm532_vm0, %v11146_v57  ;;  %v11153_v47 = vadd.f32 %v2317_v62, %v10968_v59  ;;  %9231 = vmatprep.mubr.msk.f32.mxu0 %vm9772_vm1, %v14677_v10  ;;  %v3439_v62 = vld [vmem:[%s10065_s30 + $0x82] sm:$0xff] }
 0x179   : > { %v11156_v33 = vadd.f32 %v2556_v26, %v10856_v49  ;;  %9173 = vmatprep.mubr.msk.f32.mxu1 %vm9772_vm1, %v14677_v10  ;;  %v8896_v2 = vpop.f32.mrf.mxu0  ;;  %v11180_v26 = vld [vmem:[%s10065_s30 + $0xd9] sm:$0xff] }
 0x17a   : > { %v8933_v55 = vpop.f32.mrf.mxu1  ;;  %14686 = vst [vmem:[#allocation10_spill] sm:$0xff] %v11180_v26 }
 0x17b   : > { %v2322_v48 = vpop.f32.mrf.mxu0  ;;  %9232 = vmatmul.mubr.msk.f32.gmra.mxu0 %vm532_vm0, %v3438_v20 }
 0x17c   : > { %v2561_v57 = vpop.f32.mrf.mxu1  ;;  %9174 = vmatmul.mubr.msk.f32.gmra.mxu1 %vm532_vm0, %v11163_v41  ;;  %v11170_v49 = vadd.f32 %v2322_v48, %v10984_v61  ;;  %9234 = vmatprep.mubr.msk.f32.mxu0 %vm9772_vm1, %v14677_v10  ;;  %v3440_v48 = vld [vmem:[%s10065_s30 + $0x8a] sm:$0xff] }
 0x17d   : > { %v11173_v59 = vadd.f32 %v2561_v57, %v10872_v51  ;;  %9176 = vmatprep.mubr.msk.f32.mxu1 %vm9772_vm1, %v14677_v10  ;;  %v8899_v2 = vpop.f32.mrf.mxu0  ;;  %v11197_v57 = vld [vmem:[%s10065_s30 + $0xe1] sm:$0xff] }
 0x17e   : > { %v8936_v55 = vpop.f32.mrf.mxu1  ;;  %14687 = vst [vmem:[#allocation11_spill] sm:$0xff] %v11197_v57 }
 0x17f   : > { %v2327_v20 = vpop.f32.mrf.mxu0  ;;  %9235 = vmatmul.mubr.msk.f32.gmra.mxu0 %vm532_vm0, %v3439_v62 }
 0x180   : > { %v2566_v41 = vpop.f32.mrf.mxu1  ;;  %9177 = vmatmul.mubr.msk.f32.gmra.mxu1 %vm532_vm0, %v11180_v26  ;;  %v11187_v51 = vadd.f32 %v2327_v20, %v11000_v60  ;;  %9237 = vmatprep.mubr.msk.f32.mxu0 %vm9772_vm1, %v14677_v10  ;;  %v3441_v20 = vld [vmem:[%s10065_s30 + $0x92] sm:$0xff] }
 0x181   : > { %v11190_v61 = vadd.f32 %v2566_v41, %v10888_v53  ;;  %9179 = vmatprep.mubr.msk.f32.mxu1 %vm9772_vm1, %v14677_v10  ;;  %v8902_v2 = vpop.f32.mrf.mxu0  ;;  %v11214_v41 = vld [vmem:[%s10065_s30 + $0xe9] sm:$0xff] }
 0x182   : > { %v8939_v55 = vpop.f32.mrf.mxu1  ;;  %14688 = vst [vmem:[#allocation12_spill] sm:$0xff] %v11214_v41 }
 0x183   : > { %v2332_v62 = vpop.f32.mrf.mxu0  ;;  %9238 = vmatmul.mubr.msk.f32.gmra.mxu0 %vm532_vm0, %v3440_v48 }
 0x184   : > { %v2571_v26 = vpop.f32.mrf.mxu1  ;;  %9180 = vmatmul.mubr.msk.f32.gmra.mxu1 %vm532_vm0, %v11197_v57  ;;  %v11204_v53 = vadd.f32 %v2332_v62, %v11016_v9  ;;  %9240 = vmatprep.mubr.msk.f32.mxu0 %vm9772_vm1, %v14677_v10  ;;  %v3442_v62 = vld [vmem:[%s10065_s30 + $0x9a] sm:$0xff] }
 0x185   : > { %v11207_v60 = vadd.f32 %v2571_v26, %v10904_v4  ;;  %9182 = vmatprep.mubr.msk.f32.mxu1 %vm9772_vm1, %v14677_v10  ;;  %v8905_v2 = vpop.f32.mrf.mxu0  ;;  %v11231_v26 = vld [vmem:[%s10065_s30 + $0xf1] sm:$0xff] }
 0x186   : > { %v8942_v55 = vpop.f32.mrf.mxu1  ;;  %14689 = vst [vmem:[#allocation13_spill] sm:$0xff] %v11231_v26 }
 0x187   : > { %v2337_v48 = vpop.f32.mrf.mxu0  ;;  %9241 = vmatmul.mubr.msk.f32.gmra.mxu0 %vm532_vm0, %v3441_v20 }
 0x188   : > { %v2576_v57 = vpop.f32.mrf.mxu1  ;;  %9183 = vmatmul.mubr.msk.f32.gmra.mxu1 %vm532_vm0, %v11214_v41  ;;  %v11221_v4 = vadd.f32 %v2337_v48, %v11032_v34  ;;  %9243 = vmatprep.mubr.msk.f32.mxu0 %vm9772_vm1, %v14677_v10  ;;  %v3783_v48 = vld [vmem:[%s10065_s30 + $0x20] sm:$0xff] }
 0x189   : > { %v11224_v9 = vadd.f32 %v2576_v57, %v10920_v3  ;;  %9185 = vmatprep.mubr.msk.f32.mxu1 %vm9772_vm1, %v14677_v10  ;;  %v8908_v2 = vpop.f32.mrf.mxu0  ;;  %v3443_v57 = vld [vmem:[%s10065_s30 + $0xa2] sm:$0xff] }
 0x18a   : > { %v8945_v55 = vpop.f32.mrf.mxu1 }
 0x18b   : > { %v2342_v20 = vpop.f32.mrf.mxu0  ;;  %9244 = vmatmul.mubr.msk.f32.gmra.mxu0 %vm532_vm0, %v3442_v62 }
 0x18c   : > { %v2581_v41 = vpop.f32.mrf.mxu1  ;;  %9186 = vmatmul.mubr.msk.f32.gmra.mxu1 %vm532_vm0, %v11231_v26  ;;  %v11238_v3 = vadd.f32 %v2342_v20, %v11049_v37  ;;  %9246 = vmatprep.mubr.msk.f32.mxu0 %vm9772_vm1, %v14677_v10  ;;  %v8040_v37 = vld [vmem:[%s14509_s5 + $0x88] sm:$0xff] }
 0x18d   : > { %v11241_v34 = vadd.f32 %v2581_v41, %v10936_v16  ;;  %9283 = vmatprep.mubr.msk.f32.mxu1 %vm9772_vm1, %v14677_v10  ;;  %v8911_v2 = vpop.f32.mrf.mxu0  ;;  %v8039_v16 = vld [vmem:[%s14509_s5 + $0x80] sm:$0xff] }
 0x18e   : > { %v8948_v55 = vpop.f32.mrf.mxu1 }
 0x18f   : > { %v2347_v62 = vpop.f32.mrf.mxu0  ;;  %9247 = vmatmul.mubr.msk.f32.gmra.mxu0 %vm532_vm0, %v3443_v57  ;;  %v3444_v55 = vld [vmem:[%s10065_s30 + $0xaa] sm:$0xff] }
 0x190   : > { %v2586_v20 = vpop.f32.mrf.mxu1  ;;  %9284 = vmatmul.mubr.msk.f32.vlgmr.msra.gmra.mxu1 %vm532_vm0, %v3783_v48  ;;  %v11258_v41 = vadd.f32 %v2347_v62, %v11065_v35  ;;  %9249 = vmatprep.mubr.msk.f32.mxu0 %vm9772_vm1, %v14677_v10  ;;  %v3784_v57 = vld [vmem:[%s10065_s30 + $0x28] sm:$0xff] }
 0x191   : > { %v11261_v2 = vadd.f32 %v2586_v20, %v10955_v28  ;;  %9462 = vmatpush3.msra.mxu1 %v8040_v37  ;;  %v8914_v26 = vpop.f32.mrf.mxu0  ;;  %9286 = vmatprep.mubr.msk.f32.mxu1 %vm9772_vm1, %v14677_v10  ;;  %v3785_v20 = vld [vmem:[%s10065_s30 + $0x30] sm:$0xff] }
 0x192   : > { %v8951_v48 = vpop.f32.mrf.mxu1  ;;  %9463 = vmatprep.subr.mxu1 %v14677_v10  ;;  %v3445_v26 = vld [vmem:[%s10065_s30 + $0xb2] sm:$0xff] }
 0x193   : > { %9464 = vmatpush3.msra.mxu1 %v8039_v16  ;;  %v2894_v62 = vpop.f32.mrf.mxu0  ;;  %9250 = vmatmul.mubr.msk.f32.gmra.mxu0 %vm532_vm0, %v3444_v55 }
 0x194   : > { %v2591_v35 = vpop.f32.mrf.mxu1  ;;  %9287 = vmatmul.mubr.msk.f32.gmra.mxu1 %vm532_vm0, %v3784_v57  ;;  %v11276_v37 = vadd.f32 %v2894_v62, %v11088_v25  ;;  %9252 = vmatprep.mubr.msk.f32.mxu0 %vm9772_vm1, %v14677_v10  ;;  %v3786_v57 = vld [vmem:[%s10065_s30 + $0x38] sm:$0xff] }
 0x195   : > { %v11273_v28 = vadd.f32 %v2591_v35, %v10975_v32  ;;  %9289 = vmatprep.mubr.msk.f32.mxu1 %vm9772_vm1, %v14677_v10  ;;  %v9012_v48 = vpop.f32.mrf.mxu0 }
 0x196   : > { %v8954_v16 = vpop.f32.mrf.mxu1 }
 0x197   : > { %v2899_v42 = vpop.f32.mrf.mxu0  ;;  %9253 = vmatmul.mubr.msk.f32.gmra.mxu0 %vm532_vm0, %v3445_v26 }
 0x198   : > { %v2596_v55 = vpop.f32.mrf.mxu1  ;;  %9290 = vmatmul.mubr.msk.f32.gmra.mxu1 %vm532_vm0, %v3785_v20  ;;  %v11290_v25 = vadd.f32 %v2899_v42, %v11105_v24  ;;  %9255 = vmatprep.mubr.msk.f32.mxu0 %vm9772_vm1, %v14677_v10  ;;  %v3787_v24 = vld [vmem:[%s10065_s30 + $0x40] sm:$0xff] }
 0x199   : > { %v11287_v32 = vadd.f32 %v2596_v55, %v10991_v44  ;;  %9292 = vmatprep.mubr.msk.f32.mxu1 %vm9772_vm1, %v14677_v10  ;;  %v9015_v62 = vpop.f32.mrf.mxu0 }
 0x19a   : > { %v8957_v35 = vpop.f32.mrf.mxu1 }
 0x19b   : > { %v2904_v26 = vpop.f32.mrf.mxu0  ;;  %9256 = vmatmul.mubr.msk.f32.gmra.mxu0 %vm532_vm0, %v10659_v40 }
 0x19c   : > { %v2601_v16 = vpop.f32.mrf.mxu1  ;;  %9293 = vmatmul.mubr.msk.f32.gmra.mxu1 %vm532_vm0, %v3786_v57  ;;  %v11304_v42 = vadd.f32 %v2904_v26, %v11122_v58  ;;  %9258 = vmatprep.mubr.msk.f32.mxu0 %vm9772_vm1, %v14677_v10  ;;  %v3788_v57 = vld [vmem:[%s10065_s30 + $0x48] sm:$0xff]  ;;  %v3789_v26 = vld [vmem:[%s10065_s30 + $0x50] sm:$0xff] }
 0x19d   : > { %v11301_v44 = vadd.f32 %v2601_v16, %v11007_v46  ;;  %9295 = vmatprep.mubr.msk.f32.mxu1 %vm9772_vm1, %v14677_v10  ;;  %v9018_v48 = vpop.f32.mrf.mxu0 }
 0x19e   : > { %v8960_v20 = vpop.f32.mrf.mxu1 }
 0x19f   : > { %v2909_v40 = vpop.f32.mrf.mxu0  ;;  %9259 = vmatmul.mubr.msk.f32.gmra.mxu0 %vm532_vm0, %v10681_v50 }
 0x1a0   : > { %v2606_v55 = vpop.f32.mrf.mxu1  ;;  %9296 = vmatmul.mubr.msk.f32.gmra.mxu1 %vm532_vm0, %v3787_v24  ;;  %v11318_v58 = vadd.f32 %v2909_v40, %v11139_v31  ;;  %9261 = vmatprep.mubr.msk.f32.mxu0 %vm9772_vm1, %v14677_v10 }
 0x1a1   : > { %v11315_v46 = vadd.f32 %v2606_v55, %v11023_v7  ;;  %9298 = vmatprep.mubr.msk.f32.mxu1 %vm9772_vm1, %v14677_v10  ;;  %v9021_v62 = vpop.f32.mrf.mxu0  ;;  %v3790_v55 = vld [vmem:[%s10065_s30 + $0x58] sm:$0xff] }
 0x1a2   : > { %v8963_v35 = vpop.f32.mrf.mxu1  ;;  %v3791_v62 = vld [vmem:[%s10065_s30 + $0x60] sm:$0xff] }
 0x1a3   : > { %v2914_v50 = vpop.f32.mrf.mxu0  ;;  %9262 = vmatmul.mubr.msk.f32.gmra.mxu0 %vm532_vm0, %v10703_v63 }
 0x1a4   : > { %v2611_v16 = vpop.f32.mrf.mxu1  ;;  %9299 = vmatmul.mubr.msk.f32.gmra.mxu1 %vm532_vm0, %v3788_v57  ;;  %v11332_v31 = vadd.f32 %v2914_v50, %v11156_v33  ;;  %9264 = vmatprep.mubr.msk.f32.mxu0 %vm9772_vm1, %v14677_v10 }
 0x1a5   : > { %v11329_v7 = vadd.f32 %v2611_v16, %v11039_v6  ;;  %9301 = vmatprep.mubr.msk.f32.mxu1 %vm9772_vm1, %v14677_v10  ;;  %v9024_v20 = vpop.f32.mrf.mxu0 }
 0x1a6   : > { %v8966_v24 = vpop.f32.mrf.mxu1  ;;  %v3792_v20 = vld [vmem:[%s10065_s30 + $0x68] sm:$0xff] }
 0x1a7   : > { %v2919_v63 = vpop.f32.mrf.mxu0  ;;  %9265 = vmatmul.mubr.msk.f32.gmra.mxu0 %vm532_vm0, %v10722_v54  ;;  %v11381_v24 = vld [vmem:[%s10065_s30 + $0xea] sm:$0xff] }
 0x1a8   : > { %v2616_v48 = vpop.f32.mrf.mxu1  ;;  %9302 = vmatmul.mubr.msk.f32.gmra.mxu1 %vm532_vm0, %v3789_v26  ;;  %v11346_v33 = vadd.f32 %v2919_v63, %v11173_v59  ;;  %9267 = vmatprep.mubr.msk.f32.mxu0 %vm9772_vm1, %v14677_v10 }
 0x1a9   : > { %v11343_v6 = vadd.f32 %v2616_v48, %v11055_v27  ;;  %9304 = vmatprep.mubr.msk.f32.mxu1 %vm9772_vm1, %v14677_v10  ;;  %v9027_v57 = vpop.f32.mrf.mxu0 }
 0x1aa   : > { %v8969_v40 = vpop.f32.mrf.mxu1  ;;  %v3793_v57 = vld [vmem:[%s10065_s30 + $0x70] sm:$0xff] }
 0x1ab   : > { %v2924_v54 = vpop.f32.mrf.mxu0  ;;  %9268 = vmatmul.mubr.msk.f32.gmra.mxu0 %vm532_vm0, %v10741_v0  ;;  %v11398_v40 = vld [vmem:[%s10065_s30 + $0xf2] sm:$0xff] }
 0x1ac   : > { %v2621_v35 = vpop.f32.mrf.mxu1  ;;  %9305 = vmatmul.mubr.msk.f32.gmra.mxu1 %vm532_vm0, %v3790_v55  ;;  %v11360_v59 = vadd.f32 %v2924_v54, %v11190_v61  ;;  %9270 = vmatprep.mubr.msk.f32.mxu0 %vm9772_vm1, %v14677_v10 }
 0x1ad   : > { %v11357_v27 = vadd.f32 %v2621_v35, %v11071_v17  ;;  %9307 = vmatprep.mubr.msk.f32.mxu1 %vm9772_vm1, %v14677_v10  ;;  %v9030_v50 = vpop.f32.mrf.mxu0 }
 0x1ae   : > { %v8972_v16 = vpop.f32.mrf.mxu1  ;;  %v3794_v50 = vld [vmem:[%s10065_s30 + $0x78] sm:$0xff] }
 0x1af   : > { %v2929_v26 = vpop.f32.mrf.mxu0  ;;  %9271 = vmatmul.mubr.msk.f32.gmra.mxu0 %vm532_vm0, %v10756_v30 }
 0x1b0   : > { %v2626_v0 = vpop.f32.mrf.mxu1  ;;  %9308 = vmatmul.mubr.msk.f32.gmra.mxu1 %vm532_vm0, %v3791_v62  ;;  %v11374_v61 = vadd.f32 %v2929_v26, %v11207_v60  ;;  %9273 = vmatprep.mubr.msk.f32.mxu0 %vm9772_vm1, %v14677_v10 }
 0x1b1   : > { %v11371_v17 = vadd.f32 %v2626_v0, %v11085_v38  ;;  %9310 = vmatprep.mubr.msk.f32.mxu1 %vm9772_vm1, %v14677_v10  ;;  %v9033_v48 = vpop.f32.mrf.mxu0 }
 0x1b2   : > { %v8975_v30 = vpop.f32.mrf.mxu1  ;;  %v3795_v48 = vld [vmem:[%s10065_s30 + $0x80] sm:$0xff] }
 0x1b3   : > { %v2934_v55 = vpop.f32.mrf.mxu0  ;;  %9274 = vmatmul.mubr.msk.f32.gmra.mxu0 %vm532_vm0, %v11381_v24 }
 0x1b4   : > { %v2631_v63 = vpop.f32.mrf.mxu1  ;;  %9311 = vmatmul.mubr.msk.f32.gmra.mxu1 %vm532_vm0, %v3792_v20  ;;  %v11391_v60 = vadd.f32 %v2934_v55, %v11224_v9  ;;  %9276 = vmatprep.mubr.msk.f32.mxu0 %vm9772_vm1, %v14677_v10 }
 0x1b5   : > { %v11388_v38 = vadd.f32 %v2631_v63, %v11102_v1  ;;  %9313 = vmatprep.mubr.msk.f32.mxu1 %vm9772_vm1, %v14677_v10  ;;  %v9036_v54 = vpop.f32.mrf.mxu0 }
 0x1b6   : > { %v8978_v35 = vpop.f32.mrf.mxu1 }
 0x1b7   : > { %v2939_v16 = vpop.f32.mrf.mxu0  ;;  %9277 = vmatmul.mubr.msk.f32.gmra.mxu0 %vm532_vm0, %v11398_v40 }
 0x1b8   : > { %v2636_v62 = vpop.f32.mrf.mxu1  ;;  %9314 = vmatmul.mubr.msk.f32.gmra.mxu1 %vm532_vm0, %v3793_v57  ;;  %v11408_v9 = vadd.f32 %v2939_v16, %v11241_v34  ;;  %9374 = vmatprep.mubr.msk.f32.mxu0 %vm9772_vm1, %v14677_v10 }
 0x1b9   : > { %v11405_v1 = vadd.f32 %v2636_v62, %v11119_v19  ;;  %9316 = vmatprep.mubr.msk.f32.mxu1 %vm9772_vm1, %v14677_v10  ;;  %v9039_v26 = vpop.f32.mrf.mxu0 }
 0x1ba   : > { %v8981_v0 = vpop.f32.mrf.mxu1 }
 0x1bb   : > { %v2944_v30 = vpop.f32.mrf.mxu0  ;;  %9375 = vmatmul.mubr.msk.f32.vlgmr.msra.gmra.mxu0 %vm532_vm0, %v10801_v23 }
 0x1bc   : > { %v2641_v20 = vpop.f32.mrf.mxu1  ;;  %9317 = vmatmul.mubr.msk.f32.gmra.mxu1 %vm532_vm0, %v3794_v50  ;;  %v11422_v34 = vadd.f32 %v2944_v30, %v11261_v2  ;;  %9377 = vmatprep.mubr.msk.f32.mxu0 %vm9772_vm1, %v14677_v10  ;;  %v3796_v2 = vld [vmem:[%s10065_s30 + $0x88] sm:$0xff] }
 0x1bd   : > { %v11419_v19 = vadd.f32 %v2641_v20, %v11136_v45  ;;  %9319 = vmatprep.mubr.msk.f32.mxu1 %vm9772_vm1, %v14677_v10  ;;  %v9042_v55 = vpop.f32.mrf.mxu0 }
 0x1be   : > { %v8984_v63 = vpop.f32.mrf.mxu1 }
 0x1bf   : > { %v2949_v35 = vpop.f32.mrf.mxu0  ;;  %9378 = vmatmul.mubr.msk.f32.gmra.mxu0 %vm532_vm0, %v10817_v18 }
 0x1c0   : > { %v2646_v57 = vpop.f32.mrf.mxu1  ;;  %9320 = vmatmul.mubr.msk.f32.gmra.mxu1 %vm532_vm0, %v3795_v48  ;;  %v11436_v45 = vadd.f32 %v2949_v35, %v11273_v28  ;;  %9380 = vmatprep.mubr.msk.f32.mxu0 %vm9772_vm1, %v14677_v10  ;;  %v3797_v28 = vld [vmem:[%s10065_s30 + $0x90] sm:$0xff] }
 0x1c1   : > { %v11433_v23 = vadd.f32 %v2646_v57, %v11153_v47  ;;  %9322 = vmatprep.mubr.msk.f32.mxu1 %vm9772_vm1, %v14677_v10  ;;  %v9045_v62 = vpop.f32.mrf.mxu0 }
 0x1c2   : > { %v8987_v54 = vpop.f32.mrf.mxu1 }
 0x1c3   : > { %v2954_v50 = vpop.f32.mrf.mxu0  ;;  %9381 = vmatmul.mubr.msk.f32.gmra.mxu0 %vm532_vm0, %v10832_v15 }
 0x1c4   : > { %v2651_v16 = vpop.f32.mrf.mxu1  ;;  %9323 = vmatmul.mubr.msk.f32.gmra.mxu1 %vm532_vm0, %v3796_v2  ;;  %v11450_v47 = vadd.f32 %v2954_v50, %v11287_v32  ;;  %9383 = vmatprep.mubr.msk.f32.mxu0 %vm9772_vm1, %v14677_v10  ;;  %v3798_v32 = vld [vmem:[%s10065_s30 + $0x98] sm:$0xff] }
 0x1c5   : > { %v11447_v18 = vadd.f32 %v2651_v16, %v11170_v49  ;;  %9325 = vmatprep.mubr.msk.f32.mxu1 %vm9772_vm1, %v14677_v10  ;;  %v9048_v26 = vpop.f32.mrf.mxu0 }
 0x1c6   : > { %v8990_v0 = vpop.f32.mrf.mxu1 }
 0x1c7   : > { %v2959_v30 = vpop.f32.mrf.mxu0  ;;  %9384 = vmatmul.mubr.msk.f32.gmra.mxu0 %vm532_vm0, %v10847_v5 }
 0x1c8   : > { %v2656_v20 = vpop.f32.mrf.mxu1  ;;  %9326 = vmatmul.mubr.msk.f32.gmra.mxu1 %vm532_vm0, %v3797_v28  ;;  %v11464_v49 = vadd.f32 %v2959_v30, %v11301_v44  ;;  %9386 = vmatprep.mubr.msk.f32.mxu0 %vm9772_vm1, %v14677_v10  ;;  %v3799_v44 = vld [vmem:[%s10065_s30 + $0xa0] sm:$0xff] }
 0x1c9   : > { %v11461_v15 = vadd.f32 %v2656_v20, %v11187_v51  ;;  %9328 = vmatprep.mubr.msk.f32.mxu1 %vm9772_vm1, %v14677_v10  ;;  %v9051_v63 = vpop.f32.mrf.mxu0 }
 0x1ca   : > { %v8993_v48 = vpop.f32.mrf.mxu1 }
 0x1cb   : > { %v2964_v57 = vpop.f32.mrf.mxu0  ;;  %9387 = vmatmul.mubr.msk.f32.gmra.mxu0 %vm532_vm0, %v10863_v14 }
 0x1cc   : > { %v2661_v55 = vpop.f32.mrf.mxu1  ;;  %9329 = vmatmul.mubr.msk.f32.gmra.mxu1 %vm532_vm0, %v3798_v32  ;;  %v11478_v51 = vadd.f32 %v2964_v57, %v11315_v46  ;;  %9389 = vmatprep.mubr.msk.f32.mxu0 %vm9772_vm1, %v14677_v10  ;;  %v3800_v46 = vld [vmem:[%s10065_s30 + $0xa8] sm:$0xff] }
 0x1cd   : > { %v11475_v5 = vadd.f32 %v2661_v55, %v11204_v53  ;;  %9331 = vmatprep.mubr.msk.f32.mxu1 %vm9772_vm1, %v14677_v10  ;;  %v9054_v2 = vpop.f32.mrf.mxu0 }
 0x1ce   : > { %v8996_v35 = vpop.f32.mrf.mxu1 }
 0x1cf   : > { %v2969_v62 = vpop.f32.mrf.mxu0  ;;  %9390 = vmatmul.mubr.msk.f32.gmra.mxu0 %vm532_vm0, %v10879_v11 }
 0x1d0   : > { %v2666_v54 = vpop.f32.mrf.mxu1  ;;  %9332 = vmatmul.mubr.msk.f32.gmra.mxu1 %vm532_vm0, %v3799_v44  ;;  %v11492_v53 = vadd.f32 %v2969_v62, %v11329_v7  ;;  %9392 = vmatprep.mubr.msk.f32.mxu0 %vm9772_vm1, %v14677_v10  ;;  %v3801_v7 = vld [vmem:[%s10065_s30 + $0xb0] sm:$0xff] }
 0x1d1   : > { %v11489_v14 = vadd.f32 %v2666_v54, %v11221_v4  ;;  %9334 = vmatprep.mubr.msk.f32.mxu1 %vm9772_vm1, %v14677_v10  ;;  %v9057_v50 = vpop.f32.mrf.mxu0 }
 0x1d2   : > { %v8999_v16 = vpop.f32.mrf.mxu1 }
 0x1d3   : > { %v2974_v0 = vpop.f32.mrf.mxu0  ;;  %9393 = vmatmul.mubr.msk.f32.gmra.mxu0 %vm532_vm0, %v10895_v21 }
 0x1d4   : > { %v2671_v28 = vpop.f32.mrf.mxu1  ;;  %9335 = vmatmul.mubr.msk.f32.gmra.mxu1 %vm532_vm0, %v3800_v46  ;;  %v11506_v4 = vadd.f32 %v2974_v0, %v11343_v6  ;;  %9395 = vmatprep.mubr.msk.f32.mxu0 %vm9772_vm1, %v14677_v10  ;;  %v3802_v6 = vld [vmem:[%s10065_s30 + $0xb8] sm:$0xff] }
 0x1d5   : > { %v11503_v11 = vadd.f32 %v2671_v28, %v11238_v3  ;;  %9337 = vmatprep.mubr.msk.f32.mxu1 %vm9772_vm1, %v14677_v10  ;;  %v9060_v20 = vpop.f32.mrf.mxu0 }
 0x1d6   : > { %v9002_v26 = vpop.f32.mrf.mxu1 }
 0x1d7   : > { %v2979_v32 = vpop.f32.mrf.mxu0  ;;  %9396 = vmatmul.mubr.msk.f32.gmra.mxu0 %vm532_vm0, %v10912_v29 }
 0x1d8   : > { %v2676_v30 = vpop.f32.mrf.mxu1  ;;  %9338 = vmatmul.mubr.msk.f32.gmra.mxu1 %vm532_vm0, %v3801_v7  ;;  %v11520_v3 = vadd.f32 %v2979_v32, %v11357_v27  ;;  %9398 = vmatprep.mubr.msk.f32.mxu0 %vm9772_vm1, %v14677_v10  ;;  %v3803_v27 = vld [vmem:[%s10065_s30 + $0xc0] sm:$0xff] }
 0x1d9   : > { %v11517_v21 = vadd.f32 %v2676_v30, %v11258_v41  ;;  %9340 = vmatprep.mubr.msk.f32.mxu1 %vm9772_vm1, %v14677_v10  ;;  %v9063_v63 = vpop.f32.mrf.mxu0 }
 0x1da   : > { %v9005_v48 = vpop.f32.mrf.mxu1 }
 0x1db   : > { %v2984_v55 = vpop.f32.mrf.mxu0  ;;  %9399 = vmatmul.mubr.msk.f32.gmra.mxu0 %vm532_vm0, %v10928_v43 }
 0x1dc   : > { %v3252_v57 = vpop.f32.mrf.mxu1  ;;  %9341 = vmatmul.mubr.msk.f32.gmra.mxu1 %vm532_vm0, %v3802_v6  ;;  %v11531_v29 = vadd.f32 %v2984_v55, %v11371_v17  ;;  %9401 = vmatprep.mubr.msk.f32.mxu0 %vm9772_vm1, %v14677_v10  ;;  %v3804_v17 = vld [vmem:[%s10065_s30 + $0xc8] sm:$0xff] }
 0x1dd   : > { %v11534_v41 = vadd.f32 %v3252_v57, %v11276_v37  ;;  %9343 = vmatprep.mubr.msk.f32.mxu1 %vm9772_vm1, %v14677_v10  ;;  %v9066_v44 = vpop.f32.mrf.mxu0 }
 0x1de   : > { %v9103_v35 = vpop.f32.mrf.mxu1 }
 0x1df   : > { %v2989_v2 = vpop.f32.mrf.mxu0  ;;  %9402 = vmatmul.mubr.msk.f32.gmra.mxu0 %vm532_vm0, %v10943_v8 }
 0x1e0   : > { %v3257_v54 = vpop.f32.mrf.mxu1  ;;  %9344 = vmatmul.mubr.msk.f32.gmra.mxu1 %vm532_vm0, %v3803_v27  ;;  %v11545_v43 = vadd.f32 %v2989_v2, %v11388_v38  ;;  %9404 = vmatprep.mubr.msk.f32.mxu0 %vm9772_vm1, %v14677_v10  ;;  %v3805_v38 = vld [vmem:[%s10065_s30 + $0xd0] sm:$0xff] }
 0x1e1   : > { %v11548_v37 = vadd.f32 %v3257_v54, %v11290_v25  ;;  %9346 = vmatprep.mubr.msk.f32.mxu1 %vm9772_vm1, %v14677_v10  ;;  %v9069_v62 = vpop.f32.mrf.mxu0 }
 0x1e2   : > { %v9106_v46 = vpop.f32.mrf.mxu1 }
 0x1e3   : > { %v2994_v16 = vpop.f32.mrf.mxu0  ;;  %9405 = vmatmul.mubr.msk.f32.gmra.mxu0 %vm532_vm0, %v10962_v13 }
 0x1e4   : > { %v3262_v50 = vpop.f32.mrf.mxu1  ;;  %9347 = vmatmul.mubr.msk.f32.gmra.mxu1 %vm532_vm0, %v3804_v17  ;;  %v11559_v8 = vadd.f32 %v2994_v16, %v11405_v1  ;;  %9407 = vmatprep.mubr.msk.f32.mxu0 %vm9772_vm1, %v14677_v10  ;;  %v3806_v1 = vld [vmem:[%s10065_s30 + $0xd8] sm:$0xff] }
 0x1e5   : > { %v11562_v25 = vadd.f32 %v3262_v50, %v11304_v42  ;;  %9349 = vmatprep.mubr.msk.f32.mxu1 %vm9772_vm1, %v14677_v10  ;;  %v9072_v28 = vpop.f32.mrf.mxu0 }
 0x1e6   : > { %v9109_v0 = vpop.f32.mrf.mxu1 }
 0x1e7   : > { %v2999_v7 = vpop.f32.mrf.mxu0  ;;  %9408 = vmatmul.mubr.msk.f32.gmra.mxu0 %vm532_vm0, %v10982_v36 }
 0x1e8   : > { %v3267_v26 = vpop.f32.mrf.mxu1  ;;  %9350 = vmatmul.mubr.msk.f32.gmra.mxu1 %vm532_vm0, %v3805_v38  ;;  %v11573_v13 = vadd.f32 %v2999_v7, %v11419_v19  ;;  %9410 = vmatprep.mubr.msk.f32.mxu0 %vm9772_vm1, %v14677_v10  ;;  %v3807_v19 = vld [vmem:[%s10065_s30 + $0xe0] sm:$0xff] }
 0x1e9   : > { %v11576_v42 = vadd.f32 %v3267_v26, %v11318_v58  ;;  %9352 = vmatprep.mubr.msk.f32.mxu1 %vm9772_vm1, %v14677_v10  ;;  %v9075_v20 = vpop.f32.mrf.mxu0 }
 0x1ea   : > { %v9112_v30 = vpop.f32.mrf.mxu1  ;;  %v4499_v20 = vld [vmem:[%s10065_s30 + $0x22] sm:$0xff] }
 0x1eb   : > { %v3004_v32 = vpop.f32.mrf.mxu0  ;;  %9411 = vmatmul.mubr.msk.f32.gmra.mxu0 %vm532_vm0, %v10998_v56 }
 0x1ec   : > { %v3272_v6 = vpop.f32.mrf.mxu1  ;;  %9353 = vmatmul.mubr.msk.f32.gmra.mxu1 %vm532_vm0, %v3806_v1  ;;  %v11587_v36 = vadd.f32 %v3004_v32, %v11433_v23  ;;  %9413 = vmatprep.mubr.msk.f32.mxu0 %vm9772_vm1, %v14677_v10  ;;  %v3808_v23 = vld [vmem:[%s10065_s30 + $0xe8] sm:$0xff] }
 0x1ed   : > { %v11590_v58 = vadd.f32 %v3272_v6, %v11332_v31  ;;  %9355 = vmatprep.mubr.msk.f32.mxu1 %vm9772_vm1, %v14677_v10  ;;  %v9078_v48 = vpop.f32.mrf.mxu0 }
 0x1ee   : > { %v9115_v63 = vpop.f32.mrf.mxu1  ;;  %v14691_v48 = vld [vmem:[#allocation5_spill] sm:$0xff] }
 0x1ef   : > { %v3009_v55 = vpop.f32.mrf.mxu0  ;;  %9414 = vmatmul.mubr.msk.f32.gmra.mxu0 %vm532_vm0, %v11014_v22  ;;  %v4500_v63 = vld [vmem:[%s10065_s30 + $0x2a] sm:$0xff] }
 0x1f0   : > { %v3277_v57 = vpop.f32.mrf.mxu1  ;;  %9356 = vmatmul.mubr.msk.f32.gmra.mxu1 %vm532_vm0, %v3807_v19  ;;  %v11601_v56 = vadd.f32 %v3009_v55, %v11447_v18  ;;  %9416 = vmatprep.mubr.msk.f32.mxu0 %vm9772_vm1, %v14677_v10  ;;  %v3809_v18 = vld [vmem:[%s10065_s30 + $0xf0] sm:$0xff] }
 0x1f1   : > { %v11604_v31 = vadd.f32 %v3277_v57, %v11346_v33  ;;  %9358 = vmatprep.mubr.msk.f32.mxu1 %vm9772_vm1, %v14677_v10  ;;  %v9081_v27 = vpop.f32.mrf.mxu0 }
 0x1f2   : > { %v9118_v44 = vpop.f32.mrf.mxu1 }
 0x1f3   : > { %v3014_v35 = vpop.f32.mrf.mxu0  ;;  %9417 = vmatmul.mubr.msk.f32.gmra.mxu0 %vm532_vm0, %v11030_v12  ;;  %v14692_v44 = vld [vmem:[#allocation6_spill] sm:$0xff] }
 0x1f4   : > { %v3282_v2 = vpop.f32.mrf.mxu1  ;;  %9359 = vmatmul.mubr.msk.f32.gmra.mxu1 %vm532_vm0, %v3808_v23  ;;  %v11615_v22 = vadd.f32 %v3014_v35, %v11461_v15  ;;  %9419 = vmatprep.mubr.msk.f32.mxu0 %vm9772_vm1, %v14677_v10  ;;  %v3810_v15 = vld [vmem:[%s10065_s30 + $0xf8] sm:$0xff] }
 0x1f5   : > { %v11618_v33 = vadd.f32 %v3282_v2, %v11360_v59  ;;  %9361 = vmatprep.mubr.msk.f32.mxu1 %vm9772_vm1, %v14677_v10  ;;  %v9084_v54 = vpop.f32.mrf.mxu0  ;;  %v4501_v35 = vld [vmem:[%s10065_s30 + $0x32] sm:$0xff] }
 0x1f6   : > { %v9121_v17 = vpop.f32.mrf.mxu1 }
 0x1f7   : > { %v3019_v62 = vpop.f32.mrf.mxu0  ;;  %9420 = vmatmul.mubr.msk.f32.gmra.mxu0 %vm532_vm0, %v11046_v39 }
 0x1f8   : > { %v3287_v46 = vpop.f32.mrf.mxu1  ;;  %9362 = vmatmul.mubr.msk.f32.gmra.mxu1 %vm532_vm0, %v3809_v18  ;;  %v11629_v12 = vadd.f32 %v3019_v62, %v11475_v5  ;;  %9422 = vmatprep.mubr.msk.f32.mxu0 %vm9772_vm1, %v14677_v10  ;;  %v3811_v5 = vld [vmem:[%s10065_s30 + $0x100] sm:$0xff]  ;;  %v14693_v62 = vld [vmem:[#allocation7_spill] sm:$0xff] }
 0x1f9   : > { %v11632_v59 = vadd.f32 %v3287_v46, %v11374_v61  ;;  %9364 = vmatprep.mubr.msk.f32.mxu1 %vm9772_vm1, %v14677_v10  ;;  %v9087_v16 = vpop.f32.mrf.mxu0  ;;  %v4502_v46 = vld [vmem:[%s10065_s30 + $0x3a] sm:$0xff] }
 0x1fa   : > { %v9124_v50 = vpop.f32.mrf.mxu1 }
 0x1fb   : > { %v3024_v38 = vpop.f32.mrf.mxu0  ;;  %9423 = vmatmul.mubr.msk.f32.gmra.mxu0 %vm532_vm0, %v11062_v52  ;;  %v14690_v52 = vld [vmem:[#allocation4_spill] sm:$0xff] }
 0x1fc   : > { %v3292_v28 = vpop.f32.mrf.mxu1  ;;  %9365 = vmatmul.mubr.msk.f32.gmra.mxu1 %vm532_vm0, %v3810_v15  ;;  %v11643_v39 = vadd.f32 %v3024_v38, %v11489_v14  ;;  %9425 = vmatprep.mubr.msk.f32.mxu0 %vm9772_vm1, %v14677_v10 }
 0x1fd   : > { %v11646_v61 = vadd.f32 %v3292_v28, %v11391_v60  ;;  %9367 = vmatprep.mubr.msk.f32.mxu1 %vm9772_vm1, %v14677_v10  ;;  %v9090_v0 = vpop.f32.mrf.mxu0  ;;  %v14694_v28 = vld [vmem:[#allocation8_spill] sm:$0xff] }
 0x1fe   : > { %v9127_v7 = vpop.f32.mrf.mxu1 }
 0x1ff   : > { %v3029_v26 = vpop.f32.mrf.mxu0  ;;  %9426 = vmatmul.mubr.msk.f32.gmra.mxu0 %vm532_vm0, %v14690_v52  ;;  %v14695_v52 = vld [vmem:[#allocation9_spill] sm:$0xff] }
 0x200   : > { %v3297_v1 = vpop.f32.mrf.mxu1  ;;  %9368 = vmatmul.mubr.msk.f32.gmra.mxu1 %vm532_vm0, %v3811_v5  ;;  %v11657_v60 = vadd.f32 %v3029_v26, %v11503_v11  ;;  %9428 = vmatprep.mubr.msk.f32.mxu0 %vm9772_vm1, %v14677_v10  ;;  %v4503_v5 = vld [vmem:[%s10065_s30 + $0x42] sm:$0xff] }
 0x201   : > { %v11660_v14 = vadd.f32 %v3297_v1, %v11408_v9  ;;  %9465 = vmatprep.mubr.msk.f32.mxu1 %vm9772_vm1, %v14677_v10  ;;  %v9093_v30 = vpop.f32.mrf.mxu0 }
 0x202   : > { %v9130_v32 = vpop.f32.mrf.mxu1 }
 0x203   : > { %v3034_v6 = vpop.f32.mrf.mxu0  ;;  %9429 = vmatmul.mubr.msk.f32.gmra.mxu0 %vm532_vm0, %v14691_v48  ;;  %v14696_v48 = vld [vmem:[#allocation10_spill] sm:$0xff] }
 0x204   : > { %v3302_v19 = vpop.f32.mrf.mxu1  ;;  %9466 = vmatmul.mubr.msk.f32.vlgmr.msra.gmra.mxu1 %vm532_vm0, %v4499_v20  ;;  %v11671_v9 = vadd.f32 %v3034_v6, %v11517_v21  ;;  %9431 = vmatprep.mubr.msk.f32.mxu0 %vm9772_vm1, %v14677_v10  ;;  %v4504_v20 = vld [vmem:[%s10065_s30 + $0x4a] sm:$0xff] }
 0x205   : > { %v11674_v11 = vadd.f32 %v3302_v19, %v11422_v34  ;;  %9468 = vmatprep.mubr.msk.f32.mxu1 %vm9772_vm1, %v14677_v10  ;;  %v9096_v55 = vpop.f32.mrf.mxu0 }
 0x206   : > { %v9133_v57 = vpop.f32.mrf.mxu1 }
 0x207   : > { %v3610_v27 = vpop.f32.mrf.mxu0  ;;  %9432 = vmatmul.mubr.msk.f32.gmra.mxu0 %vm532_vm0, %v14692_v44  ;;  %v14697_v44 = vld [vmem:[#allocation11_spill] sm:$0xff] }
 0x208   : > { %v3307_v23 = vpop.f32.mrf.mxu1  ;;  %9469 = vmatmul.mubr.msk.f32.gmra.mxu1 %vm532_vm0, %v4500_v63  ;;  %v11688_v21 = vadd.f32 %v3610_v27, %v11534_v41  ;;  %9434 = vmatprep.mubr.msk.f32.mxu0 %vm9772_vm1, %v14677_v10  ;;  %v4505_v63 = vld [vmem:[%s10065_s30 + $0x52] sm:$0xff] }
 0x209   : > { %v11685_v34 = vadd.f32 %v3307_v23, %v11436_v45  ;;  %9471 = vmatprep.mubr.msk.f32.mxu1 %vm9772_vm1, %v14677_v10  ;;  %v9194_v18 = vpop.f32.mrf.mxu0 }
 0x20a   : > { %v9136_v2 = vpop.f32.mrf.mxu1 }
 0x20b   : > { %v3615_v17 = vpop.f32.mrf.mxu0  ;;  %9435 = vmatmul.mubr.msk.f32.gmra.mxu0 %vm532_vm0, %v14693_v62  ;;  %v14698_v62 = vld [vmem:[#allocation12_spill] sm:$0xff] }
 0x20c   : > { %v3312_v54 = vpop.f32.mrf.mxu1  ;;  %9472 = vmatmul.mubr.msk.f32.gmra.mxu1 %vm532_vm0, %v4501_v35  ;;  %v11702_v41 = vadd.f32 %v3615_v17, %v11548_v37  ;;  %9437 = vmatprep.mubr.msk.f32.mxu0 %vm9772_vm1, %v14677_v10  ;;  %v4506_v35 = vld [vmem:[%s10065_s30 + $0x5a] sm:$0xff] }
 0x20d   : > { %v11699_v45 = vadd.f32 %v3312_v54, %v11450_v47  ;;  %9474 = vmatprep.mubr.msk.f32.mxu1 %vm9772_vm1, %v14677_v10  ;;  %v9197_v16 = vpop.f32.mrf.mxu0 }
 0x20e   : > { %v9139_v15 = vpop.f32.mrf.mxu1 }
 0x20f   : > { %v3620_v38 = vpop.f32.mrf.mxu0  ;;  %9438 = vmatmul.mubr.msk.f32.gmra.mxu0 %vm532_vm0, %v14694_v28  ;;  %v14699_v28 = vld [vmem:[#allocation13_spill] sm:$0xff] }
 0x210   : > { %v3317_v50 = vpop.f32.mrf.mxu1  ;;  %9475 = vmatmul.mubr.msk.f32.gmra.mxu1 %vm532_vm0, %v4502_v46  ;;  %v11716_v37 = vadd.f32 %v3620_v38, %v11562_v25  ;;  %9440 = vmatprep.mubr.msk.f32.mxu0 %vm9772_vm1, %v14677_v10  ;;  %v4507_v46 = vld [vmem:[%s10065_s30 + $0x62] sm:$0xff] }
 0x211   : > { %v11713_v47 = vadd.f32 %v3317_v50, %v11464_v49  ;;  %9477 = vmatprep.mubr.msk.f32.mxu1 %vm9772_vm1, %v14677_v10  ;;  %v9200_v7 = vpop.f32.mrf.mxu0 }
 0x212   : > { %v9142_v0 = vpop.f32.mrf.mxu1 }
 0x213   : > { %v3625_v1 = vpop.f32.mrf.mxu0  ;;  %9441 = vmatmul.mubr.msk.f32.gmra.mxu0 %vm532_vm0, %v14695_v52  ;;  %v4508_v0 = vld [vmem:[%s10065_s30 + $0x6a] sm:$0xff] }
 0x214   : > { %v3322_v26 = vpop.f32.mrf.mxu1  ;;  %9478 = vmatmul.mubr.msk.f32.gmra.mxu1 %vm532_vm0, %v4503_v5  ;;  %v11730_v25 = vadd.f32 %v3625_v1, %v11576_v42  ;;  %9443 = vmatprep.mubr.msk.f32.mxu0 %vm9772_vm1, %v14677_v10  ;;  %v4168_v5 = vld [vmem:[%s10065_s30 + $0xf9] sm:$0xff] }
 0x215   : > { %v11727_v49 = vadd.f32 %v3322_v26, %v11478_v51  ;;  %9480 = vmatprep.mubr.msk.f32.mxu1 %vm9772_vm1, %v14677_v10  ;;  %v9203_v32 = vpop.f32.mrf.mxu0 }
 0x216   : > { %v9145_v30 = vpop.f32.mrf.mxu1 }
 0x217   : > { %v3630_v19 = vpop.f32.mrf.mxu0  ;;  %9444 = vmatmul.mubr.msk.f32.gmra.mxu0 %vm532_vm0, %v14696_v48  ;;  %v4509_v30 = vld [vmem:[%s10065_s30 + $0x72] sm:$0xff] }
 0x218   : > { %v3327_v6 = vpop.f32.mrf.mxu1  ;;  %9481 = vmatmul.mubr.msk.f32.gmra.mxu1 %vm532_vm0, %v4504_v20  ;;  %v11744_v42 = vadd.f32 %v3630_v19, %v11590_v58  ;;  %9446 = vmatprep.mubr.msk.f32.mxu0 %vm9772_vm1, %v14677_v10  ;;  %v4169_v20 = vld [vmem:[%s10065_s30 + $0x101] sm:$0xff] }
 0x219   : > { %v11741_v51 = vadd.f32 %v3327_v6, %v11492_v53  ;;  %9483 = vmatprep.mubr.msk.f32.mxu1 %vm9772_vm1, %v14677_v10  ;;  %v9206_v57 = vpop.f32.mrf.mxu0 }
 0x21a   : > { %v9148_v55 = vpop.f32.mrf.mxu1 }
 0x21b   : > { %v3635_v27 = vpop.f32.mrf.mxu0  ;;  %9447 = vmatmul.mubr.msk.f32.gmra.mxu0 %vm532_vm0, %v14697_v44 }
 0x21c   : > { %v3332_v23 = vpop.f32.mrf.mxu1  ;;  %9484 = vmatmul.mubr.msk.f32.gmra.mxu1 %vm532_vm0, %v4505_v63  ;;  %v11758_v58 = vadd.f32 %v3635_v27, %v11604_v31  ;;  %9449 = vmatprep.mubr.msk.f32.mxu0 %vm9772_vm1, %v14677_v10  ;;  %v4510_v63 = vld [vmem:[%s10065_s30 + $0x7a] sm:$0xff] }
 0x21d   : > { %v11755_v53 = vadd.f32 %v3332_v23, %v11506_v4  ;;  %9486 = vmatprep.mubr.msk.f32.mxu1 %vm9772_vm1, %v14677_v10  ;;  %v9209_v18 = vpop.f32.mrf.mxu0 }
 0x21e   : > { %v9151_v2 = vpop.f32.mrf.mxu1 }
 0x21f   : > { %v3640_v17 = vpop.f32.mrf.mxu0  ;;  %9450 = vmatmul.mubr.msk.f32.gmra.mxu0 %vm532_vm0, %v14698_v62 }
 0x220   : > { %v3337_v54 = vpop.f32.mrf.mxu1  ;;  %9487 = vmatmul.mubr.msk.f32.gmra.mxu1 %vm532_vm0, %v4506_v35  ;;  %v11772_v31 = vadd.f32 %v3640_v17, %v11618_v33  ;;  %9452 = vmatprep.mubr.msk.f32.mxu0 %vm9772_vm1, %v14677_v10 }
 0x221   : > { %v11769_v4 = vadd.f32 %v3337_v54, %v11520_v3  ;;  %9489 = vmatprep.mubr.msk.f32.mxu1 %vm9772_vm1, %v14677_v10  ;;  %v9212_v16 = vpop.f32.mrf.mxu0 }
 0x222   : > { %v9154_v15 = vpop.f32.mrf.mxu1 }
 0x223   : > { %v3645_v38 = vpop.f32.mrf.mxu0  ;;  %9453 = vmatmul.mubr.msk.f32.gmra.mxu0 %vm532_vm0, %v14699_v28 }
 0x224   : > { %v3342_v50 = vpop.f32.mrf.mxu1  ;;  %9490 = vmatmul.mubr.msk.f32.gmra.mxu1 %vm532_vm0, %v4507_v46  ;;  %v11786_v33 = vadd.f32 %v3645_v38, %v11632_v59  ;;  %9455 = vmatprep.mubr.msk.f32.mxu0 %vm9772_vm1, %v14677_v10 }
 0x225   : > { %v11783_v3 = vadd.f32 %v3342_v50, %v11531_v29  ;;  %9492 = vmatprep.mubr.msk.f32.mxu1 %vm9772_vm1, %v14677_v10  ;;  %v9215_v26 = vpop.f32.mrf.mxu0 }
 0x226   : > { %v9157_v7 = vpop.f32.mrf.mxu1 }
 0x227   : > { %v3650_v52 = vpop.f32.mrf.mxu0  ;;  %9456 = vmatmul.mubr.msk.f32.gmra.mxu0 %vm532_vm0, %v4168_v5 }
 0x228   : > { %v3347_v1 = vpop.f32.mrf.mxu1  ;;  %9493 = vmatmul.mubr.msk.f32.gmra.mxu1 %vm532_vm0, %v4508_v0  ;;  %v11800_v59 = vadd.f32 %v3650_v52, %v11646_v61  ;;  %9458 = vmatprep.mubr.msk.f32.mxu0 %vm9772_vm1, %v14677_v10 }
 0x229   : > { %v11797_v29 = vadd.f32 %v3347_v1, %v11545_v43  ;;  %9495 = vmatprep.mubr.msk.f32.mxu1 %vm9772_vm1, %v14677_v10  ;;  %v9218_v6 = vpop.f32.mrf.mxu0 }
 0x22a   : > { %v9160_v32 = vpop.f32.mrf.mxu1 }
 0x22b   : > { %v3655_v48 = vpop.f32.mrf.mxu0  ;;  %9459 = vmatmul.mubr.msk.f32.gmra.mxu0 %vm532_vm0, %v4169_v20 }
 0x22c   : > { %v3352_v19 = vpop.f32.mrf.mxu1  ;;  %9496 = vmatmul.mubr.msk.f32.gmra.mxu1 %vm532_vm0, %v4509_v30  ;;  %v11814_v61 = vadd.f32 %v3655_v48, %v11660_v14  ;;  %v4511_v14 = vld [vmem:[%s10065_s30 + $0x82] sm:$0xff] }
 0x22d   : > { %v11811_v43 = vadd.f32 %v3352_v19, %v11559_v8  ;;  %9498 = vmatprep.mubr.msk.f32.mxu1 %vm9772_vm1, %v14677_v10  ;;  %v9221_v57 = vpop.f32.mrf.mxu0 }
 0x22e   : > { %v9163_v55 = vpop.f32.mrf.mxu1 }
 0x22f   : > { %v3660_v27 = vpop.f32.mrf.mxu0 }
 0x230   : > { %v3357_v23 = vpop.f32.mrf.mxu1  ;;  %9499 = vmatmul.mubr.msk.f32.gmra.mxu1 %vm532_vm0, %v4510_v63  ;;  %v11824_v8 = vadd.f32 %v3660_v27, %v11674_v11  ;;  %v4512_v11 = vld [vmem:[%s10065_s30 + $0x8a] sm:$0xff] }
 0x231   : > { %v11821_v44 = vadd.f32 %v3357_v23, %v11573_v13  ;;  %9501 = vmatprep.mubr.msk.f32.mxu1 %vm9772_vm1, %v14677_v10  ;;  %v9224_v2 = vpop.f32.mrf.mxu0 }
 0x232   : > { %v9166_v35 = vpop.f32.mrf.mxu1 }
 0x233   : > { %v3665_v54 = vpop.f32.mrf.mxu0 }
 0x234   : > { %v3362_v18 = vpop.f32.mrf.mxu1  ;;  %9502 = vmatmul.mubr.msk.f32.gmra.mxu1 %vm532_vm0, %v4511_v14  ;;  %v11834_v13 = vadd.f32 %v3665_v54, %v11685_v34  ;;  %v4513_v34 = vld [vmem:[%s10065_s30 + $0x92] sm:$0xff] }
 0x235   : > { %v11831_v17 = vadd.f32 %v3362_v18, %v11587_v36  ;;  %9504 = vmatprep.mubr.msk.f32.mxu1 %vm9772_vm1, %v14677_v10  ;;  %v9227_v46 = vpop.f32.mrf.mxu0 }
 0x236   : > { %v9169_v62 = vpop.f32.mrf.mxu1 }
 0x237   : > { %v3670_v16 = vpop.f32.mrf.mxu0 }
 0x238   : > { %v3367_v15 = vpop.f32.mrf.mxu1  ;;  %9505 = vmatmul.mubr.msk.f32.gmra.mxu1 %vm532_vm0, %v4512_v11  ;;  %v11844_v36 = vadd.f32 %v3670_v16, %v11699_v45  ;;  %v4514_v45 = vld [vmem:[%s10065_s30 + $0x9a] sm:$0xff] }
 0x239   : > { %v11841_v50 = vadd.f32 %v3367_v15, %v11601_v56  ;;  %9507 = vmatprep.mubr.msk.f32.mxu1 %vm9772_vm1, %v14677_v10  ;;  %v9230_v28 = vpop.f32.mrf.mxu0 }
 0x23a   : > { %v9172_v38 = vpop.f32.mrf.mxu1 }
 0x23b   : > { %v3675_v0 = vpop.f32.mrf.mxu0 }
 0x23c   : > { %v3372_v5 = vpop.f32.mrf.mxu1  ;;  %9508 = vmatmul.mubr.msk.f32.gmra.mxu1 %vm532_vm0, %v4513_v34  ;;  %v11854_v56 = vadd.f32 %v3675_v0, %v11713_v47  ;;  %v4515_v47 = vld [vmem:[%s10065_s30 + $0xa2] sm:$0xff] }
 0x23d   : > { %v11851_v7 = vadd.f32 %v3372_v5, %v11615_v22  ;;  %9510 = vmatprep.mubr.msk.f32.mxu1 %vm9772_vm1, %v14677_v10  ;;  %v9233_v1 = vpop.f32.mrf.mxu0 }
 0x23e   : > { %v9175_v26 = vpop.f32.mrf.mxu1 }
 0x23f   : > { %v3680_v20 = vpop.f32.mrf.mxu0 }
 0x240   : > { %v3377_v52 = vpop.f32.mrf.mxu1  ;;  %9511 = vmatmul.mubr.msk.f32.gmra.mxu1 %vm532_vm0, %v4514_v45  ;;  %v11864_v22 = vadd.f32 %v3680_v20, %v11727_v49  ;;  %v4516_v49 = vld [vmem:[%s10065_s30 + $0xaa] sm:$0xff] }
 0x241   : > { %v11861_v30 = vadd.f32 %v3377_v52, %v11629_v12  ;;  %9513 = vmatprep.mubr.msk.f32.mxu1 %vm9772_vm1, %v14677_v10  ;;  %v9236_v6 = vpop.f32.mrf.mxu0 }
 0x242   : > { %v9178_v32 = vpop.f32.mrf.mxu1 }
 0x243   : > { %v3685_v48 = vpop.f32.mrf.mxu0 }
 0x244   : > { %v3382_v19 = vpop.f32.mrf.mxu1  ;;  %9514 = vmatmul.mubr.msk.f32.gmra.mxu1 %vm532_vm0, %v4515_v47  ;;  %v11874_v12 = vadd.f32 %v3685_v48, %v11741_v51  ;;  %v4517_v51 = vld [vmem:[%s10065_s30 + $0xb2] sm:$0xff] }
 0x245   : > { %v11871_v63 = vadd.f32 %v3382_v19, %v11643_v39  ;;  %9516 = vmatprep.mubr.msk.f32.mxu1 %vm9772_vm1, %v14677_v10  ;;  %v9239_v57 = vpop.f32.mrf.mxu0 }
 0x246   : > { %v9181_v55 = vpop.f32.mrf.mxu1 }
 0x247   : > { %v3690_v27 = vpop.f32.mrf.mxu0 }
 0x248   : > { %v3387_v23 = vpop.f32.mrf.mxu1  ;;  %9517 = vmatmul.mubr.msk.f32.gmra.mxu1 %vm532_vm0, %v4516_v49  ;;  %v11884_v39 = vadd.f32 %v3690_v27, %v11755_v53  ;;  %v4518_v53 = vld [vmem:[%s10065_s30 + $0xba] sm:$0xff] }
 0x249   : > { %v11881_v14 = vadd.f32 %v3387_v23, %v11657_v60  ;;  %9519 = vmatprep.mubr.msk.f32.mxu1 %vm9772_vm1, %v14677_v10  ;;  %v9242_v2 = vpop.f32.mrf.mxu0 }
 0x24a   : > { %v9184_v35 = vpop.f32.mrf.mxu1 }
 0x24b   : > { %v3695_v54 = vpop.f32.mrf.mxu0 }
 0x24c   : > { %v3392_v18 = vpop.f32.mrf.mxu1  ;;  %9520 = vmatmul.mubr.msk.f32.gmra.mxu1 %vm532_vm0, %v4517_v51  ;;  %v11894_v60 = vadd.f32 %v3695_v54, %v11769_v4  ;;  %v4519_v4 = vld [vmem:[%s10065_s30 + $0xc2] sm:$0xff] }
 0x24d   : > { %v11891_v11 = vadd.f32 %v3392_v18, %v11671_v9  ;;  %9522 = vmatprep.mubr.msk.f32.mxu1 %vm9772_vm1, %v14677_v10  ;;  %v9245_v46 = vpop.f32.mrf.mxu0 }
 0x24e   : > { %v9187_v62 = vpop.f32.mrf.mxu1 }
 0x24f   : > { %v3700_v15 = vpop.f32.mrf.mxu0 }
 0x250   : > { %v3968_v16 = vpop.f32.mrf.mxu1  ;;  %9523 = vmatmul.mubr.msk.f32.gmra.mxu1 %vm532_vm0, %v4518_v53  ;;  %v11901_v34 = vadd.f32 %v3700_v15, %v11783_v3 }
 0x251   : > { %v11904_v9 = vadd.f32 %v3968_v16, %v11688_v21  ;;  %9525 = vmatprep.mubr.msk.f32.mxu1 %vm9772_vm1, %v14677_v10  ;;  %v9248_v38 = vpop.f32.mrf.mxu0  ;;  %v4520_v21 = vld [vmem:[%s10065_s30 + $0xca] sm:$0xff] }
 0x252   : > { %v9285_v28 = vpop.f32.mrf.mxu1 }
 0x253   : > { %v3705_v5 = vpop.f32.mrf.mxu0 }
 0x254   : > { %v3973_v0 = vpop.f32.mrf.mxu1  ;;  %9526 = vmatmul.mubr.msk.f32.gmra.mxu1 %vm532_vm0, %v4519_v4  ;;  %v11911_v45 = vadd.f32 %v3705_v5, %v11797_v29 }
 0x255   : > { %v11914_v3 = vadd.f32 %v3973_v0, %v11702_v41  ;;  %9528 = vmatprep.mubr.msk.f32.mxu1 %vm9772_vm1, %v14677_v10  ;;  %v9251_v26 = vpop.f32.mrf.mxu0  ;;  %v4521_v41 = vld [vmem:[%s10065_s30 + $0xd2] sm:$0xff] }
 0x256   : > { %v9288_v1 = vpop.f32.mrf.mxu1 }
 0x257   : > { %v3710_v52 = vpop.f32.mrf.mxu0 }
 0x258   : > { %v3978_v20 = vpop.f32.mrf.mxu1  ;;  %9529 = vmatmul.mubr.msk.f32.gmra.mxu1 %vm532_vm0, %v4520_v21  ;;  %v11921_v47 = vadd.f32 %v3710_v52, %v11811_v43 }
 0x259   : > { %v11924_v29 = vadd.f32 %v3978_v20, %v11716_v37  ;;  %9531 = vmatprep.mubr.msk.f32.mxu1 %vm9772_vm1, %v14677_v10  ;;  %v9254_v32 = vpop.f32.mrf.mxu0  ;;  %v4522_v37 = vld [vmem:[%s10065_s30 + $0xda] sm:$0xff] }
 0x25a   : > { %v9291_v6 = vpop.f32.mrf.mxu1 }
 0x25b   : > { %v3715_v19 = vpop.f32.mrf.mxu0 }
 0x25c   : > { %v3983_v48 = vpop.f32.mrf.mxu1  ;;  %9532 = vmatmul.mubr.msk.f32.gmra.mxu1 %vm532_vm0, %v4521_v41  ;;  %v11931_v49 = vadd.f32 %v3715_v19, %v11821_v44 }
 0x25d   : > { %v11934_v43 = vadd.f32 %v3983_v48, %v11730_v25  ;;  %9534 = vmatprep.mubr.msk.f32.mxu1 %vm9772_vm1, %v14677_v10  ;;  %v9257_v55 = vpop.f32.mrf.mxu0  ;;  %v4523_v25 = vld [vmem:[%s10065_s30 + $0xe2] sm:$0xff] }
 0x25e   : > { %v9294_v57 = vpop.f32.mrf.mxu1 }
 0x25f   : > { %v3720_v23 = vpop.f32.mrf.mxu0 }
 0x260   : > { %v3988_v27 = vpop.f32.mrf.mxu1  ;;  %9535 = vmatmul.mubr.msk.f32.gmra.mxu1 %vm532_vm0, %v4522_v37  ;;  %v11941_v51 = vadd.f32 %v3720_v23, %v11831_v17 }
 0x261   : > { %v11944_v35 = vadd.f32 %v3988_v27, %v11744_v42  ;;  %9537 = vmatprep.mubr.msk.f32.mxu1 %vm9772_vm1, %v14677_v10  ;;  %v9260_v44 = vpop.f32.mrf.mxu0 }
 0x262   : > { %v9297_v2 = vpop.f32.mrf.mxu1 }
 0x263   : > { %v3725_v18 = vpop.f32.mrf.mxu0 }
 0x264   : > { %v3993_v54 = vpop.f32.mrf.mxu1  ;;  %9538 = vmatmul.mubr.msk.f32.gmra.mxu1 %vm532_vm0, %v4523_v25  ;;  %v11951_v53 = vadd.f32 %v3725_v18, %v11841_v50 }
 0x265   : > { %v11954_v62 = vadd.f32 %v3993_v54, %v11758_v58  ;;  %9540 = vmatprep.mubr.msk.f32.mxu1 %vm9772_vm1, %v14677_v10  ;;  %v9263_v42 = vpop.f32.mrf.mxu0 }
 0x266   : > { %v9300_v17 = vpop.f32.mrf.mxu1 }
 0x267   : > { %v3730_v46 = vpop.f32.mrf.mxu0 }
 0x268   : > { %v3998_v15 = vpop.f32.mrf.mxu1  ;;  %9541 = vmatmul.mubr.msk.f32.gmra.mxu1 %vm532_vm0, %v11381_v24  ;;  %v11961_v16 = vadd.f32 %v3730_v46, %v11851_v7 }
 0x269   : > { %v11964_v50 = vadd.f32 %v3998_v15, %v11772_v31  ;;  %9543 = vmatprep.mubr.msk.f32.mxu1 %vm9772_vm1, %v14677_v10  ;;  %v9266_v58 = vpop.f32.mrf.mxu0  ;;  %v4526_v31 = vld [vmem:[%s10065_s30 + $0xfa] sm:$0xff] }
 0x26a   : > { %v9303_v4 = vpop.f32.mrf.mxu1 }
 0x26b   : > { %v3735_v38 = vpop.f32.mrf.mxu0 }
 0x26c   : > { %v4003_v28 = vpop.f32.mrf.mxu1  ;;  %9544 = vmatmul.mubr.msk.f32.gmra.mxu1 %vm532_vm0, %v11398_v40  ;;  %v11971_v5 = vadd.f32 %v3735_v38, %v11861_v30 }
 0x26d   : > { %v11974_v24 = vadd.f32 %v4003_v28, %v11786_v33  ;;  %9546 = vmatprep.mubr.msk.f32.mxu1 %vm9772_vm1, %v14677_v10  ;;  %v9269_v7 = vpop.f32.mrf.mxu0  ;;  %v4527_v33 = vld [vmem:[%s10065_s30 + $0x102] sm:$0xff] }
 0x26e   : > { %v9306_v0 = vpop.f32.mrf.mxu1 }
 0x26f   : > { %v3740_v21 = vpop.f32.mrf.mxu0 }
 0x270   : > { %v4008_v26 = vpop.f32.mrf.mxu1  ;;  %9547 = vmatmul.mubr.msk.f32.gmra.mxu1 %vm532_vm0, %v4526_v31  ;;  %v11981_v1 = vadd.f32 %v3740_v21, %v11871_v63 }
 0x271   : > { %v11984_v40 = vadd.f32 %v4008_v26, %v11800_v59  ;;  %9549 = vmatprep.mubr.msk.f32.mxu1 %vm9772_vm1, %v14677_v10  ;;  %v9272_v30 = vpop.f32.mrf.mxu0 }
 0x272   : > { %v9309_v52 = vpop.f32.mrf.mxu1 }
 0x273   : > { %v3745_v20 = vpop.f32.mrf.mxu0 }
 0x274   : > { %v4013_v41 = vpop.f32.mrf.mxu1  ;;  %9550 = vmatmul.mubr.msk.f32.gmra.mxu1 %vm532_vm0, %v4527_v33  ;;  %v11991_v32 = vadd.f32 %v3745_v20, %v11881_v14 }
 0x275   : > { %v11994_v6 = vadd.f32 %v4013_v41, %v11814_v61  ;;  %v9275_v63 = vpop.f32.mrf.mxu0 }
 0x276   : > { %v9312_v19 = vpop.f32.mrf.mxu1 }
 0x277   : > { %v3750_v59 = vpop.f32.mrf.mxu0 }
 0x278   : > { %v4018_v48 = vpop.f32.mrf.mxu1  ;;  %v11997_v37 = vadd.f32 %v3750_v59, %v11891_v11 }
 0x279   : > { %v12000_v10 = vadd.f32 %v4018_v48, %v11824_v8  ;;  %v9278_v55 = vpop.f32.mrf.mxu0 }
 0x27a   : > { %v9315_v57 = vpop.f32.mrf.mxu1 }
 0x27b   : > { %v4326_v27 = vpop.f32.mrf.mxu0 }
 0x27c   : > { %v4023_v23 = vpop.f32.mrf.mxu1  ;;  %v12006_v61 = vadd.f32 %v4326_v27, %v11904_v9 }
 0x27d   : > { %v12003_v14 = vadd.f32 %v4023_v23, %v11834_v13  ;;  %v9376_v44 = vpop.f32.mrf.mxu0 }
 0x27e   : > { %v9318_v25 = vpop.f32.mrf.mxu1 }
 0x27f   : > { %v4331_v18 = vpop.f32.mrf.mxu0 }
 0x280   : > { %v4028_v2 = vpop.f32.mrf.mxu1  ;;  %v12012_v8 = vadd.f32 %v4331_v18, %v11914_v3 }
 0x281   : > { %v12009_v11 = vadd.f32 %v4028_v2, %v11844_v36  ;;  %v9379_v42 = vpop.f32.mrf.mxu0 }
 0x282   : > { %v9321_v54 = vpop.f32.mrf.mxu1 }
 0x283   : > { %v4336_v46 = vpop.f32.mrf.mxu0 }
 0x284   : > { %v4033_v17 = vpop.f32.mrf.mxu1  ;;  %v12018_v9 = vadd.f32 %v4336_v46, %v11924_v29 }
 0x285   : > { %v12015_v13 = vadd.f32 %v4033_v17, %v11854_v56  ;;  %v9382_v58 = vpop.f32.mrf.mxu0 }
 0x286   : > { %v9324_v15 = vpop.f32.mrf.mxu1  ;;  %v6616_v58 = vld [vmem:[%s14512_s8 + $0x8] sm:$0xff] }
 0x287   : > { %v4341_v38 = vpop.f32.mrf.mxu0  ;;  %9552 = vmatprep.subr.mxu0 %v6616_v58 }
 0x288   : > { %v4038_v4 = vpop.f32.mrf.mxu1  ;;  %v12024_v3 = vadd.f32 %v4341_v38, %v11934_v43  ;;  %9553 = vmatpush3.msra.mxu0 %v6616_v58 }
 0x289   : > { %v12021_v36 = vadd.f32 %v4038_v4, %v11864_v22  ;;  %v9385_v31 = vpop.f32.mrf.mxu0 }
 0x28a   : > { %v9327_v28 = vpop.f32.mrf.mxu1 }
 0x28b   : > { %v4346_v0 = vpop.f32.mrf.mxu0 }
 0x28c   : > { %v4043_v7 = vpop.f32.mrf.mxu1  ;;  %v12030_v29 = vadd.f32 %v4346_v0, %v11944_v35 }
 0x28d   : > { %v12027_v56 = vadd.f32 %v4043_v7, %v11874_v12  ;;  %v9388_v26 = vpop.f32.mrf.mxu0 }
 0x28e   : > { %v9330_v21 = vpop.f32.mrf.mxu1 }
 0x28f   : > { %v4351_v30 = vpop.f32.mrf.mxu0 }
 0x290   : > { %v4048_v33 = vpop.f32.mrf.mxu1  ;;  %v12036_v43 = vadd.f32 %v4351_v30, %v11954_v62 }
 0x291   : > { %v12033_v22 = vadd.f32 %v4048_v33, %v11884_v39  ;;  %v9391_v20 = vpop.f32.mrf.mxu0 }
 0x292   : > { %v9333_v52 = vpop.f32.mrf.mxu1 }
 0x293   : > { %v4356_v63 = vpop.f32.mrf.mxu0 }
 0x294   : > { %v4053_v41 = vpop.f32.mrf.mxu1  ;;  %v12042_v35 = vadd.f32 %v4356_v63, %v11964_v50 }
 0x295   : > { %v12039_v12 = vadd.f32 %v4053_v41, %v11894_v60  ;;  %v9394_v59 = vpop.f32.mrf.mxu0 }
 0x296   : > { %v9336_v19 = vpop.f32.mrf.mxu1 }
 0x297   : > { %v4361_v55 = vpop.f32.mrf.mxu0 }
 0x298   : > { %v4058_v48 = vpop.f32.mrf.mxu1  ;;  %v12048_v62 = vadd.f32 %v4361_v55, %v11974_v24 }
 0x299   : > { %v12045_v39 = vadd.f32 %v4058_v48, %v11901_v34  ;;  %v9397_v23 = vpop.f32.mrf.mxu0 }
 0x29a   : > { %v9339_v57 = vpop.f32.mrf.mxu1 }
 0x29b   : > { %v4366_v25 = vpop.f32.mrf.mxu0 }
 0x29c   : > { %v4063_v27 = vpop.f32.mrf.mxu1  ;;  %v12054_v50 = vadd.f32 %v4366_v25, %v11984_v40 }
 0x29d   : > { %v12051_v60 = vadd.f32 %v4063_v27, %v11911_v45  ;;  %v9400_v2 = vpop.f32.mrf.mxu0 }
 0x29e   : > { %v9342_v44 = vpop.f32.mrf.mxu1 }
 0x29f   : > { %v4371_v54 = vpop.f32.mrf.mxu0 }
 0x2a0   : > { %v4068_v18 = vpop.f32.mrf.mxu1  ;;  %v12060_v24 = vadd.f32 %v4371_v54, %v11994_v6 }
 0x2a1   : > { %v12057_v34 = vadd.f32 %v4068_v18, %v11921_v47  ;;  %v9403_v17 = vpop.f32.mrf.mxu0 }
 0x2a2   : > { %v9345_v42 = vpop.f32.mrf.mxu1 }
 0x2a3   : > { %v4376_v15 = vpop.f32.mrf.mxu0 }
 0x2a4   : > { %v4073_v46 = vpop.f32.mrf.mxu1  ;;  %v12066_v40 = vadd.f32 %v4376_v15, %v12000_v10 }
 0x2a5   : > { %v12063_v45 = vadd.f32 %v4073_v46, %v11931_v49  ;;  %v9406_v47 = vpop.f32.mrf.mxu0 }
 0x2a6   : > { %v9348_v4 = vpop.f32.mrf.mxu1 }
 0x2a7   : > { %v4381_v38 = vpop.f32.mrf.mxu0 }
 0x2a8   : > { %v4078_v6 = vpop.f32.mrf.mxu1  ;;  %v12075_v31 = vadd.f32 %v4381_v38, %v12003_v14 }
 0x2a9   : > { %v12072_v28 = vadd.f32 %v4078_v6, %v11941_v51  ;;  %v9409_v7 = vpop.f32.mrf.mxu0 }
 0x2aa   : > { %v9351_v49 = vpop.f32.mrf.mxu1 }
 0x2ab   : > { %v4386_v0 = vpop.f32.mrf.mxu0 }
 0x2ac   : > { %v4083_v10 = vpop.f32.mrf.mxu1  ;;  %v12081_v26 = vadd.f32 %v4386_v0, %v12009_v11 }
 0x2ad   : > { %v12078_v21 = vadd.f32 %v4083_v10, %v11951_v53  ;;  %v9412_v30 = vpop.f32.mrf.mxu0 }
 0x2ae   : > { %v9354_v33 = vpop.f32.mrf.mxu1 }
 0x2af   : > { %v4391_v20 = vpop.f32.mrf.mxu0 }
 0x2b0   : > { %v4088_v52 = vpop.f32.mrf.mxu1  ;;  %v12087_v14 = vadd.f32 %v4391_v20, %v12015_v13 }
 0x2b1   : > { %v12084_v51 = vadd.f32 %v4088_v52, %v11961_v16  ;;  %v9415_v63 = vpop.f32.mrf.mxu0 }
 0x2b2   : > { %v9357_v41 = vpop.f32.mrf.mxu1 }
 0x2b3   : > { %v4396_v59 = vpop.f32.mrf.mxu0 }
 0x2b4   : > { %v4093_v19 = vpop.f32.mrf.mxu1  ;;  %v12093_v11 = vadd.f32 %v4396_v59, %v12021_v36 }
 0x2b5   : > { %v12090_v53 = vadd.f32 %v4093_v19, %v11971_v5  ;;  %v9418_v55 = vpop.f32.mrf.mxu0 }
 0x2b6   : > { %v9360_v48 = vpop.f32.mrf.mxu1 }
 0x2b7   : > { %v4401_v23 = vpop.f32.mrf.mxu0 }
 0x2b8   : > { %v4098_v57 = vpop.f32.mrf.mxu1  ;;  %v12099_v13 = vadd.f32 %v4401_v23, %v12027_v56 }
 0x2b9   : > { %v12096_v16 = vadd.f32 %v4098_v57, %v11981_v1  ;;  %v9421_v25 = vpop.f32.mrf.mxu0 }
 0x2ba   : > { %v9363_v27 = vpop.f32.mrf.mxu1 }
 0x2bb   : > { %v4406_v2 = vpop.f32.mrf.mxu0 }
 0x2bc   : > { %v4103_v44 = vpop.f32.mrf.mxu1  ;;  %v12105_v36 = vadd.f32 %v4406_v2, %v12033_v22 }
 0x2bd   : > { %v12102_v5 = vadd.f32 %v4103_v44, %v11991_v32  ;;  %v9424_v54 = vpop.f32.mrf.mxu0  ;;  %v12116_v32 = vld [vmem:[%s14510_s6] ss:$0 sm:$0xff] }
 0x2be   : > { %v9366_v18 = vpop.f32.mrf.mxu1 }
 0x2bf   : > { %v4411_v17 = vpop.f32.mrf.mxu0 }
 0x2c0   : > { %v4108_v42 = vpop.f32.mrf.mxu1  ;;  %v12111_v56 = vadd.f32 %v4411_v17, %v12039_v12 }
 0x2c1   : > { %v12108_v1 = vadd.f32 %v4108_v42, %v11997_v37  ;;  %v9427_v15 = vpop.f32.mrf.mxu0  ;;  %v12125_v37 = vld [vmem:[%s14511_s7] ss:$0 sm:$0xff] }
 0x2c2   : > { %v9369_v46 = vpop.f32.mrf.mxu1 }
 0x2c3   : > { %v4416_v58 = vpop.f32.mrf.mxu0 }
 0x2c4   : > { %v4684_v4 = vpop.f32.mrf.mxu1  ;;  %v12119_v22 = vadd.f32 %v4416_v58, %v12045_v39 }
 0x2c5   : > { %v4828_v47 = vadd.f32 %v4684_v4, %v12006_v61  ;;  %v9430_v12 = vpop.f32.mrf.mxu0 }
 0x2c6   : > { %v9467_v6 = vpop.f32.mrf.mxu1 }
 0x2c7   : > { %v4864_v38 = vmul.f32 %v12116_v32, %v4828_v47  ;;  %v4421_v49 = vpop.f32.mrf.mxu0  ;;  %v12157_v47 = vld [vmem:[#allocation2] ss:$0 sm:$0xff] }
 0x2c8   : > { %v4689_v7 = vpop.f32.mrf.mxu1  ;;  %v12130_v0 = vadd.f32 %v4421_v49, %v12051_v60 }
 0x2c9   : > { %v4900_v10 = vadd.f32 %v12125_v37, %v4864_v38  ;;  %v4829_v39 = vadd.f32 %v4689_v7, %v12012_v8  ;;  %v9433_v33 = vpop.f32.mrf.mxu0  ;;  %v12160_v38 = vld [vmem:[#allocation2 + $0x1] ss:$0 sm:$0xff] }
 0x2ca   : > { %14700 = vst [vmem:[#allocation4_spill] sm:$0xff] %v12130_v0  ;;  %v9470_v61 = vpop.f32.mrf.mxu1 }
 0x2cb   : > { %v4929_v30 = vmax.f32 %v4900_v10, 0.0  ;;  %v4865_v52 = vmul.f32 %v12116_v32, %v4829_v39  ;;  %v4426_v20 = vpop.f32.mrf.mxu0  ;;  %v12166_v61 = vld [vmem:[#allocation2 + $0x2] ss:$0 sm:$0xff] }
 0x2cc   : > { %v4694_v41 = vpop.f32.mrf.mxu1  ;;  %v12137_v19 = vadd.f32 %v4426_v20, %v12057_v34 }
 0x2cd   : > { %4958 = vst.msk [vmem:[#allocation3] sm:$0xff] %vm1687_vm2, %v4929_v30  ;;  %v4901_v63 = vadd.f32 %v12125_v37, %v4865_v52  ;;  %v4830_v59 = vadd.f32 %v4694_v41, %v12018_v9  ;;  %v9436_v60 = vpop.f32.mrf.mxu0 }
 0x2ce   : > { %14701 = vst [vmem:[#allocation5_spill] sm:$0xff] %v12137_v19  ;;  %v9473_v48 = vpop.f32.mrf.mxu1  ;;  %v12227_v19 = vld [vmem:[#allocation2 + $0xd] ss:$0 sm:$0xff] }
 0x2cf   : > { %v4930_v55 = vmax.f32 %v4901_v63, 0.0  ;;  %v4866_v8 = vmul.f32 %v12116_v32, %v4830_v59  ;;  %v4431_v57 = vpop.f32.mrf.mxu0 }
 0x2d0   : > { %v4699_v23 = vpop.f32.mrf.mxu1  ;;  %v12144_v25 = vadd.f32 %v4431_v57, %v12063_v45 }
 0x2d1   : > { %4959 = vst.msk [vmem:[#allocation3 + $0x8] sm:$0xff] %vm1687_vm2, %v4930_v55  ;;  %v4902_v27 = vadd.f32 %v12125_v37, %v4866_v8  ;;  %v4831_v44 = vadd.f32 %v4699_v23, %v12024_v3  ;;  %v9439_v34 = vpop.f32.mrf.mxu0  ;;  %v6615_v3 = vld [vmem:[%s14512_s8] sm:$0xff] }
 0x2d2   : > { %14702 = vst [vmem:[#allocation6_spill] sm:$0xff] %v12144_v25  ;;  %v9476_v2 = vpop.f32.mrf.mxu1  ;;  %9554 = vmatprep.subr.mxu0 %v6615_v3  ;;  %v12172_v8 = vld [vmem:[#allocation2 + $0x3] ss:$0 sm:$0xff]  ;;  %v12176_v34 = vld [vmem:[#allocation2 + $0x4] ss:$0 sm:$0xff] }
 0x2d3   : > { %v4931_v18 = vmax.f32 %v4902_v27, 0.0  ;;  %v4867_v9 = vmul.f32 %v12116_v32, %v4831_v44  ;;  %v4436_v54 = vpop.f32.mrf.mxu0  ;;  %9555 = vmatpush3.msra.mxu0 %v6615_v3 }
 0x2d4   : > { %v4704_v42 = vpop.f32.mrf.mxu1  ;;  %v12151_v46 = vadd.f32 %v4436_v54, %v12072_v28  ;;  %v4987_v45 = vld [vmem:[#allocation3] sm:$0xff] }
 0x2d5   : > { %4960 = vst.msk [vmem:[#allocation3 + $0x10] sm:$0xff] %vm1687_vm2, %v4931_v18  ;;  %v4903_v17 = vadd.f32 %v12125_v37, %v4867_v9  ;;  %v4832_v15 = vadd.f32 %v4704_v42, %v12030_v29  ;;  %v9442_v58 = vpop.f32.mrf.mxu0  ;;  %v5010_v29 = vmul.f32 %v12157_v47, %v4987_v45 }
 0x2d6   : > { %14703 = vst [vmem:[#allocation7_spill] sm:$0xff] %v12151_v46  ;;  %v9479_v4 = vpop.f32.mrf.mxu1  ;;  %v12221_v46 = vld [vmem:[#allocation2 + $0xc] ss:$0 sm:$0xff] }
 0x2d7   : > { %v4932_v12 = vmax.f32 %v4903_v17, 0.0  ;;  %v4868_v6 = vmul.f32 %v12116_v32, %v4832_v15  ;;  %v4441_v7 = vpop.f32.mrf.mxu0  ;;  %v12183_v4 = vld [vmem:[#allocation2 + $0x5] ss:$0 sm:$0xff] }
 0x2d8   : > { %v5028_v49 = vld [vmem:[#allocation3 + $0x1] sm:$0xff]  ;;  %v4709_v10 = vpop.f32.mrf.mxu1  ;;  %v12169_v20 = vadd.f32 %v4441_v7, %v12078_v21 }
 0x2d9   : > { %v5087_v28 = vld [vmem:[#allocation3 + $0x2] sm:$0xff]  ;;  %v5051_v39 = vmul.f32 %v12160_v38, %v5028_v49  ;;  %4961 = vst.msk [vmem:[#allocation3 + $0x18] sm:$0xff] %vm1687_vm2, %v4932_v12  ;;  %v4904_v33 = vadd.f32 %v12125_v37, %v4868_v6  ;;  %v9445_v41 = vpop.f32.mrf.mxu0 }
 0x2da   : > { %v4988_v30 = vld [vmem:[#allocation3 + $0x8] sm:$0xff]  ;;  %14704 = vst [vmem:[#allocation8_spill] sm:$0xff] %v12169_v20  ;;  %v9482_v63 = vpop.f32.mrf.mxu1  ;;  %v5110_v60 = vmul.f32 %v12166_v61, %v5087_v28  ;;  %v12195_v41 = vld [vmem:[#allocation2 + $0x8] ss:$0 sm:$0xff] }
 0x2db   : > { %v5146_v52 = vld [vmem:[#allocation3 + $0x3] sm:$0xff]  ;;  %v5069_v59 = vadd.f32 %v5051_v39, %v5010_v29  ;;  %v4933_v55 = vmax.f32 %v4904_v33, 0.0  ;;  %v4446_v27 = vpop.f32.mrf.mxu0  ;;  %v5011_v2 = vmul.f32 %v12157_v47, %v4988_v30 }
 0x2dc   : > { %v5205_v48 = vld [vmem:[#allocation3 + $0x4] sm:$0xff]  ;;  %v12174_v44 = vpop.f32.mrf.mxu1  ;;  %v5169_v18 = vmul.f32 %v12172_v8, %v5146_v52  ;;  %v4989_v54 = vld [vmem:[#allocation3 + $0x10] sm:$0xff]  ;;  %v12187_v28 = vadd.f32 %v4446_v27, %v12084_v51 }
 0x2dd   : > { %v5029_v57 = vld [vmem:[#allocation3 + $0x9] sm:$0xff]  ;;  %v5128_v21 = vadd.f32 %v5110_v60, %v5069_v59  ;;  %4962 = vst.msk [vmem:[#allocation3 + $0x20] sm:$0xff] %vm1687_vm2, %v4933_v55  ;;  %v5228_v17 = vmul.f32 %v12176_v34, %v5205_v48  ;;  %v9448_v45 = vpop.f32.mrf.mxu0  ;;  %v5012_v29 = vmul.f32 %v12157_v47, %v4989_v54 }
 0x2de   : > { %v5088_v23 = vld [vmem:[#allocation3 + $0xa] sm:$0xff]  ;;  %v5052_v42 = vmul.f32 %v12160_v38, %v5029_v57  ;;  %v9485_v58 = vpop.f32.mrf.mxu1  ;;  %14705 = vst [vmem:[#allocation9_spill] sm:$0xff] %v12187_v28  ;;  %v5330_v57 = vmul.f32 %v12195_v41, %v4989_v54 }
 0x2df   : > { %v5264_v9 = vld [vmem:[#allocation3 + $0x5] sm:$0xff]  ;;  %v5187_v3 = vadd.f32 %v5169_v18, %v5128_v21  ;;  %v5111_v6 = vmul.f32 %v12166_v61, %v5088_v23  ;;  %v12191_v30 = vpop.f32.mrf.mxu0  ;;  %v5265_v48 = vld [vmem:[#allocation3 + $0xd] sm:$0xff]  ;;  %v4833_v23 = vadd.f32 %v4709_v10, %v12036_v43  ;;  %v12203_v58 = vld [vmem:[#allocation2 + $0x9] ss:$0 sm:$0xff] }
 0x2e0   : > { %v5147_v15 = vld [vmem:[#allocation3 + $0xb] sm:$0xff]  ;;  %v5070_v12 = vadd.f32 %v5052_v42, %v5011_v2  ;;  %v5287_v7 = vmul.f32 %v12183_v4, %v5264_v9  ;;  %v12193_v52 = vpop.f32.mrf.mxu1  ;;  %v4990_v9 = vld [vmem:[#allocation3 + $0x18] sm:$0xff] }
 0x2e1   : > { %v5206_v49 = vld [vmem:[#allocation3 + $0xc] sm:$0xff]  ;;  %v5246_v63 = vadd.f32 %v5228_v17, %v5187_v3  ;;  %v5170_v60 = vmul.f32 %v12172_v8, %v5147_v15  ;;  %v9451_v27 = vpop.f32.mrf.mxu0  ;;  %v5288_v15 = vmul.f32 %v12183_v4, %v5265_v48 }
 0x2e2   : > { %v5030_v39 = vld [vmem:[#allocation3 + $0x11] sm:$0xff]  ;;  %v5129_v59 = vadd.f32 %v5111_v6, %v5070_v12  ;;  %v5229_v55 = vmul.f32 %v12176_v34, %v5206_v49  ;;  %v9488_v2 = vpop.f32.mrf.mxu1  ;;  %v12213_v27 = vld [vmem:[#allocation2 + $0xb] ss:$0 sm:$0xff] }
 0x2e3   : > { %v5089_v33 = vld [vmem:[#allocation3 + $0x12] sm:$0xff]  ;;  %v5053_v51 = vmul.f32 %v12160_v38, %v5030_v39  ;;  %v5305_v21 = vadd.f32 %v5287_v7, %v5246_v63  ;;  %v4456_v12 = vpop.f32.mrf.mxu0  ;;  %v5373_v43 = vmul.f32 %v12203_v58, %v5030_v39  ;;  %v12207_v7 = vld [vmem:[#allocation2 + $0xa] ss:$0 sm:$0xff]  ;;  %v5331_v39 = vmul.f32 %v12195_v41, %v4990_v9 }
 0x2e4   : > { %v5188_v18 = vadd.f32 %v5170_v60, %v5129_v59  ;;  %v5112_v17 = vmul.f32 %v12166_v61, %v5089_v33  ;;  %v5148_v45 = vld [vmem:[#allocation3 + $0x13] sm:$0xff]  ;;  %v4724_v6 = vpop.f32.mrf.mxu1  ;;  %v4869_v60 = vmul.f32 %v12116_v32, %v4833_v23  ;;  %v4834_v23 = vadd.f32 %v12174_v44, %v12042_v35 }
 0x2e5   : > { %v5071_v42 = vadd.f32 %v5053_v51, %v5012_v29  ;;  %v5031_v3 = vld [vmem:[#allocation3 + $0x19] sm:$0xff]  ;;  %v5348_v54 = vadd.f32 %v5330_v57, %v5305_v21  ;;  %v5013_v29 = vmul.f32 %v12157_v47, %v4990_v9  ;;  %v5171_v63 = vmul.f32 %v12172_v8, %v5148_v45  ;;  %v9454_v48 = vpop.f32.mrf.mxu0 }
 0x2e6   : > { %v5247_v49 = vadd.f32 %v5229_v55, %v5188_v18  ;;  %v5090_v10 = vld [vmem:[#allocation3 + $0x1a] sm:$0xff]  ;;  %v5054_v59 = vmul.f32 %v12160_v38, %v5031_v3  ;;  %v9491_v51 = vpop.f32.mrf.mxu1  ;;  %v5416_v18 = vmul.f32 %v12207_v7, %v5089_v33  ;;  %v5374_v9 = vmul.f32 %v12203_v58, %v5031_v3 }
 0x2e7   : > { %v5130_v28 = vadd.f32 %v5112_v17, %v5071_v42  ;;  %v5207_v57 = vld [vmem:[#allocation3 + $0x14] sm:$0xff]  ;;  %v5391_v21 = vadd.f32 %v5373_v43, %v5348_v54  ;;  %v5459_v42 = vmul.f32 %v12213_v27, %v5148_v45  ;;  %v5113_v20 = vmul.f32 %v12166_v61, %v5090_v10  ;;  %v4461_v48 = vpop.f32.mrf.mxu0 }
 0x2e8   : > { %v5306_v55 = vadd.f32 %v5288_v15, %v5247_v49  ;;  %v5266_v2 = vld [vmem:[#allocation3 + $0x15] sm:$0xff]  ;;  %v5072_v17 = vadd.f32 %v5054_v59, %v5013_v29  ;;  %v4729_v51 = vpop.f32.mrf.mxu1  ;;  %v5230_v54 = vmul.f32 %v12176_v34, %v5207_v57  ;;  %v5502_v45 = vmul.f32 %v12221_v46, %v5207_v57 }
 0x2e9   : > { %v5189_v15 = vadd.f32 %v5171_v63, %v5130_v28  ;;  %v5434_v25 = vadd.f32 %v5416_v18, %v5391_v21  ;;  %v5289_v33 = vmul.f32 %v12183_v4, %v5266_v2  ;;  %v5149_v43 = vld [vmem:[#allocation3 + $0x1b] sm:$0xff]  ;;  %v9457_v29 = vpop.f32.mrf.mxu0  ;;  %v5417_v28 = vmul.f32 %v12207_v7, %v5090_v10 }
 0x2ea   : > { %v5349_v49 = vadd.f32 %v5331_v39, %v5306_v55  ;;  %v9494_v59 = vpop.f32.mrf.mxu1  ;;  %v5131_v44 = vadd.f32 %v5113_v20, %v5072_v17  ;;  %v5545_v63 = vmul.f32 %v12227_v19, %v5266_v2  ;;  %v4905_v3 = vadd.f32 %v12125_v37, %v4869_v60  ;;  %v5208_v10 = vld [vmem:[#allocation3 + $0x1c] sm:$0xff] }
 0x2eb   : > { %v5477_v35 = vadd.f32 %v5459_v42, %v5434_v25  ;;  %v4870_v55 = vmul.f32 %v12116_v32, %v4834_v23  ;;  %v12235_v39 = vadd.f32 %v12191_v30, %v12090_v53  ;;  %v4466_v57 = vpop.f32.mrf.mxu0  ;;  %v5248_v18 = vadd.f32 %v5230_v54, %v5189_v15 }
 0x2ec   : > { %v5392_v0 = vadd.f32 %v5374_v9, %v5349_v49  ;;  %v4734_v21 = vpop.f32.mrf.mxu1  ;;  %v5172_v29 = vmul.f32 %v12172_v8, %v5149_v43  ;;  %v4835_v20 = vadd.f32 %v12193_v52, %v12048_v62  ;;  %v5460_v2 = vmul.f32 %v12213_v27, %v5149_v43  ;;  %v4991_v9 = vld [vmem:[#allocation3 + $0x20] sm:$0xff] }
 0x2ed   : > { %14706 = vst [vmem:[#allocation10_spill] sm:$0xff] %v12235_v39  ;;  %v4934_v42 = vmax.f32 %v4905_v3, 0.0  ;;  %v4906_v60 = vadd.f32 %v12125_v37, %v4870_v55  ;;  %v12243_v17 = vadd.f32 %v4456_v12, %v12096_v16  ;;  %v9460_v30 = vpop.f32.mrf.mxu0  ;;  %v5520_v23 = vadd.f32 %v5502_v45, %v5477_v35 }
 0x2ee   : > { %v5435_v25 = vadd.f32 %v5417_v28, %v5392_v0  ;;  %v9497_v53 = vpop.f32.mrf.mxu1  ;;  %v5190_v49 = vadd.f32 %v5172_v29, %v5131_v44  ;;  %v4871_v15 = vmul.f32 %v12116_v32, %v4835_v20  ;;  %v4836_v0 = vadd.f32 %v4724_v6, %v12054_v50  ;;  %v5267_v44 = vld [vmem:[#allocation3 + $0x1d] sm:$0xff] }
 0x2ef   : > { %14707 = vst [vmem:[#allocation11_spill] sm:$0xff] %v12243_v17  ;;  %4963 = vst.msk [vmem:[#allocation3 + $0x28] sm:$0xff] %vm1687_vm2, %v4934_v42  ;;  %v4935_v62 = vmax.f32 %v4906_v60, 0.0  ;;  %v12249_v52 = vadd.f32 %v4461_v48, %v12102_v5  ;;  %v4837_v43 = vadd.f32 %v4729_v51, %v12060_v24  ;;  %v5231_v12 = vmul.f32 %v12176_v34, %v5208_v10 }
 0x2f0   : > { %v5478_v54 = vadd.f32 %v5460_v2, %v5435_v25  ;;  %v4739_v16 = vpop.f32.mrf.mxu1  ;;  %v5503_v45 = vmul.f32 %v12221_v46, %v5208_v10  ;;  %v4907_v59 = vadd.f32 %v12125_v37, %v4871_v15  ;;  %v4872_v35 = vmul.f32 %v12116_v32, %v4836_v0 }
 0x2f1   : > { %14708 = vst [vmem:[#allocation12_spill] sm:$0xff] %v12249_v52  ;;  %4964 = vst.msk [vmem:[#allocation3 + $0x30] sm:$0xff] %vm1687_vm2, %v4935_v62  ;;  %v4873_v50 = vmul.f32 %v12116_v32, %v4837_v43  ;;  %v12259_v6 = vadd.f32 %v4466_v57, %v12108_v1  ;;  %v4838_v5 = vadd.f32 %v4734_v21, %v12066_v40  ;;  %v12266_v1 = vld [vmem:[#allocation2 + $0x10] ss:$0 sm:$0xff] }
 0x2f2   : > { %v4839_v24 = vadd.f32 %v4739_v16, %v12075_v31  ;;  %v9500_v48 = vpop.f32.mrf.mxu1  ;;  %v5307_v51 = vadd.f32 %v5289_v33, %v5248_v18  ;;  %v5332_v28 = vmul.f32 %v12195_v41, %v4991_v9  ;;  %v4936_v3 = vmax.f32 %v4907_v59, 0.0 }
 0x2f3   : > { %14709 = vst [vmem:[#allocation13_spill] sm:$0xff] %v12259_v6  ;;  %v4908_v55 = vadd.f32 %v12125_v37, %v4872_v35  ;;  %v5563_v29 = vadd.f32 %v5545_v63, %v5520_v23  ;;  %v5249_v25 = vadd.f32 %v5231_v12, %v5190_v49  ;;  %v5521_v20 = vadd.f32 %v5503_v45, %v5478_v54 }
 0x2f4   : > { %v4909_v10 = vadd.f32 %v12125_v37, %v4873_v50  ;;  %v4744_v2 = vpop.f32.mrf.mxu1  ;;  %4965 = vst.msk [vmem:[#allocation3 + $0x38] sm:$0xff] %vm1687_vm2, %v4936_v3  ;;  %v4874_v31 = vmul.f32 %v12116_v32, %v4838_v5  ;;  %v4875_v33 = vmul.f32 %v12116_v32, %v4839_v24  ;;  %v5290_v21 = vmul.f32 %v12183_v4, %v5267_v44 }
 0x2f5   : > { %v4937_v40 = vmax.f32 %v4908_v55, 0.0  ;;  %v4840_v57 = vadd.f32 %v4744_v2, %v12081_v26  ;;  %v5546_v63 = vmul.f32 %v12227_v19, %v5267_v44  ;;  %v5588_v18 = vmul.f32 %v12266_v1, %v4991_v9 }
 0x2f6   : > { %v4938_v42 = vmax.f32 %v4909_v10, 0.0  ;;  %v9503_v60 = vpop.f32.mrf.mxu1  ;;  %v5014_v53 = vmul.f32 %v12157_v47, %v4991_v9  ;;  %v5350_v30 = vadd.f32 %v5332_v28, %v5307_v51  ;;  %v4992_v23 = vld [vmem:[#allocation3 + $0x28] sm:$0xff]  ;;  %v5308_v0 = vadd.f32 %v5290_v21, %v5249_v25 }
 0x2f7   : > { %v5032_v49 = vld [vmem:[#allocation3 + $0x21] sm:$0xff]  ;;  %4966 = vst.msk [vmem:[#allocation3 + $0x40] sm:$0xff] %vm1687_vm2, %v4937_v40  ;;  %v5564_v54 = vadd.f32 %v5546_v63, %v5521_v20  ;;  %v5606_v62 = vadd.f32 %v5588_v18, %v5563_v29  ;;  %v12285_v59 = vadd.f32 %v12125_v37, %v4874_v31  ;;  %v12288_v35 = vadd.f32 %v12125_v37, %v4875_v33 }
 0x2f8   : > { %v5091_v15 = vld [vmem:[#allocation3 + $0x22] sm:$0xff]  ;;  %v5055_v26 = vmul.f32 %v12160_v38, %v5032_v49  ;;  %4967 = vst.msk [vmem:[#allocation3 + $0x48] sm:$0xff] %vm1687_vm2, %v4938_v42  ;;  %v12279_v12 = vpop.f32.mrf.mxu1  ;;  %v5375_v9 = vmul.f32 %v12203_v58, %v5032_v49  ;;  %v12291_v50 = vmul.f32 %v12116_v32, %v4840_v57  ;;  %v5015_v5 = vmul.f32 %v12157_v47, %v4992_v23  ;;  %v12299_v20 = vld [vmem:[#allocation2 + $0x11] ss:$0 sm:$0xff]  ;;  %v12312_v60 = vld [vmem:[#allocation3 + $0x30] sm:$0xff] }
 0x2f9   : > { %v5150_v43 = vld [vmem:[#allocation3 + $0x23] sm:$0xff]  ;;  %v5114_v48 = vmul.f32 %v12166_v61, %v5091_v15  ;;  %v5333_v51 = vmul.f32 %v12195_v41, %v4992_v23  ;;  %v5418_v29 = vmul.f32 %v12207_v7, %v5091_v15  ;;  %v12306_v57 = vld [vmem:[#allocation2 + $0x12] ss:$0 sm:$0xff]  ;;  %v5589_v42 = vmul.f32 %v12266_v1, %v4992_v23  ;;  %14711 = vst [vmem:[#allocation15_spill] sm:$0xff] %v12312_v60  ;;  %v5210_v52 = vld [vmem:[#allocation3 + $0x2c] sm:$0xff] }
 0x2fa   : > { %v5209_v16 = vld [vmem:[#allocation3 + $0x24] sm:$0xff]  ;;  %v5073_v24 = vadd.f32 %v5055_v26, %v5014_v53  ;;  %v9506_v44 = vpop.f32.mrf.mxu1  ;;  %v5173_v28 = vmul.f32 %v12172_v8, %v5150_v43  ;;  %v5393_v55 = vadd.f32 %v5375_v9, %v5350_v30  ;;  %v5461_v31 = vmul.f32 %v12213_v27, %v5150_v43  ;;  %v12314_v30 = vld [vmem:[#allocation2 + $0x13] ss:$0 sm:$0xff] }
 0x2fb   : > { %v12281_v45 = vld [vmem:[#allocation3 + $0x25] sm:$0xff]  ;;  %v5232_v3 = vmul.f32 %v12176_v34, %v5209_v16  ;;  %v5351_v40 = vadd.f32 %v5333_v51, %v5308_v0  ;;  %v5504_v63 = vmul.f32 %v12221_v46, %v5209_v16  ;;  %v12316_v0 = vld [vmem:[#allocation2 + $0x14] ss:$0 sm:$0xff]  ;;  %v5631_v9 = vmul.f32 %v12299_v20, %v5032_v49 }
 0x2fc   : > { %14710 = vst [vmem:[#allocation14_spill] sm:$0xff] %v12281_v45  ;;  %v5033_v25 = vld [vmem:[#allocation3 + $0x29] sm:$0xff]  ;;  %v5132_v10 = vadd.f32 %v5114_v48, %v5073_v24  ;;  %v5291_v2 = vmul.f32 %v12183_v4, %v12281_v45  ;;  %v12304_v33 = vpop.f32.mrf.mxu1  ;;  %v5436_v21 = vadd.f32 %v5418_v29, %v5393_v55  ;;  %v5547_v18 = vmul.f32 %v12227_v19, %v12281_v45 }
 0x2fd   : > { %v5092_v53 = vld [vmem:[#allocation3 + $0x2a] sm:$0xff]  ;;  %v5674_v24 = vmul.f32 %v12306_v57, %v5091_v15  ;;  %v5056_v48 = vmul.f32 %v12160_v38, %v5033_v25  ;;  %v5607_v29 = vadd.f32 %v5589_v42, %v5564_v54  ;;  %v12322_v23 = vmul.f32 %v12314_v30, %v5150_v43 }
 0x2fe   : > { %v5191_v26 = vadd.f32 %v5173_v28, %v5132_v10  ;;  %v5151_v51 = vld [vmem:[#allocation3 + $0x2b] sm:$0xff]  ;;  %v9509_v44 = vpop.f32.mrf.mxu1  ;;  %v5479_v55 = vadd.f32 %v5461_v31, %v5436_v21  ;;  %v12325_v6 = vmul.f32 %v12316_v0, %v5209_v16  ;;  %v5016_v28 = vmul.f32 %v12157_v47, %v12312_v60 }
 0x2ff   : > { %14712 = vst [vmem:[#allocation16_spill] sm:$0xff] %v12322_v23  ;;  %v5074_v49 = vadd.f32 %v5056_v48, %v5015_v5  ;;  %v5115_v15 = vmul.f32 %v12166_v61, %v5092_v53  ;;  %v5649_v44 = vadd.f32 %v5631_v9, %v5606_v62  ;;  %v5174_v54 = vmul.f32 %v12172_v8, %v5151_v51  ;;  %v5269_v31 = vld [vmem:[#allocation3 + $0x2d] sm:$0xff] }
 0x300   : > { %14713 = vst [vmem:[#allocation17_spill] sm:$0xff] %v12325_v6  ;;  %v5250_v17 = vadd.f32 %v5232_v3, %v5191_v26  ;;  %v12330_v10 = vpop.f32.mrf.mxu1  ;;  %v5522_v39 = vadd.f32 %v5504_v63, %v5479_v55  ;;  %v5376_v43 = vmul.f32 %v12203_v58, %v5033_v25  ;;  %v5233_v42 = vmul.f32 %v12176_v34, %v5210_v52  ;;  %v12339_v62 = vld [vmem:[#allocation3 + $0x31] sm:$0xff] }
 0x301   : > { %v5133_v16 = vadd.f32 %v5115_v15, %v5074_v49  ;;  %v5334_v3 = vmul.f32 %v12195_v41, %v12312_v60  ;;  %v5419_v45 = vmul.f32 %v12207_v7, %v5092_v53  ;;  %v5632_v63 = vmul.f32 %v12299_v20, %v5033_v25 }
 0x302   : > { %v5309_v21 = vadd.f32 %v5291_v2, %v5250_v17  ;;  %v9512_v26 = vpop.f32.mrf.mxu1  ;;  %v5565_v5 = vadd.f32 %v5547_v18, %v5522_v39  ;;  %v5394_v48 = vadd.f32 %v5376_v43, %v5351_v40  ;;  %v5292_v55 = vmul.f32 %v12183_v4, %v5269_v31  ;;  %v12346_v40 = vld [vmem:[#allocation3 + $0x38] sm:$0xff] }
 0x303   : > { %v5192_v9 = vadd.f32 %v5174_v54, %v5133_v16  ;;  %v5462_v17 = vmul.f32 %v12213_v27, %v5151_v51  ;;  %v5590_v15 = vmul.f32 %v12266_v1, %v12312_v60  ;;  %v5650_v26 = vadd.f32 %v5632_v63, %v5607_v29 }
 0x304   : > { %v5352_v6 = vadd.f32 %v5334_v3, %v5309_v21  ;;  %v4764_v2 = vpop.f32.mrf.mxu1  ;;  %v5437_v49 = vadd.f32 %v5419_v45, %v5394_v48  ;;  %v5675_v39 = vmul.f32 %v12306_v57, %v5092_v53  ;;  %v12348_v18 = vadd.f32 %v5674_v24, %v5649_v44  ;;  %v12353_v21 = vld [vmem:[#allocation3 + $0x39] sm:$0xff] }
 0x305   : > { %v5251_v25 = vadd.f32 %v5233_v42, %v5192_v9  ;;  %v5505_v54 = vmul.f32 %v12221_v46, %v5210_v52  ;;  %v5057_v43 = vmul.f32 %v12160_v38, %v12339_v62  ;;  %14714 = vst [vmem:[#allocation18_spill] sm:$0xff] %v12353_v21  ;;  %v5608_v3 = vadd.f32 %v5590_v15, %v5565_v5  ;;  %v12362_v9 = vld [vmem:[#allocation2 + $0x15] ss:$0 sm:$0xff] }
 0x306   : > { %v9515_v16 = vpop.f32.mrf.mxu1  ;;  %v5480_v45 = vadd.f32 %v5462_v17, %v5437_v49  ;;  %v5693_v48 = vadd.f32 %v5675_v39, %v5650_v26  ;;  %v5377_v29 = vmul.f32 %v12203_v58, %v12339_v62  ;;  %v5718_v63 = vmul.f32 %v12314_v30, %v5151_v51 }
 0x307   : > { %v5310_v53 = vadd.f32 %v5292_v55, %v5251_v25  ;;  %v12358_v24 = vadd.f32 %v5057_v43, %v5016_v28  ;;  %v5335_v44 = vmul.f32 %v12195_v41, %v12346_v40  ;;  %v5633_v5 = vmul.f32 %v12299_v20, %v12339_v62  ;;  %v12370_v55 = vld [vmem:[#allocation3 + $0x3a] sm:$0xff] }
 0x308   : > { %v4769_v42 = vpop.f32.mrf.mxu1  ;;  %v5523_v60 = vadd.f32 %v5505_v54, %v5480_v45  ;;  %v12364_v23 = vadd.f32 %v5377_v29, %v5352_v6  ;;  %v5058_v17 = vmul.f32 %v12160_v38, %v12353_v21  ;;  %14715 = vst [vmem:[#allocation19_spill] sm:$0xff] %v12370_v55  ;;  %v5548_v51 = vmul.f32 %v12227_v19, %v5269_v31 }
 0x309   : > { %v12374_v28 = vmul.f32 %v12316_v0, %v5210_v52  ;;  %v12377_v49 = vmul.f32 %v12362_v9, %v5269_v31  ;;  %v5017_v6 = vmul.f32 %v12157_v47, %v12346_v40  ;;  %v12381_v26 = vadd.f32 %v5718_v63, %v5693_v48 }
 0x30a   : > { %v9518_v15 = vpop.f32.mrf.mxu1  ;;  %v5353_v39 = vadd.f32 %v5335_v44, %v5310_v53  ;;  %v12385_v25 = vmul.f32 %v12266_v1, %v12346_v40  ;;  %v12387_v54 = vadd.f32 %v5633_v5, %v5608_v3  ;;  %v12391_v52 = vmul.f32 %v12166_v61, %v12370_v55 }
 0x30b   : > { %v5378_v31 = vmul.f32 %v12203_v58, %v12353_v21  ;;  %v4939_v43 = vmax.f32 %v12285_v59, 0.0  ;;  %v4940_v16 = vmax.f32 %v12288_v35, 0.0  ;;  %v12397_v48 = vadd.f32 %v5548_v51, %v5523_v60 }
 0x30c   : > { %14716 = vst [vmem:[#allocation20_spill] sm:$0xff] %v12387_v54  ;;  %v4774_v45 = vpop.f32.mrf.mxu1  ;;  %v12399_v29 = vadd.f32 %v5058_v17, %v5017_v6  ;;  %v4912_v3 = vadd.f32 %v12125_v37, %v12291_v50  ;;  %v4841_v53 = vadd.f32 %v12279_v12, %v12087_v14  ;;  %v12407_v63 = vmul.f32 %v12207_v7, %v12370_v55 }
 0x30d   : > { %4968 = vst.msk [vmem:[#allocation3 + $0x50] sm:$0xff] %vm1687_vm2, %v4939_v43  ;;  %4969 = vst.msk [vmem:[#allocation3 + $0x58] sm:$0xff] %vm1687_vm2, %v4940_v16  ;;  %v4842_v59 = vadd.f32 %v12304_v33, %v12093_v11  ;;  %v4843_v35 = vadd.f32 %v12330_v10, %v12099_v13  ;;  %v4844_v60 = vadd.f32 %v4764_v2, %v12105_v36  ;;  %v12426_v36 = vld [vmem:[#allocation3 + $0x40] sm:$0xff] }
 0x30e   : > { %v9521_v50 = vpop.f32.mrf.mxu1  ;;  %v12418_v14 = vmul.f32 %v12299_v20, %v12353_v21  ;;  %v4941_v12 = vmax.f32 %v4912_v3, 0.0  ;;  %v4877_v44 = vmul.f32 %v12116_v32, %v4841_v53  ;;  %v4845_v5 = vadd.f32 %v4769_v42, %v12111_v56  ;;  %14717 = vst [vmem:[#allocation21_spill] sm:$0xff] %v12426_v36  ;;  %v14718_v56 = vld [vmem:[#allocation4_spill] sm:$0xff] }
 0x30f   : > { %v4878_v17 = vmul.f32 %v12116_v32, %v4842_v59  ;;  %v4879_v51 = vmul.f32 %v12116_v32, %v4843_v35  ;;  %v4880_v11 = vmul.f32 %v12116_v32, %v4844_v60  ;;  %v4846_v13 = vadd.f32 %v4774_v45, %v12119_v22  ;;  %v12438_v3 = vld [vmem:[#allocation3 + $0x41] sm:$0xff]  ;;  %v12444_v35 = vld [vmem:[#allocation3 + $0x32] sm:$0xff] }
 0x310   : > { %v4779_v33 = vpop.f32.mrf.mxu1  ;;  %v12428_v10 = vadd.f32 %v5378_v31, %v5353_v39  ;;  %4970 = vst.msk [vmem:[#allocation3 + $0x60] sm:$0xff] %vm1687_vm2, %v4941_v12  ;;  %v4913_v2 = vadd.f32 %v12125_v37, %v4877_v44  ;;  %v4881_v6 = vmul.f32 %v12116_v32, %v4845_v5  ;;  %14719 = vst [vmem:[#allocation4_spill] sm:$0xff] %v12438_v3 }
 0x311   : > { %v4847_v42 = vadd.f32 %v4779_v33, %v14718_v56  ;;  %v4914_v15 = vadd.f32 %v12125_v37, %v4878_v17  ;;  %v4915_v43 = vadd.f32 %v12125_v37, %v4879_v51  ;;  %v4916_v16 = vadd.f32 %v12125_v37, %v4880_v11  ;;  %v12447_v17 = vld [vmem:[#allocation3 + $0x42] sm:$0xff] }
 0x312   : > { %v4882_v22 = vmul.f32 %v12116_v32, %v4846_v13  ;;  %v9524_v45 = vpop.f32.mrf.mxu1  ;;  %v4942_v39 = vmax.f32 %v4913_v2, 0.0  ;;  %v4917_v31 = vadd.f32 %v12125_v37, %v4881_v6  ;;  %v5018_v59 = vmul.f32 %v12157_v47, %v12426_v36  ;;  %14720 = vst [vmem:[#allocation22_spill] sm:$0xff] %v12447_v17  ;;  %v14721_v13 = vld [vmem:[#allocation5_spill] sm:$0xff] }
 0x313   : > { %v4883_v53 = vmul.f32 %v12116_v32, %v4847_v42  ;;  %v4943_v60 = vmax.f32 %v4914_v15, 0.0  ;;  %v4944_v50 = vmax.f32 %v4915_v43, 0.0  ;;  %v4945_v12 = vmax.f32 %v4916_v16, 0.0  ;;  %v12458_v42 = vld [vmem:[#allocation3 + $0x33] sm:$0xff] }
 0x314   : > { %v4918_v44 = vadd.f32 %v12125_v37, %v4882_v22  ;;  %v4784_v5 = vpop.f32.mrf.mxu1  ;;  %4971 = vst.msk [vmem:[#allocation3 + $0x68] sm:$0xff] %vm1687_vm2, %v4942_v39  ;;  %v4946_v51 = vmax.f32 %v4917_v31, 0.0  ;;  %v12452_v2 = vld [vmem:[#allocation3 + $0x50] sm:$0xff]  ;;  %v5059_v56 = vmul.f32 %v12160_v38, %v12438_v3  ;;  %v5116_v45 = vmul.f32 %v12166_v61, %v12444_v35  ;;  %v12469_v39 = vld [vmem:[#allocation3 + $0x43] sm:$0xff] }
 0x315   : > { %v4919_v11 = vadd.f32 %v12125_v37, %v4883_v53  ;;  %v4848_v33 = vadd.f32 %v4784_v5, %v14721_v13  ;;  %14722 = vst [vmem:[#allocation5_spill] sm:$0xff] %v12452_v2  ;;  %v12454_v6 = vld [vmem:[#allocation3 + $0x51] sm:$0xff]  ;;  %4972 = vst.msk [vmem:[#allocation3 + $0x70] sm:$0xff] %vm1687_vm2, %v4943_v60  ;;  %v5020_v16 = vmul.f32 %v12157_v47, %v12452_v2 }
 0x316   : > { %14723 = vst [vmem:[#allocation23_spill] sm:$0xff] %v12454_v6  ;;  %4973 = vst.msk [vmem:[#allocation3 + $0x78] sm:$0xff] %vm1687_vm2, %v4944_v50  ;;  %v4947_v15 = vmax.f32 %v4918_v44, 0.0  ;;  %v9527_v43 = vpop.f32.mrf.mxu1  ;;  %v5061_v22 = vmul.f32 %v12160_v38, %v12454_v6  ;;  %v5077_v60 = vadd.f32 %v5059_v56, %v5018_v59  ;;  %v12473_v50 = vld [vmem:[#allocation3 + $0x52] sm:$0xff]  ;;  %v12481_v38 = vmul.f32 %v12306_v57, %v12370_v55 }
 0x317   : > { %4974 = vst.msk [vmem:[#allocation3 + $0x80] sm:$0xff] %vm1687_vm2, %v4945_v12  ;;  %14724 = vst [vmem:[#allocation24_spill] sm:$0xff] %v12469_v39  ;;  %v4948_v31 = vmax.f32 %v4919_v11, 0.0  ;;  %v4884_v53 = vmul.f32 %v12116_v32, %v4848_v33  ;;  %v5118_v12 = vmul.f32 %v12166_v61, %v12447_v17  ;;  %v12477_v47 = vld [vmem:[#allocation3 + $0x34] sm:$0xff]  ;;  %v5175_v59 = vmul.f32 %v12172_v8, %v12458_v42  ;;  %v12487_v11 = vld [vmem:[#allocation3 + $0x44] sm:$0xff] }
 0x318   : > { %4975 = vst.msk [vmem:[#allocation3 + $0x88] sm:$0xff] %vm1687_vm2, %v4946_v51  ;;  %14725 = vst [vmem:[#allocation25_spill] sm:$0xff] %v12473_v50  ;;  %v4789_v44 = vpop.f32.mrf.mxu1  ;;  %v5079_v5 = vadd.f32 %v5061_v22, %v5020_v16  ;;  %v5134_v51 = vadd.f32 %v5116_v45, %v12358_v24  ;;  %v14727_v33 = vld [vmem:[#allocation6_spill] sm:$0xff]  ;;  %v5177_v54 = vmul.f32 %v12172_v8, %v12469_v39 }
 0x319   : > { %4976 = vst.msk [vmem:[#allocation3 + $0x90] sm:$0xff] %vm1687_vm2, %v4947_v15  ;;  %14726 = vst [vmem:[#allocation26_spill] sm:$0xff] %v12487_v11  ;;  %v4920_v13 = vadd.f32 %v12125_v37, %v4884_v53  ;;  %v4849_v56 = vadd.f32 %v4789_v44, %v14727_v33  ;;  %v5136_v43 = vadd.f32 %v5118_v12, %v5077_v60  ;;  %v12494_v15 = vld [vmem:[#allocation3 + $0x35] sm:$0xff]  ;;  %v12502_v53 = vld [vmem:[#allocation3 + $0x45] sm:$0xff] }
 0x31a   : > { %4977 = vst.msk [vmem:[#allocation3 + $0x98] sm:$0xff] %vm1687_vm2, %v4948_v31  ;;  %v5609_v24 = vadd.f32 %v12385_v25, %v12397_v48  ;;  %v9530_v16 = vpop.f32.mrf.mxu1  ;;  %v5120_v22 = vmul.f32 %v12166_v61, %v12473_v50  ;;  %v5193_v45 = vadd.f32 %v5175_v59, %v5134_v51  ;;  %v5234_v31 = vmul.f32 %v12176_v34, %v12477_v47  ;;  %v12505_v12 = vld [vmem:[#allocation3 + $0x53] sm:$0xff] }
 0x31b   : > { %14728 = vst [vmem:[#allocation6_spill] sm:$0xff] %v12502_v53  ;;  %v4949_v44 = vmax.f32 %v4920_v13, 0.0  ;;  %v4885_v60 = vmul.f32 %v12116_v32, %v4849_v56  ;;  %14729 = vst [vmem:[#allocation27_spill] sm:$0xff] %v12505_v12  ;;  %v5195_v33 = vadd.f32 %v5177_v54, %v5136_v43  ;;  %v5236_v55 = vmul.f32 %v12176_v34, %v12487_v11  ;;  %v14730_v56 = vld [vmem:[#allocation7_spill] sm:$0xff] }
 0x31c   : > { %v12511_v25 = vadd.f32 %v12391_v52, %v12399_v29  ;;  %v4794_v61 = vpop.f32.mrf.mxu1  ;;  %v5138_v48 = vadd.f32 %v5120_v22, %v5079_v5  ;;  %v5252_v51 = vadd.f32 %v5234_v31, %v5193_v45  ;;  %v5293_v59 = vmul.f32 %v12183_v4, %v12494_v15 }
 0x31d   : > { %4978 = vst.msk [vmem:[#allocation3 + $0xa0] sm:$0xff] %vm1687_vm2, %v4949_v44  ;;  %v4921_v13 = vadd.f32 %v12125_v37, %v4885_v60  ;;  %v4850_v16 = vadd.f32 %v4794_v61, %v14730_v56  ;;  %v5254_v54 = vadd.f32 %v5236_v55, %v5195_v33  ;;  %v5295_v43 = vmul.f32 %v12183_v4, %v12502_v53 }
 0x31e   : > { %v5652_v21 = vadd.f32 %v12418_v14, %v5609_v24  ;;  %v9533_v52 = vpop.f32.mrf.mxu1  ;;  %v5179_v29 = vmul.f32 %v12172_v8, %v12505_v12  ;;  %v5311_v5 = vadd.f32 %v5293_v59, %v5252_v51  ;;  %v5336_v22 = vmul.f32 %v12195_v41, %v12426_v36  ;;  %v14731_v51 = vld [vmem:[#allocation8_spill] sm:$0xff] }
 0x31f   : > { %v4950_v45 = vmax.f32 %v4921_v13, 0.0  ;;  %v4886_v31 = vmul.f32 %v12116_v32, %v4850_v16  ;;  %v5313_v44 = vadd.f32 %v5295_v43, %v5254_v54  ;;  %v5338_v55 = vmul.f32 %v12195_v41, %v12452_v2  ;;  %v12535_v13 = vld [vmem:[#allocation3 + $0x54] sm:$0xff] }
 0x320   : > { %v4799_v60 = vpop.f32.mrf.mxu1  ;;  %v5197_v33 = vadd.f32 %v5179_v29, %v5138_v48  ;;  %v5354_v61 = vadd.f32 %v5336_v22, %v5311_v5  ;;  %v5379_v14 = vmul.f32 %v12203_v58, %v12438_v3  ;;  %v5381_v8 = vmul.f32 %v12203_v58, %v12454_v6  ;;  %14732 = vst [vmem:[#allocation7_spill] sm:$0xff] %v12535_v13 }
 0x321   : > { %4979 = vst.msk [vmem:[#allocation3 + $0xa8] sm:$0xff] %vm1687_vm2, %v4950_v45  ;;  %v4922_v24 = vadd.f32 %v12125_v37, %v4886_v31  ;;  %v4851_v59 = vadd.f32 %v4799_v60, %v14731_v51  ;;  %v5356_v56 = vadd.f32 %v5338_v55, %v5313_v44  ;;  %v5420_v41 = vmul.f32 %v12207_v7, %v12444_v35 }
 0x322   : > { %v5397_v48 = vadd.f32 %v5379_v14, %v5354_v61  ;;  %v5422_v16 = vmul.f32 %v12207_v7, %v12447_v17  ;;  %v5424_v54 = vmul.f32 %v12207_v7, %v12473_v50  ;;  %v5463_v58 = vmul.f32 %v12213_v27, %v12458_v42  ;;  %v9536_v43 = vpop.f32.mrf.mxu1 }
 0x323   : > { %v4951_v52 = vmax.f32 %v4922_v24, 0.0  ;;  %v4887_v29 = vmul.f32 %v12116_v32, %v4851_v59  ;;  %v5399_v5 = vadd.f32 %v5381_v8, %v5356_v56  ;;  %v5438_v22 = vadd.f32 %v5420_v41, %v12364_v23  ;;  %v12557_v32 = vld [vmem:[#allocation3 + $0x55] sm:$0xff] }
 0x324   : > { %v5238_v45 = vmul.f32 %v12176_v34, %v12535_v13  ;;  %v5440_v31 = vadd.f32 %v5422_v16, %v5397_v48  ;;  %v5465_v44 = vmul.f32 %v12213_v27, %v12469_v39  ;;  %v5467_v7 = vmul.f32 %v12213_v27, %v12505_v12  ;;  %v12553_v55 = vpop.f32.mrf.mxu1  ;;  %14733 = vst [vmem:[#allocation8_spill] sm:$0xff] %v12557_v32 }
 0x325   : > { %4980 = vst.msk [vmem:[#allocation3 + $0xb0] sm:$0xff] %vm1687_vm2, %v4951_v52  ;;  %v4923_v60 = vadd.f32 %v12125_v37, %v4887_v29  ;;  %v5442_v61 = vadd.f32 %v5424_v54, %v5399_v5  ;;  %v5481_v23 = vadd.f32 %v5463_v58, %v5438_v22  ;;  %v5506_v34 = vmul.f32 %v12221_v46, %v12477_v47 }
 0x326   : > { %v5256_v14 = vadd.f32 %v5238_v45, %v5197_v33  ;;  %v5483_v8 = vadd.f32 %v5465_v44, %v5440_v31  ;;  %v5508_v24 = vmul.f32 %v12221_v46, %v12487_v11  ;;  %v5510_v27 = vmul.f32 %v12221_v46, %v12535_v13  ;;  %v9539_v51 = vpop.f32.mrf.mxu1 }
 0x327   : > { %v4952_v59 = vmax.f32 %v4923_v60, 0.0  ;;  %v5485_v56 = vadd.f32 %v5467_v7, %v5442_v61  ;;  %v5524_v41 = vadd.f32 %v5506_v34, %v5481_v23  ;;  %v5549_v37 = vmul.f32 %v12227_v19, %v12494_v15  ;;  %v14738_v60 = vld [vmem:[#allocation16_spill] sm:$0xff] }
 0x328   : > { %v12569_v48 = vadd.f32 %v12407_v63, %v12428_v10  ;;  %v5297_v33 = vmul.f32 %v12183_v4, %v12557_v32  ;;  %v5526_v16 = vadd.f32 %v5508_v24, %v5483_v8  ;;  %v5551_v54 = vmul.f32 %v12227_v19, %v12502_v53  ;;  %v12575_v58 = vpop.f32.mrf.mxu1 }
 0x329   : > { %14734 = vst [vmem:[#allocation28_spill] sm:$0xff] %v12575_v58  ;;  %v12578_v46 = vadd.f32 %v12481_v38, %v5652_v21  ;;  %4981 = vst.msk [vmem:[#allocation3 + $0xb8] sm:$0xff] %vm1687_vm2, %v4952_v59  ;;  %v5528_v43 = vadd.f32 %v5510_v27, %v5485_v56  ;;  %v5567_v52 = vadd.f32 %v5549_v37, %v5524_v41  ;;  %v14742_v59 = vld [vmem:[#allocation17_spill] sm:$0xff]  ;;  %v14743_v41 = vld [vmem:[#allocation14_spill] sm:$0xff] }
 0x32a   : > { %v5592_v63 = vmul.f32 %v12266_v1, %v12426_v36  ;;  %v12583_v10 = vadd.f32 %v5297_v33, %v5256_v14  ;;  %v5553_v4 = vmul.f32 %v12227_v19, %v12557_v32  ;;  %v5569_v29 = vadd.f32 %v5551_v54, %v5526_v16  ;;  %v9542_v22 = vpop.f32.mrf.mxu1  ;;  %v12618_v33 = vld [vmem:[#allocation2 + $0x18] ss:$0 sm:$0xff] }
 0x32b   : > { %14735 = vst [vmem:[#allocation29_spill] sm:$0xff] %v12578_v46  ;;  %v5594_v5 = vmul.f32 %v12266_v1, %v12452_v2  ;;  %v5635_v21 = vmul.f32 %v12299_v20, %v12438_v3  ;;  %v5637_v38 = vmul.f32 %v12299_v20, %v12454_v6  ;;  %v12595_v31 = vmul.f32 %v12306_v57, %v12444_v35  ;;  %v12676_v46 = vld [vmem:[#allocation2 + $0x24] ss:$0 sm:$0xff] }
 0x32c   : > { %14736 = vst [vmem:[#allocation30_spill] sm:$0xff] %v12583_v10  ;;  %v5610_v45 = vadd.f32 %v5592_v63, %v5567_v52  ;;  %v5678_v19 = vmul.f32 %v12306_v57, %v12447_v17  ;;  %v5680_v7 = vmul.f32 %v12306_v57, %v12473_v50  ;;  %v5735_v61 = vadd.f32 %v14738_v60, %v12348_v18  ;;  %v12603_v23 = vpop.f32.mrf.mxu1  ;;  %v12644_v60 = vld [vmem:[#allocation2 + $0x1a] ss:$0 sm:$0xff]  ;;  %v12732_v10 = vld [vmem:[#allocation3 + $0x3b] sm:$0xff] }
 0x32d   : > { %14737 = vst [vmem:[#allocation31_spill] sm:$0xff] %v12595_v31  ;;  %v5612_v44 = vadd.f32 %v5594_v5, %v5569_v29  ;;  %14739 = vst [vmem:[#allocation16_spill] sm:$0xff] %v12603_v23  ;;  %v12605_v34 = vadd.f32 %v5553_v4, %v5528_v43  ;;  %v12609_v8 = vmul.f32 %v12314_v30, %v12458_v42  ;;  %v14746_v5 = vld [vmem:[#allocation15_spill] sm:$0xff]  ;;  %v12678_v23 = vld [vmem:[#allocation2 + $0x25] ss:$0 sm:$0xff] }
 0x32e   : > { %v5653_v14 = vadd.f32 %v5635_v21, %v5610_v45  ;;  %v5721_v24 = vmul.f32 %v12314_v30, %v12469_v39  ;;  %v5723_v51 = vmul.f32 %v12314_v30, %v12505_v12  ;;  %v5778_v56 = vadd.f32 %v14742_v59, %v5735_v61  ;;  %v9545_v37 = vpop.f32.mrf.mxu1  ;;  %v12636_v21 = vld [vmem:[#allocation2 + $0x19] ss:$0 sm:$0xff]  ;;  %v12646_v61 = vld [vmem:[#allocation2 + $0x1b] ss:$0 sm:$0xff]  ;;  %14754 = vst [vmem:[#allocation40_spill] sm:$0xff] %v12676_v46 }
 0x32f   : > { %14740 = vst [vmem:[#allocation32_spill] sm:$0xff] %v12605_v34  ;;  %14741 = vst [vmem:[#allocation33_spill] sm:$0xff] %v12609_v8  ;;  %v5655_v27 = vadd.f32 %v5637_v38, %v5612_v44  ;;  %v5803_v18 = vmul.f32 %v12362_v9, %v14743_v41  ;;  %v12622_v54 = vmul.f32 %v12316_v0, %v12477_v47  ;;  %v12652_v41 = vld [vmem:[#allocation2 + $0x1c] ss:$0 sm:$0xff]  ;;  %v12656_v37 = vld [vmem:[#allocation2 + $0x20] ss:$0 sm:$0xff] }
 0x330   : > { %v5696_v16 = vadd.f32 %v5678_v19, %v5653_v14  ;;  %v5764_v43 = vmul.f32 %v12316_v0, %v12487_v11  ;;  %v5766_v52 = vmul.f32 %v12316_v0, %v12535_v13  ;;  %v12630_v4 = vmul.f32 %v12362_v9, %v12494_v15  ;;  %v12634_v45 = vpop.f32.mrf.mxu1  ;;  %14749 = vst [vmem:[#allocation35_spill] sm:$0xff] %v12656_v37 }
 0x331   : > { %14744 = vst [vmem:[#allocation17_spill] sm:$0xff] %v12622_v54  ;;  %v5698_v63 = vadd.f32 %v5680_v7, %v5655_v27  ;;  %v5821_v29 = vadd.f32 %v5803_v18, %v5778_v56  ;;  %v5846_v22 = vmul.f32 %v12618_v33, %v14746_v5  ;;  %14747 = vst [vmem:[#allocation15_spill] sm:$0xff] %v12634_v45  ;;  %v12654_v18 = vld [vmem:[#allocation2 + $0x1d] ss:$0 sm:$0xff]  ;;  %v12706_v54 = vld [vmem:[#allocation3 + $0x59] sm:$0xff] }
 0x332   : > { %14745 = vst [vmem:[#allocation14_spill] sm:$0xff] %v12630_v4  ;;  %v5739_v38 = vadd.f32 %v5721_v24, %v5696_v16  ;;  %v5807_v44 = vmul.f32 %v12362_v9, %v12502_v53  ;;  %v5809_v19 = vmul.f32 %v12362_v9, %v12557_v32  ;;  %v5850_v7 = vmul.f32 %v12618_v33, %v12452_v2  ;;  %v9548_v56 = vpop.f32.mrf.mxu1 }
 0x333   : > { %v5741_v14 = vadd.f32 %v5723_v51, %v5698_v63  ;;  %v5864_v27 = vadd.f32 %v5846_v22, %v5821_v29  ;;  %v5889_v59 = vmul.f32 %v12636_v21, %v12339_v62  ;;  %v5893_v24 = vmul.f32 %v12636_v21, %v12454_v6  ;;  %14748 = vst [vmem:[#allocation34_spill] sm:$0xff] %v12654_v18  ;;  %v12664_v63 = vld [vmem:[#allocation2 + $0x21] ss:$0 sm:$0xff]  ;;  %v12666_v29 = vld [vmem:[#allocation2 + $0x22] ss:$0 sm:$0xff] }
 0x334   : > { %v5782_v16 = vadd.f32 %v5764_v43, %v5739_v38  ;;  %v5932_v5 = vmul.f32 %v12644_v60, %v12444_v35  ;;  %v5936_v51 = vmul.f32 %v12644_v60, %v12473_v50  ;;  %v5975_v62 = vmul.f32 %v12646_v61, %v12458_v42  ;;  %14750 = vst [vmem:[#allocation36_spill] sm:$0xff] %v12664_v63  ;;  %v12668_v22 = vld [vmem:[#allocation2 + $0x23] ss:$0 sm:$0xff]  ;;  %v12674_v38 = vpop.f32.mrf.mxu1 }
 0x335   : > { %14751 = vst [vmem:[#allocation37_spill] sm:$0xff] %v12666_v29  ;;  %14752 = vst [vmem:[#allocation38_spill] sm:$0xff] %v12668_v22  ;;  %v5784_v56 = vadd.f32 %v5766_v52, %v5741_v14  ;;  %v5907_v45 = vadd.f32 %v5889_v59, %v5864_v27  ;;  %v5979_v43 = vmul.f32 %v12646_v61, %v12505_v12  ;;  %v12690_v27 = vld [vmem:[#allocation3 + $0x48] sm:$0xff] }
 0x336   : > { %v6018_v35 = vmul.f32 %v12652_v41, %v12477_v47  ;;  %14753 = vst [vmem:[#allocation39_spill] sm:$0xff] %v12674_v38  ;;  %14755 = vst [vmem:[#allocation41_spill] sm:$0xff] %v12678_v23  ;;  %v5825_v42 = vadd.f32 %v5807_v44, %v5782_v16  ;;  %v12682_v4 = vmul.f32 %v12652_v41, %v12535_v13  ;;  %v12702_v38 = vld [vmem:[#allocation3 + $0x58] sm:$0xff]  ;;  %v9551_v8 = vpop.f32.mrf.mxu1 }
 0x337   : > { %v6061_v52 = vmul.f32 %v12654_v18, %v12494_v15  ;;  %v12688_v14 = vmul.f32 %v12654_v18, %v12557_v32  ;;  %14756 = vst [vmem:[#allocation42_spill] sm:$0xff] %v12690_v27  ;;  %v5950_v47 = vadd.f32 %v5932_v5, %v5907_v45  ;;  %v6104_v59 = vmul.f32 %v12656_v37, %v12426_v36  ;;  %v12704_v15 = vld [vmem:[#allocation3 + $0x49] sm:$0xff]  ;;  %v12722_v36 = vld [vmem:[#allocation3 + $0x5a] sm:$0xff] }
 0x338   : > { %v12696_v44 = vmul.f32 %v12664_v63, %v12438_v3  ;;  %v12700_v16 = vmul.f32 %v12666_v29, %v12447_v17  ;;  %14757 = vst [vmem:[#allocation43_spill] sm:$0xff] %v12702_v38  ;;  %14758 = vst [vmem:[#allocation44_spill] sm:$0xff] %v12704_v15  ;;  %v5868_v31 = vadd.f32 %v5850_v7, %v5825_v42  ;;  %v12720_v3 = vld [vmem:[#allocation3 + $0x4a] sm:$0xff] }
 0x339   : > { %14759 = vst [vmem:[#allocation45_spill] sm:$0xff] %v12706_v54  ;;  %v12710_v45 = vmul.f32 %v12668_v22, %v12469_v39  ;;  %v12714_v5 = vmul.f32 %v12676_v46, %v12487_v11  ;;  %v12718_v17 = vmul.f32 %v12678_v23, %v12502_v53  ;;  %14760 = vst [vmem:[#allocation46_spill] sm:$0xff] %v12720_v3  ;;  %v14763_v7 = vld [vmem:[#allocation9_spill] sm:$0xff] }
 0x33a   : > { %14761 = vst [vmem:[#allocation47_spill] sm:$0xff] %v12722_v36  ;;  %v12724_v34 = vadd.f32 %v5809_v19, %v5784_v56  ;;  %v5993_v8 = vadd.f32 %v5975_v62, %v5950_v47  ;;  %v4852_v42 = vadd.f32 %v12553_v55, %v14763_v7  ;;  %v12728_v39 = vld [vmem:[#allocation2] ss:$0 sm:$0xff]  ;;  %v5911_v58 = vadd.f32 %v5893_v24, %v5868_v31  ;;  %v12736_v23 = vld [vmem:[#allocation2 + $0x1] ss:$0 sm:$0xff] }
 0x33b   : > { %14764 = vst [vmem:[#allocation9_spill] sm:$0xff] %v12728_v39  ;;  %v5019_v11 = vmul.f32 %v12728_v39, %v12690_v27  ;;  %v5021_v53 = vmul.f32 %v12728_v39, %v12702_v38  ;;  %14765 = vst [vmem:[#allocation49_spill] sm:$0xff] %v12736_v23  ;;  %v5060_v19 = vmul.f32 %v12736_v23, %v12704_v15  ;;  %v12742_v55 = vld [vmem:[#allocation3 + $0x4b] sm:$0xff]  ;;  %v12756_v39 = vld [vmem:[#allocation2 + $0x28] ss:$0 sm:$0xff] }
 0x33c   : > { %14762 = vst [vmem:[#allocation48_spill] sm:$0xff] %v12724_v34  ;;  %v5062_v62 = vmul.f32 %v12736_v23, %v12706_v54  ;;  %14766 = vst [vmem:[#allocation50_spill] sm:$0xff] %v12742_v55  ;;  %v6036_v56 = vadd.f32 %v6018_v35, %v5993_v8  ;;  %v12747_v47 = vld [vmem:[%s14510_s6] ss:$0 sm:$0xff]  ;;  %v12750_v24 = vld [vmem:[#allocation2 + $0x2] ss:$0 sm:$0xff]  ;;  %v5954_v23 = vadd.f32 %v5936_v51, %v5911_v58 }
 0x33d   : > { %14767 = vst [vmem:[#allocation51_spill] sm:$0xff] %v12747_v47  ;;  %v4888_v31 = vmul.f32 %v12747_v47, %v4852_v42  ;;  %14768 = vst [vmem:[#allocation52_spill] sm:$0xff] %v12750_v24  ;;  %v5119_v7 = vmul.f32 %v12750_v24, %v12720_v3  ;;  %v5121_v34 = vmul.f32 %v12750_v24, %v12722_v36  ;;  %v12758_v8 = vld [vmem:[#allocation3 + $0x5b] sm:$0xff]  ;;  %v12760_v22 = vld [vmem:[#allocation2 + $0x3] ss:$0 sm:$0xff] }
 0x33e   : > { %14769 = vst [vmem:[#allocation53_spill] sm:$0xff] %v12756_v39  ;;  %v5078_v46 = vadd.f32 %v5060_v19, %v5019_v11  ;;  %v5080_v35 = vadd.f32 %v5062_v62, %v5021_v53  ;;  %14770 = vst [vmem:[#allocation54_spill] sm:$0xff] %v12758_v8  ;;  %v5176_v42 = vmul.f32 %v12760_v22, %v12732_v10  ;;  %v12764_v47 = vld [vmem:[#allocation3 + $0x3c] sm:$0xff]  ;;  %v12773_v58 = vld [vmem:[%s14511_s7] ss:$0 sm:$0xff] }
 0x33f   : > { %14771 = vst [vmem:[#allocation55_spill] sm:$0xff] %v12760_v22  ;;  %v6079_v29 = vadd.f32 %v6061_v52, %v6036_v56  ;;  %v12768_v63 = vmul.f32 %v12756_v39, %v12452_v2  ;;  %14772 = vst [vmem:[#allocation56_spill] sm:$0xff] %v12773_v58  ;;  %v4924_v11 = vadd.f32 %v12773_v58, %v4888_v31  ;;  %v12778_v51 = vld [vmem:[#allocation3 + $0x4c] sm:$0xff]  ;;  %v12781_v56 = vld [vmem:[#allocation3 + $0x3d] sm:$0xff] }
 0x340   : > { %v5178_v53 = vmul.f32 %v12760_v22, %v12742_v55  ;;  %14773 = vst [vmem:[#allocation57_spill] sm:$0xff] %v12778_v51  ;;  %v5997_v19 = vadd.f32 %v5979_v43, %v5954_v23  ;;  %v5137_v62 = vadd.f32 %v5119_v7, %v5078_v46  ;;  %v5139_v24 = vadd.f32 %v5121_v34, %v5080_v35  ;;  %v12783_v2 = vld [vmem:[#allocation2 + $0x29] ss:$0 sm:$0xff]  ;;  %v12785_v39 = vld [vmem:[#allocation2 + $0x2a] ss:$0 sm:$0xff]  ;;  %v12793_v46 = vld [vmem:[#allocation3 + $0x4d] sm:$0xff] }
 0x341   : > { %v5194_v52 = vadd.f32 %v5176_v42, %v12511_v25  ;;  %14774 = vst [vmem:[#allocation58_spill] sm:$0xff] %v12785_v39  ;;  %v6122_v37 = vadd.f32 %v6104_v59, %v6079_v29  ;;  %v4953_v18 = vmax.f32 %v4924_v11, 0.0  ;;  %v5180_v31 = vmul.f32 %v12760_v22, %v12758_v8  ;;  %v12789_v58 = vld [vmem:[#allocation2 + $0x4] ss:$0 sm:$0xff]  ;;  %14776 = vst [vmem:[#allocation60_spill] sm:$0xff] %v12793_v46  ;;  %v12803_v43 = vld [vmem:[#allocation3 + $0x5c] sm:$0xff] }
 0x342   : > { %14775 = vst [vmem:[#allocation59_spill] sm:$0xff] %v12789_v58  ;;  %v5235_v23 = vmul.f32 %v12789_v58, %v12764_v47  ;;  %v12797_v25 = vmul.f32 %v12783_v2, %v12454_v6  ;;  %v12801_v34 = vmul.f32 %v12785_v39, %v12473_v50  ;;  %v5196_v29 = vadd.f32 %v5178_v53, %v5137_v62  ;;  %v12807_v7 = vld [vmem:[#allocation2 + $0x2b] ss:$0 sm:$0xff]  ;;  %v12811_v6 = vld [vmem:[#allocation2 + $0x5] ss:$0 sm:$0xff] }
 0x343   : > { %14777 = vst [vmem:[#allocation61_spill] sm:$0xff] %v12803_v43  ;;  %v5237_v59 = vmul.f32 %v12789_v58, %v12778_v51  ;;  %14778 = vst [vmem:[#allocation62_spill] sm:$0xff] %v12807_v7  ;;  %v6165_v35 = vadd.f32 %v12696_v44, %v6122_v37  ;;  %v5198_v42 = vadd.f32 %v5180_v31, %v5139_v24  ;;  %v12822_v37 = vld [vmem:[#allocation2 + $0x2c] ss:$0 sm:$0xff]  ;;  %v12829_v31 = vld [vmem:[#allocation2 + $0x8] ss:$0 sm:$0xff] }
 0x344   : > { %4982 = vst.msk [vmem:[#allocation3 + $0xc0] sm:$0xff] %vm1687_vm2, %v4953_v18  ;;  %v5253_v11 = vadd.f32 %v5235_v23, %v5194_v52  ;;  %14779 = vst [vmem:[#allocation63_spill] sm:$0xff] %v12811_v6  ;;  %v5294_v50 = vmul.f32 %v12811_v6, %v12781_v56  ;;  %v6040_v53 = vadd.f32 %v12682_v4, %v5997_v19  ;;  %v12824_v18 = vld [vmem:[#allocation2 + $0x2d] ss:$0 sm:$0xff] }
 0x345   : > { %v12818_v62 = vmul.f32 %v12807_v7, %v12505_v12  ;;  %v5255_v22 = vadd.f32 %v5237_v59, %v5196_v29  ;;  %v5296_v39 = vmul.f32 %v12811_v6, %v12793_v46  ;;  %14780 = vst [vmem:[#allocation64_spill] sm:$0xff] %v12822_v37  ;;  %14781 = vst [vmem:[#allocation65_spill] sm:$0xff] %v12824_v18  ;;  %v12841_v29 = vld [vmem:[#allocation3 + $0x5d] sm:$0xff]  ;;  %v12846_v12 = vld [vmem:[#allocation2 + $0x9] ss:$0 sm:$0xff] }
 0x346   : > { %v6208_v44 = vadd.f32 %v12700_v16, %v6165_v35  ;;  %v5239_v24 = vmul.f32 %v12789_v58, %v12803_v43  ;;  %v5312_v52 = vadd.f32 %v5294_v50, %v5253_v11  ;;  %14782 = vst [vmem:[#allocation66_spill] sm:$0xff] %v12829_v31  ;;  %v5337_v4 = vmul.f32 %v12829_v31, %v12690_v27 }
 0x347   : > { %v12835_v19 = vmul.f32 %v12822_v37, %v12535_v13  ;;  %v12839_v23 = vmul.f32 %v12824_v18, %v12557_v32  ;;  %14783 = vst [vmem:[#allocation67_spill] sm:$0xff] %v12841_v29  ;;  %v5314_v16 = vadd.f32 %v5296_v39, %v5255_v22  ;;  %v5339_v59 = vmul.f32 %v12829_v31, %v12702_v38  ;;  %v12855_v39 = vld [vmem:[#allocation2 + $0xb] ss:$0 sm:$0xff] }
 0x348   : > { %v6251_v50 = vadd.f32 %v12710_v45, %v6208_v44  ;;  %v5257_v35 = vadd.f32 %v5239_v24, %v5198_v42  ;;  %v5355_v11 = vadd.f32 %v5337_v4, %v5312_v52  ;;  %14784 = vst [vmem:[#allocation68_spill] sm:$0xff] %v12846_v12  ;;  %v5380_v13 = vmul.f32 %v12846_v12, %v12704_v15  ;;  %v12862_v24 = vld [vmem:[#allocation2 + $0xa] ss:$0 sm:$0xff] }
 0x349   : > { %v12851_v58 = vadd.f32 %v12688_v14, %v6040_v53  ;;  %v5357_v32 = vadd.f32 %v5339_v59, %v5314_v16  ;;  %v5382_v18 = vmul.f32 %v12846_v12, %v12706_v54  ;;  %v5464_v22 = vmul.f32 %v12855_v39, %v12732_v10  ;;  %14786 = vst [vmem:[#allocation70_spill] sm:$0xff] %v12862_v24  ;;  %v12869_v16 = vld [vmem:[#allocation2 + $0xc] ss:$0 sm:$0xff] }
 0x34a   : > { %v6294_v45 = vadd.f32 %v12714_v5, %v6251_v50  ;;  %v5298_v42 = vmul.f32 %v12811_v6, %v12841_v29  ;;  %v5398_v44 = vadd.f32 %v5380_v13, %v5355_v11  ;;  %v5423_v14 = vmul.f32 %v12862_v24, %v12720_v3  ;;  %14787 = vst [vmem:[#allocation71_spill] sm:$0xff] %v12869_v16 }
 0x34b   : > { %14785 = vst [vmem:[#allocation69_spill] sm:$0xff] %v12851_v58  ;;  %v5400_v53 = vadd.f32 %v5382_v18, %v5357_v32  ;;  %v5425_v52 = vmul.f32 %v12862_v24, %v12722_v36  ;;  %v5482_v4 = vadd.f32 %v5464_v22, %v12569_v48  ;;  %v5507_v5 = vmul.f32 %v12869_v16, %v12764_v47  ;;  %v12880_v24 = vld [vmem:[#allocation2 + $0xd] ss:$0 sm:$0xff] }
 0x34c   : > { %v6337_v59 = vadd.f32 %v12718_v17, %v6294_v45  ;;  %v12874_v50 = vadd.f32 %v5298_v42, %v5257_v35  ;;  %v5441_v13 = vadd.f32 %v5423_v14, %v5398_v44  ;;  %v5466_v11 = vmul.f32 %v12855_v39, %v12742_v55  ;;  %14789 = vst [vmem:[#allocation73_spill] sm:$0xff] %v12880_v24 }
 0x34d   : > { %v5443_v58 = vadd.f32 %v5425_v52, %v5400_v53  ;;  %v5468_v32 = vmul.f32 %v12855_v39, %v12758_v8  ;;  %v5525_v18 = vadd.f32 %v5507_v5, %v5482_v4  ;;  %v5550_v48 = vmul.f32 %v12880_v24, %v12781_v56 }
 0x34e   : > { %14788 = vst [vmem:[#allocation72_spill] sm:$0xff] %v12874_v50  ;;  %v6380_v22 = vadd.f32 %v12768_v63, %v6337_v59  ;;  %v5484_v6 = vadd.f32 %v5466_v11, %v5441_v13  ;;  %v5509_v17 = vmul.f32 %v12869_v16, %v12778_v51  ;;  %v5511_v35 = vmul.f32 %v12869_v16, %v12803_v43  ;;  %v14819_v50 = vld [vmem:[#allocation30_spill] sm:$0xff] }
 0x34f   : > { %v5486_v45 = vadd.f32 %v5468_v32, %v5443_v58  ;;  %v5552_v42 = vmul.f32 %v12880_v24, %v12793_v46  ;;  %v5568_v44 = vadd.f32 %v5550_v48, %v5525_v18  ;;  %v5593_v14 = vmul.f32 %v12266_v1, %v12690_v27 }
 0x350   : > { %v6423_v53 = vadd.f32 %v12797_v25, %v6380_v22  ;;  %v5527_v52 = vadd.f32 %v5509_v17, %v5484_v6  ;;  %v5554_v63 = vmul.f32 %v12880_v24, %v12841_v29  ;;  %v5595_v4 = vmul.f32 %v12266_v1, %v12702_v38 }
 0x351   : > { %v5611_v5 = vadd.f32 %v5593_v14, %v5568_v44  ;;  %v5636_v58 = vmul.f32 %v12299_v20, %v12704_v15  ;;  %v5638_v59 = vmul.f32 %v12299_v20, %v12706_v54  ;;  %v5679_v13 = vmul.f32 %v12306_v57, %v12720_v3 }
 0x352   : > { %v6466_v11 = vadd.f32 %v12801_v34, %v6423_v53  ;;  %v5529_v25 = vadd.f32 %v5511_v35, %v5486_v45  ;;  %v5570_v6 = vadd.f32 %v5552_v42, %v5527_v52  ;;  %v5681_v32 = vmul.f32 %v12306_v57, %v12722_v36 }
 0x353   : > { %v5654_v18 = vadd.f32 %v5636_v58, %v5611_v5  ;;  %v12909_v1 = vmul.f32 %v12314_v30, %v12732_v10  ;;  %v5722_v48 = vmul.f32 %v12314_v30, %v12742_v55  ;;  %v5779_v20 = vadd.f32 %v12374_v28, %v12381_v26 }
 0x354   : > { %v6509_v22 = vadd.f32 %v12818_v62, %v6466_v11  ;;  %v5613_v17 = vadd.f32 %v5595_v4, %v5570_v6  ;;  %v5724_v34 = vmul.f32 %v12314_v30, %v12758_v8  ;;  %v12920_v57 = vmul.f32 %v12316_v0, %v12764_v47  ;;  %v14794_v4 = vld [vmem:[#allocation18_spill] sm:$0xff] }
 0x355   : > { %14790 = vst [vmem:[#allocation74_spill] sm:$0xff] %v12909_v1  ;;  %v5697_v35 = vadd.f32 %v5679_v13, %v5654_v18  ;;  %v5765_v45 = vmul.f32 %v12316_v0, %v12778_v51  ;;  %v5822_v42 = vadd.f32 %v12377_v49, %v5779_v20  ;;  %v5847_v44 = vmul.f32 %v12618_v33, %v12346_v40  ;;  %v14795_v13 = vld [vmem:[#allocation19_spill] sm:$0xff] }
 0x356   : > { %14791 = vst [vmem:[#allocation75_spill] sm:$0xff] %v12920_v57  ;;  %v6552_v28 = vadd.f32 %v12835_v19, %v6509_v22  ;;  %v12928_v26 = vadd.f32 %v5554_v63, %v5529_v25  ;;  %v5656_v62 = vadd.f32 %v5638_v59, %v5613_v17  ;;  %v5767_v30 = vmul.f32 %v12316_v0, %v12803_v43  ;;  %v13018_v57 = vld [vmem:[#allocation3 + $0x64] sm:$0xff] }
 0x357   : > { %v5740_v14 = vadd.f32 %v5722_v48, %v5697_v35  ;;  %v12934_v53 = vmul.f32 %v12362_v9, %v12781_v56  ;;  %v5865_v52 = vadd.f32 %v5847_v44, %v5822_v42  ;;  %v5890_v49 = vmul.f32 %v12636_v21, %v14794_v4  ;;  %v14796_v35 = vld [vmem:[#allocation34_spill] sm:$0xff]  ;;  %v14801_v4 = vld [vmem:[#allocation37_spill] sm:$0xff] }
 0x358   : > { %14792 = vst [vmem:[#allocation76_spill] sm:$0xff] %v12928_v26  ;;  %v6595_v5 = vadd.f32 %v12839_v23, %v6552_v28  ;;  %v5699_v40 = vadd.f32 %v5681_v32, %v5656_v62  ;;  %v5808_v19 = vmul.f32 %v12362_v9, %v12793_v46  ;;  %v5810_v63 = vmul.f32 %v12362_v9, %v12841_v29 }
 0x359   : > { %14793 = vst [vmem:[#allocation77_spill] sm:$0xff] %v12934_v53  ;;  %v5783_v58 = vadd.f32 %v5765_v45, %v5740_v14  ;;  %v5851_v0 = vmul.f32 %v12618_v33, %v12702_v38  ;;  %v5908_v59 = vadd.f32 %v5890_v49, %v5865_v52  ;;  %v5933_v11 = vmul.f32 %v12644_v60, %v14795_v13  ;;  %v12973_v14 = vld [vmem:[#allocation3 + $0x61] sm:$0xff] }
 0x35a   : > { %6828 = vrot.lane.b32.xlu0 %v6595_v5, %s9773_s29  ;;  %9556 = vmatprep.mubr.msk.f32.mxu0 %vm532_vm0, %v6595_v5  ;;  %v5742_v23 = vadd.f32 %v5724_v34, %v5699_v40  ;;  %v5894_v25 = vmul.f32 %v12636_v21, %v12706_v54  ;;  %v5937_v6 = vmul.f32 %v12644_v60, %v12722_v36  ;;  %v14803_v40 = vld [vmem:[#allocation40_spill] sm:$0xff] }
 0x35b   : > { %v5826_v32 = vadd.f32 %v5808_v19, %v5783_v58  ;;  %v5951_v18 = vadd.f32 %v5933_v11, %v5908_v59  ;;  %v5976_v48 = vmul.f32 %v12646_v61, %v12732_v10  ;;  %v5980_v20 = vmul.f32 %v12646_v61, %v12758_v8  ;;  %v14797_v10 = vld [vmem:[#allocation35_spill] sm:$0xff]  ;;  %14799 = vst [vmem:[#allocation19_spill] sm:$0xff] %v12973_v14  ;;  %v14804_v59 = vld [vmem:[#allocation41_spill] sm:$0xff]  ;;  %v14815_v53 = vld [vmem:[#allocation52_spill] sm:$0xff] }
 0x35c   : > { %v5785_v22 = vadd.f32 %v5767_v30, %v5742_v23  ;;  %v6019_v17 = vmul.f32 %v12652_v41, %v12764_v47  ;;  %v12961_v34 = vmul.f32 %v12652_v41, %v12803_v43  ;;  %v6062_v45 = vmul.f32 %v14796_v35, %v12781_v56  ;;  %v12971_v30 = vld [vmem:[#allocation3 + $0x60] sm:$0xff]  ;;  %v14800_v47 = vld [vmem:[#allocation36_spill] sm:$0xff]  ;;  %v14802_v56 = vld [vmem:[#allocation38_spill] sm:$0xff]  ;;  %14816 = vst [vmem:[#allocation37_spill] sm:$0xff] %v13018_v57 }
 0x35d   : > { %v5869_v42 = vadd.f32 %v5851_v0, %v5826_v32  ;;  %v5994_v44 = vadd.f32 %v5976_v48, %v5951_v18  ;;  %v12967_v28 = vmul.f32 %v14796_v35, %v12841_v29  ;;  %v6105_v62 = vmul.f32 %v14797_v10, %v12690_v27  ;;  %14798 = vst [vmem:[#allocation18_spill] sm:$0xff] %v12971_v30  ;;  %v14805_v11 = vld [vmem:[#allocation53_spill] sm:$0xff]  ;;  %v12991_v32 = vld [vmem:[#allocation3 + $0x62] sm:$0xff]  ;;  %v14808_v48 = vld [vmem:[#allocation10_spill] sm:$0xff] }
 0x35e   : > { %v6148_v52 = vmul.f32 %v14800_v47, %v12704_v15  ;;  %v6191_v49 = vmul.f32 %v14801_v4, %v12720_v3  ;;  %v6234_v5 = vmul.f32 %v14802_v56, %v12742_v55  ;;  %v6277_v19 = vmul.f32 %v14803_v40, %v12778_v51  ;;  %14806 = vst [vmem:[#allocation34_spill] sm:$0xff] %v12991_v32  ;;  %v14809_v3 = vld [vmem:[#allocation28_spill] sm:$0xff]  ;;  %v14810_v15 = vld [vmem:[#allocation9_spill] sm:$0xff] }
 0x35f   : > { %v5912_v58 = vadd.f32 %v5894_v25, %v5869_v42  ;;  %v6037_v0 = vadd.f32 %v6019_v17, %v5994_v44  ;;  %v12985_v13 = vmul.f32 %v14804_v59, %v12793_v46  ;;  %v12989_v23 = vmul.f32 %v14805_v11, %v12702_v38  ;;  %v14811_v25 = vld [vmem:[#allocation49_spill] sm:$0xff]  ;;  %v13001_v42 = vld [vmem:[#allocation3 + $0x63] sm:$0xff]  ;;  %v14813_v46 = vld [vmem:[#allocation58_spill] sm:$0xff] }
 0x360   : > { %v12993_v18 = vadd.f32 %v5810_v63, %v5785_v22  ;;  %v4853_v55 = vadd.f32 %v14809_v3, %v14808_v48  ;;  %v5022_v51 = vmul.f32 %v14810_v15, %v12971_v30  ;;  %v5063_v17 = vmul.f32 %v14811_v25, %v12973_v14  ;;  %14812 = vst [vmem:[#allocation36_spill] sm:$0xff] %v13001_v42  ;;  %v14814_v22 = vld [vmem:[#allocation51_spill] sm:$0xff] }
 0x361   : > { %v6080_v44 = vadd.f32 %v6062_v45, %v6037_v0  ;;  %v13005_v38 = vmul.f32 %v12783_v2, %v12706_v54  ;;  %v13009_v63 = vmul.f32 %v14813_v46, %v12722_v36  ;;  %v13013_v3 = vmul.f32 %v12807_v7, %v12758_v8  ;;  %v13020_v45 = vld [vmem:[#allocation3 + $0x65] sm:$0xff] }
 0x362   : > { %14807 = vst [vmem:[#allocation35_spill] sm:$0xff] %v12993_v18  ;;  %v4889_v48 = vmul.f32 %v14814_v22, %v4853_v55  ;;  %v5081_v18 = vadd.f32 %v5063_v17, %v5022_v51  ;;  %v5122_v27 = vmul.f32 %v14815_v53, %v12991_v32  ;;  %v5340_v0 = vmul.f32 %v12829_v31, %v12971_v30  ;;  %v14817_v8 = vld [vmem:[#allocation55_spill] sm:$0xff]  ;;  %v14818_v51 = vld [vmem:[#allocation56_spill] sm:$0xff] }
 0x363   : > { %v5955_v54 = vadd.f32 %v5937_v6, %v5912_v58  ;;  %v6123_v36 = vadd.f32 %v6105_v62, %v6080_v44  ;;  %v13026_v1 = vmul.f32 %v12822_v37, %v12803_v43  ;;  %v5181_v55 = vmul.f32 %v14817_v8, %v13001_v42  ;;  %v14820_v31 = vld [vmem:[#allocation59_spill] sm:$0xff]  ;;  %v14822_v44 = vld [vmem:[#allocation70_spill] sm:$0xff] }
 0x364   : > { %v4925_v17 = vadd.f32 %v14818_v51, %v4889_v48  ;;  %v5140_v26 = vadd.f32 %v5122_v27, %v5081_v18  ;;  %v5358_v53 = vadd.f32 %v5340_v0, %v14819_v50  ;;  %v5383_v7 = vmul.f32 %v12846_v12, %v12973_v14  ;;  %v14821_v62 = vld [vmem:[#allocation63_spill] sm:$0xff] }
 0x365   : > { %v6166_v22 = vadd.f32 %v6148_v52, %v6123_v36  ;;  %v5240_v6 = vmul.f32 %v14820_v31, %v13018_v57  ;;  %v5299_v58 = vmul.f32 %v14821_v62, %v13020_v45  ;;  %v5426_v43 = vmul.f32 %v14822_v44, %v12991_v32  ;;  %v13040_v48 = vld [vmem:[#allocation2 + $0x10] ss:$0 sm:$0xff]  ;;  %v13046_v52 = vld [vmem:[#allocation2 + $0x11] ss:$0 sm:$0xff] }
 0x366   : > { %v4954_v37 = vmax.f32 %v4925_v17, 0.0  ;;  %v5199_v8 = vadd.f32 %v5181_v55, %v5140_v26  ;;  %v5401_v46 = vadd.f32 %v5383_v7, %v5358_v53  ;;  %14823 = vst [vmem:[#allocation38_spill] sm:$0xff] %v13040_v48  ;;  %v5596_v27 = vmul.f32 %v13040_v48, %v12971_v30  ;;  %v14824_v7 = vld [vmem:[#allocation32_spill] sm:$0xff]  ;;  %v14826_v44 = vld [vmem:[#allocation31_spill] sm:$0xff] }
 0x367   : > { %v5998_v50 = vadd.f32 %v5980_v20, %v5955_v54  ;;  %v6209_v18 = vadd.f32 %v6191_v49, %v6166_v22  ;;  %v5469_v36 = vmul.f32 %v12855_v39, %v13001_v42  ;;  %v5639_v0 = vmul.f32 %v13046_v52, %v12973_v14  ;;  %v14825_v55 = vld [vmem:[#allocation20_spill] sm:$0xff]  ;;  %v14827_v54 = vld [vmem:[#allocation65_spill] sm:$0xff]  ;;  %v13060_v22 = vld [vmem:[#allocation2 + $0x12] ss:$0 sm:$0xff] }
 0x368   : > { %4983 = vst.msk [vmem:[#allocation3 + $0xc8] sm:$0xff] %vm1687_vm2, %v4954_v37  ;;  %v5258_v17 = vadd.f32 %v5240_v6, %v5199_v8  ;;  %v5444_v26 = vadd.f32 %v5426_v43, %v5401_v46  ;;  %v5614_v53 = vadd.f32 %v5596_v27, %v14824_v7  ;;  %v5694_v62 = vadd.f32 %v14826_v44, %v14825_v55  ;;  %v14829_v6 = vld [vmem:[#allocation33_spill] sm:$0xff] }
 0x369   : > { %v6252_v48 = vadd.f32 %v6234_v5, %v6209_v18  ;;  %v13056_v20 = vmul.f32 %v14827_v54, %v12841_v29  ;;  %v5512_v49 = vmul.f32 %v12869_v16, %v13018_v57  ;;  %v5682_v37 = vmul.f32 %v13060_v22, %v12991_v32  ;;  %v13072_v54 = vld [vmem:[#allocation2 + $0x13] ss:$0 sm:$0xff] }
 0x36a   : > { %v13064_v8 = vadd.f32 %v5299_v58, %v5258_v17  ;;  %v5487_v46 = vadd.f32 %v5469_v36, %v5444_v26  ;;  %v5657_v43 = vadd.f32 %v5639_v0, %v5614_v53  ;;  %v5737_v27 = vadd.f32 %v14829_v6, %v5694_v62  ;;  %v14830_v36 = vld [vmem:[#allocation17_spill] sm:$0xff]  ;;  %v13078_v17 = vld [vmem:[#allocation2 + $0x14] ss:$0 sm:$0xff] }
 0x36b   : > { %v6041_v5 = vadd.f32 %v12961_v34, %v5998_v50  ;;  %v6295_v44 = vadd.f32 %v6277_v19, %v6252_v48  ;;  %v5555_v18 = vmul.f32 %v12880_v24, %v13020_v45  ;;  %v5852_v7 = vmul.f32 %v12618_v33, %v12971_v30  ;;  %v14831_v19 = vld [vmem:[#allocation48_spill] sm:$0xff] }
 0x36c   : > { %14828 = vst [vmem:[#allocation40_spill] sm:$0xff] %v13064_v8  ;;  %v5530_v55 = vadd.f32 %v5512_v49, %v5487_v46  ;;  %v5700_v29 = vadd.f32 %v5682_v37, %v5657_v43  ;;  %v5725_v58 = vmul.f32 %v13072_v54, %v13001_v42  ;;  %v5780_v0 = vadd.f32 %v14830_v36, %v5737_v27  ;;  %v14833_v49 = vld [vmem:[#allocation14_spill] sm:$0xff]  ;;  %v14834_v46 = vld [vmem:[#allocation21_spill] sm:$0xff] }
 0x36d   : > { %v6338_v62 = vadd.f32 %v12985_v13, %v6295_v44  ;;  %v5768_v34 = vmul.f32 %v13078_v17, %v13018_v57  ;;  %v5870_v48 = vadd.f32 %v5852_v7, %v14831_v19  ;;  %v5895_v50 = vmul.f32 %v12636_v21, %v12973_v14  ;;  %v14838_v19 = vld [vmem:[#allocation24_spill] sm:$0xff] }
 0x36e   : > { %v13085_v26 = vadd.f32 %v5555_v18, %v5530_v55  ;;  %v5743_v53 = vadd.f32 %v5725_v58, %v5700_v29  ;;  %v5823_v37 = vadd.f32 %v14833_v49, %v5780_v0  ;;  %v5848_v43 = vmul.f32 %v12618_v33, %v14834_v46  ;;  %v14836_v29 = vld [vmem:[#allocation4_spill] sm:$0xff]  ;;  %v14837_v0 = vld [vmem:[#allocation22_spill] sm:$0xff] }
 0x36f   : > { %v13091_v13 = vadd.f32 %v12967_v28, %v6041_v5  ;;  %v6381_v6 = vadd.f32 %v12989_v23, %v6338_v62  ;;  %v5913_v27 = vadd.f32 %v5895_v50, %v5870_v48  ;;  %v5938_v44 = vmul.f32 %v12644_v60, %v12991_v32  ;;  %v14841_v49 = vld [vmem:[#allocation6_spill] sm:$0xff] }
 0x370   : > { %14832 = vst [vmem:[#allocation41_spill] sm:$0xff] %v13085_v26  ;;  %v5786_v7 = vadd.f32 %v5768_v34, %v5743_v53  ;;  %v5811_v18 = vmul.f32 %v12362_v9, %v13020_v45  ;;  %v5866_v55 = vadd.f32 %v5848_v43, %v5823_v37  ;;  %v5891_v58 = vmul.f32 %v12636_v21, %v14836_v29  ;;  %v14840_v9 = vld [vmem:[#allocation26_spill] sm:$0xff] }
 0x371   : > { %14835 = vst [vmem:[#allocation53_spill] sm:$0xff] %v13091_v13  ;;  %v6424_v36 = vadd.f32 %v13005_v38, %v6381_v6  ;;  %v5934_v28 = vmul.f32 %v12644_v60, %v14837_v0  ;;  %v5956_v5 = vadd.f32 %v5938_v44, %v5913_v27  ;;  %v5977_v23 = vmul.f32 %v12646_v61, %v14838_v19  ;;  %v14842_v27 = vld [vmem:[#allocation5_spill] sm:$0xff]  ;;  %v14847_v0 = vld [vmem:[#allocation27_spill] sm:$0xff]  ;;  %v14853_v13 = vld [vmem:[#allocation58_spill] sm:$0xff] }
 0x372   : > { %v13105_v62 = vadd.f32 %v5811_v18, %v5786_v7  ;;  %v5909_v48 = vadd.f32 %v5891_v58, %v5866_v55  ;;  %v5981_v34 = vmul.f32 %v12646_v61, %v13001_v42  ;;  %v6020_v50 = vmul.f32 %v12652_v41, %v14840_v9  ;;  %v14843_v7 = vld [vmem:[#allocation23_spill] sm:$0xff]  ;;  %v13124_v55 = vld [vmem:[#allocation3 + $0x68] sm:$0xff]  ;;  %v14846_v58 = vld [vmem:[#allocation25_spill] sm:$0xff] }
 0x373   : > { %v6467_v53 = vadd.f32 %v13009_v63, %v6424_v36  ;;  %v6024_v38 = vmul.f32 %v12652_v41, %v13018_v57  ;;  %v6063_v37 = vmul.f32 %v14796_v35, %v14841_v49  ;;  %v13118_v46 = vmul.f32 %v14796_v35, %v13020_v45  ;;  %14844 = vst [vmem:[#allocation28_spill] sm:$0xff] %v13124_v55  ;;  %v13126_v63 = vld [vmem:[#allocation3 + $0x69] sm:$0xff] }
 0x374   : > { %14839 = vst [vmem:[#allocation10_spill] sm:$0xff] %v13105_v62  ;;  %v5952_v43 = vadd.f32 %v5934_v28, %v5909_v48  ;;  %v5999_v6 = vadd.f32 %v5981_v34, %v5956_v5  ;;  %v6106_v44 = vmul.f32 %v14797_v10, %v14842_v27  ;;  %v6149_v18 = vmul.f32 %v14800_v47, %v14843_v7  ;;  %v14848_v28 = vld [vmem:[#allocation7_spill] sm:$0xff]  ;;  %v14849_v34 = vld [vmem:[#allocation8_spill] sm:$0xff]  ;;  %v14857_v62 = vld [vmem:[#allocation62_spill] sm:$0xff] }
 0x375   : > { %14845 = vst [vmem:[#allocation30_spill] sm:$0xff] %v13126_v63  ;;  %v6510_v29 = vadd.f32 %v13013_v3, %v6467_v53  ;;  %v6192_v36 = vmul.f32 %v14801_v4, %v14846_v58  ;;  %v6235_v19 = vmul.f32 %v14802_v56, %v14847_v0  ;;  %v13135_v5 = vmul.f32 %v14803_v40, %v14848_v28  ;;  %v14850_v3 = vld [vmem:[#allocation11_spill] sm:$0xff]  ;;  %v14851_v53 = vld [vmem:[#allocation16_spill] sm:$0xff] }
 0x376   : > { %v5995_v48 = vadd.f32 %v5977_v23, %v5952_v43  ;;  %v13139_v9 = vmul.f32 %v14804_v59, %v14849_v34  ;;  %v13143_v49 = vmul.f32 %v14805_v11, %v12971_v30  ;;  %v4854_v27 = vadd.f32 %v14851_v53, %v14850_v3  ;;  %v13147_v7 = vld [vmem:[#allocation3 + $0x6a] sm:$0xff]  ;;  %v14854_v53 = vld [vmem:[#allocation51_spill] sm:$0xff] }
 0x377   : > { %14852 = vst [vmem:[#allocation32_spill] sm:$0xff] %v13147_v7  ;;  %v6553_v58 = vadd.f32 %v13026_v1, %v6510_v29  ;;  %v13152_v0 = vmul.f32 %v12783_v2, %v12973_v14  ;;  %v5023_v23 = vmul.f32 %v14810_v15, %v13124_v55  ;;  %v5064_v43 = vmul.f32 %v14811_v25, %v13126_v63  ;;  %v13165_v1 = vld [vmem:[#allocation3 + $0x6b] sm:$0xff] }
 0x378   : > { %v6038_v28 = vadd.f32 %v6020_v50, %v5995_v48  ;;  %v13158_v34 = vadd.f32 %v6024_v38, %v5999_v6  ;;  %v13162_v3 = vmul.f32 %v14853_v13, %v12991_v32  ;;  %v4890_v30 = vmul.f32 %v14854_v53, %v4854_v27  ;;  %14855 = vst [vmem:[#allocation20_spill] sm:$0xff] %v13165_v1  ;;  %v13167_v29 = vld [vmem:[#allocation3 + $0x6c] sm:$0xff]  ;;  %v14861_v13 = vld [vmem:[#allocation66_spill] sm:$0xff] }
 0x379   : > { %14856 = vst [vmem:[#allocation31_spill] sm:$0xff] %v13167_v29  ;;  %v6596_v14 = vadd.f32 %v13056_v20, %v6553_v58  ;;  %v13172_v26 = vmul.f32 %v14857_v62, %v13001_v42  ;;  %v5082_v8 = vadd.f32 %v5064_v43, %v5023_v23  ;;  %v14858_v50 = vld [vmem:[#allocation52_spill] sm:$0xff]  ;;  %v5341_v20 = vmul.f32 %v14861_v13, %v13124_v55  ;;  %v14862_v23 = vld [vmem:[#allocation55_spill] sm:$0xff] }
 0x37a   : > { %v5123_v38 = vmul.f32 %v14858_v50, %v13147_v7  ;;  %v6081_v6 = vadd.f32 %v6063_v37, %v6038_v28  ;;  %v14859_v48 = vld [vmem:[#allocation64_spill] sm:$0xff]  ;;  %v4926_v27 = vadd.f32 %v14818_v51, %v4890_v30  ;;  %v5182_v43 = vmul.f32 %v14862_v23, %v13165_v1  ;;  %v14864_v13 = vld [vmem:[#allocation63_spill] sm:$0xff] }
 0x37b   : > { %v13178_v32 = vmul.f32 %v14859_v48, %v13018_v57  ;;  %v13181_v53 = vld [vmem:[#allocation3 + $0x6d] sm:$0xff]  ;;  %6830 = vrot.lane.b32.xlu0 %v6596_v14, %s9773_s29  ;;  %9557 = vmatmul.mubr.msk.f32.vlgmr.msra.gmra.mxu0 %vm532_vm0, %v6596_v14  ;;  %v5241_v37 = vmul.f32 %v14820_v31, %v13167_v29  ;;  %v5384_v51 = vmul.f32 %v12846_v12, %v13126_v63  ;;  %v14865_v14 = vld [vmem:[#allocation70_spill] sm:$0xff] }
 0x37c   : > { %v5141_v58 = vadd.f32 %v5123_v38, %v5082_v8  ;;  %v6124_v28 = vadd.f32 %v6106_v44, %v6081_v6  ;;  %v4955_v57 = vmax.f32 %v4926_v27, 0.0  ;;  %v14863_v42 = vld [vmem:[#allocation72_spill] sm:$0xff]  ;;  %v5300_v50 = vmul.f32 %v14864_v13, %v13181_v53  ;;  %v14866_v38 = vld [vmem:[#allocation38_spill] sm:$0xff]  ;;  %v14868_v13 = vld [vmem:[#allocation29_spill] sm:$0xff] }
 0x37d   : > { %14860 = vst [vmem:[#allocation33_spill] sm:$0xff] %v13178_v32  ;;  %v5359_v30 = vadd.f32 %v5341_v20, %v14863_v42  ;;  %v5427_v8 = vmul.f32 %v14865_v14, %v13147_v7  ;;  %v5597_v23 = vmul.f32 %v14866_v38, %v13124_v55  ;;  %v5470_v42 = vmul.f32 %v12855_v39, %v13165_v1  ;;  %v14867_v20 = vld [vmem:[#allocation76_spill] sm:$0xff]  ;;  %v14869_v14 = vld [vmem:[#allocation74_spill] sm:$0xff] }
 0x37e   : > { %v5200_v48 = vadd.f32 %v5182_v43, %v5141_v58  ;;  %v6167_v32 = vadd.f32 %v6149_v18, %v6124_v28  ;;  %4984 = vst.msk [vmem:[#allocation3 + $0xd0] sm:$0xff] %vm1687_vm2, %v4955_v57  ;;  %v5513_v6 = vmul.f32 %v12869_v16, %v13167_v29  ;;  %v5640_v43 = vmul.f32 %v13046_v52, %v13126_v63 }
 0x37f   : > { %v5402_v44 = vadd.f32 %v5384_v51, %v5359_v30  ;;  %v5615_v58 = vadd.f32 %v5597_v23, %v14867_v20  ;;  %v5738_v31 = vadd.f32 %v14869_v14, %v14868_v13  ;;  %v5556_v57 = vmul.f32 %v12880_v24, %v13181_v53  ;;  %v14872_v13 = vld [vmem:[#allocation42_spill] sm:$0xff]  ;;  %v14874_v24 = vld [vmem:[#allocation35_spill] sm:$0xff] }
 0x380   : > { %v5259_v27 = vadd.f32 %v5241_v37, %v5200_v48  ;;  %v6210_v38 = vadd.f32 %v6192_v36, %v6167_v32  ;;  %v5683_v51 = vmul.f32 %v13060_v22, %v13147_v7  ;;  %v14871_v48 = vld [vmem:[#allocation75_spill] sm:$0xff]  ;;  %v5853_v23 = vmul.f32 %v12618_v33, %v13124_v55 }
 0x381   : > { %v5445_v18 = vadd.f32 %v5427_v8, %v5402_v44  ;;  %v5658_v30 = vadd.f32 %v5640_v43, %v5615_v58  ;;  %v5781_v37 = vadd.f32 %v14871_v48, %v5738_v31  ;;  %v5726_v32 = vmul.f32 %v13072_v54, %v13165_v1  ;;  %v14873_v8 = vld [vmem:[#allocation77_spill] sm:$0xff] }
 0x382   : > { %v13214_v28 = vadd.f32 %v5300_v50, %v5259_v27  ;;  %v6253_v20 = vadd.f32 %v6235_v19, %v6210_v38  ;;  %v5849_v36 = vmul.f32 %v12618_v33, %v14872_v13  ;;  %v5871_v50 = vadd.f32 %v5853_v23, %v14874_v24  ;;  %v14875_v38 = vld [vmem:[#allocation44_spill] sm:$0xff] }
 0x383   : > { %v5488_v16 = vadd.f32 %v5470_v42, %v5445_v18  ;;  %v5701_v14 = vadd.f32 %v5683_v51, %v5658_v30  ;;  %v5824_v44 = vadd.f32 %v14873_v8, %v5781_v37  ;;  %v5896_v27 = vmul.f32 %v12636_v21, %v13126_v63  ;;  %v14876_v30 = vld [vmem:[#allocation65_spill] sm:$0xff]  ;;  %v14880_v8 = vld [vmem:[#allocation50_spill] sm:$0xff] }
 0x384   : > { %14870 = vst [vmem:[#allocation17_spill] sm:$0xff] %v13214_v28  ;;  %v6296_v31 = vadd.f32 %v13135_v5, %v6253_v20  ;;  %v5769_v19 = vmul.f32 %v13078_v17, %v13167_v29  ;;  %v5892_v42 = vmul.f32 %v12636_v21, %v14875_v38  ;;  %v5939_v51 = vmul.f32 %v12644_v60, %v13147_v7 }
 0x385   : > { %v5531_v58 = vadd.f32 %v5513_v6, %v5488_v16  ;;  %v5744_v43 = vadd.f32 %v5726_v32, %v5701_v14  ;;  %v5867_v18 = vadd.f32 %v5849_v36, %v5824_v44  ;;  %v5914_v48 = vadd.f32 %v5896_v27, %v5871_v50  ;;  %v14878_v16 = vld [vmem:[#allocation46_spill] sm:$0xff]  ;;  %v13248_v14 = vld [vmem:[#allocation2 + $0x15] ss:$0 sm:$0xff] }
 0x386   : > { %v6339_v24 = vadd.f32 %v13139_v9, %v6296_v31  ;;  %v6579_v37 = vmul.f32 %v14876_v30, %v13020_v45  ;;  %v5935_v5 = vmul.f32 %v12644_v60, %v14878_v16  ;;  %v5982_v32 = vmul.f32 %v12646_v61, %v13165_v1  ;;  %v14881_v31 = vld [vmem:[#allocation57_spill] sm:$0xff]  ;;  %v14886_v16 = vld [vmem:[#allocation47_spill] sm:$0xff] }
 0x387   : > { %v13237_v23 = vadd.f32 %v5556_v57, %v5531_v58  ;;  %v5787_v6 = vadd.f32 %v5769_v19, %v5744_v43  ;;  %v5910_v20 = vadd.f32 %v5892_v42, %v5867_v18  ;;  %v5957_v13 = vadd.f32 %v5939_v51, %v5914_v48  ;;  %v14883_v42 = vld [vmem:[#allocation43_spill] sm:$0xff]  ;;  %v14885_v51 = vld [vmem:[#allocation45_spill] sm:$0xff] }
 0x388   : > { %v13245_v36 = vadd.f32 %v13118_v46, %v13158_v34  ;;  %v6382_v9 = vadd.f32 %v13143_v49, %v6339_v24  ;;  %v5812_v57 = vmul.f32 %v13248_v14, %v13181_v53  ;;  %v5978_v44 = vmul.f32 %v12646_v61, %v14880_v8  ;;  %v14882_v34 = vld [vmem:[#allocation60_spill] sm:$0xff]  ;;  %v14888_v8 = vld [vmem:[#allocation61_spill] sm:$0xff] }
 0x389   : > { %14877 = vst [vmem:[#allocation48_spill] sm:$0xff] %v13237_v23  ;;  %v5953_v50 = vadd.f32 %v5935_v5, %v5910_v20  ;;  %v6000_v27 = vadd.f32 %v5982_v32, %v5957_v13  ;;  %v6021_v58 = vmul.f32 %v12652_v41, %v14881_v31  ;;  %v6025_v19 = vmul.f32 %v12652_v41, %v13167_v29  ;;  %v13271_v20 = vld [vmem:[#allocation3 + $0x70] sm:$0xff]  ;;  %v14887_v32 = vld [vmem:[#allocation54_spill] sm:$0xff] }
 0x38a   : > { %14879 = vst [vmem:[#allocation14_spill] sm:$0xff] %v13245_v36  ;;  %v6425_v46 = vadd.f32 %v13152_v0, %v6382_v9  ;;  %v6064_v49 = vmul.f32 %v14796_v35, %v14882_v34  ;;  %v6068_v38 = vmul.f32 %v14796_v35, %v13181_v53  ;;  %v6107_v43 = vmul.f32 %v14797_v10, %v14883_v42  ;;  %v13273_v0 = vld [vmem:[#allocation3 + $0x71] sm:$0xff]  ;;  %v14890_v42 = vld [vmem:[#allocation12_spill] sm:$0xff] }
 0x38b   : > { %v13265_v18 = vadd.f32 %v5812_v57, %v5787_v6  ;;  %v5996_v48 = vadd.f32 %v5978_v44, %v5953_v50  ;;  %v6150_v24 = vmul.f32 %v14800_v47, %v14885_v51  ;;  %v6193_v5 = vmul.f32 %v14801_v4, %v14886_v16  ;;  %v14889_v57 = vld [vmem:[#allocation67_spill] sm:$0xff]  ;;  %v13315_v23 = vld [vmem:[#allocation3 + $0x74] sm:$0xff] }
 0x38c   : > { %v6468_v13 = vadd.f32 %v13162_v3, %v6425_v46  ;;  %v6236_v9 = vmul.f32 %v14802_v56, %v14887_v32  ;;  %v6279_v6 = vmul.f32 %v14803_v40, %v14888_v8  ;;  %v13282_v44 = vmul.f32 %v14804_v59, %v14889_v57  ;;  %v14891_v51 = vld [vmem:[#allocation15_spill] sm:$0xff]  ;;  %v13290_v3 = vld [vmem:[#allocation3 + $0x72] sm:$0xff]  ;;  %14897 = vst [vmem:[#allocation22_spill] sm:$0xff] %v13315_v23 }
 0x38d   : > { %14884 = vst [vmem:[#allocation21_spill] sm:$0xff] %v13265_v18  ;;  %v6039_v50 = vadd.f32 %v6021_v58, %v5996_v48  ;;  %v6043_v31 = vadd.f32 %v6025_v19, %v6000_v27  ;;  %v13286_v34 = vmul.f32 %v14805_v11, %v13124_v55  ;;  %v4855_v16 = vadd.f32 %v14891_v51, %v14890_v42  ;;  %v13301_v58 = vld [vmem:[#allocation3 + $0x73] sm:$0xff]  ;;  %v14896_v55 = vld [vmem:[#allocation52_spill] sm:$0xff] }
 0x38e   : > { %v6511_v46 = vadd.f32 %v13172_v26, %v6468_v13  ;;  %v13295_v32 = vmul.f32 %v12783_v2, %v13126_v63  ;;  %v5024_v8 = vmul.f32 %v14810_v15, %v13271_v20  ;;  %v5065_v27 = vmul.f32 %v14811_v25, %v13273_v0  ;;  %v14892_v48 = vld [vmem:[#allocation58_spill] sm:$0xff]  ;;  %v14894_v13 = vld [vmem:[#allocation51_spill] sm:$0xff]  ;;  %v14895_v51 = vld [vmem:[#allocation33_spill] sm:$0xff] }
 0x38f   : > { %v6082_v19 = vadd.f32 %v6064_v49, %v6039_v50  ;;  %v13305_v57 = vmul.f32 %v14892_v48, %v13147_v7  ;;  %v13309_v26 = vmul.f32 %v14857_v62, %v13165_v1  ;;  %v4891_v42 = vmul.f32 %v14894_v13, %v4855_v16  ;;  %v14898_v49 = vld [vmem:[#allocation66_spill] sm:$0xff]  ;;  %v14899_v7 = vld [vmem:[#allocation64_spill] sm:$0xff]  ;;  %v14902_v16 = vld [vmem:[#allocation55_spill] sm:$0xff] }
 0x390   : > { %v6554_v36 = vadd.f32 %v14895_v51, %v6511_v46  ;;  %v5083_v63 = vadd.f32 %v5065_v27, %v5024_v8  ;;  %v5124_v18 = vmul.f32 %v14896_v55, %v13290_v3  ;;  %v5342_v50 = vmul.f32 %v14898_v49, %v13271_v20  ;;  %v14901_v1 = vld [vmem:[#allocation56_spill] sm:$0xff]  ;;  %v13326_v27 = vld [vmem:[#allocation3 + $0x75] sm:$0xff] }
 0x391   : > { %14893 = vst [vmem:[#allocation4_spill] sm:$0xff] %v13309_v26  ;;  %v6125_v28 = vadd.f32 %v6107_v43, %v6082_v19  ;;  %v13321_v25 = vmul.f32 %v14899_v7, %v13167_v29  ;;  %v4927_v26 = vadd.f32 %v14901_v1, %v4891_v42  ;;  %v5183_v13 = vmul.f32 %v14902_v16, %v13301_v58  ;;  %v14904_v51 = vld [vmem:[#allocation40_spill] sm:$0xff]  ;;  %v14905_v19 = vld [vmem:[#allocation59_spill] sm:$0xff] }
 0x392   : > { %v6597_v46 = vadd.f32 %v6579_v37, %v6554_v36  ;;  %v5142_v8 = vadd.f32 %v5124_v18, %v5083_v63  ;;  %14903 = vst [vmem:[#allocation26_spill] sm:$0xff] %v13326_v27  ;;  %v5360_v55 = vadd.f32 %v5342_v50, %v14904_v51  ;;  %v5385_v15 = vmul.f32 %v12846_v12, %v13273_v0  ;;  %v14907_v36 = vld [vmem:[#allocation38_spill] sm:$0xff]  ;;  %v14910_v12 = vld [vmem:[#allocation41_spill] sm:$0xff] }
 0x393   : > { %14900 = vst [vmem:[#allocation24_spill] sm:$0xff] %v13321_v25  ;;  %v6168_v49 = vadd.f32 %v6150_v24, %v6125_v28  ;;  %v4956_v43 = vmax.f32 %v4927_v26, 0.0  ;;  %v5242_v29 = vmul.f32 %v14905_v19, %v13315_v23  ;;  %v14906_v25 = vld [vmem:[#allocation70_spill] sm:$0xff]  ;;  %v5598_v18 = vmul.f32 %v14907_v36, %v13271_v20  ;;  %v14909_v28 = vld [vmem:[#allocation63_spill] sm:$0xff] }
 0x394   : > { %v5428_v42 = vmul.f32 %v14906_v25, %v13290_v3  ;;  %6832 = vrot.lane.b32.xlu1 %v6597_v46, %s9773_s29  ;;  %9559 = vmatprep.mubr.msk.f32.mxu0 %vm532_vm0, %v6597_v46  ;;  %v5201_v63 = vadd.f32 %v5183_v13, %v5142_v8  ;;  %v5403_v37 = vadd.f32 %v5385_v15, %v5360_v55 }
 0x395   : > { %v13339_v50 = vadd.f32 %v6068_v38, %v6043_v31  ;;  %v6211_v51 = vadd.f32 %v6193_v5, %v6168_v49  ;;  %4985 = vst.msk [vmem:[#allocation3 + $0xd8] sm:$0xff] %vm1687_vm2, %v4956_v43  ;;  %v5301_v24 = vmul.f32 %v14909_v28, %v13326_v27  ;;  %v5471_v26 = vmul.f32 %v12855_v39, %v13301_v58  ;;  %v14911_v5 = vld [vmem:[#allocation71_spill] sm:$0xff] }
 0x396   : > { %v5260_v19 = vadd.f32 %v5242_v29, %v5201_v63  ;;  %v5446_v25 = vadd.f32 %v5428_v42, %v5403_v37  ;;  %v5616_v46 = vadd.f32 %v5598_v18, %v14910_v12  ;;  %v5641_v15 = vmul.f32 %v13046_v52, %v13273_v0  ;;  %v14913_v63 = vld [vmem:[#allocation10_spill] sm:$0xff] }
 0x397   : > { %14908 = vst [vmem:[#allocation6_spill] sm:$0xff] %v13339_v50  ;;  %v6254_v55 = vadd.f32 %v6236_v9, %v6211_v51  ;;  %v13351_v38 = vmul.f32 %v14876_v30, %v13181_v53  ;;  %v5514_v31 = vmul.f32 %v14911_v5, %v13315_v23  ;;  %v5854_v13 = vmul.f32 %v12618_v33, %v13271_v20  ;;  %v14912_v9 = vld [vmem:[#allocation73_spill] sm:$0xff] }
 0x398   : > { %v13357_v49 = vadd.f32 %v5301_v24, %v5260_v19  ;;  %v5489_v29 = vadd.f32 %v5471_v26, %v5446_v25  ;;  %v5659_v8 = vadd.f32 %v5641_v15, %v5616_v46  ;;  %v5684_v12 = vmul.f32 %v13060_v22, %v13290_v3  ;;  %v14914_v19 = vld [vmem:[#allocation18_spill] sm:$0xff] }
 0x399   : > { %v6297_v43 = vadd.f32 %v6279_v6, %v6254_v55  ;;  %v5557_v42 = vmul.f32 %v14912_v9, %v13326_v27  ;;  %v5872_v37 = vadd.f32 %v5854_v13, %v14913_v63  ;;  %v5897_v18 = vmul.f32 %v12636_v21, %v13273_v0  ;;  %v14915_v55 = vld [vmem:[#allocation69_spill] sm:$0xff]  ;;  %v14916_v13 = vld [vmem:[#allocation19_spill] sm:$0xff] }
 0x39a   : > { %v5532_v51 = vadd.f32 %v5514_v31, %v5489_v29  ;;  %v5702_v50 = vadd.f32 %v5684_v12, %v5659_v8  ;;  %v5727_v33 = vmul.f32 %v13072_v54, %v13301_v58  ;;  %v6108_v25 = vmul.f32 %v14797_v10, %v14914_v19  ;;  %v13398_v19 = vld [vmem:[#allocation3 + $0x79] sm:$0xff] }
 0x39b   : > { %v6340_v24 = vadd.f32 %v13282_v44, %v6297_v43  ;;  %v5770_v6 = vmul.f32 %v13078_v17, %v13315_v23  ;;  %v5915_v26 = vadd.f32 %v5897_v18, %v5872_v37  ;;  %v5940_v46 = vmul.f32 %v12644_v60, %v13290_v3  ;;  %v14918_v37 = vld [vmem:[#allocation36_spill] sm:$0xff]  ;;  %14921 = vst [vmem:[#allocation23_spill] sm:$0xff] %v13398_v19 }
 0x39c   : > { %v13375_v15 = vadd.f32 %v5557_v42, %v5532_v51  ;;  %v5745_v21 = vadd.f32 %v5727_v33, %v5702_v50  ;;  %v6126_v31 = vadd.f32 %v6108_v25, %v14915_v55  ;;  %v6151_v29 = vmul.f32 %v14800_v47, %v14916_v13  ;;  %v14917_v42 = vld [vmem:[#allocation34_spill] sm:$0xff]  ;;  %v14919_v51 = vld [vmem:[#allocation37_spill] sm:$0xff]  ;;  %v14928_v13 = vld [vmem:[#allocation4_spill] sm:$0xff] }
 0x39d   : > { %v6383_v8 = vadd.f32 %v13286_v34, %v6340_v24  ;;  %v5813_v10 = vmul.f32 %v13248_v14, %v13326_v27  ;;  %v5958_v44 = vadd.f32 %v5940_v46, %v5915_v26  ;;  %v5983_v12 = vmul.f32 %v12646_v61, %v13301_v58  ;;  %v13396_v61 = vld [vmem:[#allocation3 + $0x78] sm:$0xff]  ;;  %v14922_v24 = vld [vmem:[#allocation13_spill] sm:$0xff] }
 0x39e   : > { %v6026_v60 = vmul.f32 %v12652_v41, %v13315_v23  ;;  %v6069_v50 = vmul.f32 %v14796_v35, %v13326_v27  ;;  %v6169_v43 = vadd.f32 %v6151_v29, %v6126_v31  ;;  %v6194_v63 = vmul.f32 %v14801_v4, %v14917_v42  ;;  %14920 = vst [vmem:[#allocation5_spill] sm:$0xff] %v13396_v61  ;;  %v13411_v46 = vld [vmem:[#allocation3 + $0x7a] sm:$0xff]  ;;  %v14926_v55 = vld [vmem:[#allocation49_spill] sm:$0xff] }
 0x39f   : > { %v6426_v47 = vadd.f32 %v13295_v32, %v6383_v8  ;;  %v5788_v34 = vadd.f32 %v5770_v6, %v5745_v21  ;;  %v6237_v18 = vmul.f32 %v14802_v56, %v14918_v37  ;;  %v6280_v33 = vmul.f32 %v14803_v40, %v14919_v51  ;;  %v14923_v6 = vld [vmem:[#allocation39_spill] sm:$0xff]  ;;  %14924 = vst [vmem:[#allocation25_spill] sm:$0xff] %v13411_v46  ;;  %v14931_v37 = vld [vmem:[#allocation66_spill] sm:$0xff]  ;;  %v14932_v51 = vld [vmem:[#allocation24_spill] sm:$0xff] }
 0x3a0   : > { %v6212_v41 = vadd.f32 %v6194_v63, %v6169_v43  ;;  %v6323_v35 = vmul.f32 %v14804_v59, %v13020_v45  ;;  %v6366_v4 = vmul.f32 %v14805_v11, %v13271_v20  ;;  %v6409_v32 = vmul.f32 %v12783_v2, %v13273_v0  ;;  %v14925_v11 = vld [vmem:[#allocation9_spill] sm:$0xff]  ;;  %v14930_v63 = vld [vmem:[#allocation52_spill] sm:$0xff] }
 0x3a1   : > { %v6469_v25 = vadd.f32 %v13305_v57, %v6426_v47  ;;  %v6001_v56 = vadd.f32 %v5983_v12, %v5958_v44  ;;  %v6452_v40 = vmul.f32 %v14892_v48, %v13290_v3  ;;  %v4856_v26 = vadd.f32 %v14923_v6, %v14922_v24  ;;  %v13419_v57 = vld [vmem:[#allocation3 + $0x7b] sm:$0xff] }
 0x3a2   : > { %v6255_v21 = vadd.f32 %v6237_v18, %v6212_v41  ;;  %v6495_v59 = vmul.f32 %v14857_v62, %v13301_v58  ;;  %v5025_v45 = vmul.f32 %v14925_v11, %v13396_v61  ;;  %v5066_v31 = vmul.f32 %v14926_v55, %v13398_v19  ;;  %14927 = vst [vmem:[#allocation27_spill] sm:$0xff] %v13419_v57  ;;  %v14929_v44 = vld [vmem:[#allocation51_spill] sm:$0xff] }
 0x3a3   : > { %v6512_v29 = vadd.f32 %v14928_v13, %v6469_v25  ;;  %v13422_v48 = vadd.f32 %v5813_v10, %v5788_v34  ;;  %v6538_v8 = vmul.f32 %v14899_v7, %v13315_v23  ;;  %v4892_v12 = vmul.f32 %v14929_v44, %v4856_v26  ;;  %v13435_v11 = vld [vmem:[#allocation3 + $0x7c] sm:$0xff]  ;;  %v13567_v23 = vld [vmem:[#allocation3 + $0x85] sm:$0xff] }
 0x3a4   : > { %v6298_v43 = vadd.f32 %v6280_v33, %v6255_v21  ;;  %v5084_v42 = vadd.f32 %v5066_v31, %v5025_v45  ;;  %v5125_v47 = vmul.f32 %v14930_v63, %v13411_v46  ;;  %v5343_v18 = vmul.f32 %v14931_v37, %v13396_v61  ;;  %14933 = vst [vmem:[#allocation7_spill] sm:$0xff] %v13435_v11  ;;  %v14934_v33 = vld [vmem:[#allocation17_spill] sm:$0xff]  ;;  %v14935_v21 = vld [vmem:[#allocation68_spill] sm:$0xff] }
 0x3a5   : > { %v6555_v41 = vadd.f32 %v14932_v51, %v6512_v29  ;;  %v6044_v24 = vadd.f32 %v6026_v60, %v6001_v56  ;;  %v4928_v25 = vadd.f32 %v14901_v1, %v4892_v12  ;;  %v5184_v10 = vmul.f32 %v14902_v16, %v13419_v57  ;;  %v14936_v1 = vld [vmem:[#allocation70_spill] sm:$0xff]  ;;  %v14939_v12 = vld [vmem:[#allocation59_spill] sm:$0xff]  ;;  %14963 = vst [vmem:[#allocation60_spill] sm:$0xff] %v13567_v23 }
 0x3a6   : > { %v6341_v34 = vadd.f32 %v6323_v35, %v6298_v43  ;;  %v5143_v6 = vadd.f32 %v5125_v47, %v5084_v42  ;;  %v5361_v26 = vadd.f32 %v5343_v18, %v14934_v33  ;;  %v5386_v45 = vmul.f32 %v14935_v21, %v13398_v19  ;;  %v13445_v35 = vld [vmem:[#allocation3 + $0x7d] sm:$0xff]  ;;  %v14940_v47 = vld [vmem:[#allocation48_spill] sm:$0xff] }
 0x3a7   : > { %v6598_v55 = vadd.f32 %v13351_v38, %v6555_v41  ;;  %v6581_v31 = vmul.f32 %v14876_v30, %v13326_v27  ;;  %v4957_v60 = vmax.f32 %v4928_v25, 0.0  ;;  %v5429_v56 = vmul.f32 %v14936_v1, %v13411_v46  ;;  %14937 = vst [vmem:[#allocation8_spill] sm:$0xff] %v13445_v35  ;;  %v13467_v25 = vld [vmem:[#allocation2 + $0x18] ss:$0 sm:$0xff] }
 0x3a8   : > { %v6384_v13 = vadd.f32 %v6366_v4, %v6341_v34  ;;  %v5202_v16 = vadd.f32 %v5184_v10, %v5143_v6  ;;  %v5404_v29 = vadd.f32 %v5386_v45, %v5361_v26  ;;  %v5599_v44 = vmul.f32 %v14907_v36, %v13396_v61  ;;  %14941 = vst [vmem:[#allocation16_spill] sm:$0xff] %v13467_v25  ;;  %v14942_v45 = vld [vmem:[#allocation21_spill] sm:$0xff]  ;;  %v13553_v27 = vld [vmem:[#allocation3 + $0x84] sm:$0xff] }
 0x3a9   : > { %6834 = vrot.lane.b32.xlu1 %v6598_v55, %s9773_s29  ;;  %9560 = vmatmul.mubr.msk.f32.gmra.mxu0 %vm532_vm0, %v6598_v55  ;;  %v13451_v38 = vadd.f32 %v6069_v50, %v6044_v24  ;;  %4986 = vst.msk [vmem:[#allocation3 + $0xe0] sm:$0xff] %vm1687_vm2, %v4957_v60  ;;  %v5243_v43 = vmul.f32 %v14939_v12, %v13435_v11  ;;  %v13476_v60 = vld [vmem:[#allocation2 + $0x19] ss:$0 sm:$0xff]  ;;  %14962 = vst [vmem:[#allocation57_spill] sm:$0xff] %v13553_v27 }
 0x3aa   : > { %v5472_v4 = vmul.f32 %v12855_v39, %v13419_v57  ;;  %v6427_v42 = vadd.f32 %v6409_v32, %v6384_v13  ;;  %v5447_v63 = vadd.f32 %v5429_v56, %v5404_v29  ;;  %v5617_v18 = vadd.f32 %v5599_v44, %v14940_v47  ;;  %14943 = vst [vmem:[#allocation62_spill] sm:$0xff] %v13476_v60 }
 0x3ab   : > { %14938 = vst [vmem:[#allocation11_spill] sm:$0xff] %v13451_v38  ;;  %v5642_v51 = vmul.f32 %v13046_v52, %v13398_v19  ;;  %v5302_v41 = vmul.f32 %v14909_v28, %v13445_v35  ;;  %v5515_v50 = vmul.f32 %v14911_v5, %v13435_v11  ;;  %v5685_v24 = vmul.f32 %v13060_v22, %v13411_v46 }
 0x3ac   : > { %v5855_v32 = vmul.f32 %v13467_v25, %v13396_v61  ;;  %v6470_v10 = vadd.f32 %v6452_v40, %v6427_v42  ;;  %v5261_v34 = vadd.f32 %v5243_v43, %v5202_v16  ;;  %v5490_v6 = vadd.f32 %v5472_v4, %v5447_v63  ;;  %v13484_v43 = vld [vmem:[#allocation2 + $0x1a] ss:$0 sm:$0xff]  ;;  %v13488_v42 = vld [vmem:[#allocation2 + $0x20] ss:$0 sm:$0xff] }
 0x3ad   : > { %v5660_v33 = vadd.f32 %v5642_v51, %v5617_v18  ;;  %v5558_v26 = vmul.f32 %v14912_v9, %v13445_v35  ;;  %v5728_v28 = vmul.f32 %v13072_v54, %v13419_v57  ;;  %v5898_v56 = vmul.f32 %v13476_v60, %v13398_v19  ;;  %14944 = vst [vmem:[#allocation72_spill] sm:$0xff] %v13488_v42  ;;  %v14945_v63 = vld [vmem:[#allocation28_spill] sm:$0xff] }
 0x3ae   : > { %v5873_v55 = vadd.f32 %v5855_v32, %v14942_v45  ;;  %v6513_v13 = vadd.f32 %v6495_v59, %v6470_v10  ;;  %v5533_v29 = vadd.f32 %v5515_v50, %v5490_v6  ;;  %v5771_v40 = vmul.f32 %v13078_v17, %v13435_v11  ;;  %v13496_v32 = vld [vmem:[#allocation2 + $0x1b] ss:$0 sm:$0xff]  ;;  %v14948_v6 = vld [vmem:[#allocation53_spill] sm:$0xff] }
 0x3af   : > { %v5703_v44 = vadd.f32 %v5685_v24, %v5660_v33  ;;  %v5814_v16 = vmul.f32 %v13248_v14, %v13445_v35  ;;  %v5941_v4 = vmul.f32 %v13484_v43, %v13411_v46  ;;  %v6109_v47 = vmul.f32 %v13488_v42, %v14945_v63  ;;  %v13501_v45 = vld [vmem:[#allocation2 + $0x21] ss:$0 sm:$0xff] }
 0x3b0   : > { %v5916_v12 = vadd.f32 %v5898_v56, %v5873_v55  ;;  %v6556_v59 = vadd.f32 %v6538_v8, %v6513_v13  ;;  %v13492_v18 = vadd.f32 %v5302_v41, %v5261_v34  ;;  %v13494_v51 = vadd.f32 %v5558_v26, %v5533_v29  ;;  %v14949_v55 = vld [vmem:[#allocation30_spill] sm:$0xff]  ;;  %v13505_v41 = vld [vmem:[#allocation2 + $0x1c] ss:$0 sm:$0xff]  ;;  %v13509_v26 = vld [vmem:[#allocation2 + $0x1d] ss:$0 sm:$0xff] }
 0x3b1   : > { %v5746_v50 = vadd.f32 %v5728_v28, %v5703_v44  ;;  %v5984_v10 = vmul.f32 %v13496_v32, %v13419_v57  ;;  %v6127_v33 = vadd.f32 %v6109_v47, %v14948_v6  ;;  %v6152_v56 = vmul.f32 %v13501_v45, %v14949_v55  ;;  %v13513_v13 = vld [vmem:[#allocation3 + $0x80] sm:$0xff]  ;;  %v13521_v47 = vld [vmem:[#allocation2 + $0x23] ss:$0 sm:$0xff]  ;;  %v13527_v6 = vld [vmem:[#allocation2 + $0x24] ss:$0 sm:$0xff] }
 0x3b2   : > { %14946 = vst [vmem:[#allocation76_spill] sm:$0xff] %v13492_v18  ;;  %14947 = vst [vmem:[#allocation29_spill] sm:$0xff] %v13494_v51  ;;  %v5959_v24 = vadd.f32 %v5941_v4, %v5916_v12  ;;  %v6599_v63 = vadd.f32 %v6581_v31, %v6556_v59  ;;  %v6027_v34 = vmul.f32 %v13505_v41, %v13435_v11  ;;  %v13515_v29 = vld [vmem:[#allocation3 + $0x81] sm:$0xff]  ;;  %v13517_v4 = vld [vmem:[#allocation2 + $0x22] ss:$0 sm:$0xff] }
 0x3b3   : > { %v5789_v8 = vadd.f32 %v5771_v40, %v5746_v50  ;;  %v6070_v28 = vmul.f32 %v13509_v26, %v13445_v35  ;;  %14950 = vst [vmem:[#allocation74_spill] sm:$0xff] %v13513_v13  ;;  %14951 = vst [vmem:[#allocation75_spill] sm:$0xff] %v13515_v29  ;;  %v6170_v12 = vadd.f32 %v6152_v56, %v6127_v33  ;;  %v14952_v31 = vld [vmem:[#allocation32_spill] sm:$0xff]  ;;  %v14955_v55 = vld [vmem:[#allocation31_spill] sm:$0xff] }
 0x3b4   : > { %v6002_v44 = vadd.f32 %v5984_v10, %v5959_v24  ;;  %v6195_v40 = vmul.f32 %v13517_v4, %v14952_v31  ;;  %v14953_v59 = vld [vmem:[#allocation20_spill] sm:$0xff]  ;;  %6836 = vrot.lane.b32.xlu0 %v6599_v63, %s9773_s29  ;;  %9562 = vmatprep.mubr.msk.f32.mxu0 %vm532_vm0, %v6599_v63  ;;  %14954 = vst [vmem:[#allocation42_spill] sm:$0xff] %v13527_v6  ;;  %v13531_v10 = vld [vmem:[#allocation2 + $0x25] ss:$0 sm:$0xff]  ;;  %v13535_v56 = vld [vmem:[#allocation2 + $0x28] ss:$0 sm:$0xff] }
 0x3b5   : > { %v6238_v50 = vmul.f32 %v13521_v47, %v14953_v59  ;;  %v6281_v24 = vmul.f32 %v13527_v6, %v14955_v55  ;;  %14956 = vst [vmem:[#allocation77_spill] sm:$0xff] %v13531_v10  ;;  %v6324_v33 = vmul.f32 %v13531_v10, %v13181_v53  ;;  %14957 = vst [vmem:[#allocation35_spill] sm:$0xff] %v13535_v56  ;;  %v13539_v59 = vld [vmem:[#allocation3 + $0x82] sm:$0xff]  ;;  %v13543_v51 = vld [vmem:[#allocation2] ss:$0 sm:$0xff] }
 0x3b6   : > { %v6367_v31 = vmul.f32 %v13535_v56, %v13396_v61  ;;  %14958 = vst [vmem:[#allocation44_spill] sm:$0xff] %v13539_v59  ;;  %v6213_v38 = vadd.f32 %v6195_v40, %v6170_v12  ;;  %v6410_v63 = vmul.f32 %v12783_v2, %v13398_v19  ;;  %14959 = vst [vmem:[#allocation65_spill] sm:$0xff] %v13543_v51  ;;  %v13547_v18 = vld [vmem:[#allocation2 + $0x1] ss:$0 sm:$0xff]  ;;  %v13551_v10 = vld [vmem:[#allocation3 + $0x83] sm:$0xff] }
 0x3b7   : > { %v5026_v55 = vmul.f32 %v13543_v51, %v13513_v13  ;;  %14960 = vst [vmem:[#allocation46_spill] sm:$0xff] %v13547_v18  ;;  %v5067_v53 = vmul.f32 %v13547_v18, %v13515_v29  ;;  %14961 = vst [vmem:[#allocation50_spill] sm:$0xff] %v13551_v10  ;;  %v13555_v61 = vadd.f32 %v5814_v16, %v5789_v8  ;;  %v13557_v40 = vld [vmem:[#allocation2 + $0x2a] ss:$0 sm:$0xff]  ;;  %v13563_v6 = vld [vmem:[#allocation2 + $0x2] ss:$0 sm:$0xff] }
 0x3b8   : > { %v6045_v12 = vadd.f32 %v6027_v34, %v6002_v44  ;;  %v6453_v2 = vmul.f32 %v13557_v40, %v13411_v46  ;;  %v6496_v19 = vmul.f32 %v14857_v62, %v13419_v57  ;;  %v6256_v51 = vadd.f32 %v6238_v50, %v6213_v38  ;;  %v13577_v62 = vld [vmem:[#allocation2 + $0x3] ss:$0 sm:$0xff]  ;;  %v13581_v44 = vld [vmem:[#allocation2 + $0x4] ss:$0 sm:$0xff] }
 0x3b9   : > { %v5085_v56 = vadd.f32 %v5067_v53, %v5026_v55  ;;  %v5126_v18 = vmul.f32 %v13563_v6, %v13539_v59  ;;  %v5344_v16 = vmul.f32 %v14931_v37, %v13513_v13  ;;  %v6539_v8 = vmul.f32 %v14899_v7, %v13435_v11 }
 0x3ba   : > { %v13575_v34 = vmul.f32 %v14876_v30, %v13445_v35  ;;  %v5185_v38 = vmul.f32 %v13577_v62, %v13551_v10  ;;  %v5244_v50 = vmul.f32 %v13581_v44, %v13553_v27  ;;  %v6299_v55 = vadd.f32 %v6281_v24, %v6256_v51  ;;  %v13590_v30 = vld [vmem:[#allocation2 + $0x5] ss:$0 sm:$0xff] }
 0x3bb   : > { %v5144_v53 = vadd.f32 %v5126_v18, %v5085_v56  ;;  %v5362_v37 = vadd.f32 %v5344_v16, %v13357_v49  ;;  %v5387_v7 = vmul.f32 %v14935_v21, %v13515_v29  ;;  %v13588_v11 = vadd.f32 %v6070_v28, %v6045_v12 }
 0x3bc   : > { %v5303_v35 = vmul.f32 %v13590_v30, %v13567_v23  ;;  %v5430_v57 = vmul.f32 %v14936_v1, %v13539_v59  ;;  %v5600_v46 = vmul.f32 %v14907_v36, %v13513_v13  ;;  %v6342_v51 = vadd.f32 %v6324_v33, %v6299_v55 }
 0x3bd   : > { %14964 = vst [vmem:[#allocation43_spill] sm:$0xff] %v13588_v11  ;;  %v5203_v18 = vadd.f32 %v5185_v38, %v5144_v53  ;;  %v5405_v24 = vadd.f32 %v5387_v7, %v5362_v37  ;;  %v5473_v49 = vmul.f32 %v12855_v39, %v13551_v10  ;;  %v5516_v21 = vmul.f32 %v14911_v5, %v13553_v27 }
 0x3be   : > { %v5618_v28 = vadd.f32 %v5600_v46, %v13375_v15  ;;  %v5643_v56 = vmul.f32 %v13046_v52, %v13515_v29  ;;  %v5856_v1 = vmul.f32 %v13467_v25, %v13513_v13  ;;  %v6385_v12 = vadd.f32 %v6367_v31, %v6342_v51 }
 0x3bf   : > { %v5448_v16 = vadd.f32 %v5430_v57, %v5405_v24  ;;  %v5559_v33 = vmul.f32 %v14912_v9, %v13567_v23  ;;  %v5686_v38 = vmul.f32 %v13060_v22, %v13539_v59  ;;  %v5729_v5 = vmul.f32 %v13072_v54, %v13551_v10 }
 0x3c0   : > { %v5661_v39 = vadd.f32 %v5643_v56, %v5618_v28  ;;  %v5874_v15 = vadd.f32 %v5856_v1, %v13422_v48  ;;  %v5899_v46 = vmul.f32 %v13476_v60, %v13515_v29  ;;  %v6428_v55 = vadd.f32 %v6410_v63, %v6385_v12 }
 0x3c1   : > { %v5262_v53 = vadd.f32 %v5244_v50, %v5203_v18  ;;  %v5491_v37 = vadd.f32 %v5473_v49, %v5448_v16  ;;  %v5772_v57 = vmul.f32 %v13078_v17, %v13553_v27  ;;  %v5942_v7 = vmul.f32 %v13484_v43, %v13539_v59  ;;  %v14965_v49 = vld [vmem:[#allocation14_spill] sm:$0xff] }
 0x3c2   : > { %v5704_v31 = vadd.f32 %v5686_v38, %v5661_v39  ;;  %v5917_v9 = vadd.f32 %v5899_v46, %v5874_v15  ;;  %v6110_v51 = vmul.f32 %v13488_v42, %v13271_v20  ;;  %v6471_v24 = vadd.f32 %v6453_v2, %v6428_v55  ;;  %v13639_v15 = vld [vmem:[#allocation3 + $0x88] sm:$0xff]  ;;  %v14968_v46 = vld [vmem:[#allocation22_spill] sm:$0xff] }
 0x3c3   : > { %v5534_v28 = vadd.f32 %v5516_v21, %v5491_v37  ;;  %v5815_v48 = vmul.f32 %v13248_v14, %v13567_v23  ;;  %v5985_v63 = vmul.f32 %v13496_v32, %v13551_v10  ;;  %v6153_v1 = vmul.f32 %v13501_v45, %v13273_v0  ;;  %14966 = vst [vmem:[#allocation45_spill] sm:$0xff] %v13639_v15  ;;  %v13641_v0 = vld [vmem:[#allocation3 + $0x89] sm:$0xff]  ;;  %v14969_v55 = vld [vmem:[#allocation42_spill] sm:$0xff] }
 0x3c4   : > { %v5747_v50 = vadd.f32 %v5729_v5, %v5704_v31  ;;  %v5960_v18 = vadd.f32 %v5942_v7, %v5917_v9  ;;  %v6128_v56 = vadd.f32 %v6110_v51, %v14965_v49  ;;  %v6514_v12 = vadd.f32 %v6496_v19, %v6471_v24  ;;  %14967 = vst [vmem:[#allocation47_spill] sm:$0xff] %v13641_v0  ;;  %v14970_v37 = vld [vmem:[#allocation26_spill] sm:$0xff]  ;;  %v14971_v31 = vld [vmem:[#allocation77_spill] sm:$0xff] }
 0x3c5   : > { %v13629_v16 = vadd.f32 %v5303_v35, %v5262_v53  ;;  %v6028_v20 = vmul.f32 %v13505_v41, %v13553_v27  ;;  %v6071_v2 = vmul.f32 %v13509_v26, %v13567_v23  ;;  %v6196_v39 = vmul.f32 %v13517_v4, %v13290_v3  ;;  %v14972_v3 = vld [vmem:[#allocation35_spill] sm:$0xff]  ;;  %v13654_v49 = vld [vmem:[#allocation2 + $0x29] ss:$0 sm:$0xff] }
 0x3c6   : > { %v6003_v21 = vadd.f32 %v5985_v63, %v5960_v18  ;;  %v6171_v38 = vadd.f32 %v6153_v1, %v6128_v56  ;;  %v6239_v5 = vmul.f32 %v13521_v47, %v13301_v58  ;;  %v6557_v19 = vadd.f32 %v6539_v8, %v6514_v12  ;;  %v13651_v58 = vld [vmem:[#allocation3 + $0x8a] sm:$0xff]  ;;  %v14975_v56 = vld [vmem:[#allocation46_spill] sm:$0xff] }
 0x3c7   : > { %v13643_v35 = vadd.f32 %v5559_v33, %v5534_v28  ;;  %v6282_v53 = vmul.f32 %v14969_v55, %v14968_v46  ;;  %v6325_v9 = vmul.f32 %v14971_v31, %v14970_v37  ;;  %v5790_v7 = vadd.f32 %v5772_v57, %v5747_v50  ;;  %14973 = vst [vmem:[#allocation54_spill] sm:$0xff] %v13651_v58  ;;  %v14974_v33 = vld [vmem:[#allocation65_spill] sm:$0xff]  ;;  %v6827_v50 = vld [vmem:[%s14513_s9 + $0x8] sm:$0xff] }
 0x3c8   : > { %v6046_v51 = vadd.f32 %v6028_v20, %v6003_v21  ;;  %v6214_v24 = vadd.f32 %v6196_v39, %v6171_v38  ;;  %v6368_v63 = vmul.f32 %v14972_v3, %v13513_v13  ;;  %v6600_v18 = vadd.f32 %v13575_v34, %v6557_v19  ;;  %v13667_v34 = vld [vmem:[#allocation2 + $0x2b] ss:$0 sm:$0xff]  ;;  %v13673_v21 = vld [vmem:[#allocation2 + $0x2c] ss:$0 sm:$0xff]  ;;  %v13679_v39 = vld [vmem:[#allocation3 + $0x8b] sm:$0xff]  ;;  %9583 = vmatprep.subr.mxu0 %v6827_v50 }
 0x3c9   : > { %v6411_v8 = vmul.f32 %v13654_v49, %v13515_v29  ;;  %v5027_v28 = vmul.f32 %v14974_v33, %v13639_v15  ;;  %v5068_v57 = vmul.f32 %v14975_v56, %v13641_v0  ;;  %v6454_v12 = vmul.f32 %v13557_v40, %v13539_v59  ;;  %14976 = vst [vmem:[#allocation61_spill] sm:$0xff] %v13679_v39  ;;  %v13688_v37 = vld [vmem:[#allocation3 + $0x8c] sm:$0xff]  ;;  %v13692_v33 = vld [vmem:[#allocation2 + $0x8] ss:$0 sm:$0xff]  ;;  %v13700_v59 = vld [vmem:[#allocation2 + $0x2d] ss:$0 sm:$0xff] }
 0x3ca   : > { %v6257_v1 = vadd.f32 %v6239_v5, %v6214_v24  ;;  %v13671_v20 = vmul.f32 %v13667_v34, %v13551_v10  ;;  %v13677_v38 = vmul.f32 %v13673_v21, %v13553_v27  ;;  %v6826_v5 = vld [vmem:[%s14513_s9] sm:$0xff]  ;;  %6838 = vrot.lane.b32.xlu1 %v6600_v18, %s9773_s29  ;;  %9563 = vmatmul.mubr.msk.f32.gmra.mxu0 %vm532_vm0, %v6600_v18  ;;  %v13707_v13 = vld [vmem:[#allocation2 + $0x9] ss:$0 sm:$0xff] }
 0x3cb   : > { %v5086_v19 = vadd.f32 %v5068_v57, %v5027_v28  ;;  %v5127_v46 = vmul.f32 %v13563_v6, %v13651_v58  ;;  %14977 = vst [vmem:[#allocation67_spill] sm:$0xff] %v13688_v37  ;;  %v13690_v24 = vld [vmem:[#allocation3 + $0x8d] sm:$0xff]  ;;  %v5345_v56 = vmul.f32 %v13692_v33, %v13639_v15  ;;  %v13696_v11 = vadd.f32 %v5815_v48, %v5790_v7 }
 0x3cc   : > { %14978 = vst [vmem:[#allocation12_spill] sm:$0xff] %v13690_v24  ;;  %v13698_v27 = vadd.f32 %v6071_v2, %v6046_v51  ;;  %v6300_v10 = vadd.f32 %v6282_v53, %v6257_v1  ;;  %v6583_v18 = vmul.f32 %v13700_v59, %v13567_v23  ;;  %9584 = vmatpush3.msra.mxu0 %v6827_v50  ;;  %v14981_v57 = vld [vmem:[#allocation76_spill] sm:$0xff]  ;;  %v13717_v1 = vld [vmem:[#allocation2 + $0xa] ss:$0 sm:$0xff] }
 0x3cd   : > { %14979 = vst [vmem:[#allocation15_spill] sm:$0xff] %v13696_v11  ;;  %v5145_v6 = vadd.f32 %v5127_v46, %v5086_v19  ;;  %v5186_v28 = vmul.f32 %v13577_v62, %v13679_v39  ;;  %v5363_v29 = vadd.f32 %v5345_v56, %v14981_v57  ;;  %v5388_v48 = vmul.f32 %v13707_v13, %v13641_v0  ;;  %v13721_v46 = vld [vmem:[#allocation2 + $0xb] ss:$0 sm:$0xff] }
 0x3ce   : > { %14980 = vst [vmem:[#allocation58_spill] sm:$0xff] %v13698_v27  ;;  %9585 = vmatprep.subr.mxu0 %v6826_v5  ;;  %v6343_v2 = vadd.f32 %v6325_v9, %v6300_v10  ;;  %v5245_v53 = vmul.f32 %v13581_v44, %v13688_v37  ;;  %v5304_v7 = vmul.f32 %v13590_v30, %v13690_v24  ;;  %v14982_v9 = vld [vmem:[#allocation29_spill] sm:$0xff] }
 0x3cf   : > { %v5601_v51 = vmul.f32 %v14907_v36, %v13639_v15  ;;  %9586 = vmatpush3.msra.mxu0 %v6826_v5  ;;  %v5204_v62 = vadd.f32 %v5186_v28, %v5145_v6  ;;  %v5406_v50 = vadd.f32 %v5388_v48, %v5363_v29  ;;  %v5431_v19 = vmul.f32 %v13717_v1, %v13651_v58  ;;  %v13730_v5 = vld [vmem:[#allocation2 + $0xc] ss:$0 sm:$0xff]  ;;  %v13734_v28 = vld [vmem:[#allocation2 + $0xd] ss:$0 sm:$0xff] }
 0x3d0   : > { %v5474_v10 = vmul.f32 %v13721_v46, %v13679_v39  ;;  %v6386_v44 = vadd.f32 %v6368_v63, %v6343_v2  ;;  %v5644_v30 = vmul.f32 %v13046_v52, %v13641_v0  ;;  %v5857_v36 = vmul.f32 %v13467_v25, %v13639_v15  ;;  %14983 = vst [vmem:[#allocation33_spill] sm:$0xff] %v13734_v28 }
 0x3d1   : > { %v5619_v56 = vadd.f32 %v5601_v51, %v14982_v9  ;;  %v5449_v29 = vadd.f32 %v5431_v19, %v5406_v50  ;;  %v5517_v6 = vmul.f32 %v13730_v5, %v13688_v37  ;;  %v5560_v57 = vmul.f32 %v13734_v28, %v13690_v24  ;;  %v14984_v28 = vld [vmem:[#allocation5_spill] sm:$0xff] }
 0x3d2   : > { %v5687_v63 = vmul.f32 %v13060_v22, %v13651_v58  ;;  %v6429_v48 = vadd.f32 %v6411_v8, %v6386_v44  ;;  %v5875_v52 = vadd.f32 %v5857_v36, %v13555_v61  ;;  %v5900_v51 = vmul.f32 %v13476_v60, %v13641_v0 }
 0x3d3   : > { %v5662_v2 = vadd.f32 %v5644_v30, %v5619_v56  ;;  %v5263_v50 = vadd.f32 %v5245_v53, %v5204_v62  ;;  %v5492_v19 = vadd.f32 %v5474_v10, %v5449_v29  ;;  %v5730_v9 = vmul.f32 %v13072_v54, %v13679_v39  ;;  %v14985_v62 = vld [vmem:[#allocation23_spill] sm:$0xff] }
 0x3d4   : > { %v5943_v27 = vmul.f32 %v13484_v43, %v13651_v58  ;;  %v6472_v23 = vadd.f32 %v6454_v12, %v6429_v48  ;;  %v5918_v25 = vadd.f32 %v5900_v51, %v5875_v52  ;;  %v6111_v22 = vmul.f32 %v13488_v42, %v14984_v28  ;;  %v14986_v12 = vld [vmem:[#allocation6_spill] sm:$0xff]  ;;  %v14989_v52 = vld [vmem:[#allocation7_spill] sm:$0xff] }
 0x3d5   : > { %v5705_v11 = vadd.f32 %v5687_v63, %v5662_v2  ;;  %v5535_v8 = vadd.f32 %v5517_v6, %v5492_v19  ;;  %v5773_v61 = vmul.f32 %v13078_v17, %v13688_v37  ;;  %v5986_v53 = vmul.f32 %v13496_v32, %v13679_v39 }
 0x3d6   : > { %v6154_v10 = vmul.f32 %v13501_v45, %v14985_v62  ;;  %v6515_v54 = vadd.f32 %v13671_v20, %v6472_v23  ;;  %v5961_v56 = vadd.f32 %v5943_v27, %v5918_v25  ;;  %v6129_v30 = vadd.f32 %v6111_v22, %v14986_v12  ;;  %v14987_v23 = vld [vmem:[#allocation25_spill] sm:$0xff] }
 0x3d7   : > { %v5748_v44 = vadd.f32 %v5730_v9, %v5705_v11  ;;  %v13757_v36 = vadd.f32 %v5304_v7, %v5263_v50  ;;  %v5816_v29 = vmul.f32 %v13248_v14, %v13690_v24  ;;  %v6029_v17 = vmul.f32 %v13505_v41, %v13688_v37  ;;  %v13768_v11 = vld [vmem:[#allocation3 + $0x90] sm:$0xff]  ;;  %v14988_v7 = vld [vmem:[#allocation27_spill] sm:$0xff] }
 0x3d8   : > { %v6072_v6 = vmul.f32 %v13509_v26, %v13690_v24  ;;  %v6558_v28 = vadd.f32 %v13677_v38, %v6515_v54  ;;  %v6004_v63 = vadd.f32 %v5986_v53, %v5961_v56  ;;  %v6172_v48 = vadd.f32 %v6154_v10, %v6129_v30  ;;  %v14990_v38 = vld [vmem:[#allocation8_spill] sm:$0xff]  ;;  %v13778_v53 = vld [vmem:[#allocation3 + $0x91] sm:$0xff] }
 0x3d9   : > { %v6197_v27 = vmul.f32 %v13517_v4, %v14987_v23  ;;  %v13770_v25 = vadd.f32 %v5560_v57, %v5535_v8  ;;  %v5791_v20 = vadd.f32 %v5773_v61, %v5748_v44  ;;  %v6240_v2 = vmul.f32 %v13521_v47, %v14988_v7  ;;  %v13798_v56 = vld [vmem:[#allocation3 + $0x93] sm:$0xff] }
 0x3da   : > { %v6283_v51 = vmul.f32 %v14969_v55, %v14989_v52  ;;  %v6601_v50 = vadd.f32 %v6583_v18, %v6558_v28  ;;  %v6047_v19 = vadd.f32 %v6029_v17, %v6004_v63  ;;  %v6326_v22 = vmul.f32 %v14971_v31, %v14990_v38  ;;  %v13788_v18 = vld [vmem:[#allocation3 + $0x92] sm:$0xff] }
 0x3db   : > { %v6215_v9 = vadd.f32 %v6197_v27, %v6172_v48  ;;  %v6369_v62 = vmul.f32 %v14972_v3, %v13639_v15  ;;  %v6412_v57 = vmul.f32 %v13654_v49, %v13641_v0  ;;  %v6455_v8 = vmul.f32 %v13557_v40, %v13651_v58  ;;  %v13805_v28 = vld [vmem:[#allocation3 + $0x94] sm:$0xff]  ;;  %v13809_v48 = vld [vmem:[#allocation2 + $0x10] ss:$0 sm:$0xff] }
 0x3dc   : > { %v5346_v61 = vmul.f32 %v13692_v33, %v13768_v11  ;;  %6840 = vrot.lane.b32.xlu0 %v6601_v50, %s9773_s29  ;;  %9565 = vmatprep.mubr.msk.f32.mxu0 %vm532_vm0, %v6601_v50  ;;  %v6498_v54 = vmul.f32 %v13667_v34, %v13679_v39  ;;  %v13796_v44 = vmul.f32 %v13673_v21, %v13688_v37  ;;  %v13807_v63 = vld [vmem:[#allocation3 + $0x95] sm:$0xff]  ;;  %v13824_v50 = vld [vmem:[#allocation2 + $0x11] ss:$0 sm:$0xff] }
 0x3dd   : > { %v6258_v10 = vadd.f32 %v6240_v2, %v6215_v9  ;;  %v13800_v12 = vadd.f32 %v5816_v29, %v5791_v20  ;;  %v5389_v17 = vmul.f32 %v13707_v13, %v13778_v53  ;;  %14992 = vst [vmem:[#allocation56_spill] sm:$0xff] %v13805_v28  ;;  %14993 = vst [vmem:[#allocation55_spill] sm:$0xff] %v13807_v63  ;;  %v14995_v9 = vld [vmem:[#allocation33_spill] sm:$0xff]  ;;  %v15000_v58 = vld [vmem:[#allocation74_spill] sm:$0xff] }
 0x3de   : > { %v5364_v30 = vadd.f32 %v5346_v61, %v13629_v16  ;;  %v5602_v23 = vmul.f32 %v13809_v48, %v13768_v11  ;;  %v13813_v27 = vadd.f32 %v6072_v6, %v6047_v19  ;;  %v13817_v29 = vmul.f32 %v13700_v59, %v13690_v24  ;;  %v14996_v61 = vld [vmem:[#allocation16_spill] sm:$0xff]  ;;  %v14999_v24 = vld [vmem:[#allocation15_spill] sm:$0xff] }
 0x3df   : > { %14991 = vst [vmem:[#allocation64_spill] sm:$0xff] %v13800_v12  ;;  %v6301_v7 = vadd.f32 %v6283_v51, %v6258_v10  ;;  %v5432_v16 = vmul.f32 %v13717_v1, %v13788_v18  ;;  %v5475_v2 = vmul.f32 %v13721_v46, %v13798_v56  ;;  %v5645_v6 = vmul.f32 %v13824_v50, %v13778_v53 }
 0x3e0   : > { %14994 = vst [vmem:[#allocation40_spill] sm:$0xff] %v13813_v27  ;;  %v5407_v20 = vadd.f32 %v5389_v17, %v5364_v30  ;;  %v5620_v52 = vadd.f32 %v5602_v23, %v13643_v35  ;;  %v5518_v51 = vmul.f32 %v13730_v5, %v13805_v28  ;;  %v5561_v38 = vmul.f32 %v14995_v9, %v13807_v63  ;;  %v13834_v27 = vld [vmem:[#allocation2 + $0x12] ss:$0 sm:$0xff]  ;;  %v13838_v23 = vld [vmem:[#allocation2 + $0x13] ss:$0 sm:$0xff] }
 0x3e1   : > { %v6344_v19 = vadd.f32 %v6326_v22, %v6301_v7  ;;  %v5858_v10 = vmul.f32 %v14996_v61, %v13768_v11  ;;  %14997 = vst [vmem:[#allocation38_spill] sm:$0xff] %v13834_v27  ;;  %v5688_v35 = vmul.f32 %v13834_v27, %v13788_v18  ;;  %14998 = vst [vmem:[#allocation63_spill] sm:$0xff] %v13838_v23 }
 0x3e2   : > { %v5450_v30 = vadd.f32 %v5432_v16, %v5407_v20  ;;  %v5663_v17 = vadd.f32 %v5645_v6, %v5620_v52  ;;  %v5731_v22 = vmul.f32 %v13838_v23, %v13798_v56  ;;  %v5901_v39 = vmul.f32 %v13476_v60, %v13778_v53  ;;  %v13847_v6 = vld [vmem:[#allocation2 + $0x14] ss:$0 sm:$0xff] }
 0x3e3   : > { %v6387_v7 = vadd.f32 %v6369_v62, %v6344_v19  ;;  %v5876_v37 = vadd.f32 %v5858_v10, %v14999_v24  ;;  %v6112_v16 = vmul.f32 %v13488_v42, %v15000_v58  ;;  %v5774_v0 = vmul.f32 %v13847_v6, %v13805_v28  ;;  %v15001_v19 = vld [vmem:[#allocation11_spill] sm:$0xff]  ;;  %v15003_v42 = vld [vmem:[#allocation44_spill] sm:$0xff] }
 0x3e4   : > { %v5493_v20 = vadd.f32 %v5475_v2, %v5450_v30  ;;  %v5706_v52 = vadd.f32 %v5688_v35, %v5663_v17  ;;  %v5944_v15 = vmul.f32 %v13484_v43, %v13788_v18  ;;  %v15002_v10 = vld [vmem:[#allocation75_spill] sm:$0xff]  ;;  %v5817_v58 = vmul.f32 %v13248_v14, %v13807_v63 }
 0x3e5   : > { %v6430_v23 = vadd.f32 %v6412_v57, %v6387_v7  ;;  %v5919_v62 = vadd.f32 %v5901_v39, %v5876_v37  ;;  %v6130_v24 = vadd.f32 %v6112_v16, %v15001_v19  ;;  %v6155_v60 = vmul.f32 %v13501_v45, %v15002_v10  ;;  %v13862_v39 = vld [vmem:[#allocation3 + $0x98] sm:$0xff] }
 0x3e6   : > { %v5536_v12 = vadd.f32 %v5518_v51, %v5493_v20  ;;  %v5749_v27 = vadd.f32 %v5731_v22, %v5706_v52  ;;  %v5987_v2 = vmul.f32 %v13496_v32, %v13798_v56  ;;  %v6198_v57 = vmul.f32 %v13517_v4, %v15003_v42  ;;  %v15004_v22 = vld [vmem:[#allocation50_spill] sm:$0xff] }
 0x3e7   : > { %v6473_v30 = vadd.f32 %v6455_v8, %v6430_v23  ;;  %v5962_v17 = vadd.f32 %v5944_v15, %v5919_v62  ;;  %v6173_v35 = vadd.f32 %v6155_v60, %v6130_v24  ;;  %v6030_v7 = vmul.f32 %v13505_v41, %v13805_v28  ;;  %v15005_v15 = vld [vmem:[#allocation57_spill] sm:$0xff]  ;;  %v13872_v23 = vld [vmem:[#allocation3 + $0x99] sm:$0xff] }
 0x3e8   : > { %v5792_v37 = vadd.f32 %v5774_v0, %v5749_v27  ;;  %v6073_v51 = vmul.f32 %v13509_v26, %v13807_v63  ;;  %v6241_v16 = vmul.f32 %v13521_v47, %v15004_v22  ;;  %v6284_v60 = vmul.f32 %v14969_v55, %v15005_v15  ;;  %15006 = vst [vmem:[#allocation41_spill] sm:$0xff] %v13872_v23  ;;  %v15007_v0 = vld [vmem:[#allocation60_spill] sm:$0xff] }
 0x3e9   : > { %v6516_v20 = vadd.f32 %v6498_v54, %v6473_v30  ;;  %v6005_v52 = vadd.f32 %v5987_v2, %v5962_v17  ;;  %v6216_v8 = vadd.f32 %v6198_v57, %v6173_v35  ;;  %v13874_v42 = vadd.f32 %v5561_v38, %v5536_v12  ;;  %v13887_v12 = vld [vmem:[#allocation3 + $0x9a] sm:$0xff] }
 0x3ea   : > { %v6327_v27 = vmul.f32 %v14971_v31, %v15007_v0  ;;  %v6370_v62 = vmul.f32 %v14972_v3, %v13768_v11  ;;  %v5347_v19 = vmul.f32 %v13692_v33, %v13862_v39  ;;  %v6413_v10 = vmul.f32 %v13654_v49, %v13778_v53  ;;  %15008 = vst [vmem:[#allocation71_spill] sm:$0xff] %v13887_v12  ;;  %v13898_v35 = vld [vmem:[#allocation3 + $0x9c] sm:$0xff] }
 0x3eb   : > { %v6559_v54 = vadd.f32 %v13796_v44, %v6516_v20  ;;  %v6259_v24 = vadd.f32 %v6241_v16, %v6216_v8  ;;  %v6456_v2 = vmul.f32 %v13557_v40, %v13788_v18  ;;  %v13889_v38 = vadd.f32 %v5817_v58, %v5792_v37  ;;  %v13896_v44 = vld [vmem:[#allocation3 + $0x9b] sm:$0xff]  ;;  %15010 = vst [vmem:[#allocation10_spill] sm:$0xff] %v13898_v35 }
 0x3ec   : > { %v6499_v30 = vmul.f32 %v13667_v34, %v13798_v56  ;;  %v5365_v17 = vadd.f32 %v5347_v19, %v13757_v36  ;;  %v5390_v33 = vmul.f32 %v13707_v13, %v13872_v23  ;;  %15009 = vst [vmem:[#allocation73_spill] sm:$0xff] %v13896_v44  ;;  %v6048_v22 = vadd.f32 %v6030_v7, %v6005_v52  ;;  %v13907_v8 = vld [vmem:[#allocation3 + $0x9d] sm:$0xff] }
 0x3ed   : > { %v6602_v57 = vadd.f32 %v13817_v29, %v6559_v54  ;;  %v6302_v16 = vadd.f32 %v6284_v60, %v6259_v24  ;;  %v6542_v58 = vmul.f32 %v13673_v21, %v13805_v28  ;;  %v6585_v37 = vmul.f32 %v13700_v59, %v13807_v63  ;;  %15011 = vst [vmem:[#allocation18_spill] sm:$0xff] %v13907_v8 }
 0x3ee   : > { %v5408_v20 = vadd.f32 %v5390_v33, %v5365_v17  ;;  %v5433_v36 = vmul.f32 %v13717_v1, %v13887_v12  ;;  %v5603_v13 = vmul.f32 %v13809_v48, %v13862_v39  ;;  %v5476_v7 = vmul.f32 %v13721_v46, %v13896_v44  ;;  %v15013_v46 = vld [vmem:[#allocation38_spill] sm:$0xff]  ;;  %v15014_v33 = vld [vmem:[#allocation64_spill] sm:$0xff] }
 0x3ef   : > { %6842 = vrot.lane.b32.xlu1 %v6602_v57, %s9773_s29  ;;  %9566 = vmatmul.mubr.msk.f32.gmra.mxu0 %vm532_vm0, %v6602_v57  ;;  %v6345_v29 = vadd.f32 %v6327_v27, %v6302_v16  ;;  %v5519_v52 = vmul.f32 %v13730_v5, %v13898_v35  ;;  %v5646_v1 = vmul.f32 %v13824_v50, %v13872_v23 }
 0x3f0   : > { %v5451_v15 = vadd.f32 %v5433_v36, %v5408_v20  ;;  %v5621_v60 = vadd.f32 %v5603_v13, %v13770_v25  ;;  %v5859_v0 = vmul.f32 %v14996_v61, %v13862_v39  ;;  %v13922_v19 = vadd.f32 %v6073_v51, %v6048_v22  ;;  %v15015_v25 = vld [vmem:[#allocation62_spill] sm:$0xff]  ;;  %v15016_v36 = vld [vmem:[#allocation63_spill] sm:$0xff]  ;;  %v15018_v22 = vld [vmem:[#allocation72_spill] sm:$0xff] }
 0x3f1   : > { %v6388_v54 = vadd.f32 %v6370_v62, %v6345_v29  ;;  %v5562_v27 = vmul.f32 %v14995_v9, %v13907_v8  ;;  %v5689_v24 = vmul.f32 %v15013_v46, %v13887_v12  ;;  %v5902_v16 = vmul.f32 %v15015_v25, %v13872_v23  ;;  %v15017_v62 = vld [vmem:[#allocation45_spill] sm:$0xff] }
 0x3f2   : > { %15012 = vst [vmem:[#allocation69_spill] sm:$0xff] %v13922_v19  ;;  %v5494_v17 = vadd.f32 %v5476_v7, %v5451_v15  ;;  %v5664_v5 = vadd.f32 %v5646_v1, %v5621_v60  ;;  %v5877_v57 = vadd.f32 %v5859_v0, %v15014_v33  ;;  %v5732_v13 = vmul.f32 %v15016_v36, %v13896_v44  ;;  %v15020_v0 = vld [vmem:[#allocation47_spill] sm:$0xff] }
 0x3f3   : > { %v6431_v20 = vadd.f32 %v6413_v10, %v6388_v54  ;;  %v5775_v51 = vmul.f32 %v13847_v6, %v13898_v35  ;;  %v6113_v9 = vmul.f32 %v15018_v22, %v15017_v62  ;;  %v5945_v7 = vmul.f32 %v13484_v43, %v13887_v12  ;;  %v15019_v10 = vld [vmem:[#allocation43_spill] sm:$0xff] }
 0x3f4   : > { %v5537_v29 = vadd.f32 %v5519_v52, %v5494_v17  ;;  %v5707_v19 = vadd.f32 %v5689_v24, %v5664_v5  ;;  %v5920_v63 = vadd.f32 %v5902_v16, %v5877_v57  ;;  %v5818_v60 = vmul.f32 %v13248_v14, %v13907_v8  ;;  %v15021_v5 = vld [vmem:[#allocation54_spill] sm:$0xff]  ;;  %v13952_v57 = vld [vmem:[#allocation3 + $0xa0] sm:$0xff] }
 0x3f5   : > { %v6474_v15 = vadd.f32 %v6456_v2, %v6431_v20  ;;  %v6131_v1 = vadd.f32 %v6113_v9, %v15019_v10  ;;  %v6156_v54 = vmul.f32 %v13501_v45, %v15020_v0  ;;  %v5988_v62 = vmul.f32 %v13496_v32, %v13896_v44  ;;  %v15024_v10 = vld [vmem:[#allocation12_spill] sm:$0xff] }
 0x3f6   : > { %v5750_v33 = vadd.f32 %v5732_v13, %v5707_v19  ;;  %v5963_v28 = vadd.f32 %v5945_v7, %v5920_v63  ;;  %v6031_v52 = vmul.f32 %v13505_v41, %v13898_v35  ;;  %v6074_v2 = vmul.f32 %v13509_v26, %v13907_v8  ;;  %v15022_v63 = vld [vmem:[#allocation61_spill] sm:$0xff]  ;;  %v15023_v13 = vld [vmem:[#allocation67_spill] sm:$0xff] }
 0x3f7   : > { %v6517_v24 = vadd.f32 %v6499_v30, %v6474_v15  ;;  %v6174_v17 = vadd.f32 %v6156_v54, %v6131_v1  ;;  %v6199_v14 = vmul.f32 %v13517_v4, %v15021_v5  ;;  %v13954_v16 = vadd.f32 %v5562_v27, %v5537_v29  ;;  %v13962_v0 = vld [vmem:[#allocation3 + $0xa1] sm:$0xff] }
 0x3f8   : > { %v6006_v19 = vadd.f32 %v5988_v62, %v5963_v28  ;;  %v6242_v20 = vmul.f32 %v13521_v47, %v15022_v63  ;;  %v6285_v9 = vmul.f32 %v14969_v55, %v15023_v13  ;;  %v5793_v30 = vadd.f32 %v5775_v51, %v5750_v33  ;;  %v13974_v33 = vld [vmem:[#allocation3 + $0xa2] sm:$0xff] }
 0x3f9   : > { %v6560_v7 = vadd.f32 %v6542_v58, %v6517_v24  ;;  %v6217_v15 = vadd.f32 %v6199_v14, %v6174_v17  ;;  %v6328_v1 = vmul.f32 %v14971_v31, %v15024_v10  ;;  %v6371_v27 = vmul.f32 %v14972_v3, %v13862_v39  ;;  %v13993_v13 = vld [vmem:[#allocation3 + $0xa5] sm:$0xff] }
 0x3fa   : > { %v6049_v54 = vadd.f32 %v6031_v52, %v6006_v19  ;;  %v6414_v28 = vmul.f32 %v13654_v49, %v13872_v23  ;;  %v5604_v29 = vmul.f32 %v13809_v48, %v13952_v57  ;;  %v6457_v58 = vmul.f32 %v13557_v40, %v13887_v12  ;;  %v13976_v52 = vld [vmem:[#allocation3 + $0xa3] sm:$0xff] }
 0x3fb   : > { %v6603_v62 = vadd.f32 %v6585_v37, %v6560_v7  ;;  %v6260_v5 = vadd.f32 %v6242_v20, %v6217_v15  ;;  %v6500_v51 = vmul.f32 %v13667_v34, %v13896_v44  ;;  %v6543_v24 = vmul.f32 %v13673_v21, %v13898_v35  ;;  %v13987_v19 = vld [vmem:[#allocation3 + $0xa4] sm:$0xff]  ;;  %v13995_v7 = vld [vmem:[#allocation3 + $0xb0] sm:$0xff] }
 0x3fc   : > { %v13982_v17 = vmul.f32 %v13700_v59, %v13907_v8  ;;  %v5622_v37 = vadd.f32 %v5604_v29, %v13874_v42  ;;  %v5647_v14 = vmul.f32 %v13824_v50, %v13962_v0  ;;  %v13991_v63 = vadd.f32 %v5818_v60, %v5793_v30  ;;  %v14010_v35 = vld [vmem:[#allocation2 + $0x15] ss:$0 sm:$0xff] }
 0x3fd   : > { %6844 = vrot.lane.b32.xlu0 %v6603_v62, %s9773_s29  ;;  %9568 = vmatprep.mubr.msk.f32.mxu0 %vm532_vm0, %v6603_v62  ;;  %v6303_v20 = vadd.f32 %v6285_v9, %v6260_v5  ;;  %v5860_v15 = vmul.f32 %v14996_v61, %v13952_v57  ;;  %v13999_v42 = vadd.f32 %v6074_v2, %v6049_v54 }
 0x3fe   : > { %v5665_v10 = vadd.f32 %v5647_v14, %v5622_v37  ;;  %v5690_v29 = vmul.f32 %v15013_v46, %v13974_v33  ;;  %v5733_v8 = vmul.f32 %v15016_v36, %v13976_v52  ;;  %v5776_v60 = vmul.f32 %v13847_v6, %v13987_v19 }
 0x3ff   : > { %15025 = vst [vmem:[#allocation19_spill] sm:$0xff] %v13999_v42  ;;  %v6346_v62 = vadd.f32 %v6328_v1, %v6303_v20  ;;  %v5878_v9 = vadd.f32 %v5860_v15, %v13889_v38  ;;  %v5903_v30 = vmul.f32 %v15015_v25, %v13962_v0  ;;  %v5819_v2 = vmul.f32 %v14010_v35, %v13993_v13 }
 0x400   : > { %v5708_v5 = vadd.f32 %v5690_v29, %v5665_v10  ;;  %v5862_v54 = vmul.f32 %v14996_v61, %v13995_v7  ;;  %v6114_v1 = vmul.f32 %v15018_v22, %v13768_v11  ;;  %v5946_v38 = vmul.f32 %v13484_v43, %v13974_v33  ;;  %v15026_v29 = vld [vmem:[#allocation58_spill] sm:$0xff] }
 0x401   : > { %v6389_v37 = vadd.f32 %v6371_v27, %v6346_v62  ;;  %v5921_v14 = vadd.f32 %v5903_v30, %v5878_v9  ;;  %v5989_v20 = vmul.f32 %v13496_v32, %v13976_v52  ;;  %v6032_v10 = vmul.f32 %v13505_v41, %v13987_v19 }
 0x402   : > { %v5751_v15 = vadd.f32 %v5733_v8, %v5708_v5  ;;  %v6132_v42 = vadd.f32 %v6114_v1, %v15026_v29  ;;  %v6157_v44 = vmul.f32 %v13501_v45, %v13778_v53  ;;  %v6075_v11 = vmul.f32 %v13509_v26, %v13993_v13 }
 0x403   : > { %v6432_v12 = vadd.f32 %v6414_v28, %v6389_v37  ;;  %v5964_v23 = vadd.f32 %v5946_v38, %v5921_v14  ;;  %v14031_v27 = vmul.f32 %v15018_v22, %v13952_v57  ;;  %v6118_v8 = vmul.f32 %v15018_v22, %v13995_v7 }
 0x404   : > { %v5794_v62 = vadd.f32 %v5776_v60, %v5751_v15  ;;  %v6175_v9 = vadd.f32 %v6157_v44, %v6132_v42  ;;  %v6200_v30 = vmul.f32 %v13517_v4, %v13788_v18  ;;  %v14039_v53 = vmul.f32 %v13501_v45, %v13962_v0  ;;  %v14051_v18 = vld [vmem:[#allocation3 + $0xa8] sm:$0xff] }
 0x405   : > { %v6475_v5 = vadd.f32 %v6457_v58, %v6432_v12  ;;  %v6007_v1 = vadd.f32 %v5989_v20, %v5964_v23  ;;  %v14043_v28 = vmul.f32 %v13517_v4, %v13974_v33  ;;  %v6243_v60 = vmul.f32 %v13521_v47, %v13798_v56  ;;  %v15027_v58 = vld [vmem:[#allocation56_spill] sm:$0xff]  ;;  %v15028_v20 = vld [vmem:[#allocation55_spill] sm:$0xff] }
 0x406   : > { %v5837_v37 = vadd.f32 %v5819_v2, %v5794_v62  ;;  %v6218_v14 = vadd.f32 %v6200_v30, %v6175_v9  ;;  %v14049_v44 = vmul.f32 %v13521_v47, %v13976_v52  ;;  %v6286_v42 = vmul.f32 %v14969_v55, %v15027_v58  ;;  %v14081_v58 = vld [vmem:[#allocation3 + $0xab] sm:$0xff] }
 0x407   : > { %v6518_v23 = vadd.f32 %v6500_v51, %v6475_v5  ;;  %v6050_v12 = vadd.f32 %v6032_v10, %v6007_v1  ;;  %v14057_v38 = vmul.f32 %v14969_v55, %v13987_v19  ;;  %v6329_v15 = vmul.f32 %v14971_v31, %v15028_v20  ;;  %v14067_v51 = vld [vmem:[#allocation3 + $0xa9] sm:$0xff] }
 0x408   : > { %v6261_v2 = vadd.f32 %v6243_v60, %v6218_v14  ;;  %v14063_v56 = vmul.f32 %v14971_v31, %v13993_v13  ;;  %v6372_v29 = vmul.f32 %v14972_v3, %v13952_v57  ;;  %v6415_v62 = vmul.f32 %v13654_v49, %v13962_v0  ;;  %v14075_v5 = vld [vmem:[#allocation3 + $0xaa] sm:$0xff] }
 0x409   : > { %v6561_v10 = vadd.f32 %v6543_v24, %v6518_v23  ;;  %v6458_v9 = vmul.f32 %v13557_v40, %v13974_v33  ;;  %v5605_v30 = vmul.f32 %v13809_v48, %v14051_v18  ;;  %v14077_v1 = vadd.f32 %v5862_v54, %v5837_v37  ;;  %v14083_v24 = vld [vmem:[#allocation3 + $0xac] sm:$0xff] }
 0x40a   : > { %v6093_v14 = vadd.f32 %v6075_v11, %v6050_v12  ;;  %v6304_v60 = vadd.f32 %v6286_v42, %v6261_v2  ;;  %v6501_v57 = vmul.f32 %v13667_v34, %v13976_v52  ;;  %v6544_v33 = vmul.f32 %v13673_v21, %v13987_v19  ;;  %v14095_v23 = vld [vmem:[#allocation3 + $0xad] sm:$0xff]  ;;  %v14097_v12 = vld [vmem:[#allocation3 + $0xb8] sm:$0xff] }
 0x40b   : > { %v6604_v0 = vadd.f32 %v13982_v17, %v6561_v10  ;;  %v5623_v48 = vadd.f32 %v5605_v30, %v13954_v16  ;;  %v5648_v54 = vmul.f32 %v13824_v50, %v14067_v51  ;;  %v6587_v11 = vmul.f32 %v13700_v59, %v13993_v13 }
 0x40c   : > { %v6347_v37 = vadd.f32 %v6329_v15, %v6304_v60  ;;  %v5691_v52 = vmul.f32 %v15013_v46, %v14075_v5  ;;  %v5861_v17 = vmul.f32 %v14996_v61, %v14051_v18  ;;  %v5734_v50 = vmul.f32 %v15016_v36, %v14081_v58  ;;  %v15029_v60 = vld [vmem:[#allocation40_spill] sm:$0xff] }
 0x40d   : > { %6846 = vrot.lane.b32.xlu1 %v6604_v0, %s9773_s29  ;;  %9569 = vmatmul.mubr.msk.f32.gmra.mxu0 %vm532_vm0, %v6604_v0  ;;  %v5666_v16 = vadd.f32 %v5648_v54, %v5623_v48  ;;  %v5777_v19 = vmul.f32 %v13847_v6, %v14083_v24  ;;  %v14107_v13 = vadd.f32 %v6118_v8, %v6093_v14  ;;  %v15030_v0 = vld [vmem:[#allocation41_spill] sm:$0xff] }
 0x40e   : > { %v6390_v46 = vadd.f32 %v6372_v29, %v6347_v37  ;;  %v5879_v42 = vadd.f32 %v5861_v17, %v13991_v63  ;;  %v5904_v2 = vmul.f32 %v15015_v25, %v14067_v51  ;;  %v5820_v15 = vmul.f32 %v14010_v35, %v14095_v23 }
 0x40f   : > { %v5709_v20 = vadd.f32 %v5691_v52, %v5666_v16  ;;  %v5863_v10 = vmul.f32 %v14996_v61, %v14097_v12  ;;  %v6115_v36 = vmul.f32 %v15018_v22, %v13862_v39  ;;  %v5947_v8 = vmul.f32 %v13484_v43, %v14075_v5  ;;  %v15031_v16 = vld [vmem:[#allocation71_spill] sm:$0xff] }
 0x410   : > { %v6433_v30 = vadd.f32 %v6415_v62, %v6390_v46  ;;  %v5922_v6 = vadd.f32 %v5904_v2, %v5879_v42  ;;  %v5990_v63 = vmul.f32 %v13496_v32, %v14081_v58  ;;  %v6033_v14 = vmul.f32 %v13505_v41, %v14083_v24 }
 0x411   : > { %v5752_v29 = vadd.f32 %v5734_v50, %v5709_v20  ;;  %v6133_v35 = vadd.f32 %v6115_v36, %v15029_v60  ;;  %v6158_v61 = vmul.f32 %v13501_v45, %v15030_v0  ;;  %v6076_v39 = vmul.f32 %v13509_v26, %v14095_v23 }
 0x412   : > { %v6476_v48 = vadd.f32 %v6458_v9, %v6433_v30  ;;  %v5965_v54 = vadd.f32 %v5947_v8, %v5922_v6  ;;  %v14131_v62 = vmul.f32 %v15018_v22, %v14051_v18  ;;  %v6119_v52 = vmul.f32 %v15018_v22, %v14097_v12  ;;  %v5882_v8 = vld [vmem:[#allocation3 + $0xb1] sm:$0xff] }
 0x413   : > { %v5795_v37 = vadd.f32 %v5777_v19, %v5752_v29  ;;  %v6176_v17 = vadd.f32 %v6158_v61, %v6133_v35  ;;  %v6201_v50 = vmul.f32 %v13517_v4, %v15031_v16  ;;  %v14139_v9 = vmul.f32 %v13501_v45, %v14067_v51  ;;  %v15032_v19 = vld [vmem:[#allocation73_spill] sm:$0xff]  ;;  %v15033_v29 = vld [vmem:[#allocation10_spill] sm:$0xff] }
 0x414   : > { %v6519_v46 = vadd.f32 %v6501_v57, %v6476_v48  ;;  %v6008_v42 = vadd.f32 %v5990_v63, %v5965_v54  ;;  %v14143_v2 = vmul.f32 %v13517_v4, %v14075_v5  ;;  %v6244_v30 = vmul.f32 %v13521_v47, %v15032_v19  ;;  %v5968_v19 = vld [vmem:[#allocation3 + $0xb3] sm:$0xff] }
 0x415   : > { %v5838_v20 = vadd.f32 %v5820_v15, %v5795_v37  ;;  %v6219_v36 = vadd.f32 %v6201_v50, %v6176_v17  ;;  %v14149_v6 = vmul.f32 %v13521_v47, %v14081_v58  ;;  %v6287_v60 = vmul.f32 %v14969_v55, %v15033_v29  ;;  %v15034_v15 = vld [vmem:[#allocation18_spill] sm:$0xff] }
 0x416   : > { %v6562_v57 = vadd.f32 %v6544_v33, %v6519_v46  ;;  %v6051_v63 = vadd.f32 %v6033_v14, %v6008_v42  ;;  %v14155_v35 = vmul.f32 %v14969_v55, %v14083_v24  ;;  %v6330_v61 = vmul.f32 %v14971_v31, %v15034_v15  ;;  %v5925_v33 = vld [vmem:[#allocation3 + $0xb2] sm:$0xff] }
 0x417   : > { %v6262_v0 = vadd.f32 %v6244_v30, %v6219_v36  ;;  %v14161_v48 = vmul.f32 %v14971_v31, %v14095_v23  ;;  %v6373_v54 = vmul.f32 %v14972_v3, %v14051_v18  ;;  %v6416_v37 = vmul.f32 %v13654_v49, %v14067_v51  ;;  %v6011_v18 = vld [vmem:[#allocation3 + $0xb4] sm:$0xff] }
 0x418   : > { %v6605_v14 = vadd.f32 %v6587_v11, %v6562_v57  ;;  %v6459_v17 = vmul.f32 %v13557_v40, %v14075_v5  ;;  %v5905_v16 = vmul.f32 %v15015_v25, %v5882_v8  ;;  %v5881_v50 = vadd.f32 %v5863_v10, %v5838_v20  ;;  %v14174_v30 = vld [vmem:[#allocation3 + $0xb5] sm:$0xff]  ;;  %v14182_v20 = vld [vmem:[#allocation3 + $0xc0] sm:$0xff] }
 0x419   : > { %v6305_v46 = vadd.f32 %v6287_v60, %v6262_v0  ;;  %v6502_v42 = vmul.f32 %v13667_v34, %v14081_v58  ;;  %v6545_v36 = vmul.f32 %v13673_v21, %v14083_v24  ;;  %v6094_v51 = vadd.f32 %v6076_v39, %v6051_v63  ;;  %v15035_v24 = vld [vmem:[#allocation69_spill] sm:$0xff] }
 0x41a   : > { %6848 = vrot.lane.b32.xlu0 %v6605_v14, %s9773_s29  ;;  %9571 = vmatprep.mubr.msk.f32.mxu0 %vm532_vm0, %v6605_v14  ;;  %v5923_v5 = vadd.f32 %v5905_v16, %v14077_v1  ;;  %v5948_v11 = vmul.f32 %v13484_v43, %v5925_v33  ;;  %v6588_v58 = vmul.f32 %v13700_v59, %v14095_v23  ;;  %v14194_v14 = vld [vmem:[#allocation3 + $0xb9] sm:$0xff] }
 0x41b   : > { %v6348_v10 = vadd.f32 %v6330_v61, %v6305_v46  ;;  %v6134_v57 = vadd.f32 %v14031_v27, %v15035_v24  ;;  %v6161_v29 = vmul.f32 %v13501_v45, %v5882_v8  ;;  %v5991_v0 = vmul.f32 %v13496_v32, %v5968_v19 }
 0x41c   : > { %v5966_v60 = vadd.f32 %v5948_v11, %v5923_v5  ;;  %v6034_v39 = vmul.f32 %v13505_v41, %v6011_v18  ;;  %v6077_v1 = vmul.f32 %v13509_v26, %v14174_v30  ;;  %v6204_v61 = vmul.f32 %v13517_v4, %v5925_v33 }
 0x41d   : > { %v6391_v63 = vadd.f32 %v6373_v54, %v6348_v10  ;;  %v6177_v15 = vadd.f32 %v14039_v53, %v6134_v57  ;;  %v6179_v23 = vadd.f32 %v6161_v29, %v14107_v13  ;;  %v6137_v27 = vadd.f32 %v6119_v52, %v6094_v51  ;;  %v14201_v53 = vld [vmem:[#allocation3 + $0xba] sm:$0xff] }
 0x41e   : > { %v6009_v16 = vadd.f32 %v5991_v0, %v5966_v60  ;;  %v6120_v46 = vmul.f32 %v15018_v22, %v14182_v20  ;;  %v6247_v5 = vmul.f32 %v13521_v47, %v5968_v19  ;;  %v6290_v54 = vmul.f32 %v14969_v55, %v6011_v18  ;;  %v14209_v51 = vld [vmem:[#allocation3 + $0xbb] sm:$0xff] }
 0x41f   : > { %v6434_v11 = vadd.f32 %v6416_v37, %v6391_v63  ;;  %v6220_v24 = vadd.f32 %v14043_v28, %v6177_v15  ;;  %v6222_v26 = vadd.f32 %v6204_v61, %v6179_v23  ;;  %v6333_v10 = vmul.f32 %v14971_v31, %v14174_v30  ;;  %v15036_v63 = vld [vmem:[#allocation19_spill] sm:$0xff] }
 0x420   : > { %v6052_v13 = vadd.f32 %v6034_v39, %v6009_v16  ;;  %v6374_v52 = vmul.f32 %v14972_v3, %v13995_v7  ;;  %v5906_v22 = vmul.f32 %v15015_v25, %v14194_v14  ;;  %v6417_v55 = vmul.f32 %v13654_v49, %v5882_v8  ;;  %v6012_v3 = vld [vmem:[#allocation3 + $0xbc] sm:$0xff] }
 0x421   : > { %v6477_v47 = vadd.f32 %v6459_v17, %v6434_v11  ;;  %v6263_v28 = vadd.f32 %v14049_v44, %v6220_v24  ;;  %v6265_v37 = vadd.f32 %v6247_v5, %v6222_v26  ;;  %v6460_v57 = vmul.f32 %v13557_v40, %v5925_v33  ;;  %v6055_v8 = vld [vmem:[#allocation3 + $0xbd] sm:$0xff]  ;;  %v14235_v5 = vld [vmem:[#allocation2 + $0x23] ss:$0 sm:$0xff]  ;;  %v9752_v11 = vld [vmem:[#allocation2 + $0x20] ss:$0 sm:$0xff] }
 0x422   : > { %v6503_v29 = vmul.f32 %v13667_v34, %v5968_v19  ;;  %v5924_v60 = vadd.f32 %v5906_v22, %v5881_v50  ;;  %v5949_v31 = vmul.f32 %v13484_v43, %v14201_v53  ;;  %v6546_v0 = vmul.f32 %v13673_v21, %v6011_v18  ;;  %v14227_v18 = vld [vmem:[#allocation3 + $0xc8] sm:$0xff] }
 0x423   : > { %v6520_v7 = vadd.f32 %v6502_v42, %v6477_v47  ;;  %v6306_v25 = vadd.f32 %v14057_v38, %v6263_v28  ;;  %v5992_v44 = vmul.f32 %v13496_v32, %v14209_v51  ;;  %v6095_v17 = vadd.f32 %v6077_v1, %v6052_v13  ;;  %v14246_v47 = vld [vmem:[#allocation2 + $0x25] ss:$0 sm:$0xff] }
 0x424   : > { %v5967_v39 = vadd.f32 %v5949_v31, %v5924_v60  ;;  %v6135_v40 = vadd.f32 %v14131_v62, %v15036_v63  ;;  %v6162_v33 = vmul.f32 %v13501_v45, %v14194_v14  ;;  %v6308_v43 = vadd.f32 %v6290_v54, %v6265_v37  ;;  %v14243_v54 = vld [vmem:[#allocation2 + $0x24] ss:$0 sm:$0xff]  ;;  %v14249_v37 = vld [vmem:[#allocation2 + $0x28] ss:$0 sm:$0xff]  ;;  %v9758_v63 = vld [vmem:[#allocation2 + $0x22] ss:$0 sm:$0xff] }
 0x425   : > { %v6563_v50 = vadd.f32 %v6545_v36, %v6520_v7  ;;  %v6349_v42 = vadd.f32 %v14063_v56, %v6306_v25  ;;  %v6035_v38 = vmul.f32 %v13505_v41, %v6012_v3  ;;  %v6205_v15 = vmul.f32 %v13517_v4, %v14201_v53  ;;  %v9750_v36 = vld [vmem:[#allocation2 + $0x1d] ss:$0 sm:$0xff]  ;;  %v14256_v7 = vld [vmem:[#allocation2 + $0x2a] ss:$0 sm:$0xff]  ;;  %v6226_v25 = vld [vmem:[#allocation3 + $0xc3] sm:$0xff] }
 0x426   : > { %v6010_v19 = vadd.f32 %v5992_v44, %v5967_v39  ;;  %v6178_v32 = vadd.f32 %v14139_v9, %v6135_v40  ;;  %v6180_v1 = vadd.f32 %v6162_v33, %v6137_v27  ;;  %v6589_v45 = vmul.f32 %v13700_v59, %v14174_v30  ;;  %v6140_v27 = vld [vmem:[#allocation3 + $0xc1] sm:$0xff] }
 0x427   : > { %v6606_v23 = vadd.f32 %v6588_v58, %v6563_v50  ;;  %v6392_v62 = vadd.f32 %v6374_v52, %v6349_v42  ;;  %v6078_v61 = vmul.f32 %v9750_v36, %v6055_v8  ;;  %v6248_v9 = vmul.f32 %v14235_v5, %v14209_v51  ;;  %v6183_v52 = vld [vmem:[#allocation3 + $0xc2] sm:$0xff]  ;;  %v6184_v36 = vld [vmem:[#allocation3 + $0xca] sm:$0xff] }
 0x428   : > { %v6053_v16 = vadd.f32 %v6035_v38, %v6010_v19  ;;  %v6221_v56 = vadd.f32 %v14143_v2, %v6178_v32  ;;  %v6223_v41 = vadd.f32 %v6205_v15, %v6180_v1  ;;  %v6138_v4 = vadd.f32 %v6120_v46, %v6095_v17  ;;  %v6269_v50 = vld [vmem:[#allocation3 + $0xc4] sm:$0xff] }
 0x429   : > { %6850 = vrot.lane.b32.xlu1 %v6606_v23, %s9773_s29  ;;  %9572 = vmatmul.mubr.msk.f32.gmra.mxu0 %vm532_vm0, %v6606_v23  ;;  %v6435_v58 = vadd.f32 %v6417_v55, %v6392_v62  ;;  %v6121_v30 = vmul.f32 %v9752_v11, %v14227_v18  ;;  %v6351_v24 = vadd.f32 %v6333_v10, %v6308_v43  ;;  %v9756_v55 = vld [vmem:[#allocation2 + $0x21] ss:$0 sm:$0xff]  ;;  %v6141_v38 = vld [vmem:[#allocation3 + $0xc9] sm:$0xff] }
 0x42a   : > { %v6264_v26 = vadd.f32 %v14149_v6, %v6221_v56  ;;  %v6266_v2 = vadd.f32 %v6248_v9, %v6223_v41  ;;  %v6291_v13 = vmul.f32 %v14243_v54, %v6012_v3  ;;  %v6334_v28 = vmul.f32 %v14246_v47, %v6055_v8  ;;  %v6312_v1 = vld [vmem:[#allocation3 + $0xc5] sm:$0xff] }
 0x42b   : > { %v6478_v22 = vadd.f32 %v6460_v57, %v6435_v58  ;;  %v6375_v46 = vmul.f32 %v14249_v37, %v14097_v12  ;;  %v6163_v10 = vmul.f32 %v9756_v55, %v6140_v27  ;;  %v6096_v60 = vadd.f32 %v6078_v61, %v6053_v16  ;;  %v6227_v9 = vld [vmem:[#allocation3 + $0xcb] sm:$0xff] }
 0x42c   : > { %v6307_v6 = vadd.f32 %v14155_v35, %v6264_v26  ;;  %v6418_v31 = vmul.f32 %v13654_v49, %v14194_v14  ;;  %v6461_v57 = vmul.f32 %v14256_v7, %v14201_v53  ;;  %v6309_v17 = vadd.f32 %v6291_v13, %v6266_v2  ;;  %v6270_v2 = vld [vmem:[#allocation3 + $0xcc] sm:$0xff] }
 0x42d   : > { %v6521_v44 = vadd.f32 %v6503_v29, %v6478_v22  ;;  %v6181_v39 = vadd.f32 %v6163_v10, %v6138_v4  ;;  %v6206_v40 = vmul.f32 %v9758_v63, %v6183_v52  ;;  %v6504_v33 = vmul.f32 %v13667_v34, %v14209_v51 }
 0x42e   : > { %v6350_v12 = vadd.f32 %v14161_v48, %v6307_v6  ;;  %v6547_v35 = vmul.f32 %v13673_v21, %v6012_v3  ;;  %v6376_v14 = vmul.f32 %v14249_v37, %v14182_v20  ;;  %v6590_v53 = vmul.f32 %v13700_v59, %v6055_v8 }
 0x42f   : > { %v6564_v43 = vadd.f32 %v6546_v0, %v6521_v44  ;;  %v6224_v42 = vadd.f32 %v6206_v40, %v6181_v39  ;;  %v6249_v29 = vmul.f32 %v14235_v5, %v6226_v25  ;;  %v6139_v19 = vadd.f32 %v6121_v30, %v6096_v60  ;;  %v6355_v0 = vld [vmem:[#allocation3 + $0xd0] sm:$0xff]  ;;  %v9759_v40 = vld [vmem:[#allocation2 + $0x29] ss:$0 sm:$0xff] }
 0x430   : > { %v6393_v32 = vadd.f32 %v6375_v46, %v6350_v12  ;;  %v6394_v48 = vadd.f32 %v6376_v14, %v6351_v24  ;;  %v6419_v15 = vmul.f32 %v13654_v49, %v6140_v27  ;;  %v6352_v23 = vadd.f32 %v6334_v28, %v6309_v17  ;;  %v6313_v60 = vld [vmem:[#allocation3 + $0xcd] sm:$0xff] }
 0x431   : > { %v6607_v51 = vadd.f32 %v6589_v45, %v6564_v43  ;;  %v6267_v3 = vadd.f32 %v6249_v29, %v6224_v42  ;;  %v6292_v62 = vmul.f32 %v14243_v54, %v6269_v50  ;;  %v6462_v8 = vmul.f32 %v14256_v7, %v6183_v52  ;;  %v6441_v17 = vld [vmem:[#allocation3 + $0xd2] sm:$0xff] }
 0x432   : > { %v6436_v20 = vadd.f32 %v6418_v31, %v6393_v32  ;;  %v6437_v61 = vadd.f32 %v6419_v15, %v6394_v48  ;;  %v6164_v16 = vmul.f32 %v9756_v55, %v6141_v38  ;;  %v6335_v41 = vmul.f32 %v14246_v47, %v6312_v1  ;;  %v6484_v14 = vld [vmem:[#allocation3 + $0xd3] sm:$0xff] }
 0x433   : > { %6852 = vrot.lane.b32.xlu0 %v6607_v51, %s9773_s29  ;;  %9574 = vmatprep.mubr.msk.f32.mxu0 %vm532_vm0, %v6607_v51  ;;  %v6310_v56 = vadd.f32 %v6292_v62, %v6267_v3  ;;  %v6505_v45 = vmul.f32 %v13667_v34, %v6226_v25  ;;  %v6207_v11 = vmul.f32 %v9758_v63, %v6184_v36  ;;  %v6398_v34 = vld [vmem:[#allocation3 + $0xd1] sm:$0xff]  ;;  %v6442_v51 = vld [vmem:[#allocation3 + $0xda] sm:$0xff] }
 0x434   : > { %v6479_v27 = vadd.f32 %v6461_v57, %v6436_v20  ;;  %v6480_v4 = vadd.f32 %v6462_v8, %v6437_v61  ;;  %v6182_v58 = vadd.f32 %v6164_v16, %v6139_v19  ;;  %v6378_v24 = vmul.f32 %v14249_v37, %v6355_v0  ;;  %v9762_v62 = vld [vmem:[#allocation2 + $0x2d] ss:$0 sm:$0xff]  ;;  %v6570_v20 = vld [vmem:[#allocation3 + $0xd5] sm:$0xff] }
 0x435   : > { %v6353_v30 = vadd.f32 %v6335_v41, %v6310_v56  ;;  %v6548_v26 = vmul.f32 %v13673_v21, %v6269_v50  ;;  %v6377_v13 = vmul.f32 %v14249_v37, %v14227_v18  ;;  %v6250_v46 = vmul.f32 %v14235_v5, %v6227_v9  ;;  %v6356_v18 = vld [vmem:[#allocation3 + $0xd8] sm:$0xff]  ;;  %v7181_v8 = vld [vmem:[%s14516_s12] sm:$0xff] }
 0x436   : > { %v6522_v52 = vadd.f32 %v6504_v33, %v6479_v27  ;;  %v6523_v22 = vadd.f32 %v6505_v45, %v6480_v4  ;;  %v6225_v28 = vadd.f32 %v6207_v11, %v6182_v58  ;;  %v6591_v10 = vmul.f32 %v13700_v59, %v6312_v1  ;;  %v6527_v1 = vld [vmem:[#allocation3 + $0xd4] sm:$0xff] }
 0x437   : > { %v6396_v55 = vadd.f32 %v6378_v24, %v6353_v30  ;;  %v6395_v6 = vadd.f32 %v6377_v13, %v6352_v23  ;;  %v6420_v31 = vmul.f32 %v13654_v49, %v6141_v38  ;;  %v6293_v44 = vmul.f32 %v14243_v54, %v6270_v2  ;;  %v9760_v49 = vld [vmem:[#allocation2 + $0x2b] ss:$0 sm:$0xff]  ;;  %v14294_v23 = vld [vmem:[%s14514_s10] ss:$0 sm:$0xff] }
 0x438   : > { %v6565_v57 = vadd.f32 %v6547_v35, %v6522_v52  ;;  %v6566_v25 = vadd.f32 %v6548_v26, %v6523_v22  ;;  %v6268_v21 = vadd.f32 %v6250_v46, %v6225_v28  ;;  %v6463_v63 = vmul.f32 %v14256_v7, %v6184_v36  ;;  %v6399_v54 = vld [vmem:[#allocation3 + $0xd9] sm:$0xff] }
 0x439   : > { %v6438_v39 = vadd.f32 %v6420_v31, %v6395_v6  ;;  %v6421_v5 = vmul.f32 %v9759_v40, %v6398_v34  ;;  %v6336_v59 = vmul.f32 %v14246_v47, %v6313_v60  ;;  %v6506_v35 = vmul.f32 %v9760_v49, %v6227_v9  ;;  %v6485_v45 = vld [vmem:[#allocation3 + $0xdb] sm:$0xff]  ;;  %v14305_v9 = vld [vmem:[%s14515_s11] ss:$0 sm:$0xff] }
 0x43a   : > { %v6608_v12 = vadd.f32 %v6590_v53, %v6565_v57  ;;  %v6609_v33 = vadd.f32 %v6591_v10, %v6566_v25  ;;  %v6311_v50 = vadd.f32 %v6293_v44, %v6268_v21  ;;  %v6464_v29 = vmul.f32 %v14256_v7, %v6441_v17  ;;  %v9761_v53 = vld [vmem:[#allocation2 + $0x2c] ss:$0 sm:$0xff]  ;;  %v6571_v34 = vld [vmem:[#allocation3 + $0xdd] sm:$0xff]  ;;  %v6833_v44 = vpop.permute.xlu1 %6832 }
 0x43b   : > { %v6481_v43 = vadd.f32 %v6463_v63, %v6438_v39  ;;  %v6439_v42 = vadd.f32 %v6421_v5, %v6396_v55  ;;  %v6379_v19 = vmul.f32 %v14249_v37, %v6356_v18  ;;  %v6549_v32 = vmul.f32 %v9761_v53, %v6270_v2  ;;  %v7182_v37 = vld [vmem:[%s14516_s12 + $0x8] sm:$0xff]  ;;  %v9558_v61 = vpop.f32.mrf.mxu0 }
 0x43c   : > { %6854 = vrot.lane.b32.xlu1 %v6608_v12, %s9773_s29  ;;  %9575 = vmatmul.mubr.msk.f32.gmra.mxu0 %vm532_vm0, %v6608_v12  ;;  %v6354_v38 = vadd.f32 %v6336_v59, %v6311_v50  ;;  %v6507_v15 = vmul.f32 %v9760_v49, %v6484_v14  ;;  %v6592_v36 = vmul.f32 %v9762_v62, %v6313_v60  ;;  %v6528_v2 = vld [vmem:[#allocation3 + $0xdc] sm:$0xff]  ;;  %v6829_v60 = vpop.permute.xlu0 %6828 }
 0x43d   : > { %6856 = vrot.lane.b32.xlu0 %v6609_v33, %s9773_s29  ;;  %9577 = vmatprep.mubr.msk.f32.mxu0 %vm532_vm0, %v6609_v33  ;;  %v6524_v47 = vadd.f32 %v6506_v35, %v6481_v43  ;;  %v6482_v48 = vadd.f32 %v6464_v29, %v6439_v42  ;;  %v6422_v0 = vmul.f32 %v9759_v40, %v6399_v54  ;;  %v6737_v11 = vpop.f32.mrf.mxu0 }
 0x43e   : > { %v6397_v3 = vadd.f32 %v6379_v19, %v6354_v38  ;;  %9645 = vmatprep.subr.mxu1 %v7182_v37  ;;  %v6550_v41 = vmul.f32 %v9761_v53, %v6527_v1  ;;  %v7062_v27 = vmul.f32 %v9558_v61, %v14294_v23  ;;  %v6465_v58 = vmul.f32 %v14256_v7, %v6442_v51  ;;  %v6835_v18 = vpop.permute.xlu1 %6834  ;;  %v7184_v51 = vld [vmem:[%s14517_s13 + $0x8] sm:$0xff] }
 0x43f   : > { %v6567_v16 = vadd.f32 %v6549_v32, %v6524_v47  ;;  %v6525_v56 = vadd.f32 %v6507_v15, %v6482_v48  ;;  %9646 = vmatpush3.msra.mxu1 %v7182_v37  ;;  %v6593_v26 = vmul.f32 %v9762_v62, %v6570_v20  ;;  %v7061_v13 = vmul.f32 %v14294_v23, %v6737_v11  ;;  %v7183_v37 = vld [vmem:[%s14517_s13] sm:$0xff] }
 0x440   : > { %v6440_v4 = vadd.f32 %v6422_v0, %v6397_v3  ;;  %9647 = vmatprep.subr.mxu1 %v7181_v8  ;;  %v6508_v22 = vmul.f32 %v9760_v49, %v6485_v45  ;;  %v7086_v28 = vadd.f32 %v14305_v9, %v7062_v27  ;;  %v6551_v10 = vmul.f32 %v9761_v53, %v6528_v2  ;;  %v6831_v17 = vpop.permute.xlu0 %6830 }
 0x441   : > { %v6610_v30 = vadd.f32 %v6592_v36, %v6567_v16  ;;  %v6568_v24 = vadd.f32 %v6550_v41, %v6525_v56  ;;  %9648 = vmatpush3.msra.mxu1 %v7181_v8  ;;  %v7085_v7 = vadd.f32 %v14305_v9, %v7061_v13  ;;  %v6594_v57 = vmul.f32 %v9762_v62, %v6571_v34 }
 0x442   : > { %v6483_v52 = vadd.f32 %v6465_v58, %v6440_v4  ;;  %v7104_v25 = vmax.f32 %v7086_v28, 0.0  ;;  %v6839_v63 = vpop.permute.xlu1 %6838  ;;  %9614 = vmatprep.subr.mxu0 %v7184_v51 }
 0x443   : > { %6858 = vrot.lane.b32.xlu1 %v6610_v30, %s9773_s29  ;;  %9578 = vmatmul.mubr.msk.f32.gmra.mxu0 %vm532_vm0, %v6610_v30  ;;  %v6611_v46 = vadd.f32 %v6593_v26, %v6568_v24  ;;  %v7103_v6 = vmax.f32 %v7085_v7, 0.0 }
 0x444   : > { %v6526_v55 = vadd.f32 %v6508_v22, %v6483_v52  ;;  %v6837_v39 = vpop.permute.xlu0 %6836 }
 0x445   : > { %6860 = vrot.lane.b32.xlu0 %v6611_v46, %s9773_s29  ;;  %9580 = vmatprep.mubr.msk.f32.mxu0 %vm532_vm0, %v6611_v46 }
 0x446   : > { %v6569_v31 = vadd.f32 %v6551_v10, %v6526_v55  ;;  %9649 = vmatprep.mubr.msk.f32.mxu1 %vm532_vm0, %v7103_v6 }
 0x447   : > { %9650 = vmatmul.mubr.msk.f32.vlgmr.msra.gmra.mxu1 %vm532_vm0, %v7104_v25 }
 0x448   : > { %v6612_v21 = vadd.f32 %v6594_v57, %v6569_v31 }
 0x449   : > { %7121 = vrot.lane.b32.xlu0 %v14294_v23, %s9773_s29 }
 0x44a   : > { %6862 = vrot.lane.b32.xlu1 %v6612_v21, %s9773_s29  ;;  %9581 = vmatmul.mubr.msk.f32.gmra.mxu0 %vm532_vm0, %v6612_v21 }
 0x44b   : > { %9587 = vmatprep.mubr.msk.f32.mxu0 %vm532_vm0, %v6829_v60 }
 0x44e   : > { %9588 = vmatmul.mubr.msk.f32.vlgmr.msra.gmra.mxu0 %vm532_vm0, %v6831_v17  ;;  %7142 = vrot.lane.b32.xlu1 %v14305_v9, %s9773_s29  ;;  %v6841_v40 = vpop.permute.xlu0 %6840 }
 0x44f   : > { %9590 = vmatprep.mubr.msk.f32.mxu0 %vm532_vm0, %v6833_v44  ;;  %9615 = vmatpush3.msra.mxu0 %v7184_v51 }
 0x450   : > { %9616 = vmatprep.subr.mxu0 %v7183_v37 }
 0x451   : > { %9617 = vmatpush3.msra.mxu0 %v7183_v37 }
 0x452   : > { %9591 = vmatmul.mubr.msk.f32.gmra.mxu0 %vm532_vm0, %v6835_v18 }
 0x453   : > { %9593 = vmatprep.mubr.msk.f32.mxu0 %vm532_vm0, %v6837_v39 }
 0x456   : > { %9594 = vmatmul.mubr.msk.f32.gmra.mxu0 %vm532_vm0, %v6839_v63 }
 0x457   : > { %9596 = vmatprep.mubr.msk.f32.mxu0 %vm532_vm0, %v6841_v40 }
 0x461   : > { %v6843_v5 = vpop.permute.xlu1 %6842 }
 0x462   : > { %9597 = vmatmul.mubr.msk.f32.gmra.mxu0 %vm532_vm0, %v6843_v5 }
 0x469   : > { %v9561_v12 = vpop.f32.mrf.mxu0 }
 0x46a   : > { %v7064_v33 = vmul.f32 %v9561_v12, %v14294_v23 }
 0x46b   : > { %v6747_v50 = vpop.f32.mrf.mxu0 }
 0x46c   : > { %v7063_v14 = vmul.f32 %v14294_v23, %v6747_v50  ;;  %v7088_v43 = vadd.f32 %v14305_v9, %v7064_v33 }
 0x46e   : > { %v7087_v49 = vadd.f32 %v14305_v9, %v7063_v14  ;;  %v7106_v42 = vmax.f32 %v7088_v43, 0.0 }
 0x46f   : > { %v6845_v59 = vpop.permute.xlu0 %6844 }
 0x470   : > { %9599 = vmatprep.mubr.msk.f32.mxu0 %vm532_vm0, %v6845_v59  ;;  %v7105_v35 = vmax.f32 %v7087_v49, 0.0 }
 0x472   : > { %9652 = vmatprep.mubr.msk.f32.mxu1 %vm532_vm0, %v7105_v35 }
 0x473   : > { %9653 = vmatmul.mubr.msk.f32.gmra.mxu1 %vm532_vm0, %v7106_v42 }
 0x47f   : > { %v6847_v29 = vpop.permute.xlu1 %6846 }
 0x480   : > { %9600 = vmatmul.mubr.msk.f32.gmra.mxu0 %vm532_vm0, %v6847_v29 }
 0x48a   : > { %v9564_v38 = vpop.f32.mrf.mxu0 }
 0x48b   : > { %v7066_v19 = vmul.f32 %v9564_v38, %v14294_v23 }
 0x48c   : > { %v6849_v54 = vpop.permute.xlu0 %6848  ;;  %v6757_v53 = vpop.f32.mrf.mxu0 }
 0x48d   : > { %9602 = vmatprep.mubr.msk.f32.mxu0 %vm532_vm0, %v6849_v54  ;;  %v7065_v32 = vmul.f32 %v14294_v23, %v6757_v53  ;;  %v7090_v1 = vadd.f32 %v14305_v9, %v7066_v19 }
 0x48f   : > { %v7089_v47 = vadd.f32 %v14305_v9, %v7065_v32  ;;  %v7108_v15 = vmax.f32 %v7090_v1, 0.0 }
 0x491   : > { %v7107_v48 = vmax.f32 %v7089_v47, 0.0 }
 0x493   : > { %9655 = vmatprep.mubr.msk.f32.mxu1 %vm532_vm0, %v7107_v48 }
 0x494   : > { %9656 = vmatmul.mubr.msk.f32.gmra.mxu1 %vm532_vm0, %v7108_v15 }
 0x49b   : > { %v6851_v3 = vpop.permute.xlu1 %6850 }
 0x49c   : > { %9603 = vmatmul.mubr.msk.f32.gmra.mxu0 %vm532_vm0, %v6851_v3 }
 0x4a5   : > { %v6853_v62 = vpop.permute.xlu0 %6852 }
 0x4a6   : > { %9605 = vmatprep.mubr.msk.f32.mxu0 %vm532_vm0, %v6853_v62 }
 0x4ae   : > { %v6855_v36 = vpop.permute.xlu1 %6854 }
 0x4af   : > { %9606 = vmatmul.mubr.msk.f32.gmra.mxu0 %vm532_vm0, %v6855_v36  ;;  %v6857_v20 = vpop.permute.xlu0 %6856  ;;  %v9567_v0 = vpop.f32.mrf.mxu0 }
 0x4b0   : > { %9608 = vmatprep.mubr.msk.f32.mxu0 %vm532_vm0, %v6857_v20  ;;  %v7068_v61 = vmul.f32 %v9567_v0, %v14294_v23 }
 0x4b1   : > { %v6767_v8 = vpop.f32.mrf.mxu0 }
 0x4b2   : > { %v7067_v16 = vmul.f32 %v14294_v23, %v6767_v8  ;;  %v7092_v56 = vadd.f32 %v14305_v9, %v7068_v61 }
 0x4b4   : > { %v7091_v41 = vadd.f32 %v14305_v9, %v7067_v16  ;;  %v7110_v58 = vmax.f32 %v7092_v56, 0.0 }
 0x4b5   : > { %v6859_v45 = vpop.permute.xlu1 %6858 }
 0x4b6   : > { %9609 = vmatmul.mubr.msk.f32.gmra.mxu0 %vm532_vm0, %v6859_v45  ;;  %v7109_v27 = vmax.f32 %v7091_v41, 0.0 }
 0x4b7   : > { %v6861_v4 = vpop.permute.xlu0 %6860 }
 0x4b8   : > { %9611 = vmatprep.mubr.msk.f32.mxu0 %vm532_vm0, %v6861_v4  ;;  %9658 = vmatprep.mubr.msk.f32.mxu1 %vm532_vm0, %v7109_v27 }
 0x4b9   : > { %9659 = vmatmul.mubr.msk.f32.gmra.mxu1 %vm532_vm0, %v7110_v58 }
 0x4bb   : > { %v14390_v29 = vpop.permute.xlu0 %7121 }
 0x4bc   : > { %v6863_v11 = vpop.permute.xlu1 %6862 }
 0x4bd   : > { %9612 = vmatmul.mubr.msk.f32.gmra.mxu0 %vm532_vm0, %v6863_v11 }
 0x4c0   : > { %v14397_v1 = vpop.permute.xlu1 %7142 }
 0x4cd   : > { %v9570_v30 = vpop.f32.mrf.mxu0 }
 0x4ce   : > { %v7070_v24 = vmul.f32 %v9570_v30, %v14294_v23 }
 0x4cf   : > { %v6777_v26 = vpop.f32.mrf.mxu0 }
 0x4d0   : > { %v7069_v2 = vmul.f32 %v14294_v23, %v6777_v26  ;;  %v7094_v13 = vadd.f32 %v14305_v9, %v7070_v24 }
 0x4d2   : > { %v7093_v52 = vadd.f32 %v14305_v9, %v7069_v2  ;;  %v7112_v28 = vmax.f32 %v7094_v13, 0.0 }
 0x4d4   : > { %v7111_v22 = vmax.f32 %v7093_v52, 0.0 }
 0x4d6   : > { %9661 = vmatprep.mubr.msk.f32.mxu1 %vm532_vm0, %v7111_v22 }
 0x4d7   : > { %9662 = vmatmul.mubr.msk.f32.gmra.mxu1 %vm532_vm0, %v7112_v28 }
 0x4e9   : > { %v9573_v46 = vpop.f32.mrf.mxu0 }
 0x4ea   : > { %v7072_v34 = vmul.f32 %v9573_v46, %v14294_v23 }
 0x4eb   : > { %v6787_v7 = vpop.f32.mrf.mxu0 }
 0x4ec   : > { %v7071_v55 = vmul.f32 %v14294_v23, %v6787_v7  ;;  %v7096_v10 = vadd.f32 %v14305_v9, %v7072_v34 }
 0x4ee   : > { %v7095_v60 = vadd.f32 %v14305_v9, %v7071_v55  ;;  %v7114_v31 = vmax.f32 %v7096_v10, 0.0 }
 0x4f0   : > { %v7113_v6 = vmax.f32 %v7095_v60, 0.0 }
 0x4f2   : > { %9664 = vmatprep.mubr.msk.f32.mxu1 %vm532_vm0, %v7113_v6 }
 0x4f3   : > { %9665 = vmatmul.mubr.msk.f32.gmra.mxu1 %vm532_vm0, %v7114_v31 }
 0x4fc   : > { %v9576_v57 = vpop.f32.mrf.mxu0 }
 0x4fd   : > { %v7074_v25 = vmul.f32 %v9576_v57, %v14294_v23 }
 0x4fe   : > { %v6797_v21 = vpop.f32.mrf.mxu0 }
 0x4ff   : > { %v7073_v44 = vmul.f32 %v14294_v23, %v6797_v21  ;;  %v7098_v17 = vadd.f32 %v14305_v9, %v7074_v25 }
 0x501   : > { %v7097_v18 = vadd.f32 %v14305_v9, %v7073_v44  ;;  %v7116_v40 = vmax.f32 %v7098_v17, 0.0 }
 0x503   : > { %v7115_v39 = vmax.f32 %v7097_v18, 0.0  ;;  %v9579_v63 = vpop.f32.mrf.mxu0 }
 0x504   : > { %v7076_v5 = vmul.f32 %v9579_v63, %v14294_v23 }
 0x505   : > { %9667 = vmatprep.mubr.msk.f32.mxu1 %vm532_vm0, %v7115_v39  ;;  %v6807_v12 = vpop.f32.mrf.mxu0 }
 0x506   : > { %v7075_v33 = vmul.f32 %v14294_v23, %v6807_v12  ;;  %9668 = vmatmul.mubr.msk.f32.gmra.mxu1 %vm532_vm0, %v7116_v40  ;;  %v7100_v50 = vadd.f32 %v14305_v9, %v7076_v5 }
 0x508   : > { %v7099_v59 = vadd.f32 %v14305_v9, %v7075_v33  ;;  %v7118_v49 = vmax.f32 %v7100_v50, 0.0 }
 0x50a   : > { %v7117_v14 = vmax.f32 %v7099_v59, 0.0  ;;  %v9582_v43 = vpop.f32.mrf.mxu0 }
 0x50b   : > { %v7078_v35 = vmul.f32 %v9582_v43, %v14294_v23 }
 0x50c   : > { %9670 = vmatprep.mubr.msk.f32.mxu1 %vm532_vm0, %v7117_v14  ;;  %v6817_v42 = vpop.f32.mrf.mxu0 }
 0x50d   : > { %v7077_v54 = vmul.f32 %v14294_v23, %v6817_v42  ;;  %9671 = vmatmul.mubr.msk.f32.gmra.mxu1 %vm532_vm0, %v7118_v49  ;;  %v7102_v38 = vadd.f32 %v14305_v9, %v7078_v35 }
 0x50e   : > { %v9589_v19 = vpop.f32.mrf.mxu0 }
 0x50f   : > { %v7101_v53 = vadd.f32 %v14305_v9, %v7077_v54  ;;  %v7125_v32 = vmul.f32 %v9589_v19, %v14390_v29  ;;  %v7120_v51 = vmax.f32 %v7102_v38, 0.0 }
 0x510   : > { %v6966_v47 = vpop.f32.mrf.mxu0 }
 0x511   : > { %v7119_v48 = vmax.f32 %v7101_v53, 0.0  ;;  %v7124_v15 = vmul.f32 %v14390_v29, %v6966_v47  ;;  %v7146_v3 = vadd.f32 %v14397_v1, %v7125_v32 }
 0x512   : > { %v9592_v37 = vpop.f32.mrf.mxu0 }
 0x513   : > { %9673 = vmatprep.mubr.msk.f32.mxu1 %vm532_vm0, %v7119_v48  ;;  %v7145_v23 = vadd.f32 %v14397_v1, %v7124_v15  ;;  %v7127_v62 = vmul.f32 %v9592_v37, %v14390_v29  ;;  %v7164_v61 = vmax.f32 %v7146_v3, 0.0 }
 0x514   : > { %9674 = vmatmul.mubr.msk.f32.gmra.mxu1 %vm532_vm0, %v7120_v51  ;;  %v6976_v9 = vpop.f32.mrf.mxu0 }
 0x515   : > { %v7163_v36 = vmax.f32 %v7145_v23, 0.0  ;;  %v7126_v20 = vmul.f32 %v14390_v29, %v6976_v9  ;;  %v7148_v0 = vadd.f32 %v14397_v1, %v7127_v62 }
 0x516   : > { %v9595_v8 = vpop.f32.mrf.mxu0 }
 0x517   : > { %9618 = vmatprep.mubr.msk.f32.mxu0 %vm532_vm0, %v7163_v36  ;;  %v7147_v16 = vadd.f32 %v14397_v1, %v7126_v20  ;;  %v7129_v56 = vmul.f32 %v9595_v8, %v14390_v29  ;;  %v7166_v4 = vmax.f32 %v7148_v0, 0.0  ;;  %v9651_v20 = vpop.f32.mrf.mxu1 }
 0x518   : > { %9619 = vmatmul.mubr.msk.f32.vlgmr.msra.gmra.mxu0 %vm532_vm0, %v7164_v61  ;;  %v6986_v41 = vpop.f32.mrf.mxu0 }
 0x519   : > { %v7165_v45 = vmax.f32 %v7147_v16, 0.0  ;;  %v7128_v27 = vmul.f32 %v14390_v29, %v6986_v41  ;;  %v7150_v58 = vadd.f32 %v14397_v1, %v7129_v56  ;;  %v7514_v0 = vpop.f32.mrf.mxu1 }
 0x51b   : > { %9621 = vmatprep.mubr.msk.f32.mxu0 %vm532_vm0, %v7165_v45  ;;  %v7149_v11 = vadd.f32 %v14397_v1, %v7128_v27  ;;  %v7168_v24 = vmax.f32 %v7150_v58, 0.0 }
 0x51c   : > { %9622 = vmatmul.mubr.msk.f32.gmra.mxu0 %vm532_vm0, %v7166_v4 }
 0x51d   : > { %v7167_v30 = vmax.f32 %v7149_v11, 0.0 }
 0x51f   : > { %9624 = vmatprep.mubr.msk.f32.mxu0 %vm532_vm0, %v7167_v30 }
 0x520   : > { %9625 = vmatmul.mubr.msk.f32.gmra.mxu0 %vm532_vm0, %v7168_v24 }
 0x522   : > { %v9598_v26 = vpop.f32.mrf.mxu0 }
 0x523   : > { %v7131_v2 = vmul.f32 %v9598_v26, %v14390_v29 }
 0x524   : > { %v6996_v13 = vpop.f32.mrf.mxu0 }
 0x525   : > { %v7130_v52 = vmul.f32 %v14390_v29, %v6996_v13  ;;  %v7152_v22 = vadd.f32 %v14397_v1, %v7131_v2 }
 0x527   : > { %v7151_v28 = vadd.f32 %v14397_v1, %v7130_v52  ;;  %v7170_v34 = vmax.f32 %v7152_v22, 0.0 }
 0x529   : > { %v7169_v46 = vmax.f32 %v7151_v28, 0.0 }
 0x52b   : > { %9627 = vmatprep.mubr.msk.f32.mxu0 %vm532_vm0, %v7169_v46 }
 0x52c   : > { %9628 = vmatmul.mubr.msk.f32.gmra.mxu0 %vm532_vm0, %v7170_v34 }
 0x533   : > { %v9654_v61 = vpop.f32.mrf.mxu1 }
 0x535   : > { %v7524_v45 = vpop.f32.mrf.mxu1 }
 0x540   : > { %v9601_v7 = vpop.f32.mrf.mxu0 }
 0x541   : > { %v7133_v55 = vmul.f32 %v9601_v7, %v14390_v29 }
 0x542   : > { %v7006_v10 = vpop.f32.mrf.mxu0 }
 0x543   : > { %v7132_v60 = vmul.f32 %v14390_v29, %v7006_v10  ;;  %v7154_v6 = vadd.f32 %v14397_v1, %v7133_v55 }
 0x545   : > { %v7153_v31 = vadd.f32 %v14397_v1, %v7132_v60  ;;  %v7172_v25 = vmax.f32 %v7154_v6, 0.0 }
 0x547   : > { %v7171_v57 = vmax.f32 %v7153_v31, 0.0 }
 0x549   : > { %9630 = vmatprep.mubr.msk.f32.mxu0 %vm532_vm0, %v7171_v57 }
 0x54a   : > { %9631 = vmatmul.mubr.msk.f32.gmra.mxu0 %vm532_vm0, %v7172_v25 }
 0x554   : > { %v9657_v11 = vpop.f32.mrf.mxu1 }
 0x556   : > { %v7534_v22 = vpop.f32.mrf.mxu1 }
 0x55c   : > { %v9604_v21 = vpop.f32.mrf.mxu0 }
 0x55d   : > { %v7135_v44 = vmul.f32 %v9604_v21, %v14390_v29 }
 0x55e   : > { %v7016_v17 = vpop.f32.mrf.mxu0 }
 0x55f   : > { %v7134_v18 = vmul.f32 %v14390_v29, %v7016_v17  ;;  %v7156_v39 = vadd.f32 %v14397_v1, %v7135_v44 }
 0x561   : > { %v7155_v63 = vadd.f32 %v14397_v1, %v7134_v18  ;;  %v7174_v5 = vmax.f32 %v7156_v39, 0.0 }
 0x563   : > { %v7173_v40 = vmax.f32 %v7155_v63, 0.0 }
 0x565   : > { %9633 = vmatprep.mubr.msk.f32.mxu0 %vm532_vm0, %v7173_v40 }
 0x566   : > { %9634 = vmatmul.mubr.msk.f32.gmra.mxu0 %vm532_vm0, %v7174_v5 }
 0x56f   : > { %v9607_v12 = vpop.f32.mrf.mxu0 }
 0x570   : > { %v7137_v33 = vmul.f32 %v9607_v12, %v14390_v29 }
 0x571   : > { %v7026_v50 = vpop.f32.mrf.mxu0 }
 0x572   : > { %v7136_v59 = vmul.f32 %v14390_v29, %v7026_v50  ;;  %v7158_v14 = vadd.f32 %v14397_v1, %v7137_v33 }
 0x574   : > { %v7157_v43 = vadd.f32 %v14397_v1, %v7136_v59  ;;  %v7176_v42 = vmax.f32 %v7158_v14, 0.0 }
 0x576   : > { %v7175_v49 = vmax.f32 %v7157_v43, 0.0  ;;  %v9610_v35 = vpop.f32.mrf.mxu0 }
 0x577   : > { %v7139_v54 = vmul.f32 %v9610_v35, %v14390_v29 }
 0x578   : > { %9636 = vmatprep.mubr.msk.f32.mxu0 %vm532_vm0, %v7175_v49  ;;  %v7036_v38 = vpop.f32.mrf.mxu0 }
 0x579   : > { %v7138_v19 = vmul.f32 %v14390_v29, %v7036_v38  ;;  %9637 = vmatmul.mubr.msk.f32.gmra.mxu0 %vm532_vm0, %v7176_v42  ;;  %v7160_v53 = vadd.f32 %v14397_v1, %v7139_v54  ;;  %v9660_v55 = vpop.f32.mrf.mxu1 }
 0x57b   : > { %v7159_v32 = vadd.f32 %v14397_v1, %v7138_v19  ;;  %v7178_v15 = vmax.f32 %v7160_v53, 0.0  ;;  %v7544_v6 = vpop.f32.mrf.mxu1 }
 0x57d   : > { %v7177_v47 = vmax.f32 %v7159_v32, 0.0  ;;  %v9613_v48 = vpop.f32.mrf.mxu0 }
 0x57e   : > { %v7141_v51 = vmul.f32 %v9613_v48, %v14390_v29 }
 0x57f   : > { %9639 = vmatprep.mubr.msk.f32.mxu0 %vm532_vm0, %v7177_v47  ;;  %v7046_v37 = vpop.f32.mrf.mxu0 }
 0x580   : > { %v7140_v3 = vmul.f32 %v14390_v29, %v7046_v37  ;;  %9640 = vmatmul.mubr.msk.f32.gmra.mxu0 %vm532_vm0, %v7178_v15  ;;  %v7162_v23 = vadd.f32 %v14397_v1, %v7141_v51  ;;  %v14458_v29 = vld [vmem:[%s14518_s14] ss:$0 sm:$0xff] }
 0x582   : > { %v7161_v62 = vadd.f32 %v14397_v1, %v7140_v3  ;;  %v7180_v36 = vmax.f32 %v7162_v23, 0.0 }
 0x584   : > { %v7179_v9 = vmax.f32 %v7161_v62, 0.0 }
 0x586   : > { %9642 = vmatprep.mubr.msk.f32.mxu0 %vm532_vm0, %v7179_v9 }
 0x587   : > { %9643 = vmatmul.mubr.msk.f32.gmra.mxu0 %vm532_vm0, %v7180_v36 }
 0x597   : > { %v9663_v44 = vpop.f32.mrf.mxu1 }
 0x599   : > { %v7554_v39 = vpop.f32.mrf.mxu1 }
 0x5b3   : > { %v9666_v33 = vpop.f32.mrf.mxu1 }
 0x5b5   : > { %v7564_v14 = vpop.f32.mrf.mxu1 }
 0x5c6   : > { %v9669_v54 = vpop.f32.mrf.mxu1 }
 0x5c8   : > { %v7574_v53 = vpop.f32.mrf.mxu1 }
 0x5cd   : > { %v9672_v15 = vpop.f32.mrf.mxu1 }
 0x5cf   : > { %v7584_v23 = vpop.f32.mrf.mxu1 }
 0x5d8   : > { %v9620_v8 = vpop.f32.mrf.mxu0 }
 0x5d9   : > { %v7520_v16 = vadd.f32 %v9651_v20, %v9620_v8  ;;  %v9675_v20 = vpop.f32.mrf.mxu1 }
 0x5da   : > { %v7305_v1 = vpop.f32.mrf.mxu0 }
 0x5db   : > { %v7611_v56 = vadd.f32 %v14458_v29, %v7520_v16  ;;  %v7515_v41 = vadd.f32 %v7514_v0, %v7305_v1  ;;  %v7594_v16 = vpop.f32.mrf.mxu1 }
 0x5dc   : > { %v9623_v27 = vpop.f32.mrf.mxu0 }
 0x5dd   : > { %7629 = vst [vmem:[%s14463_s25 + $0x8] sm:$0xff] %v7611_v56  ;;  %v7610_v4 = vadd.f32 %v14458_v29, %v7515_v41  ;;  %v7530_v58 = vadd.f32 %v9654_v61, %v9623_v27 }
 0x5de   : > { %v7315_v30 = vpop.f32.mrf.mxu0 }
 0x5df   : > { %7628 = vst [vmem:[%s14463_s25] sm:$0xff] %v7610_v4  ;;  %v7613_v24 = vadd.f32 %v14458_v29, %v7530_v58  ;;  %v7525_v26 = vadd.f32 %v7524_v45, %v7315_v30 }
 0x5e0   : > { %v9626_v2 = vpop.f32.mrf.mxu0 }
 0x5e1   : > { %7631 = vst [vmem:[%s14463_s25 + $0x18] sm:$0xff] %v7613_v24  ;;  %v7612_v13 = vadd.f32 %v14458_v29, %v7525_v26  ;;  %v7540_v52 = vadd.f32 %v9657_v11, %v9626_v2 }
 0x5e2   : > { %v7325_v28 = vpop.f32.mrf.mxu0 }
 0x5e3   : > { %7630 = vst [vmem:[%s14463_s25 + $0x10] sm:$0xff] %v7612_v13  ;;  %v7615_v46 = vadd.f32 %v14458_v29, %v7540_v52  ;;  %v7535_v34 = vadd.f32 %v7534_v22, %v7325_v28 }
 0x5e5   : > { %7633 = vst [vmem:[%s14463_s25 + $0x28] sm:$0xff] %v7615_v46  ;;  %v7614_v7 = vadd.f32 %v14458_v29, %v7535_v34 }
 0x5e7   : > { %7632 = vst [vmem:[%s14463_s25 + $0x20] sm:$0xff] %v7614_v7 }
 0x5ec   : > { %v9629_v10 = vpop.f32.mrf.mxu0 }
 0x5ed   : > { %v7550_v60 = vadd.f32 %v9660_v55, %v9629_v10 }
 0x5ee   : > { %v7335_v31 = vpop.f32.mrf.mxu0 }
 0x5ef   : > { %v7617_v57 = vadd.f32 %v14458_v29, %v7550_v60  ;;  %v7545_v25 = vadd.f32 %v7544_v6, %v7335_v31 }
 0x5f1   : > { %7635 = vst [vmem:[%s14463_s25 + $0x38] sm:$0xff] %v7617_v57  ;;  %v7616_v21 = vadd.f32 %v14458_v29, %v7545_v25 }
 0x5f3   : > { %7634 = vst [vmem:[%s14463_s25 + $0x30] sm:$0xff] %v7616_v21 }
 0x60a   : > { %v9632_v17 = vpop.f32.mrf.mxu0 }
 0x60b   : > { %v7560_v18 = vadd.f32 %v9663_v44, %v9632_v17 }
 0x60c   : > { %v7345_v63 = vpop.f32.mrf.mxu0 }
 0x60d   : > { %v7619_v40 = vadd.f32 %v14458_v29, %v7560_v18  ;;  %v7555_v5 = vadd.f32 %v7554_v39, %v7345_v63 }
 0x60f   : > { %7637 = vst [vmem:[%s14463_s25 + $0x48] sm:$0xff] %v7619_v40  ;;  %v7618_v12 = vadd.f32 %v14458_v29, %v7555_v5 }
 0x611   : > { %7636 = vst [vmem:[%s14463_s25 + $0x40] sm:$0xff] %v7618_v12 }
 0x626   : > { %v9635_v50 = vpop.f32.mrf.mxu0 }
 0x627   : > { %v7570_v59 = vadd.f32 %v9666_v33, %v9635_v50 }
 0x628   : > { %v7355_v43 = vpop.f32.mrf.mxu0 }
 0x629   : > { %v7621_v49 = vadd.f32 %v14458_v29, %v7570_v59  ;;  %v7565_v35 = vadd.f32 %v7564_v14, %v7355_v43 }
 0x62b   : > { %7639 = vst [vmem:[%s14463_s25 + $0x58] sm:$0xff] %v7621_v49  ;;  %v7620_v42 = vadd.f32 %v14458_v29, %v7565_v35 }
 0x62d   : > { %7638 = vst [vmem:[%s14463_s25 + $0x50] sm:$0xff] %v7620_v42 }
 0x639   : > { %v9638_v38 = vpop.f32.mrf.mxu0 }
 0x63a   : > { %v7580_v19 = vadd.f32 %v9669_v54, %v9638_v38 }
 0x63b   : > { %v7365_v32 = vpop.f32.mrf.mxu0 }
 0x63c   : > { %v7623_v47 = vadd.f32 %v14458_v29, %v7580_v19  ;;  %v7575_v48 = vadd.f32 %v7574_v53, %v7365_v32 }
 0x63e   : > { %7641 = vst [vmem:[%s14463_s25 + $0x68] sm:$0xff] %v7623_v47  ;;  %v7622_v51 = vadd.f32 %v14458_v29, %v7575_v48 }
 0x640   : > { %7640 = vst [vmem:[%s14463_s25 + $0x60] sm:$0xff] %v7622_v51  ;;  %v9641_v37 = vpop.f32.mrf.mxu0 }
 0x641   : > { %v7590_v3 = vadd.f32 %v9672_v15, %v9641_v37 }
 0x642   : > { %v7375_v62 = vpop.f32.mrf.mxu0 }
 0x643   : > { %v7625_v9 = vadd.f32 %v14458_v29, %v7590_v3  ;;  %v7585_v36 = vadd.f32 %v7584_v23, %v7375_v62 }
 0x645   : > { %7643 = vst [vmem:[%s14463_s25 + $0x78] sm:$0xff] %v7625_v9  ;;  %v7624_v0 = vadd.f32 %v14458_v29, %v7585_v36 }
 0x647   : > { %7642 = vst [vmem:[%s14463_s25 + $0x70] sm:$0xff] %v7624_v0  ;;  %v9644_v61 = vpop.f32.mrf.mxu0 }
 0x648   : > { %v7600_v8 = vadd.f32 %v9675_v20, %v9644_v61 }
 0x649   : > { %v7385_v1 = vpop.f32.mrf.mxu0 }
 0x64a   : > { %v7627_v56 = vadd.f32 %v14458_v29, %v7600_v8  ;;  %v7595_v41 = vadd.f32 %v7594_v16, %v7385_v1 }
 0x64c   : > { %7645 = vst [vmem:[%s14463_s25 + $0x88] sm:$0xff] %v7627_v56  ;;  %v7626_v45 = vadd.f32 %v14458_v29, %v7595_v41 }
 0x64e   : > { %7644 = vst [vmem:[%s14463_s25 + $0x80] sm:$0xff] %v7626_v45 }
 0x64f PF: > { %s25_s18 = sadd.s32 1, %s9769_s18  }
 0x650   : > { %p22_p4 = scmp.ge.s32.totalorder %s25_s18, 4  }
 0x652   :  { %24 = sbr.rel (!%p22_p4) target bundleno = 1 (0x1), region = 129 }

</bundles_post_ra>
